<compile_context>
chip_gen: v5e
topology: v5e:2x2
jax: 0.10.0
libtpu: 0.0.40
codegen_flags: <defaults>
</compile_context>

<pallas_src>
import functools

import numpy as np

import jax
import jax.numpy as jnp
from jax import lax
from jax.experimental import pallas as pl
from jax.experimental.pallas import tpu as pltpu

KSIZE = 5          # all ConvTranspose2d layers use 5x5 kernels
H1_PAD = 256       # hidden 200  -> 256  (2 x 128 lanes)
H2_PAD = 1024      # hidden 1000 -> 1024 (8 x 128 lanes)


def decoder_inner_dims(image_width, image_height):
    """Replicates CNNDecoder2.__init__ spatial arithmetic."""
    w_in, h_in = image_width - 4, image_height - 4
    for _ in range(2):
        w_in = int(w_in / 2) - 4
        h_in = int(h_in / 2) - 4
    return w_in, h_in


def _pad_axis_to(a, size, axis):
    pad = size - a.shape[axis]
    if pad <= 0:
        return a
    widths = [(0, 0)] * a.ndim
    widths[axis] = (0, pad)
    return jnp.pad(a, widths)


def _lane_pad(n):
    return max(8, ((n + 7) // 8) * 8)


def _flat_pad(n):
    return max(128, ((n + 127) // 128) * 128)


# --------------------------------------------------------------- banded weight preparation
def _width_map(upsample, w_a, ksize):
    """0/1 map T[kx, w, ow]: output column ow takes tap kx from pre-upsample column w.

    Folds the K-1 width zero-padding and the (optional) nearest x2 width-upsample of the
    conv input, so the kernel never materialises width-padded/upsampled activations."""
    w_u = upsample * w_a
    w_o = w_u + ksize - 1
    t = np.zeros((ksize, w_a, w_o), np.float32)
    for kx in range(ksize):
        for ow in range(w_o):
            xu = ow + kx - (ksize - 1)
            if 0 <= xu < w_u:
                t[kx, xu // upsample, ow] = 1.0
    return t


def _banded_weight(wt, upsample, w_a, *, channel_major_out, pad_rows_to=None):
    """torch ConvTranspose2d weight (C_in, C_out, K, K) -> banded BW (K, w_a*C_in, cols).

    out_rows = sum_ky XP[ky:ky+H_out, :] @ BW[ky] implements the stride-1/pad-0 transpose
    conv (== full conv with the flipped kernel) on the width-upsampled zero-padded input.
    Column layout is (ow, co) channel-fast, or (co, ow) channel-major for the last layer."""
    c_in, c_out, k, _ = wt.shape
    wf = jnp.transpose(jnp.flip(wt, (2, 3)), (2, 3, 0, 1))      # (K, K, C_in, C_out)
    t = jnp.asarray(_width_map(upsample, w_a, k))                # (K, w_a, w_o)
    w_o = t.shape[-1]
    if channel_major_out:
        bw = jnp.einsum("xwo,yxic->ywico", t, wf).reshape(k, w_a * c_in, c_out * w_o)
    else:
        bw = jnp.einsum("xwo,yxic->ywioc", t, wf).reshape(k, w_a * c_in, w_o * c_out)
    if pad_rows_to is not None and pad_rows_to > w_a * c_in:
        bw = jnp.pad(bw, ((0, 0), (0, pad_rows_to - w_a * c_in), (0, 0)))
    return bw


def prepare_params(params, image_width, image_height):
    """One-time weight preparation (runs in plain XLA, outside the hot path)."""
    w_in, h_in = decoder_inner_dims(image_width, image_height)
    k = KSIZE
    lane1 = _lane_pad(h_in)                      # conv1 contraction lanes (>= 8)
    p_pad = _flat_pad(w_in * h_in)
    w_o1 = h_in + (k - 1)
    w_o2 = 2 * w_o1 + (k - 1)
    w_o3 = 2 * w_o2 + (k - 1)

    prep = {}
    prep["w1"] = _pad_axis_to(params["lin1_w"].T, H1_PAD, 1)                       # (z,256)
    prep["b1"] = _pad_axis_to(params["lin1_b"][None, :], H1_PAD, 1)                # (1,256)
    prep["w2"] = _pad_axis_to(_pad_axis_to(params["lin2_w"].T, H1_PAD, 0), H2_PAD, 1)
    prep["b2"] = _pad_axis_to(params["lin2_b"][None, :], H2_PAD, 1)                # (1,1024)
    prep["w3"] = _pad_axis_to(_pad_axis_to(params["lin3_w"].T, H2_PAD, 0), p_pad, 1)
    prep["b3"] = _pad_axis_to(params["lin3_b"][None, :], p_pad, 1)                 # (1,128)

    prep["bw1"] = _banded_weight(params["conv1_w"], 1, h_in,
                                 channel_major_out=False, pad_rows_to=lane1)       # (5,8,288)
    prep["br1"] = jnp.tile(params["conv1_b"], w_o1)[None, :]                       # (1,288)
    prep["bw2"] = _banded_weight(params["conv2_w"], 2, w_o1, channel_major_out=False)
    prep["br2"] = jnp.tile(params["conv2_b"], w_o2)[None, :]                       # (1,704)
    prep["bw3"] = _banded_weight(params["conv3_w"], 2, w_o2, channel_major_out=True)
    prep["br3"] = jnp.repeat(params["conv3_b"], w_o3)[None, :]                     # (1,nc*48)
    return jax.tree_util.tree_map(lambda a: a.astype(jnp.float32), prep)


# ------------------------------------------------------------------------ fused kernel
def _decoder_kernel(x_ref, w1_ref, b1_ref, w2_ref, b2_ref, w3_ref, b3_ref,
                    bw1_ref, br1_ref, bw2_ref, br2_ref, bw3_ref, br3_ref,
                    o_ref, *, w_in, h_in, lane1, nc, ksize):
    km1 = ksize - 1
    b = pl.program_id(0)

    # -------- MLP: Linear+ReLU, Linear+ReLU, Linear (zero-padded dims, exact) --------
    xb = x_ref[pl.ds(b, 1), :]                                                 # (1, z)
    h = jnp.dot(xb, w1_ref[...], preferred_element_type=jnp.float32) + b1_ref[...]
    h = jnp.maximum(h, 0.0)
    h = jnp.dot(h, w2_ref[...], preferred_element_type=jnp.float32) + b2_ref[...]
    h = jnp.maximum(h, 0.0)
    flat = jnp.dot(h, w3_ref[...], preferred_element_type=jnp.float32) + b3_ref[...]

    # -------- scatter the w_in x h_in pixels into conv1's zero-padded row stack ------
    zpad = jnp.zeros((km1, lane1), jnp.float32)
    rows = [zpad]
    for y in range(w_in):
        r = flat[:, y * h_in:(y + 1) * h_in]                                   # (1, h_in)
        if lane1 > h_in:
            r = jnp.concatenate([r, jnp.zeros((1, lane1 - h_in), jnp.float32)], axis=1)
        rows.append(r)
    rows.append(zpad)
    xp1 = jnp.concatenate(rows, axis=0)                       # (w_in + 2*(K-1), lane1)

    def banded_conv(xp_rows, bw_ref, brow, h_out, act):
        # Full (transpose-)conv == K whole-image MXU matmuls, one per kernel row.
        acc = jnp.zeros((h_out, brow.shape[-1]), jnp.float32)
        for ky in range(ksize):
            acc = acc + jnp.dot(xp_rows[ky:ky + h_out, :], bw_ref[ky],
                                preferred_element_type=jnp.float32)
        acc = acc + brow
        if act == "relu":
            return jnp.maximum(acc, 0.0)
        return jax.nn.sigmoid(acc)

    def up2_pad_rows(a, h_a):
        # Nearest x2 height-upsample + K-1 zero rows, as one 0/1-matrix matmul.
        n = 2 * h_a + 2 * km1
        y = lax.broadcasted_iota(jnp.int32, (n, h_a), 0)
        s = lax.broadcasted_iota(jnp.int32, (n, h_a), 1)
        rep = jnp.logical_or(y == 2 * s + km1, y == 2 * s + km1 + 1)
        return jnp.dot(rep.astype(jnp.float32), a, preferred_element_type=jnp.float32)

    h1 = w_in + km1                                            # conv1 output rows
    a1 = banded_conv(xp1, bw1_ref, br1_ref[...], h1, "relu")   # (h1,  w_o1*32)
    h2 = 2 * h1 + km1                                          # conv2 output rows
    a2 = banded_conv(up2_pad_rows(a1, h1), bw2_ref, br2_ref[...], h2, "relu")
    h3 = 2 * h2 + km1                                          # conv3 output rows
    a3 = banded_conv(up2_pad_rows(a2, h2), bw3_ref, br3_ref[...], h3, "sigmoid")

    # a3 columns are channel-major (co, ow): store straight into the NCHW output block.
    w_o3 = a3.shape[-1] // nc
    for c in range(nc):
        o_ref[0, c, :, :] = a3[:, c * w_o3:(c + 1) * w_o3]


# ------------------------------------------------------------------------ full forward
def cnn_decoder2_forward(x, prep, image_width, image_height, grayscale):
    """x: (B, z_dim) f32.  prep: output of prepare_params.  Returns NCHW f32 output."""
    w_in, h_in = decoder_inner_dims(image_width, image_height)
    k = KSIZE
    nc = 2 if grayscale else 6
    lane1 = _lane_pad(h_in)
    h1 = w_in + (k - 1)
    h2 = 2 * h1 + (k - 1)
    h3 = 2 * h2 + (k - 1)
    w_o3 = prep["bw3"].shape[2] // nc
    batch, z_dim = x.shape

    order = ["w1", "b1", "w2", "b2", "w3", "b3",
             "bw1", "br1", "bw2", "br2", "bw3", "br3"]
    args = [x.astype(jnp.float32)] + [prep[n] for n in order]

    def resident(a):
        nd = a.ndim
        return pl.BlockSpec(a.shape, lambda b, _nd=nd: (0,) * _nd)

    in_specs = [resident(a) for a in args]           # weights DMA'd once, stay resident
    out_specs = pl.BlockSpec((1, nc, h3, w_o3), lambda b: (b, 0, 0, 0))

    flops = 2 * batch * (
        z_dim * H1_PAD + H1_PAD * H2_PAD + H2_PAD * prep["w3"].shape[1]
        + k * h1 * lane1 * prep["bw1"].shape[2]
        + (2 * h1 + 2 * (k - 1)) * h1 * prep["bw2"].shape[1]
        + k * h2 * prep["bw2"].shape[1] * prep["bw2"].shape[2]
        + (2 * h2 + 2 * (k - 1)) * h2 * prep["bw3"].shape[1]
        + k * h3 * prep["bw3"].shape[1] * prep["bw3"].shape[2])
    nbytes = 4 * (x.size + sum(int(a.size) for a in args[1:]) + batch * nc * h3 * w_o3)

    kernel = functools.partial(_decoder_kernel, w_in=w_in, h_in=h_in,
                               lane1=lane1, nc=nc, ksize=k)
    return pl.pallas_call(
        kernel,
        out_shape=jax.ShapeDtypeStruct((batch, nc, h3, w_o3), jnp.float32),
        grid=(batch,),
        in_specs=in_specs,
        out_specs=out_specs,
        compiler_params=pltpu.CompilerParams(
            dimension_semantics=("parallel",),
            vmem_limit_bytes=32 * 1024 * 1024),      # ~7 MB weights x2 buffers fits easily
        cost_estimate=pl.CostEstimate(flops=int(flops),
                                      transcendentals=int(batch * nc * h3 * w_o3),
                                      bytes_accessed=int(nbytes)),
    )(*args)


# ---------------------------------------------------------------------- params & reference
def init_params(key, z_dim, width_in, height_in, num_channels_out):
    """Deterministic params in PyTorch layouts:
    Linear weight (out, in), bias (out,); ConvTranspose2d weight (C_in, C_out, K, K)."""
    p_flat = width_in * height_in
    keys = iter(jax.random.split(key, 12))

    def linear(fan_in, fan_out):
        bound = 1.0 / float(fan_in) ** 0.5
        w = jax.random.uniform(next(keys), (fan_out, fan_in), jnp.float32, -bound, bound)
        b = jax.random.uniform(next(keys), (fan_out,), jnp.float32, -bound, bound)
        return w, b

    def convt(c_in, c_out):
        bound = 1.0 / float(c_out * KSIZE * KSIZE) ** 0.5
        w = jax.random.uniform(next(keys), (c_in, c_out, KSIZE, KSIZE), jnp.float32,
                               -bound, bound)
        b = jax.random.uniform(next(keys), (c_out,), jnp.float32, -bound, bound)
        return w, b

    p = {}
    p["lin1_w"], p["lin1_b"] = linear(z_dim, 200)
    p["lin2_w"], p["lin2_b"] = linear(200, 1000)
    p["lin3_w"], p["lin3_b"] = linear(1000, p_flat)
    p["conv1_w"], p["conv1_b"] = convt(1, 32)
    p["conv2_w"], p["conv2_b"] = convt(32, 32)
    p["conv3_w"], p["conv3_b"] = convt(32, num_channels_out)
    return p


def _reference_forward(x, params, image_width, image_height, grayscale):
    """Pure-JAX (XLA) reference mirroring the PyTorch forward in NCHW."""
    w_in, h_in = decoder_inner_dims(image_width, image_height)
    hp = jax.lax.Precision.HIGHEST

    h = jnp.maximum(jnp.dot(x, params["lin1_w"].T, precision=hp) + params["lin1_b"], 0.0)
    h = jnp.maximum(jnp.dot(h, params["lin2_w"].T, precision=hp) + params["lin2_b"], 0.0)
    h = jnp.dot(h, params["lin3_w"].T, precision=hp) + params["lin3_b"]
    h = h.reshape(x.shape[0], 1, w_in, h_in)                                  # NCHW

    def convt(t, w, b):
        ksz = w.shape[-1]
        wc = jnp.transpose(jnp.flip(w, axis=(2, 3)), (1, 0, 2, 3))  # (C_out, C_in, K, K)
        y = jax.lax.conv_general_dilated(
            t, wc, window_strides=(1, 1),
            padding=((ksz - 1, ksz - 1), (ksz - 1, ksz - 1)),
            dimension_numbers=("NCHW", "OIHW", "NCHW"), precision=hp)
        return y + b.reshape(1, -1, 1, 1)

    def up2(t):
        return jnp.repeat(jnp.repeat(t, 2, axis=2), 2, axis=3)

    h = jnp.maximum(convt(h, params["conv1_w"], params["conv1_b"]), 0.0)
    h = jnp.maximum(up2(h), 0.0)
    h = jnp.maximum(convt(h, params["conv2_w"], params["conv2_b"]), 0.0)
    h = jnp.maximum(up2(h), 0.0)
    return jax.nn.sigmoid(convt(h, params["conv3_w"], params["conv3_b"]))


if __name__ == "__main__":
    z_dim = 16
    image_width = 48
    image_height = 48
    grayscale = True
    batch = 2

    num_channels_out = 2 if grayscale else 6
    width_in, height_in = decoder_inner_dims(image_width, image_height)      # 5 x 5
    assert 4 * width_in + 28 == image_width and 4 * height_in + 28 == image_height

    key = jax.random.PRNGKey(0)
    k_params, k_x = jax.random.split(key)
    params = init_params(k_params, z_dim, width_in, height_in, num_channels_out)
    x = jax.random.normal(k_x, (batch, z_dim), jnp.float32)

    prep = prepare_params(params, image_width, image_height)
    out = cnn_decoder2_forward(x, prep, image_width, image_height, grayscale)
    out = jax.block_until_ready(out)
    assert out.shape == (batch, num_channels_out, image_width, image_height), out.shape

    ref = _reference_forward(x, params, image_width, image_height, grayscale)
    max_err = float(jnp.max(jnp.abs(out - ref)))
    assert jnp.allclose(out, ref, atol=1e-3, rtol=1e-3), f"mismatch vs reference: {max_err}"

    print("KERNEL_OK")
</pallas_src>

<mosaic_0001>
module attributes {stable_mosaic.version = 11 : i64} {
  func.func @_decoder_kernel(%arg0: i32, %arg1: memref<2x16xf32, #tpu.memory_space<vmem>>, %arg2: memref<16x256xf32, #tpu.memory_space<vmem>>, %arg3: memref<1x256xf32, #tpu.memory_space<vmem>>, %arg4: memref<256x1024xf32, #tpu.memory_space<vmem>>, %arg5: memref<1x1024xf32, #tpu.memory_space<vmem>>, %arg6: memref<1024x128xf32, #tpu.memory_space<vmem>>, %arg7: memref<1x128xf32, #tpu.memory_space<vmem>>, %arg8: memref<5x8x288xf32, #tpu.memory_space<vmem>>, %arg9: memref<1x288xf32, #tpu.memory_space<vmem>>, %arg10: memref<5x288x704xf32, #tpu.memory_space<vmem>>, %arg11: memref<1x704xf32, #tpu.memory_space<vmem>>, %arg12: memref<5x704x96xf32, #tpu.memory_space<vmem>>, %arg13: memref<1x96xf32, #tpu.memory_space<vmem>>, %arg14: memref<1x2x48x48xf32, #tpu.memory_space<vmem>>) attributes {dimension_semantics = [#tpu.dimension_semantics<parallel>], iteration_bounds = array<i64: 2>, scalar_prefetch = 0 : i64, scratch_operands = 0 : i64, tpu.core_type = #tpu.core_type<tc>, window_params = [{pipeline_mode = #tpu.pipeline_mode<synchronous>, transform_indices = @transform_0, window_bounds = array<i64: 2, 16>}, {pipeline_mode = #tpu.pipeline_mode<synchronous>, transform_indices = @transform_1, window_bounds = array<i64: 16, 256>}, {pipeline_mode = #tpu.pipeline_mode<synchronous>, transform_indices = @transform_2, window_bounds = array<i64: 1, 256>}, {pipeline_mode = #tpu.pipeline_mode<synchronous>, transform_indices = @transform_3, window_bounds = array<i64: 256, 1024>}, {pipeline_mode = #tpu.pipeline_mode<synchronous>, transform_indices = @transform_4, window_bounds = array<i64: 1, 1024>}, {pipeline_mode = #tpu.pipeline_mode<synchronous>, transform_indices = @transform_5, window_bounds = array<i64: 1024, 128>}, {pipeline_mode = #tpu.pipeline_mode<synchronous>, transform_indices = @transform_6, window_bounds = array<i64: 1, 128>}, {pipeline_mode = #tpu.pipeline_mode<synchronous>, transform_indices = @transform_7, window_bounds = array<i64: 5, 8, 288>}, {pipeline_mode = #tpu.pipeline_mode<synchronous>, transform_indices = @transform_8, window_bounds = array<i64: 1, 288>}, {pipeline_mode = #tpu.pipeline_mode<synchronous>, transform_indices = @transform_9, window_bounds = array<i64: 5, 288, 704>}, {pipeline_mode = #tpu.pipeline_mode<synchronous>, transform_indices = @transform_10, window_bounds = array<i64: 1, 704>}, {pipeline_mode = #tpu.pipeline_mode<synchronous>, transform_indices = @transform_11, window_bounds = array<i64: 5, 704, 96>}, {pipeline_mode = #tpu.pipeline_mode<synchronous>, transform_indices = @transform_12, window_bounds = array<i64: 1, 96>}, {transform_indices = @transform_13, window_bounds = array<i64: 1, 2, 48, 48>}]} {
    %0 = arith.index_cast %arg0 : i32 to index
    %c0 = arith.constant 0 : index
    %1 = vector.load %arg1[%0, %c0] : memref<2x16xf32, #tpu.memory_space<vmem>>, vector<1x16xf32>
    %c0_0 = arith.constant 0 : index
    %c0_1 = arith.constant 0 : index
    %2 = vector.load %arg2[%c0_0, %c0_1] : memref<16x256xf32, #tpu.memory_space<vmem>>, vector<16x256xf32>
    %cst = arith.constant dense<0.000000e+00> : vector<1x256xf32>
    %3 = tpu.matmul %1, %2, %cst {dimension_numbers = #tpu.dot_dimension_numbers<[1], [0], [0], [1], [0, 0, 1, 1], [], []>} : vector<1x16xf32>, vector<16x256xf32>, vector<1x256xf32> -> vector<1x256xf32>
    %c0_2 = arith.constant 0 : index
    %c0_3 = arith.constant 0 : index
    %4 = vector.load %arg3[%c0_2, %c0_3] : memref<1x256xf32, #tpu.memory_space<vmem>>, vector<1x256xf32>
    %5 = arith.addf %3, %4 : vector<1x256xf32>
    %cst_4 = arith.constant 0.000000e+00 : f32
    %6 = vector.broadcast %cst_4 : f32 to vector<1x256xf32>
    %7 = arith.maximumf %5, %6 : vector<1x256xf32>
    %c0_5 = arith.constant 0 : index
    %c0_6 = arith.constant 0 : index
    %8 = vector.load %arg4[%c0_5, %c0_6] : memref<256x1024xf32, #tpu.memory_space<vmem>>, vector<256x1024xf32>
    %cst_7 = arith.constant dense<0.000000e+00> : vector<1x1024xf32>
    %9 = tpu.matmul %7, %8, %cst_7 {dimension_numbers = #tpu.dot_dimension_numbers<[1], [0], [0], [1], [0, 0, 1, 1], [], []>} : vector<1x256xf32>, vector<256x1024xf32>, vector<1x1024xf32> -> vector<1x1024xf32>
    %c0_8 = arith.constant 0 : index
    %c0_9 = arith.constant 0 : index
    %10 = vector.load %arg5[%c0_8, %c0_9] : memref<1x1024xf32, #tpu.memory_space<vmem>>, vector<1x1024xf32>
    %11 = arith.addf %9, %10 : vector<1x1024xf32>
    %cst_10 = arith.constant 0.000000e+00 : f32
    %12 = vector.broadcast %cst_10 : f32 to vector<1x1024xf32>
    %13 = arith.maximumf %11, %12 : vector<1x1024xf32>
    %c0_11 = arith.constant 0 : index
    %c0_12 = arith.constant 0 : index
    %14 = vector.load %arg6[%c0_11, %c0_12] : memref<1024x128xf32, #tpu.memory_space<vmem>>, vector<1024x128xf32>
    %cst_13 = arith.constant dense<0.000000e+00> : vector<1x128xf32>
    %15 = tpu.matmul %13, %14, %cst_13 {dimension_numbers = #tpu.dot_dimension_numbers<[1], [0], [0], [1], [0, 0, 1, 1], [], []>} : vector<1x1024xf32>, vector<1024x128xf32>, vector<1x128xf32> -> vector<1x128xf32>
    %c0_14 = arith.constant 0 : index
    %c0_15 = arith.constant 0 : index
    %16 = vector.load %arg7[%c0_14, %c0_15] : memref<1x128xf32, #tpu.memory_space<vmem>>, vector<1x128xf32>
    %17 = arith.addf %15, %16 : vector<1x128xf32>
    %cst_16 = arith.constant 0.000000e+00 : f32
    %18 = vector.broadcast %cst_16 : f32 to vector<4x8xf32>
    %19 = vector.extract_strided_slice %17 {offsets = [0, 0], sizes = [1, 5], strides = [1, 1]} : vector<1x128xf32> to vector<1x5xf32>
    %cst_17 = arith.constant 0.000000e+00 : f32
    %20 = vector.broadcast %cst_17 : f32 to vector<1x3xf32>
    %21 = tpu.concatenate %19, %20 in 1 : vector<1x5xf32>, vector<1x3xf32> -> vector<1x8xf32>
    %22 = vector.extract_strided_slice %17 {offsets = [0, 5], sizes = [1, 5], strides = [1, 1]} : vector<1x128xf32> to vector<1x5xf32>
    %cst_18 = arith.constant 0.000000e+00 : f32
    %23 = vector.broadcast %cst_18 : f32 to vector<1x3xf32>
    %24 = tpu.concatenate %22, %23 in 1 : vector<1x5xf32>, vector<1x3xf32> -> vector<1x8xf32>
    %25 = vector.extract_strided_slice %17 {offsets = [0, 10], sizes = [1, 5], strides = [1, 1]} : vector<1x128xf32> to vector<1x5xf32>
    %cst_19 = arith.constant 0.000000e+00 : f32
    %26 = vector.broadcast %cst_19 : f32 to vector<1x3xf32>
    %27 = tpu.concatenate %25, %26 in 1 : vector<1x5xf32>, vector<1x3xf32> -> vector<1x8xf32>
    %28 = vector.extract_strided_slice %17 {offsets = [0, 15], sizes = [1, 5], strides = [1, 1]} : vector<1x128xf32> to vector<1x5xf32>
    %cst_20 = arith.constant 0.000000e+00 : f32
    %29 = vector.broadcast %cst_20 : f32 to vector<1x3xf32>
    %30 = tpu.concatenate %28, %29 in 1 : vector<1x5xf32>, vector<1x3xf32> -> vector<1x8xf32>
    %31 = vector.extract_strided_slice %17 {offsets = [0, 20], sizes = [1, 5], strides = [1, 1]} : vector<1x128xf32> to vector<1x5xf32>
    %cst_21 = arith.constant 0.000000e+00 : f32
    %32 = vector.broadcast %cst_21 : f32 to vector<1x3xf32>
    %33 = tpu.concatenate %31, %32 in 1 : vector<1x5xf32>, vector<1x3xf32> -> vector<1x8xf32>
    %34 = tpu.concatenate %18, %21, %24, %27, %30, %33, %18 in 0 : vector<4x8xf32>, vector<1x8xf32>, vector<1x8xf32>, vector<1x8xf32>, vector<1x8xf32>, vector<1x8xf32>, vector<4x8xf32> -> vector<13x8xf32>
    %c0_22 = arith.constant 0 : index
    %c0_23 = arith.constant 0 : index
    %35 = vector.load %arg9[%c0_22, %c0_23] : memref<1x288xf32, #tpu.memory_space<vmem>>, vector<1x288xf32>
    %cst_24 = arith.constant 0.000000e+00 : f32
    %36 = vector.broadcast %cst_24 : f32 to vector<9x288xf32>
    %37 = vector.extract_strided_slice %34 {offsets = [0, 0], sizes = [9, 8], strides = [1, 1]} : vector<13x8xf32> to vector<9x8xf32>
    %c0_25 = arith.constant 0 : index
    %c0_26 = arith.constant 0 : index
    %c0_27 = arith.constant 0 : index
    %38 = vector.load %arg8[%c0_25, %c0_26, %c0_27] : memref<5x8x288xf32, #tpu.memory_space<vmem>>, vector<1x8x288xf32>
    %39 = vector.shape_cast %38 : vector<1x8x288xf32> to vector<8x288xf32>
    %cst_28 = arith.constant dense<0.000000e+00> : vector<9x288xf32>
    %40 = tpu.matmul %37, %39, %cst_28 {dimension_numbers = #tpu.dot_dimension_numbers<[1], [0], [0], [1], [0, 0, 1, 1], [], []>} : vector<9x8xf32>, vector<8x288xf32>, vector<9x288xf32> -> vector<9x288xf32>
    %41 = arith.addf %36, %40 : vector<9x288xf32>
    %42 = vector.extract_strided_slice %34 {offsets = [1, 0], sizes = [9, 8], strides = [1, 1]} : vector<13x8xf32> to vector<9x8xf32>
    %c1 = arith.constant 1 : index
    %c0_29 = arith.constant 0 : index
    %c0_30 = arith.constant 0 : index
    %43 = vector.load %arg8[%c1, %c0_29, %c0_30] : memref<5x8x288xf32, #tpu.memory_space<vmem>>, vector<1x8x288xf32>
    %44 = vector.shape_cast %43 : vector<1x8x288xf32> to vector<8x288xf32>
    %cst_31 = arith.constant dense<0.000000e+00> : vector<9x288xf32>
    %45 = tpu.matmul %42, %44, %cst_31 {dimension_numbers = #tpu.dot_dimension_numbers<[1], [0], [0], [1], [0, 0, 1, 1], [], []>} : vector<9x8xf32>, vector<8x288xf32>, vector<9x288xf32> -> vector<9x288xf32>
    %46 = arith.addf %41, %45 : vector<9x288xf32>
    %47 = vector.extract_strided_slice %34 {offsets = [2, 0], sizes = [9, 8], strides = [1, 1]} : vector<13x8xf32> to vector<9x8xf32>
    %c2 = arith.constant 2 : index
    %c0_32 = arith.constant 0 : index
    %c0_33 = arith.constant 0 : index
    %48 = vector.load %arg8[%c2, %c0_32, %c0_33] : memref<5x8x288xf32, #tpu.memory_space<vmem>>, vector<1x8x288xf32>
    %49 = vector.shape_cast %48 : vector<1x8x288xf32> to vector<8x288xf32>
    %cst_34 = arith.constant dense<0.000000e+00> : vector<9x288xf32>
    %50 = tpu.matmul %47, %49, %cst_34 {dimension_numbers = #tpu.dot_dimension_numbers<[1], [0], [0], [1], [0, 0, 1, 1], [], []>} : vector<9x8xf32>, vector<8x288xf32>, vector<9x288xf32> -> vector<9x288xf32>
    %51 = arith.addf %46, %50 : vector<9x288xf32>
    %52 = vector.extract_strided_slice %34 {offsets = [3, 0], sizes = [9, 8], strides = [1, 1]} : vector<13x8xf32> to vector<9x8xf32>
    %c3 = arith.constant 3 : index
    %c0_35 = arith.constant 0 : index
    %c0_36 = arith.constant 0 : index
    %53 = vector.load %arg8[%c3, %c0_35, %c0_36] : memref<5x8x288xf32, #tpu.memory_space<vmem>>, vector<1x8x288xf32>
    %54 = vector.shape_cast %53 : vector<1x8x288xf32> to vector<8x288xf32>
    %cst_37 = arith.constant dense<0.000000e+00> : vector<9x288xf32>
    %55 = tpu.matmul %52, %54, %cst_37 {dimension_numbers = #tpu.dot_dimension_numbers<[1], [0], [0], [1], [0, 0, 1, 1], [], []>} : vector<9x8xf32>, vector<8x288xf32>, vector<9x288xf32> -> vector<9x288xf32>
    %56 = arith.addf %51, %55 : vector<9x288xf32>
    %57 = vector.extract_strided_slice %34 {offsets = [4, 0], sizes = [9, 8], strides = [1, 1]} : vector<13x8xf32> to vector<9x8xf32>
    %c4 = arith.constant 4 : index
    %c0_38 = arith.constant 0 : index
    %c0_39 = arith.constant 0 : index
    %58 = vector.load %arg8[%c4, %c0_38, %c0_39] : memref<5x8x288xf32, #tpu.memory_space<vmem>>, vector<1x8x288xf32>
    %59 = vector.shape_cast %58 : vector<1x8x288xf32> to vector<8x288xf32>
    %cst_40 = arith.constant dense<0.000000e+00> : vector<9x288xf32>
    %60 = tpu.matmul %57, %59, %cst_40 {dimension_numbers = #tpu.dot_dimension_numbers<[1], [0], [0], [1], [0, 0, 1, 1], [], []>} : vector<9x8xf32>, vector<8x288xf32>, vector<9x288xf32> -> vector<9x288xf32>
    %61 = arith.addf %56, %60 : vector<9x288xf32>
    %62 = vector.broadcast %35 : vector<1x288xf32> to vector<9x288xf32>
    %63 = arith.addf %61, %62 : vector<9x288xf32>
    %cst_41 = arith.constant 0.000000e+00 : f32
    %64 = vector.broadcast %cst_41 : f32 to vector<9x288xf32>
    %65 = arith.maximumf %63, %64 : vector<9x288xf32>
    %66 = tpu.iota {dimensions = array<i32: 0>} : vector<26x9xi32>
    %67 = tpu.iota {dimensions = array<i32: 1>} : vector<26x9xi32>
    %c2_i32 = arith.constant 2 : i32
    %68 = vector.broadcast %c2_i32 : i32 to vector<26x9xi32>
    %69 = arith.muli %68, %67 : vector<26x9xi32>
    %c4_i32 = arith.constant 4 : i32
    %70 = vector.broadcast %c4_i32 : i32 to vector<26x9xi32>
    %71 = arith.addi %69, %70 : vector<26x9xi32>
    %72 = arith.cmpi eq, %66, %71 : vector<26x9xi32>
    %c2_i32_42 = arith.constant 2 : i32
    %73 = vector.broadcast %c2_i32_42 : i32 to vector<26x9xi32>
    %74 = arith.muli %73, %67 : vector<26x9xi32>
    %c4_i32_43 = arith.constant 4 : i32
    %75 = vector.broadcast %c4_i32_43 : i32 to vector<26x9xi32>
    %76 = arith.addi %74, %75 : vector<26x9xi32>
    %c1_i32 = arith.constant 1 : i32
    %77 = vector.broadcast %c1_i32 : i32 to vector<26x9xi32>
    %78 = arith.addi %76, %77 : vector<26x9xi32>
    %79 = arith.cmpi eq, %66, %78 : vector<26x9xi32>
    %80 = arith.ori %72, %79 : vector<26x9xi1>
    %81 = arith.extui %80 : vector<26x9xi1> to vector<26x9xi32>
    %82 = arith.sitofp %81 : vector<26x9xi32> to vector<26x9xf32>
    %cst_44 = arith.constant dense<0.000000e+00> : vector<26x288xf32>
    %83 = tpu.matmul %82, %65, %cst_44 {dimension_numbers = #tpu.dot_dimension_numbers<[1], [0], [0], [1], [0, 0, 1, 1], [], []>} : vector<26x9xf32>, vector<9x288xf32>, vector<26x288xf32> -> vector<26x288xf32>
    %c0_45 = arith.constant 0 : index
    %c0_46 = arith.constant 0 : index
    %84 = vector.load %arg11[%c0_45, %c0_46] : memref<1x704xf32, #tpu.memory_space<vmem>>, vector<1x704xf32>
    %cst_47 = arith.constant 0.000000e+00 : f32
    %85 = vector.broadcast %cst_47 : f32 to vector<22x704xf32>
    %86 = vector.extract_strided_slice %83 {offsets = [0, 0], sizes = [22, 288], strides = [1, 1]} : vector<26x288xf32> to vector<22x288xf32>
    %c0_48 = arith.constant 0 : index
    %c0_49 = arith.constant 0 : index
    %c0_50 = arith.constant 0 : index
    %87 = vector.load %arg10[%c0_48, %c0_49, %c0_50] : memref<5x288x704xf32, #tpu.memory_space<vmem>>, vector<1x288x704xf32>
    %88 = vector.shape_cast %87 : vector<1x288x704xf32> to vector<288x704xf32>
    %cst_51 = arith.constant dense<0.000000e+00> : vector<22x704xf32>
    %89 = tpu.matmul %86, %88, %cst_51 {dimension_numbers = #tpu.dot_dimension_numbers<[1], [0], [0], [1], [0, 0, 1, 1], [], []>} : vector<22x288xf32>, vector<288x704xf32>, vector<22x704xf32> -> vector<22x704xf32>
    %90 = arith.addf %85, %89 : vector<22x704xf32>
    %91 = vector.extract_strided_slice %83 {offsets = [1, 0], sizes = [22, 288], strides = [1, 1]} : vector<26x288xf32> to vector<22x288xf32>
    %c1_52 = arith.constant 1 : index
    %c0_53 = arith.constant 0 : index
    %c0_54 = arith.constant 0 : index
    %92 = vector.load %arg10[%c1_52, %c0_53, %c0_54] : memref<5x288x704xf32, #tpu.memory_space<vmem>>, vector<1x288x704xf32>
    %93 = vector.shape_cast %92 : vector<1x288x704xf32> to vector<288x704xf32>
    %cst_55 = arith.constant dense<0.000000e+00> : vector<22x704xf32>
    %94 = tpu.matmul %91, %93, %cst_55 {dimension_numbers = #tpu.dot_dimension_numbers<[1], [0], [0], [1], [0, 0, 1, 1], [], []>} : vector<22x288xf32>, vector<288x704xf32>, vector<22x704xf32> -> vector<22x704xf32>
    %95 = arith.addf %90, %94 : vector<22x704xf32>
    %96 = vector.extract_strided_slice %83 {offsets = [2, 0], sizes = [22, 288], strides = [1, 1]} : vector<26x288xf32> to vector<22x288xf32>
    %c2_56 = arith.constant 2 : index
    %c0_57 = arith.constant 0 : index
    %c0_58 = arith.constant 0 : index
    %97 = vector.load %arg10[%c2_56, %c0_57, %c0_58] : memref<5x288x704xf32, #tpu.memory_space<vmem>>, vector<1x288x704xf32>
    %98 = vector.shape_cast %97 : vector<1x288x704xf32> to vector<288x704xf32>
    %cst_59 = arith.constant dense<0.000000e+00> : vector<22x704xf32>
    %99 = tpu.matmul %96, %98, %cst_59 {dimension_numbers = #tpu.dot_dimension_numbers<[1], [0], [0], [1], [0, 0, 1, 1], [], []>} : vector<22x288xf32>, vector<288x704xf32>, vector<22x704xf32> -> vector<22x704xf32>
    %100 = arith.addf %95, %99 : vector<22x704xf32>
    %101 = vector.extract_strided_slice %83 {offsets = [3, 0], sizes = [22, 288], strides = [1, 1]} : vector<26x288xf32> to vector<22x288xf32>
    %c3_60 = arith.constant 3 : index
    %c0_61 = arith.constant 0 : index
    %c0_62 = arith.constant 0 : index
    %102 = vector.load %arg10[%c3_60, %c0_61, %c0_62] : memref<5x288x704xf32, #tpu.memory_space<vmem>>, vector<1x288x704xf32>
    %103 = vector.shape_cast %102 : vector<1x288x704xf32> to vector<288x704xf32>
    %cst_63 = arith.constant dense<0.000000e+00> : vector<22x704xf32>
    %104 = tpu.matmul %101, %103, %cst_63 {dimension_numbers = #tpu.dot_dimension_numbers<[1], [0], [0], [1], [0, 0, 1, 1], [], []>} : vector<22x288xf32>, vector<288x704xf32>, vector<22x704xf32> -> vector<22x704xf32>
    %105 = arith.addf %100, %104 : vector<22x704xf32>
    %106 = vector.extract_strided_slice %83 {offsets = [4, 0], sizes = [22, 288], strides = [1, 1]} : vector<26x288xf32> to vector<22x288xf32>
    %c4_64 = arith.constant 4 : index
    %c0_65 = arith.constant 0 : index
    %c0_66 = arith.constant 0 : index
    %107 = vector.load %arg10[%c4_64, %c0_65, %c0_66] : memref<5x288x704xf32, #tpu.memory_space<vmem>>, vector<1x288x704xf32>
    %108 = vector.shape_cast %107 : vector<1x288x704xf32> to vector<288x704xf32>
    %cst_67 = arith.constant dense<0.000000e+00> : vector<22x704xf32>
    %109 = tpu.matmul %106, %108, %cst_67 {dimension_numbers = #tpu.dot_dimension_numbers<[1], [0], [0], [1], [0, 0, 1, 1], [], []>} : vector<22x288xf32>, vector<288x704xf32>, vector<22x704xf32> -> vector<22x704xf32>
    %110 = arith.addf %105, %109 : vector<22x704xf32>
    %111 = vector.broadcast %84 : vector<1x704xf32> to vector<22x704xf32>
    %112 = arith.addf %110, %111 : vector<22x704xf32>
    %cst_68 = arith.constant 0.000000e+00 : f32
    %113 = vector.broadcast %cst_68 : f32 to vector<22x704xf32>
    %114 = arith.maximumf %112, %113 : vector<22x704xf32>
    %115 = tpu.iota {dimensions = array<i32: 0>} : vector<52x22xi32>
    %116 = tpu.iota {dimensions = array<i32: 1>} : vector<52x22xi32>
    %c2_i32_69 = arith.constant 2 : i32
    %117 = vector.broadcast %c2_i32_69 : i32 to vector<52x22xi32>
    %118 = arith.muli %117, %116 : vector<52x22xi32>
    %c4_i32_70 = arith.constant 4 : i32
    %119 = vector.broadcast %c4_i32_70 : i32 to vector<52x22xi32>
    %120 = arith.addi %118, %119 : vector<52x22xi32>
    %121 = arith.cmpi eq, %115, %120 : vector<52x22xi32>
    %c2_i32_71 = arith.constant 2 : i32
    %122 = vector.broadcast %c2_i32_71 : i32 to vector<52x22xi32>
    %123 = arith.muli %122, %116 : vector<52x22xi32>
    %c4_i32_72 = arith.constant 4 : i32
    %124 = vector.broadcast %c4_i32_72 : i32 to vector<52x22xi32>
    %125 = arith.addi %123, %124 : vector<52x22xi32>
    %c1_i32_73 = arith.constant 1 : i32
    %126 = vector.broadcast %c1_i32_73 : i32 to vector<52x22xi32>
    %127 = arith.addi %125, %126 : vector<52x22xi32>
    %128 = arith.cmpi eq, %115, %127 : vector<52x22xi32>
    %129 = arith.ori %121, %128 : vector<52x22xi1>
    %130 = arith.extui %129 : vector<52x22xi1> to vector<52x22xi32>
    %131 = arith.sitofp %130 : vector<52x22xi32> to vector<52x22xf32>
    %cst_74 = arith.constant dense<0.000000e+00> : vector<52x704xf32>
    %132 = tpu.matmul %131, %114, %cst_74 {dimension_numbers = #tpu.dot_dimension_numbers<[1], [0], [0], [1], [0, 0, 1, 1], [], []>} : vector<52x22xf32>, vector<22x704xf32>, vector<52x704xf32> -> vector<52x704xf32>
    %c0_75 = arith.constant 0 : index
    %c0_76 = arith.constant 0 : index
    %133 = vector.load %arg13[%c0_75, %c0_76] : memref<1x96xf32, #tpu.memory_space<vmem>>, vector<1x96xf32>
    %cst_77 = arith.constant 0.000000e+00 : f32
    %134 = vector.broadcast %cst_77 : f32 to vector<48x96xf32>
    %135 = vector.extract_strided_slice %132 {offsets = [0, 0], sizes = [48, 704], strides = [1, 1]} : vector<52x704xf32> to vector<48x704xf32>
    %c0_78 = arith.constant 0 : index
    %c0_79 = arith.constant 0 : index
    %c0_80 = arith.constant 0 : index
    %136 = vector.load %arg12[%c0_78, %c0_79, %c0_80] : memref<5x704x96xf32, #tpu.memory_space<vmem>>, vector<1x704x96xf32>
    %137 = vector.shape_cast %136 : vector<1x704x96xf32> to vector<704x96xf32>
    %cst_81 = arith.constant dense<0.000000e+00> : vector<48x96xf32>
    %138 = tpu.matmul %135, %137, %cst_81 {dimension_numbers = #tpu.dot_dimension_numbers<[1], [0], [0], [1], [0, 0, 1, 1], [], []>} : vector<48x704xf32>, vector<704x96xf32>, vector<48x96xf32> -> vector<48x96xf32>
    %139 = arith.addf %134, %138 : vector<48x96xf32>
    %140 = vector.extract_strided_slice %132 {offsets = [1, 0], sizes = [48, 704], strides = [1, 1]} : vector<52x704xf32> to vector<48x704xf32>
    %c1_82 = arith.constant 1 : index
    %c0_83 = arith.constant 0 : index
    %c0_84 = arith.constant 0 : index
    %141 = vector.load %arg12[%c1_82, %c0_83, %c0_84] : memref<5x704x96xf32, #tpu.memory_space<vmem>>, vector<1x704x96xf32>
    %142 = vector.shape_cast %141 : vector<1x704x96xf32> to vector<704x96xf32>
    %cst_85 = arith.constant dense<0.000000e+00> : vector<48x96xf32>
    %143 = tpu.matmul %140, %142, %cst_85 {dimension_numbers = #tpu.dot_dimension_numbers<[1], [0], [0], [1], [0, 0, 1, 1], [], []>} : vector<48x704xf32>, vector<704x96xf32>, vector<48x96xf32> -> vector<48x96xf32>
    %144 = arith.addf %139, %143 : vector<48x96xf32>
    %145 = vector.extract_strided_slice %132 {offsets = [2, 0], sizes = [48, 704], strides = [1, 1]} : vector<52x704xf32> to vector<48x704xf32>
    %c2_86 = arith.constant 2 : index
    %c0_87 = arith.constant 0 : index
    %c0_88 = arith.constant 0 : index
    %146 = vector.load %arg12[%c2_86, %c0_87, %c0_88] : memref<5x704x96xf32, #tpu.memory_space<vmem>>, vector<1x704x96xf32>
    %147 = vector.shape_cast %146 : vector<1x704x96xf32> to vector<704x96xf32>
    %cst_89 = arith.constant dense<0.000000e+00> : vector<48x96xf32>
    %148 = tpu.matmul %145, %147, %cst_89 {dimension_numbers = #tpu.dot_dimension_numbers<[1], [0], [0], [1], [0, 0, 1, 1], [], []>} : vector<48x704xf32>, vector<704x96xf32>, vector<48x96xf32> -> vector<48x96xf32>
    %149 = arith.addf %144, %148 : vector<48x96xf32>
    %150 = vector.extract_strided_slice %132 {offsets = [3, 0], sizes = [48, 704], strides = [1, 1]} : vector<52x704xf32> to vector<48x704xf32>
    %c3_90 = arith.constant 3 : index
    %c0_91 = arith.constant 0 : index
    %c0_92 = arith.constant 0 : index
    %151 = vector.load %arg12[%c3_90, %c0_91, %c0_92] : memref<5x704x96xf32, #tpu.memory_space<vmem>>, vector<1x704x96xf32>
    %152 = vector.shape_cast %151 : vector<1x704x96xf32> to vector<704x96xf32>
    %cst_93 = arith.constant dense<0.000000e+00> : vector<48x96xf32>
    %153 = tpu.matmul %150, %152, %cst_93 {dimension_numbers = #tpu.dot_dimension_numbers<[1], [0], [0], [1], [0, 0, 1, 1], [], []>} : vector<48x704xf32>, vector<704x96xf32>, vector<48x96xf32> -> vector<48x96xf32>
    %154 = arith.addf %149, %153 : vector<48x96xf32>
    %155 = vector.extract_strided_slice %132 {offsets = [4, 0], sizes = [48, 704], strides = [1, 1]} : vector<52x704xf32> to vector<48x704xf32>
    %c4_94 = arith.constant 4 : index
    %c0_95 = arith.constant 0 : index
    %c0_96 = arith.constant 0 : index
    %156 = vector.load %arg12[%c4_94, %c0_95, %c0_96] : memref<5x704x96xf32, #tpu.memory_space<vmem>>, vector<1x704x96xf32>
    %157 = vector.shape_cast %156 : vector<1x704x96xf32> to vector<704x96xf32>
    %cst_97 = arith.constant dense<0.000000e+00> : vector<48x96xf32>
    %158 = tpu.matmul %155, %157, %cst_97 {dimension_numbers = #tpu.dot_dimension_numbers<[1], [0], [0], [1], [0, 0, 1, 1], [], []>} : vector<48x704xf32>, vector<704x96xf32>, vector<48x96xf32> -> vector<48x96xf32>
    %159 = arith.addf %154, %158 : vector<48x96xf32>
    %160 = vector.broadcast %133 : vector<1x96xf32> to vector<48x96xf32>
    %161 = arith.addf %159, %160 : vector<48x96xf32>
    %162 = arith.negf %161 : vector<48x96xf32>
    %163 = math.exp %162 : vector<48x96xf32>
    %cst_98 = arith.constant 1.000000e+00 : f32
    %164 = vector.broadcast %cst_98 : f32 to vector<48x96xf32>
    %165 = arith.addf %164, %163 : vector<48x96xf32>
    %166 = arith.divf %164, %165 : vector<48x96xf32>
    %167 = vector.extract_strided_slice %166 {offsets = [0, 0], sizes = [48, 48], strides = [1, 1]} : vector<48x96xf32> to vector<48x48xf32>
    %c0_99 = arith.constant 0 : index
    %c0_100 = arith.constant 0 : index
    %c0_101 = arith.constant 0 : index
    %c0_102 = arith.constant 0 : index
    %168 = vector.load %arg14[%c0_99, %c0_100, %c0_101, %c0_102] : memref<1x2x48x48xf32, #tpu.memory_space<vmem>>, vector<1x1x48x48xf32>
    %169 = vector.shape_cast %168 : vector<1x1x48x48xf32> to vector<48x48xf32>
    %170 = vector.shape_cast %167 : vector<48x48xf32> to vector<1x1x48x48xf32>
    tpu.vector_store %arg14[%c0_99, %c0_100, %c0_101, %c0_102], %170 {strides = array<i32>} : memref<1x2x48x48xf32, #tpu.memory_space<vmem>>, vector<1x1x48x48xf32>,
    %171 = vector.extract_strided_slice %166 {offsets = [0, 48], sizes = [48, 48], strides = [1, 1]} : vector<48x96xf32> to vector<48x48xf32>
    %c0_103 = arith.constant 0 : index
    %c1_104 = arith.constant 1 : index
    %c0_105 = arith.constant 0 : index
    %c0_106 = arith.constant 0 : index
    %172 = vector.load %arg14[%c0_103, %c1_104, %c0_105, %c0_106] : memref<1x2x48x48xf32, #tpu.memory_space<vmem>>, vector<1x1x48x48xf32>
    %173 = vector.shape_cast %172 : vector<1x1x48x48xf32> to vector<48x48xf32>
    %174 = vector.shape_cast %171 : vector<48x48xf32> to vector<1x1x48x48xf32>
    tpu.vector_store %arg14[%c0_103, %c1_104, %c0_105, %c0_106], %174 {strides = array<i32>} : memref<1x2x48x48xf32, #tpu.memory_space<vmem>>, vector<1x1x48x48xf32>,
    return
  }
  func.func @transform_0(%arg0: i32) -> (i32, i32) {
    %c0_i32 = arith.constant 0 : i32
    %c0_i32_0 = arith.constant 0 : i32
    %c0_i32_1 = arith.constant 0 : i32
    return %c0_i32, %c0_i32_0 : i32, i32
  }
  func.func @transform_1(%arg0: i32) -> (i32, i32) {
    %c0_i32 = arith.constant 0 : i32
    %c0_i32_0 = arith.constant 0 : i32
    %c0_i32_1 = arith.constant 0 : i32
    return %c0_i32, %c0_i32_0 : i32, i32
  }
  func.func @transform_2(%arg0: i32) -> (i32, i32) {
    %c0_i32 = arith.constant 0 : i32
    %c0_i32_0 = arith.constant 0 : i32
    %c0_i32_1 = arith.constant 0 : i32
    return %c0_i32, %c0_i32_0 : i32, i32
  }
  func.func @transform_3(%arg0: i32) -> (i32, i32) {
    %c0_i32 = arith.constant 0 : i32
    %c0_i32_0 = arith.constant 0 : i32
    %c0_i32_1 = arith.constant 0 : i32
    return %c0_i32, %c0_i32_0 : i32, i32
  }
  func.func @transform_4(%arg0: i32) -> (i32, i32) {
    %c0_i32 = arith.constant 0 : i32
    %c0_i32_0 = arith.constant 0 : i32
    %c0_i32_1 = arith.constant 0 : i32
    return %c0_i32, %c0_i32_0 : i32, i32
  }
  func.func @transform_5(%arg0: i32) -> (i32, i32) {
    %c0_i32 = arith.constant 0 : i32
    %c0_i32_0 = arith.constant 0 : i32
    %c0_i32_1 = arith.constant 0 : i32
    return %c0_i32, %c0_i32_0 : i32, i32
  }
  func.func @transform_6(%arg0: i32) -> (i32, i32) {
    %c0_i32 = arith.constant 0 : i32
    %c0_i32_0 = arith.constant 0 : i32
    %c0_i32_1 = arith.constant 0 : i32
    return %c0_i32, %c0_i32_0 : i32, i32
  }
  func.func @transform_7(%arg0: i32) -> (i32, i32, i32) {
    %c0_i32 = arith.constant 0 : i32
    %c0_i32_0 = arith.constant 0 : i32
    %c0_i32_1 = arith.constant 0 : i32
    %c0_i32_2 = arith.constant 0 : i32
    return %c0_i32, %c0_i32_0, %c0_i32_1 : i32, i32, i32
  }
  func.func @transform_8(%arg0: i32) -> (i32, i32) {
    %c0_i32 = arith.constant 0 : i32
    %c0_i32_0 = arith.constant 0 : i32
    %c0_i32_1 = arith.constant 0 : i32
    return %c0_i32, %c0_i32_0 : i32, i32
  }
  func.func @transform_9(%arg0: i32) -> (i32, i32, i32) {
    %c0_i32 = arith.constant 0 : i32
    %c0_i32_0 = arith.constant 0 : i32
    %c0_i32_1 = arith.constant 0 : i32
    %c0_i32_2 = arith.constant 0 : i32
    return %c0_i32, %c0_i32_0, %c0_i32_1 : i32, i32, i32
  }
  func.func @transform_10(%arg0: i32) -> (i32, i32) {
    %c0_i32 = arith.constant 0 : i32
    %c0_i32_0 = arith.constant 0 : i32
    %c0_i32_1 = arith.constant 0 : i32
    return %c0_i32, %c0_i32_0 : i32, i32
  }
  func.func @transform_11(%arg0: i32) -> (i32, i32, i32) {
    %c0_i32 = arith.constant 0 : i32
    %c0_i32_0 = arith.constant 0 : i32
    %c0_i32_1 = arith.constant 0 : i32
    %c0_i32_2 = arith.constant 0 : i32
    return %c0_i32, %c0_i32_0, %c0_i32_1 : i32, i32, i32
  }
  func.func @transform_12(%arg0: i32) -> (i32, i32) {
    %c0_i32 = arith.constant 0 : i32
    %c0_i32_0 = arith.constant 0 : i32
    %c0_i32_1 = arith.constant 0 : i32
    return %c0_i32, %c0_i32_0 : i32, i32
  }
  func.func @transform_13(%arg0: i32) -> (i32, i32, i32, i32) {
    %c0_i32 = arith.constant 0 : i32
    %c0_i32_0 = arith.constant 0 : i32
    %c0_i32_1 = arith.constant 0 : i32
    %c0_i32_2 = arith.constant 0 : i32
    return %arg0, %c0_i32, %c0_i32_0, %c0_i32_1 : i32, i32, i32, i32
  }
}

</mosaic_0001>

<bundles_post_ra>
// kernel: tpu_custom_call.1
= control target key start
LH: loop header
LB: loop body
LE: loop exit
PB: predicated region body
PF: predicated region fallthrough
CT: control target
= control target key end

     0   :  { %s14113_s0 = inlined_call_operand.vmem [shape: f32[2,16], index: 0, kind: input, shape index: {}]   ;;  %s14114_s1 = inlined_call_operand.vmem [shape: f32[16,256], index: 1, kind: input, shape index: {}]   ;;  %s14115_s2 = inlined_call_operand.vmem [shape: f32[1,256], index: 2, kind: input, shape index: {}]   ;;  %s14116_s3 = inlined_call_operand.vmem [shape: f32[256,1024], index: 3, kind: input, shape index: {}]   ;;  %s14117_s4 = inlined_call_operand.vmem [shape: f32[1,1024], index: 4, kind: input, shape index: {}]   ;;  %s14118_s5 = inlined_call_operand.vmem [shape: f32[1024,128], index: 5, kind: input, shape index: {}]   ;;  %s14119_s6 = inlined_call_operand.vmem [shape: f32[1,128], index: 6, kind: input, shape index: {}]   ;;  %s14120_s7 = inlined_call_operand.vmem [shape: f32[5,8,288], index: 7, kind: input, shape index: {}]   ;;  %s14121_s8 = inlined_call_operand.vmem [shape: f32[1,288], index: 8, kind: input, shape index: {}]   ;;  %s14122_s9 = inlined_call_operand.hbm [shape: f32[5,288,704], index: 9, kind: input, shape index: {}]   ;;  %s14123_s10 = inlined_call_operand.vmem [shape: f32[1,704], index: 10, kind: input, shape index: {}]   ;;  %s14124_s11 = inlined_call_operand.vmem [shape: f32[5,704,96], index: 11, kind: input, shape index: {}]   ;;  %s14125_s12 = inlined_call_operand.vmem [shape: f32[1,96], index: 12, kind: input, shape index: {}]   ;;  %s14126_s13 = inlined_call_operand.hbm [shape: f32[2,2,48,48], index: 13, kind: output, shape index: {}]  }
   0x1   :  { %14186 = sst [smem:[#allocation181_spill]] %s14113_s0 }
   0x2   :  { %14187 = sst [smem:[#allocation182_spill]] %s14122_s9 }
   0x3   :  { %18 = vsyncpa [#allocation3], 0 }
   0x4   :  { %19 = vsyncpa [#allocation4], 0 }
   0x5   :  { %21 = vsyncpa [#allocation4 + $0x1], 0  ;;  %s9112_s25 = smov 0   ;;  %s9114_s26 = smov 0  }
   0x6   :  { %s9116_s27 = smov 0   ;;  %s9118_s28 = smov 0  }
   0x7 LB: > { %14188 = sst [smem:[#allocation8_spill]] %s9025_s27  ;;  %s9133_s29 = sadd.s32 4294967295, %s9029_s28   ;;  %s9029_s28 = sphi %s9118_s28, %s14619_s28   ;;  %s9025_s27 = sphi %s9116_s27, %s14616_s27   ;;  %s9021_s26 = sphi %s9114_s26, %s14618_s26   ;;  %s9017_s25 = sphi %s9112_s25, %s14617_s25  }
   0x8   : > { %s8239_s30 = sadd.s32 4294967294, %s9029_s28   ;;  %s9137_s14 = sadd.s32 1, %s9029_s28  }
   0x9   : > { %s307_s15 = sadd.s32 1, %s9025_s27  ;;  %s304_s16 = ssub.s32 %s9029_s28, %s9137_s14 }
   0xa   : > { %p317_p0 = scmp.ne.s32.totalorder %s9025_s27, %s9021_s26  ;;  %p305_p1 = scmp.eq.s32.totalorder %s304_s16, 0 }
   0xb   : > { %p318_p2 = scmp.eq.s32.totalorder %s9133_s29, 1  ;;  %p323_p3 = scmp.ne.s32.totalorder %s9021_s26, %s9017_s25 }
   0xc   : > { %p324_p4 = scmp.eq.s32.totalorder %s8239_s30, 1  ;;  %p8240_p7 = scmp.ge.s32.totalorder %s9029_s28, 1 }
   0xd   : > { %s9148_s17 = scalar_select %p305_p1, %s9025_s27, %s307_s15  }
   0xe   : > { %p9150_p5 = por %p318_p2, %p317_p0  ;;  %p9154_p6 = por %p324_p4, %p323_p3 }
   0xf   : > { %14189 = sst [smem:[#allocation9_spill]] %s9148_s17  ;;  %p331_p8 = scmp.lt.s32.totalorder %s9029_s28, 3 }
  0x10   : > { %p8862_p9 = scmp.eq.s32.totalorder %s9133_s29, 0  ;;  %s14192_s9 = sld [smem:[#allocation182_spill]] }
  0x11   : > { %p332_p10 = pnand %p8240_p7, %p331_p8  ;;  %s9031_s23 = smov [#allocation2]  }
  0x12   : > { %s371_s24 = sshll.u32 %s9031_s23, 4  ;;  %s9032_s30 = smov 768   ;;  %s372_s24 = int_to_ptr.vmem [resolvable:$true] %s371_s24 }
  0x13   : > { %p8854_p11 = pneg %p332_p10  ;;  %s9033_s15 = smov 48  }
  0x14   : > { %396 = sbr.rel (%p332_p10) target bundleno = 2510 (0x9ce), region = 72 }
  0x15   : > { %p8855_p12 = pnand %p8862_p9, %p8854_p11 }
  0x16   : > { %s369_s22 = sshll.u32 %s14192_s9, 4  ;;  %s370_s22 = int_to_ptr.hbm [resolvable:$true] %s369_s22 }
  0x17   : > { %8857 = dma.hbm_to_vmem [thread:$0]  (!%p8855_p12), %s370_s22, 138240, %s372_s24, [#allocation3], %s9032_s30, %s9032_s30, %s9033_s15  }
  0x19   : > { %9008 = dma.done.wait (%p8862_p9), [#allocation3], 138240  }
  0x1a   : > { %9010 = vsyncadd (%p8862_p9), [#allocation3], 4294829056  ;;  %s14193_s0 = sld [smem:[#allocation181_spill]]  ;;  %v440_v0 = vld [vmem:[%s14114_s1 + $0x10] sm:$0xff]  ;;  %v441_v1 = vld [vmem:[%s14114_s1 + $0x18] sm:$0xff]  ;;  %vm448_vm0 = vcmask 130048  }
  0x1b   : > { %v438_v2 = vld [vmem:[%s14114_s1] sm:$0xff]  ;;  %466 = vmatpush.msra.mxu0 %v440_v0  ;;  %486 = vmatpush.msra.mxu1 %v441_v1  ;;  %v439_v3 = vld [vmem:[%s14114_s1 + $0x8] sm:$0xff]  ;;  %s9034_s17 = smov 113   ;;  %s9035_s23 = smov 123   ;;  %vm1385_vm1 = vcmask 39936   ;;  %vm1416_vm2 = vcmask 1043456  }
  0x1c   : > { %v614_v5 = vld [vmem:[%s14116_s3 + $0x3c0] sm:$0xff]  ;;  %v615_v7 = vld [vmem:[%s14116_s3 + $0x3c8] sm:$0xff]  ;;  %s9036_s22 = smov 108   ;;  %s9037_s24 = smov 118   ;;  %vm1424_vm3 = vcmask 1040384   ;;  %vm1418_vm4 = vcmask 1044480  }
  0x1d   : > { %768 = vmatpush.msra.mxu2 %v614_v5  ;;  %v742_v6 = vld [vmem:[%s14116_s3 + $0x7c0] sm:$0xff]  ;;  %467 = vmatpush.msra.mxu0 %v438_v2  ;;  %v743_v8 = vld [vmem:[%s14116_s3 + $0x7c8] sm:$0xff]  ;;  %v616_v5 = vld [vmem:[%s14116_s3 + $0x3d0] sm:$0xff]  ;;  %vm1420_vm5 = vcmask 1045504   ;;  %vm1422_vm6 = vcmask 1046528   ;;  %vm1439_vm7 = vcmask 64512  }
  0x1e   : > { %487 = vmatpush.msra.mxu1 %v439_v3  ;;  %v606_v9 = vld [vmem:[%s14116_s3 + $0x380] sm:$0xff]  ;;  %v607_v11 = vld [vmem:[%s14116_s3 + $0x388] sm:$0xff]  ;;  %788 = vmatpush.msra.mxu3 %v742_v6  ;;  %v744_v6 = vld [vmem:[%s14116_s3 + $0x7d0] sm:$0xff]  ;;  %vm1893_vm11 = vcmask 72704   ;;  %s433_s16 = sand.u32 1, %s9021_s26   ;;  %s9039_s9 = smov 80  }
  0x1f   : > { %v734_v10 = vld [vmem:[%s14116_s3 + $0x780] sm:$0xff]  ;;  %808 = vmatpush.msrb.mxu0 %v615_v7  ;;  %v735_v12 = vld [vmem:[%s14116_s3 + $0x788] sm:$0xff]  ;;  %769 = vmatpush.msra.mxu2 %v606_v9  ;;  %v617_v7 = vld [vmem:[%s14116_s3 + $0x3d8] sm:$0xff]  ;;  %s14035_s20 = smul.u32 96, %s433_s16  ;;  %s8161_s15 = scalar_lea.sflag [#allocation4], %s433_s16 }
  0x20   : > { %s436_s21 = scalar_lea.vmem %s14193_s0, %s9133_s29  ;;  %v598_v13 = vld [vmem:[%s14116_s3 + $0x340] sm:$0xff]  ;;  %828 = vmatpush.msrb.mxu1 %v743_v8  ;;  %v599_v15 = vld [vmem:[%s14116_s3 + $0x348] sm:$0xff]  ;;  %789 = vmatpush.msra.mxu3 %v734_v10  ;;  %v745_v8 = vld [vmem:[%s14116_s3 + $0x7d8] sm:$0xff] }
  0x21   : > { %v437_v4 = vld [vmem:[%s436_s21] sm:$0x1]  ;;  %809 = vmatpush.msrb.mxu0 %v607_v11  ;;  %v727_v16 = vld [vmem:[%s14116_s3 + $0x748] sm:$0xff]  ;;  %770 = vmatpush.msra.mxu2 %v598_v13  ;;  %v608_v9 = vld [vmem:[%s14116_s3 + $0x390] sm:$0xff]  ;;  %s14042_s27 = scalar_lea.vmem [#allocation5], %s14035_s20 }
  0x22   : > { %8244 = vmatmul.msk.f32.vlgmr.msra.gmra.mxu0 %vm448_vm0, %v437_v4  ;;  %8245 = vmatmul.msk.f32.vlgmr.msra.gmra.mxu1 %vm448_vm0, %v437_v4  ;;  %v726_v14 = vld [vmem:[%s14116_s3 + $0x740] sm:$0xff]  ;;  %v591_v19 = vld [vmem:[%s14116_s3 + $0x308] sm:$0xff]  ;;  %v736_v10 = vld [vmem:[%s14116_s3 + $0x790] sm:$0xff]  ;;  %s8173_s21 = sshll.u32 %s14042_s27, 4  ;;  %s8174_s21 = int_to_ptr.vmem [resolvable:$true] %s8173_s21 }
  0x23   : > { %v590_v17 = vld [vmem:[%s14116_s3 + $0x300] sm:$0xff]  ;;  %829 = vmatpush.msrb.mxu1 %v735_v12  ;;  %790 = vmatpush.msra.mxu3 %v726_v14  ;;  %v719_v20 = vld [vmem:[%s14116_s3 + $0x708] sm:$0xff]  ;;  %v609_v11 = vld [vmem:[%s14116_s3 + $0x398] sm:$0xff] }
  0x24   : > { %v718_v18 = vld [vmem:[%s14116_s3 + $0x700] sm:$0xff]  ;;  %810 = vmatpush.msrb.mxu0 %v599_v15  ;;  %771 = vmatpush.msra.mxu2 %v590_v17  ;;  %v583_v23 = vld [vmem:[%s14116_s3 + $0x2c8] sm:$0xff]  ;;  %v737_v12 = vld [vmem:[%s14116_s3 + $0x798] sm:$0xff] }
  0x25   : > { %v582_v21 = vld [vmem:[%s14116_s3 + $0x2c0] sm:$0xff]  ;;  %830 = vmatpush.msrb.mxu1 %v727_v16  ;;  %791 = vmatpush.msra.mxu3 %v718_v18  ;;  %v711_v24 = vld [vmem:[%s14116_s3 + $0x6c8] sm:$0xff]  ;;  %v600_v13 = vld [vmem:[%s14116_s3 + $0x350] sm:$0xff] }
  0x26   : > { %v710_v22 = vld [vmem:[%s14116_s3 + $0x6c0] sm:$0xff]  ;;  %811 = vmatpush.msrb.mxu0 %v591_v19  ;;  %772 = vmatpush.msra.mxu2 %v582_v21  ;;  %v575_v27 = vld [vmem:[%s14116_s3 + $0x288] sm:$0xff]  ;;  %v728_v14 = vld [vmem:[%s14116_s3 + $0x750] sm:$0xff] }
  0x27   : > { %v574_v25 = vld [vmem:[%s14116_s3 + $0x280] sm:$0xff]  ;;  %831 = vmatpush.msrb.mxu1 %v719_v20  ;;  %792 = vmatpush.msra.mxu3 %v710_v22  ;;  %v703_v28 = vld [vmem:[%s14116_s3 + $0x688] sm:$0xff]  ;;  %v601_v15 = vld [vmem:[%s14116_s3 + $0x358] sm:$0xff] }
  0x28   : > { %v702_v26 = vld [vmem:[%s14116_s3 + $0x680] sm:$0xff]  ;;  %812 = vmatpush.msrb.mxu0 %v583_v23  ;;  %773 = vmatpush.msra.mxu2 %v574_v25  ;;  %v567_v31 = vld [vmem:[%s14116_s3 + $0x248] sm:$0xff]  ;;  %v729_v16 = vld [vmem:[%s14116_s3 + $0x758] sm:$0xff] }
  0x29   : > { %v566_v29 = vld [vmem:[%s14116_s3 + $0x240] sm:$0xff]  ;;  %832 = vmatpush.msrb.mxu1 %v711_v24  ;;  %793 = vmatpush.msra.mxu3 %v702_v26  ;;  %v695_v32 = vld [vmem:[%s14116_s3 + $0x648] sm:$0xff]  ;;  %v592_v17 = vld [vmem:[%s14116_s3 + $0x310] sm:$0xff] }
  0x2a   : > { %v694_v30 = vld [vmem:[%s14116_s3 + $0x640] sm:$0xff]  ;;  %813 = vmatpush.msrb.mxu0 %v575_v27  ;;  %774 = vmatpush.msra.mxu2 %v566_v29  ;;  %v559_v35 = vld [vmem:[%s14116_s3 + $0x208] sm:$0xff]  ;;  %v720_v18 = vld [vmem:[%s14116_s3 + $0x710] sm:$0xff] }
  0x2b   : > { %v558_v33 = vld [vmem:[%s14116_s3 + $0x200] sm:$0xff]  ;;  %833 = vmatpush.msrb.mxu1 %v703_v28  ;;  %794 = vmatpush.msra.mxu3 %v694_v30  ;;  %v687_v36 = vld [vmem:[%s14116_s3 + $0x608] sm:$0xff]  ;;  %v593_v19 = vld [vmem:[%s14116_s3 + $0x318] sm:$0xff] }
  0x2c   : > { %v686_v34 = vld [vmem:[%s14116_s3 + $0x600] sm:$0xff]  ;;  %814 = vmatpush.msrb.mxu0 %v567_v31  ;;  %775 = vmatpush.msra.mxu2 %v558_v33  ;;  %v551_v39 = vld [vmem:[%s14116_s3 + $0x1c8] sm:$0xff]  ;;  %v721_v20 = vld [vmem:[%s14116_s3 + $0x718] sm:$0xff] }
  0x2d   : > { %v550_v37 = vld [vmem:[%s14116_s3 + $0x1c0] sm:$0xff]  ;;  %834 = vmatpush.msrb.mxu1 %v695_v32  ;;  %795 = vmatpush.msra.mxu3 %v686_v34  ;;  %v679_v40 = vld [vmem:[%s14116_s3 + $0x5c8] sm:$0xff]  ;;  %v584_v21 = vld [vmem:[%s14116_s3 + $0x2d0] sm:$0xff] }
  0x2e   : > { %v678_v38 = vld [vmem:[%s14116_s3 + $0x5c0] sm:$0xff]  ;;  %815 = vmatpush.msrb.mxu0 %v559_v35  ;;  %776 = vmatpush.msra.mxu2 %v550_v37  ;;  %v543_v43 = vld [vmem:[%s14116_s3 + $0x188] sm:$0xff]  ;;  %v712_v22 = vld [vmem:[%s14116_s3 + $0x6d0] sm:$0xff] }
  0x2f   : > { %v542_v41 = vld [vmem:[%s14116_s3 + $0x180] sm:$0xff]  ;;  %835 = vmatpush.msrb.mxu1 %v687_v36  ;;  %796 = vmatpush.msra.mxu3 %v678_v38  ;;  %v671_v44 = vld [vmem:[%s14116_s3 + $0x588] sm:$0xff]  ;;  %v585_v23 = vld [vmem:[%s14116_s3 + $0x2d8] sm:$0xff] }
  0x30   : > { %v670_v42 = vld [vmem:[%s14116_s3 + $0x580] sm:$0xff]  ;;  %816 = vmatpush.msrb.mxu0 %v551_v39  ;;  %777 = vmatpush.msra.mxu2 %v542_v41  ;;  %v535_v47 = vld [vmem:[%s14116_s3 + $0x148] sm:$0xff]  ;;  %v713_v24 = vld [vmem:[%s14116_s3 + $0x6d8] sm:$0xff] }
  0x31   : > { %v534_v45 = vld [vmem:[%s14116_s3 + $0x140] sm:$0xff]  ;;  %836 = vmatpush.msrb.mxu1 %v679_v40  ;;  %797 = vmatpush.msra.mxu3 %v670_v42  ;;  %v663_v48 = vld [vmem:[%s14116_s3 + $0x548] sm:$0xff]  ;;  %v576_v25 = vld [vmem:[%s14116_s3 + $0x290] sm:$0xff] }
  0x32   : > { %v662_v46 = vld [vmem:[%s14116_s3 + $0x540] sm:$0xff]  ;;  %817 = vmatpush.msrb.mxu0 %v543_v43  ;;  %778 = vmatpush.msra.mxu2 %v534_v45  ;;  %v527_v51 = vld [vmem:[%s14116_s3 + $0x108] sm:$0xff]  ;;  %v704_v26 = vld [vmem:[%s14116_s3 + $0x690] sm:$0xff] }
  0x33   : > { %v526_v49 = vld [vmem:[%s14116_s3 + $0x100] sm:$0xff]  ;;  %837 = vmatpush.msrb.mxu1 %v671_v44  ;;  %798 = vmatpush.msra.mxu3 %v662_v46  ;;  %v655_v52 = vld [vmem:[%s14116_s3 + $0x508] sm:$0xff]  ;;  %v577_v27 = vld [vmem:[%s14116_s3 + $0x298] sm:$0xff] }
  0x34   : > { %v654_v50 = vld [vmem:[%s14116_s3 + $0x500] sm:$0xff]  ;;  %818 = vmatpush.msrb.mxu0 %v535_v47  ;;  %779 = vmatpush.msra.mxu2 %v526_v49  ;;  %v519_v55 = vld [vmem:[%s14116_s3 + $0xc8] sm:$0xff]  ;;  %v705_v28 = vld [vmem:[%s14116_s3 + $0x698] sm:$0xff] }
  0x35   : > { %v518_v53 = vld [vmem:[%s14116_s3 + $0xc0] sm:$0xff]  ;;  %838 = vmatpush.msrb.mxu1 %v663_v48  ;;  %799 = vmatpush.msra.mxu3 %v654_v50  ;;  %v647_v56 = vld [vmem:[%s14116_s3 + $0x4c8] sm:$0xff]  ;;  %v568_v29 = vld [vmem:[%s14116_s3 + $0x250] sm:$0xff] }
  0x36   : > { %v646_v54 = vld [vmem:[%s14116_s3 + $0x4c0] sm:$0xff]  ;;  %819 = vmatpush.msrb.mxu0 %v527_v51  ;;  %780 = vmatpush.msra.mxu2 %v518_v53  ;;  %v511_v59 = vld [vmem:[%s14116_s3 + $0x88] sm:$0xff]  ;;  %v696_v30 = vld [vmem:[%s14116_s3 + $0x650] sm:$0xff] }
  0x37   : > { %v510_v57 = vld [vmem:[%s14116_s3 + $0x80] sm:$0xff]  ;;  %839 = vmatpush.msrb.mxu1 %v655_v52  ;;  %800 = vmatpush.msra.mxu3 %v646_v54  ;;  %v639_v60 = vld [vmem:[%s14116_s3 + $0x488] sm:$0xff]  ;;  %v569_v31 = vld [vmem:[%s14116_s3 + $0x258] sm:$0xff] }
  0x38   : > { %v638_v58 = vld [vmem:[%s14116_s3 + $0x480] sm:$0xff]  ;;  %820 = vmatpush.msrb.mxu0 %v519_v55  ;;  %781 = vmatpush.msra.mxu2 %v510_v57  ;;  %v503_v63 = vld [vmem:[%s14116_s3 + $0x48] sm:$0xff]  ;;  %v697_v32 = vld [vmem:[%s14116_s3 + $0x658] sm:$0xff] }
  0x39   : > { %v502_v61 = vld [vmem:[%s14116_s3 + $0x40] sm:$0xff]  ;;  %840 = vmatpush.msrb.mxu1 %v647_v56  ;;  %801 = vmatpush.msra.mxu3 %v638_v58  ;;  %v631_v0 = vld [vmem:[%s14116_s3 + $0x448] sm:$0xff]  ;;  %v560_v33 = vld [vmem:[%s14116_s3 + $0x210] sm:$0xff] }
  0x3a   : > { %v630_v62 = vld [vmem:[%s14116_s3 + $0x440] sm:$0xff]  ;;  %821 = vmatpush.msrb.mxu0 %v511_v59  ;;  %782 = vmatpush.msra.mxu2 %v502_v61  ;;  %v495_v3 = vld [vmem:[%s14116_s3 + $0x8] sm:$0xff]  ;;  %v688_v34 = vld [vmem:[%s14116_s3 + $0x610] sm:$0xff] }
  0x3b   : > { %v494_v1 = vld [vmem:[%s14116_s3] sm:$0xff]  ;;  %841 = vmatpush.msrb.mxu1 %v639_v60  ;;  %802 = vmatpush.msra.mxu3 %v630_v62  ;;  %v623_v4 = vld [vmem:[%s14116_s3 + $0x408] sm:$0xff]  ;;  %v561_v35 = vld [vmem:[%s14116_s3 + $0x218] sm:$0xff] }
  0x3c   : > { %v622_v2 = vld [vmem:[%s14116_s3 + $0x400] sm:$0xff]  ;;  %822 = vmatpush.msrb.mxu0 %v503_v63  ;;  %783 = vmatpush.msra.mxu2 %v494_v1  ;;  %v689_v36 = vld [vmem:[%s14116_s3 + $0x618] sm:$0xff]  ;;  %v552_v37 = vld [vmem:[%s14116_s3 + $0x1d0] sm:$0xff] }
  0x3d   : > { %842 = vmatpush.msrb.mxu1 %v631_v0  ;;  %803 = vmatpush.msra.mxu3 %v622_v2  ;;  %v680_v38 = vld [vmem:[%s14116_s3 + $0x5d0] sm:$0xff]  ;;  %v553_v39 = vld [vmem:[%s14116_s3 + $0x1d8] sm:$0xff] }
  0x3e   : > { %823 = vmatpush.msrb.mxu0 %v495_v3  ;;  %848 = vmatpush.msrb.mxu2 %v616_v5  ;;  %v681_v40 = vld [vmem:[%s14116_s3 + $0x5d8] sm:$0xff]  ;;  %v544_v41 = vld [vmem:[%s14116_s3 + $0x190] sm:$0xff]  ;;  %v442_v5 = vld [vmem:[%s14115_s2] sm:$0x3] }
  0x3f   : > { %843 = vmatpush.msrb.mxu1 %v623_v4  ;;  %868 = vmatpush.msrb.mxu3 %v744_v6  ;;  %v672_v42 = vld [vmem:[%s14116_s3 + $0x590] sm:$0xff]  ;;  %v545_v43 = vld [vmem:[%s14116_s3 + $0x198] sm:$0xff]  ;;  %v444_v6 = vperm.slane %v442_v5, 0 }
  0x40   : > { %888 = vmatpush.msra.mxu0 %v617_v7  ;;  %849 = vmatpush.msrb.mxu2 %v608_v9  ;;  %v673_v44 = vld [vmem:[%s14116_s3 + $0x598] sm:$0xff]  ;;  %v536_v45 = vld [vmem:[%s14116_s3 + $0x150] sm:$0xff]  ;;  %v445_v7 = vperm.slane %v442_v5, 1  ;;  %v643_v5 = vld [vmem:[%s14116_s3 + $0x4a8] sm:$0xff] }
  0x41   : > { %908 = vmatpush.msra.mxu1 %v745_v8  ;;  %869 = vmatpush.msrb.mxu3 %v736_v10  ;;  %v664_v46 = vld [vmem:[%s14116_s3 + $0x550] sm:$0xff]  ;;  %v537_v47 = vld [vmem:[%s14116_s3 + $0x158] sm:$0xff] }
  0x42   : > { %889 = vmatpush.msra.mxu0 %v609_v11  ;;  %850 = vmatpush.msrb.mxu2 %v600_v13  ;;  %v665_v48 = vld [vmem:[%s14116_s3 + $0x558] sm:$0xff]  ;;  %v528_v49 = vld [vmem:[%s14116_s3 + $0x110] sm:$0xff] }
  0x43   : > { %909 = vmatpush.msra.mxu1 %v737_v12  ;;  %870 = vmatpush.msrb.mxu3 %v728_v14  ;;  %v656_v50 = vld [vmem:[%s14116_s3 + $0x510] sm:$0xff]  ;;  %v529_v51 = vld [vmem:[%s14116_s3 + $0x118] sm:$0xff]  ;;  %v618_v14 = vld [vmem:[%s14116_s3 + $0x3e0] sm:$0xff] }
  0x44   : > { %890 = vmatpush.msra.mxu0 %v601_v15  ;;  %851 = vmatpush.msrb.mxu2 %v592_v17  ;;  %v657_v52 = vld [vmem:[%s14116_s3 + $0x518] sm:$0xff]  ;;  %v520_v53 = vld [vmem:[%s14116_s3 + $0xd0] sm:$0xff]  ;;  %v746_v15 = vld [vmem:[%s14116_s3 + $0x7e0] sm:$0xff] }
  0x45   : > { %910 = vmatpush.msra.mxu1 %v729_v16  ;;  %871 = vmatpush.msrb.mxu3 %v720_v18  ;;  %v648_v54 = vld [vmem:[%s14116_s3 + $0x4d0] sm:$0xff]  ;;  %v521_v55 = vld [vmem:[%s14116_s3 + $0xd8] sm:$0xff]  ;;  %v619_v16 = vld [vmem:[%s14116_s3 + $0x3e8] sm:$0xff] }
  0x46   : > { %891 = vmatpush.msra.mxu0 %v593_v19  ;;  %852 = vmatpush.msrb.mxu2 %v584_v21  ;;  %v649_v56 = vld [vmem:[%s14116_s3 + $0x4d8] sm:$0xff]  ;;  %v512_v57 = vld [vmem:[%s14116_s3 + $0x90] sm:$0xff]  ;;  %v747_v17 = vld [vmem:[%s14116_s3 + $0x7e8] sm:$0xff] }
  0x47   : > { %911 = vmatpush.msra.mxu1 %v721_v20  ;;  %872 = vmatpush.msrb.mxu3 %v712_v22  ;;  %v640_v58 = vld [vmem:[%s14116_s3 + $0x490] sm:$0xff]  ;;  %v513_v59 = vld [vmem:[%s14116_s3 + $0x98] sm:$0xff]  ;;  %v610_v18 = vld [vmem:[%s14116_s3 + $0x3a0] sm:$0xff] }
  0x48   : > { %892 = vmatpush.msra.mxu0 %v585_v23  ;;  %853 = vmatpush.msrb.mxu2 %v576_v25  ;;  %v641_v60 = vld [vmem:[%s14116_s3 + $0x498] sm:$0xff]  ;;  %v504_v61 = vld [vmem:[%s14116_s3 + $0x50] sm:$0xff]  ;;  %v738_v19 = vld [vmem:[%s14116_s3 + $0x7a0] sm:$0xff] }
  0x49   : > { %912 = vmatpush.msra.mxu1 %v713_v24  ;;  %873 = vmatpush.msrb.mxu3 %v704_v26  ;;  %v632_v62 = vld [vmem:[%s14116_s3 + $0x450] sm:$0xff]  ;;  %v505_v63 = vld [vmem:[%s14116_s3 + $0x58] sm:$0xff]  ;;  %v611_v20 = vld [vmem:[%s14116_s3 + $0x3a8] sm:$0xff] }
  0x4a   : > { %893 = vmatpush.msra.mxu0 %v577_v27  ;;  %854 = vmatpush.msrb.mxu2 %v568_v29  ;;  %v633_v0 = vld [vmem:[%s14116_s3 + $0x458] sm:$0xff]  ;;  %v496_v1 = vld [vmem:[%s14116_s3 + $0x10] sm:$0xff]  ;;  %v739_v21 = vld [vmem:[%s14116_s3 + $0x7a8] sm:$0xff] }
  0x4b   : > { %913 = vmatpush.msra.mxu1 %v705_v28  ;;  %874 = vmatpush.msrb.mxu3 %v696_v30  ;;  %v624_v2 = vld [vmem:[%s14116_s3 + $0x410] sm:$0xff]  ;;  %v497_v3 = vld [vmem:[%s14116_s3 + $0x18] sm:$0xff]  ;;  %v602_v22 = vld [vmem:[%s14116_s3 + $0x360] sm:$0xff] }
  0x4c   : > { %894 = vmatpush.msra.mxu0 %v569_v31  ;;  %855 = vmatpush.msrb.mxu2 %v560_v33  ;;  %v625_v4 = vld [vmem:[%s14116_s3 + $0x418] sm:$0xff]  ;;  %v730_v23 = vld [vmem:[%s14116_s3 + $0x760] sm:$0xff]  ;;  %v603_v24 = vld [vmem:[%s14116_s3 + $0x368] sm:$0xff] }
  0x4d   : > { %914 = vmatpush.msra.mxu1 %v697_v32  ;;  %875 = vmatpush.msrb.mxu3 %v688_v34  ;;  %v731_v25 = vld [vmem:[%s14116_s3 + $0x768] sm:$0xff]  ;;  %v594_v26 = vld [vmem:[%s14116_s3 + $0x320] sm:$0xff] }
  0x4e   : > { %895 = vmatpush.msra.mxu0 %v561_v35  ;;  %856 = vmatpush.msrb.mxu2 %v552_v37  ;;  %v722_v27 = vld [vmem:[%s14116_s3 + $0x720] sm:$0xff]  ;;  %v595_v28 = vld [vmem:[%s14116_s3 + $0x328] sm:$0xff] }
  0x4f   : > { %915 = vmatpush.msra.mxu1 %v689_v36  ;;  %876 = vmatpush.msrb.mxu3 %v680_v38  ;;  %v723_v29 = vld [vmem:[%s14116_s3 + $0x728] sm:$0xff]  ;;  %v586_v30 = vld [vmem:[%s14116_s3 + $0x2e0] sm:$0xff] }
  0x50   : > { %896 = vmatpush.msra.mxu0 %v553_v39  ;;  %857 = vmatpush.msrb.mxu2 %v544_v41  ;;  %v714_v31 = vld [vmem:[%s14116_s3 + $0x6e0] sm:$0xff]  ;;  %v587_v32 = vld [vmem:[%s14116_s3 + $0x2e8] sm:$0xff] }
  0x51   : > { %916 = vmatpush.msra.mxu1 %v681_v40  ;;  %877 = vmatpush.msrb.mxu3 %v672_v42  ;;  %v715_v33 = vld [vmem:[%s14116_s3 + $0x6e8] sm:$0xff]  ;;  %v578_v34 = vld [vmem:[%s14116_s3 + $0x2a0] sm:$0xff] }
  0x52   : > { %897 = vmatpush.msra.mxu0 %v545_v43  ;;  %858 = vmatpush.msrb.mxu2 %v536_v45  ;;  %v706_v35 = vld [vmem:[%s14116_s3 + $0x6a0] sm:$0xff]  ;;  %v579_v36 = vld [vmem:[%s14116_s3 + $0x2a8] sm:$0xff] }
  0x53   : > { %917 = vmatpush.msra.mxu1 %v673_v44  ;;  %878 = vmatpush.msrb.mxu3 %v664_v46  ;;  %v707_v37 = vld [vmem:[%s14116_s3 + $0x6a8] sm:$0xff]  ;;  %v570_v38 = vld [vmem:[%s14116_s3 + $0x260] sm:$0xff] }
  0x54   : > { %898 = vmatpush.msra.mxu0 %v537_v47  ;;  %859 = vmatpush.msrb.mxu2 %v528_v49  ;;  %v698_v39 = vld [vmem:[%s14116_s3 + $0x660] sm:$0xff]  ;;  %v571_v40 = vld [vmem:[%s14116_s3 + $0x268] sm:$0xff] }
  0x55   : > { %918 = vmatpush.msra.mxu1 %v665_v48  ;;  %879 = vmatpush.msrb.mxu3 %v656_v50  ;;  %v699_v41 = vld [vmem:[%s14116_s3 + $0x668] sm:$0xff]  ;;  %v562_v42 = vld [vmem:[%s14116_s3 + $0x220] sm:$0xff] }
  0x56   : > { %899 = vmatpush.msra.mxu0 %v529_v51  ;;  %860 = vmatpush.msrb.mxu2 %v520_v53  ;;  %v690_v43 = vld [vmem:[%s14116_s3 + $0x620] sm:$0xff]  ;;  %v563_v44 = vld [vmem:[%s14116_s3 + $0x228] sm:$0xff] }
  0x57   : > { %919 = vmatpush.msra.mxu1 %v657_v52  ;;  %880 = vmatpush.msrb.mxu3 %v648_v54  ;;  %v691_v45 = vld [vmem:[%s14116_s3 + $0x628] sm:$0xff]  ;;  %v554_v46 = vld [vmem:[%s14116_s3 + $0x1e0] sm:$0xff] }
  0x58   : > { %900 = vmatpush.msra.mxu0 %v521_v55  ;;  %861 = vmatpush.msrb.mxu2 %v512_v57  ;;  %v682_v47 = vld [vmem:[%s14116_s3 + $0x5e0] sm:$0xff]  ;;  %v555_v48 = vld [vmem:[%s14116_s3 + $0x1e8] sm:$0xff] }
  0x59   : > { %920 = vmatpush.msra.mxu1 %v649_v56  ;;  %881 = vmatpush.msrb.mxu3 %v640_v58  ;;  %v683_v49 = vld [vmem:[%s14116_s3 + $0x5e8] sm:$0xff]  ;;  %v546_v50 = vld [vmem:[%s14116_s3 + $0x1a0] sm:$0xff] }
  0x5a   : > { %901 = vmatpush.msra.mxu0 %v513_v59  ;;  %862 = vmatpush.msrb.mxu2 %v504_v61  ;;  %v674_v51 = vld [vmem:[%s14116_s3 + $0x5a0] sm:$0xff]  ;;  %v547_v52 = vld [vmem:[%s14116_s3 + $0x1a8] sm:$0xff] }
  0x5b   : > { %921 = vmatpush.msra.mxu1 %v641_v60  ;;  %882 = vmatpush.msrb.mxu3 %v632_v62  ;;  %v675_v53 = vld [vmem:[%s14116_s3 + $0x5a8] sm:$0xff]  ;;  %v538_v54 = vld [vmem:[%s14116_s3 + $0x160] sm:$0xff] }
  0x5c   : > { %902 = vmatpush.msra.mxu0 %v505_v63  ;;  %863 = vmatpush.msrb.mxu2 %v496_v1  ;;  %v666_v55 = vld [vmem:[%s14116_s3 + $0x560] sm:$0xff]  ;;  %v539_v56 = vld [vmem:[%s14116_s3 + $0x168] sm:$0xff] }
  0x5d   : > { %922 = vmatpush.msra.mxu1 %v633_v0  ;;  %883 = vmatpush.msrb.mxu3 %v624_v2  ;;  %v667_v57 = vld [vmem:[%s14116_s3 + $0x568] sm:$0xff]  ;;  %v530_v58 = vld [vmem:[%s14116_s3 + $0x120] sm:$0xff] }
  0x5e   : > { %903 = vmatpush.msra.mxu0 %v497_v3  ;;  %v658_v59 = vld [vmem:[%s14116_s3 + $0x520] sm:$0xff]  ;;  %v531_v60 = vld [vmem:[%s14116_s3 + $0x128] sm:$0xff] }
  0x5f   : > { %923 = vmatpush.msra.mxu1 %v625_v4  ;;  %v659_v61 = vld [vmem:[%s14116_s3 + $0x528] sm:$0xff]  ;;  %v522_v62 = vld [vmem:[%s14116_s3 + $0xe0] sm:$0xff] }
  0x60   : > { %v650_v63 = vld [vmem:[%s14116_s3 + $0x4e0] sm:$0xff]  ;;  %v523_v0 = vld [vmem:[%s14116_s3 + $0xe8] sm:$0xff] }
  0x61   : > { %v651_v1 = vld [vmem:[%s14116_s3 + $0x4e8] sm:$0xff]  ;;  %v514_v2 = vld [vmem:[%s14116_s3 + $0xa0] sm:$0xff] }
  0x62   : > { %v642_v3 = vld [vmem:[%s14116_s3 + $0x4a0] sm:$0xff]  ;;  %v515_v4 = vld [vmem:[%s14116_s3 + $0xa8] sm:$0xff] }
  0x9f   : > { %v469_v8 = vpop.f32.mrf.mxu0  ;;  %v489_v9 = vpop.f32.mrf.mxu1 }
  0xa0   : > { %v470_v10 = vadd.f32 %v469_v8, %v444_v6  ;;  %v490_v11 = vadd.f32 %v489_v9, %v445_v7  ;;  %v506_v6 = vld [vmem:[%s14116_s3 + $0x60] sm:$0xff]  ;;  %v507_v8 = vld [vmem:[%s14116_s3 + $0x68] sm:$0xff] }
  0xa1   : > { %v634_v7 = vld [vmem:[%s14116_s3 + $0x460] sm:$0xff]  ;;  %v635_v9 = vld [vmem:[%s14116_s3 + $0x468] sm:$0xff] }
  0xa2   : > { %v9573_v12 = vmax.f32 %v470_v10, 0.0  ;;  %v9575_v13 = vmax.f32 %v490_v11, 0.0  ;;  %v498_v10 = vld [vmem:[%s14116_s3 + $0x20] sm:$0xff] }
  0xa3   : > { %v626_v11 = vld [vmem:[%s14116_s3 + $0x420] sm:$0xff] }
  0xa4   : > { %784 = vmatmul.f32.vlgmr.msra.gmra.mxu2 %v9573_v12  ;;  %804 = vmatmul.f32.vlgmr.msra.gmra.mxu3 %v9575_v13 }
  0xa5   : > { %824 = vmatmul.f32.vlgmr.msrb.gmra.mxu0 %v9573_v12  ;;  %844 = vmatmul.f32.vlgmr.msrb.gmra.mxu1 %v9575_v13 }
  0xa6   : > { %928 = vmatpush.msra.mxu2 %v618_v14  ;;  %948 = vmatpush.msra.mxu3 %v746_v15  ;;  %v499_v14 = vld [vmem:[%s14116_s3 + $0x28] sm:$0xff] }
  0xa7   : > { %968 = vmatpush.msrb.mxu0 %v619_v16  ;;  %988 = vmatpush.msrb.mxu1 %v747_v17  ;;  %v627_v15 = vld [vmem:[%s14116_s3 + $0x428] sm:$0xff]  ;;  %v620_v16 = vld [vmem:[%s14116_s3 + $0x3f0] sm:$0xff] }
  0xa8   : > { %929 = vmatpush.msra.mxu2 %v610_v18  ;;  %949 = vmatpush.msra.mxu3 %v738_v19  ;;  %v748_v17 = vld [vmem:[%s14116_s3 + $0x7f0] sm:$0xff]  ;;  %v621_v18 = vld [vmem:[%s14116_s3 + $0x3f8] sm:$0xff] }
  0xa9   : > { %969 = vmatpush.msrb.mxu0 %v611_v20  ;;  %989 = vmatpush.msrb.mxu1 %v739_v21  ;;  %v749_v19 = vld [vmem:[%s14116_s3 + $0x7f8] sm:$0xff]  ;;  %v612_v20 = vld [vmem:[%s14116_s3 + $0x3b0] sm:$0xff] }
  0xaa   : > { %930 = vmatpush.msra.mxu2 %v602_v22  ;;  %950 = vmatpush.msra.mxu3 %v730_v23  ;;  %v740_v21 = vld [vmem:[%s14116_s3 + $0x7b0] sm:$0xff]  ;;  %v613_v22 = vld [vmem:[%s14116_s3 + $0x3b8] sm:$0xff] }
  0xab   : > { %970 = vmatpush.msrb.mxu0 %v603_v24  ;;  %990 = vmatpush.msrb.mxu1 %v731_v25  ;;  %v741_v23 = vld [vmem:[%s14116_s3 + $0x7b8] sm:$0xff]  ;;  %v604_v24 = vld [vmem:[%s14116_s3 + $0x370] sm:$0xff] }
  0xac   : > { %931 = vmatpush.msra.mxu2 %v594_v26  ;;  %951 = vmatpush.msra.mxu3 %v722_v27  ;;  %v732_v25 = vld [vmem:[%s14116_s3 + $0x770] sm:$0xff]  ;;  %v605_v26 = vld [vmem:[%s14116_s3 + $0x378] sm:$0xff] }
  0xad   : > { %971 = vmatpush.msrb.mxu0 %v595_v28  ;;  %991 = vmatpush.msrb.mxu1 %v723_v29  ;;  %v733_v27 = vld [vmem:[%s14116_s3 + $0x778] sm:$0xff]  ;;  %v596_v28 = vld [vmem:[%s14116_s3 + $0x330] sm:$0xff] }
  0xae   : > { %864 = vmatmul.f32.vlgmr.msrb.gmra.mxu2 %v9573_v12  ;;  %884 = vmatmul.f32.vlgmr.msrb.gmra.mxu3 %v9575_v13  ;;  %v724_v29 = vld [vmem:[%s14116_s3 + $0x730] sm:$0xff] }
  0xaf   : > { %904 = vmatmul.f32.vlgmr.msra.gmra.mxu0 %v9573_v12  ;;  %924 = vmatmul.f32.vlgmr.msra.gmra.mxu1 %v9575_v13 }
  0xb0   : > { %932 = vmatpush.msra.mxu2 %v586_v30  ;;  %952 = vmatpush.msra.mxu3 %v714_v31  ;;  %v597_v30 = vld [vmem:[%s14116_s3 + $0x338] sm:$0xff] }
  0xb1   : > { %972 = vmatpush.msrb.mxu0 %v587_v32  ;;  %992 = vmatpush.msrb.mxu1 %v715_v33  ;;  %v725_v31 = vld [vmem:[%s14116_s3 + $0x738] sm:$0xff]  ;;  %v588_v32 = vld [vmem:[%s14116_s3 + $0x2f0] sm:$0xff] }
  0xb2   : > { %933 = vmatpush.msra.mxu2 %v578_v34  ;;  %953 = vmatpush.msra.mxu3 %v706_v35  ;;  %v716_v33 = vld [vmem:[%s14116_s3 + $0x6f0] sm:$0xff]  ;;  %v589_v34 = vld [vmem:[%s14116_s3 + $0x2f8] sm:$0xff] }
  0xb3   : > { %973 = vmatpush.msrb.mxu0 %v579_v36  ;;  %993 = vmatpush.msrb.mxu1 %v707_v37  ;;  %v717_v35 = vld [vmem:[%s14116_s3 + $0x6f8] sm:$0xff]  ;;  %v580_v36 = vld [vmem:[%s14116_s3 + $0x2b0] sm:$0xff] }
  0xb4   : > { %934 = vmatpush.msra.mxu2 %v570_v38  ;;  %954 = vmatpush.msra.mxu3 %v698_v39  ;;  %v708_v37 = vld [vmem:[%s14116_s3 + $0x6b0] sm:$0xff]  ;;  %v581_v38 = vld [vmem:[%s14116_s3 + $0x2b8] sm:$0xff] }
  0xb5   : > { %974 = vmatpush.msrb.mxu0 %v571_v40  ;;  %994 = vmatpush.msrb.mxu1 %v699_v41  ;;  %v709_v39 = vld [vmem:[%s14116_s3 + $0x6b8] sm:$0xff]  ;;  %v572_v40 = vld [vmem:[%s14116_s3 + $0x270] sm:$0xff] }
  0xb6   : > { %935 = vmatpush.msra.mxu2 %v562_v42  ;;  %955 = vmatpush.msra.mxu3 %v690_v43  ;;  %v700_v41 = vld [vmem:[%s14116_s3 + $0x670] sm:$0xff]  ;;  %v573_v42 = vld [vmem:[%s14116_s3 + $0x278] sm:$0xff] }
  0xb7   : > { %975 = vmatpush.msrb.mxu0 %v563_v44  ;;  %995 = vmatpush.msrb.mxu1 %v691_v45  ;;  %v701_v43 = vld [vmem:[%s14116_s3 + $0x678] sm:$0xff]  ;;  %v564_v44 = vld [vmem:[%s14116_s3 + $0x230] sm:$0xff] }
  0xb8   : > { %936 = vmatpush.msra.mxu2 %v554_v46  ;;  %956 = vmatpush.msra.mxu3 %v682_v47  ;;  %v692_v45 = vld [vmem:[%s14116_s3 + $0x630] sm:$0xff]  ;;  %v565_v46 = vld [vmem:[%s14116_s3 + $0x238] sm:$0xff] }
  0xb9   : > { %976 = vmatpush.msrb.mxu0 %v555_v48  ;;  %996 = vmatpush.msrb.mxu1 %v683_v49  ;;  %v693_v47 = vld [vmem:[%s14116_s3 + $0x638] sm:$0xff]  ;;  %v556_v48 = vld [vmem:[%s14116_s3 + $0x1f0] sm:$0xff] }
  0xba   : > { %937 = vmatpush.msra.mxu2 %v546_v50  ;;  %957 = vmatpush.msra.mxu3 %v674_v51  ;;  %v684_v49 = vld [vmem:[%s14116_s3 + $0x5f0] sm:$0xff]  ;;  %v557_v50 = vld [vmem:[%s14116_s3 + $0x1f8] sm:$0xff] }
  0xbb   : > { %977 = vmatpush.msrb.mxu0 %v547_v52  ;;  %997 = vmatpush.msrb.mxu1 %v675_v53  ;;  %v685_v51 = vld [vmem:[%s14116_s3 + $0x5f8] sm:$0xff]  ;;  %v548_v52 = vld [vmem:[%s14116_s3 + $0x1b0] sm:$0xff] }
  0xbc   : > { %938 = vmatpush.msra.mxu2 %v538_v54  ;;  %958 = vmatpush.msra.mxu3 %v666_v55  ;;  %v676_v53 = vld [vmem:[%s14116_s3 + $0x5b0] sm:$0xff]  ;;  %v549_v54 = vld [vmem:[%s14116_s3 + $0x1b8] sm:$0xff] }
  0xbd   : > { %978 = vmatpush.msrb.mxu0 %v539_v56  ;;  %998 = vmatpush.msrb.mxu1 %v667_v57  ;;  %v677_v55 = vld [vmem:[%s14116_s3 + $0x5b8] sm:$0xff]  ;;  %v540_v56 = vld [vmem:[%s14116_s3 + $0x170] sm:$0xff] }
  0xbe   : > { %939 = vmatpush.msra.mxu2 %v530_v58  ;;  %959 = vmatpush.msra.mxu3 %v658_v59  ;;  %v668_v57 = vld [vmem:[%s14116_s3 + $0x570] sm:$0xff]  ;;  %v541_v58 = vld [vmem:[%s14116_s3 + $0x178] sm:$0xff] }
  0xbf   : > { %979 = vmatpush.msrb.mxu0 %v531_v60  ;;  %999 = vmatpush.msrb.mxu1 %v659_v61  ;;  %v669_v59 = vld [vmem:[%s14116_s3 + $0x578] sm:$0xff]  ;;  %v532_v60 = vld [vmem:[%s14116_s3 + $0x130] sm:$0xff] }
  0xc0   : > { %940 = vmatpush.msra.mxu2 %v522_v62  ;;  %960 = vmatpush.msra.mxu3 %v650_v63  ;;  %v660_v61 = vld [vmem:[%s14116_s3 + $0x530] sm:$0xff]  ;;  %v533_v62 = vld [vmem:[%s14116_s3 + $0x138] sm:$0xff] }
  0xc1   : > { %980 = vmatpush.msrb.mxu0 %v523_v0  ;;  %1000 = vmatpush.msrb.mxu1 %v651_v1  ;;  %v661_v63 = vld [vmem:[%s14116_s3 + $0x538] sm:$0xff]  ;;  %v524_v0 = vld [vmem:[%s14116_s3 + $0xf0] sm:$0xff] }
  0xc2   : > { %941 = vmatpush.msra.mxu2 %v514_v2  ;;  %961 = vmatpush.msra.mxu3 %v642_v3  ;;  %v652_v1 = vld [vmem:[%s14116_s3 + $0x4f0] sm:$0xff]  ;;  %v525_v2 = vld [vmem:[%s14116_s3 + $0xf8] sm:$0xff] }
  0xc3   : > { %981 = vmatpush.msrb.mxu0 %v515_v4  ;;  %1001 = vmatpush.msrb.mxu1 %v643_v5  ;;  %v653_v3 = vld [vmem:[%s14116_s3 + $0x4f8] sm:$0xff]  ;;  %v516_v4 = vld [vmem:[%s14116_s3 + $0xb0] sm:$0xff] }
  0xc4   : > { %942 = vmatpush.msra.mxu2 %v506_v6  ;;  %962 = vmatpush.msra.mxu3 %v634_v7  ;;  %v644_v5 = vld [vmem:[%s14116_s3 + $0x4b0] sm:$0xff]  ;;  %v517_v6 = vld [vmem:[%s14116_s3 + $0xb8] sm:$0xff] }
  0xc5   : > { %982 = vmatpush.msrb.mxu0 %v507_v8  ;;  %1002 = vmatpush.msrb.mxu1 %v635_v9  ;;  %v645_v7 = vld [vmem:[%s14116_s3 + $0x4b8] sm:$0xff]  ;;  %v508_v8 = vld [vmem:[%s14116_s3 + $0x70] sm:$0xff] }
  0xc6   : > { %943 = vmatpush.msra.mxu2 %v498_v10  ;;  %963 = vmatpush.msra.mxu3 %v626_v11  ;;  %v636_v9 = vld [vmem:[%s14116_s3 + $0x470] sm:$0xff]  ;;  %v509_v10 = vld [vmem:[%s14116_s3 + $0x78] sm:$0xff] }
  0xc7   : > { %983 = vmatpush.msrb.mxu0 %v499_v14  ;;  %1003 = vmatpush.msrb.mxu1 %v627_v15  ;;  %v637_v11 = vld [vmem:[%s14116_s3 + $0x478] sm:$0xff]  ;;  %v500_v14 = vld [vmem:[%s14116_s3 + $0x30] sm:$0xff] }
  0xc8   : > { %944 = vmatmul.f32.vlgmr.msra.gmra.mxu2 %v9573_v12  ;;  %964 = vmatmul.f32.vlgmr.msra.gmra.mxu3 %v9575_v13  ;;  %v628_v15 = vld [vmem:[%s14116_s3 + $0x430] sm:$0xff] }
  0xc9   : > { %984 = vmatmul.f32.vlgmr.msrb.gmra.mxu0 %v9573_v12  ;;  %1004 = vmatmul.f32.vlgmr.msrb.gmra.mxu1 %v9575_v13 }
  0xca   : > { %1008 = vmatpush.msrb.mxu2 %v620_v16  ;;  %1028 = vmatpush.msrb.mxu3 %v748_v17  ;;  %v501_v16 = vld [vmem:[%s14116_s3 + $0x38] sm:$0xff] }
  0xcb   : > { %1048 = vmatpush.msra.mxu0 %v621_v18  ;;  %1068 = vmatpush.msra.mxu1 %v749_v19  ;;  %v629_v17 = vld [vmem:[%s14116_s3 + $0x438] sm:$0xff] }
  0xcc   : > { %1009 = vmatpush.msrb.mxu2 %v612_v20  ;;  %1029 = vmatpush.msrb.mxu3 %v740_v21  ;;  %v1127_v18 = vld [vmem:[%s14118_s5 + $0xf8] sm:$0xff] }
  0xcd   : > { %1049 = vmatpush.msra.mxu0 %v613_v22  ;;  %1069 = vmatpush.msra.mxu1 %v741_v23  ;;  %v1111_v19 = vld [vmem:[%s14118_s5 + $0x78] sm:$0xff]  ;;  %v1126_v22 = vld [vmem:[%s14118_s5 + $0xf0] sm:$0xff] }
  0xce   : > { %1010 = vmatpush.msrb.mxu2 %v604_v24  ;;  %1030 = vmatpush.msrb.mxu3 %v732_v25  ;;  %v1159_v20 = vld [vmem:[%s14118_s5 + $0x1f8] sm:$0xff]  ;;  %v1110_v23 = vld [vmem:[%s14118_s5 + $0x70] sm:$0xff]  ;;  %v1109_v25 = vld [vmem:[%s14118_s5 + $0x68] sm:$0xff] }
  0xcf   : > { %1050 = vmatpush.msra.mxu0 %v605_v26  ;;  %1070 = vmatpush.msra.mxu1 %v733_v27  ;;  %v1143_v21 = vld [vmem:[%s14118_s5 + $0x178] sm:$0xff]  ;;  %v1158_v24 = vld [vmem:[%s14118_s5 + $0x1f0] sm:$0xff]  ;;  %v1157_v26 = vld [vmem:[%s14118_s5 + $0x1e8] sm:$0xff] }
  0xd0   : > { %1011 = vmatpush.msrb.mxu2 %v596_v28  ;;  %1031 = vmatpush.msrb.mxu3 %v724_v29  ;;  %v1141_v27 = vld [vmem:[%s14118_s5 + $0x168] sm:$0xff]  ;;  %v1124_v28 = vld [vmem:[%s14118_s5 + $0xe0] sm:$0xff] }
  0xd1   : > { %1051 = vmatpush.msra.mxu0 %v597_v30  ;;  %1071 = vmatpush.msra.mxu1 %v725_v31  ;;  %v1108_v29 = vld [vmem:[%s14118_s5 + $0x60] sm:$0xff] }
  0xd2   : > { %1012 = vmatpush.msrb.mxu2 %v588_v32  ;;  %1032 = vmatpush.msrb.mxu3 %v716_v33  ;;  %v1156_v30 = vld [vmem:[%s14118_s5 + $0x1e0] sm:$0xff]  ;;  %v1123_v32 = vld [vmem:[%s14118_s5 + $0xd8] sm:$0xff] }
  0xd3   : > { %1052 = vmatpush.msra.mxu0 %v589_v34  ;;  %1072 = vmatpush.msra.mxu1 %v717_v35  ;;  %v1140_v31 = vld [vmem:[%s14118_s5 + $0x160] sm:$0xff]  ;;  %v1107_v33 = vld [vmem:[%s14118_s5 + $0x58] sm:$0xff] }
  0xd4   : > { %1013 = vmatpush.msrb.mxu2 %v580_v36  ;;  %1033 = vmatpush.msrb.mxu3 %v708_v37  ;;  %v1155_v34 = vld [vmem:[%s14118_s5 + $0x1d8] sm:$0xff]  ;;  %v1122_v36 = vld [vmem:[%s14118_s5 + $0xd0] sm:$0xff] }
  0xd5   : > { %1053 = vmatpush.msra.mxu0 %v581_v38  ;;  %1073 = vmatpush.msra.mxu1 %v709_v39  ;;  %v1139_v35 = vld [vmem:[%s14118_s5 + $0x158] sm:$0xff]  ;;  %v1106_v37 = vld [vmem:[%s14118_s5 + $0x50] sm:$0xff]  ;;  %v1121_v39 = vld [vmem:[%s14118_s5 + $0xc8] sm:$0xff] }
  0xd6   : > { %1014 = vmatpush.msrb.mxu2 %v572_v40  ;;  %1034 = vmatpush.msrb.mxu3 %v700_v41  ;;  %v1154_v38 = vld [vmem:[%s14118_s5 + $0x1d0] sm:$0xff]  ;;  %v1105_v40 = vld [vmem:[%s14118_s5 + $0x48] sm:$0xff] }
  0xd7   : > { %1054 = vmatpush.msra.mxu0 %v573_v42  ;;  %1074 = vmatpush.msra.mxu1 %v701_v43  ;;  %v1153_v41 = vld [vmem:[%s14118_s5 + $0x1c8] sm:$0xff]  ;;  %v1120_v42 = vld [vmem:[%s14118_s5 + $0xc0] sm:$0xff] }
  0xd8   : > { %1015 = vmatpush.msrb.mxu2 %v564_v44  ;;  %1035 = vmatpush.msrb.mxu3 %v692_v45  ;;  %v1104_v43 = vld [vmem:[%s14118_s5 + $0x40] sm:$0xff]  ;;  %v1119_v45 = vld [vmem:[%s14118_s5 + $0xb8] sm:$0xff] }
  0xd9   : > { %1055 = vmatpush.msra.mxu0 %v565_v46  ;;  %1075 = vmatpush.msra.mxu1 %v693_v47  ;;  %v1152_v44 = vld [vmem:[%s14118_s5 + $0x1c0] sm:$0xff]  ;;  %v1103_v46 = vld [vmem:[%s14118_s5 + $0x38] sm:$0xff]  ;;  %v1118_v47 = vld [vmem:[%s14118_s5 + $0xb0] sm:$0xff] }
  0xda   : > { %1016 = vmatpush.msrb.mxu2 %v556_v48  ;;  %1036 = vmatpush.msrb.mxu3 %v684_v49  ;;  %v1117_v48 = vld [vmem:[%s14118_s5 + $0xa8] sm:$0xff]  ;;  %v1116_v49 = vld [vmem:[%s14118_s5 + $0xa0] sm:$0xff] }
  0xdb   : > { %1056 = vmatpush.msra.mxu0 %v557_v50  ;;  %1076 = vmatpush.msra.mxu1 %v685_v51  ;;  %v1102_v50 = vld [vmem:[%s14118_s5 + $0x30] sm:$0xff]  ;;  %v1115_v51 = vld [vmem:[%s14118_s5 + $0x98] sm:$0xff] }
  0xdc   : > { %1017 = vmatpush.msrb.mxu2 %v548_v52  ;;  %1037 = vmatpush.msrb.mxu3 %v676_v53  ;;  %v1138_v52 = vld [vmem:[%s14118_s5 + $0x150] sm:$0xff]  ;;  %v1151_v53 = vld [vmem:[%s14118_s5 + $0x1b8] sm:$0xff] }
  0xdd   : > { %1057 = vmatpush.msra.mxu0 %v549_v54  ;;  %1077 = vmatpush.msra.mxu1 %v677_v55  ;;  %v1101_v54 = vld [vmem:[%s14118_s5 + $0x28] sm:$0xff]  ;;  %v1114_v55 = vld [vmem:[%s14118_s5 + $0x90] sm:$0xff] }
  0xde   : > { %1018 = vmatpush.msrb.mxu2 %v540_v56  ;;  %1038 = vmatpush.msrb.mxu3 %v668_v57  ;;  %v1137_v56 = vld [vmem:[%s14118_s5 + $0x148] sm:$0xff]  ;;  %v1150_v57 = vld [vmem:[%s14118_s5 + $0x1b0] sm:$0xff] }
  0xdf   : > { %1058 = vmatpush.msra.mxu0 %v541_v58  ;;  %1078 = vmatpush.msra.mxu1 %v669_v59  ;;  %v1100_v58 = vld [vmem:[%s14118_s5 + $0x20] sm:$0xff]  ;;  %v1113_v59 = vld [vmem:[%s14118_s5 + $0x88] sm:$0xff] }
  0xe0   : > { %1019 = vmatpush.msrb.mxu2 %v532_v60  ;;  %1039 = vmatpush.msrb.mxu3 %v660_v61  ;;  %v1136_v60 = vld [vmem:[%s14118_s5 + $0x140] sm:$0xff]  ;;  %v1149_v61 = vld [vmem:[%s14118_s5 + $0x1a8] sm:$0xff] }
  0xe1   : > { %1059 = vmatpush.msra.mxu0 %v533_v62  ;;  %1079 = vmatpush.msra.mxu1 %v661_v63  ;;  %v1099_v62 = vld [vmem:[%s14118_s5 + $0x18] sm:$0xff]  ;;  %v1112_v63 = vld [vmem:[%s14118_s5 + $0x80] sm:$0xff] }
  0xe2   : > { %1020 = vmatpush.msrb.mxu2 %v524_v0  ;;  %1040 = vmatpush.msrb.mxu3 %v652_v1  ;;  %v1135_v0 = vld [vmem:[%s14118_s5 + $0x138] sm:$0xff]  ;;  %v1148_v1 = vld [vmem:[%s14118_s5 + $0x1a0] sm:$0xff] }
  0xe3   : > { %1060 = vmatpush.msra.mxu0 %v525_v2  ;;  %1080 = vmatpush.msra.mxu1 %v653_v3  ;;  %v1191_v2 = vld [vmem:[%s14118_s5 + $0x2f8] sm:$0xff]  ;;  %v1098_v3 = vld [vmem:[%s14118_s5 + $0x10] sm:$0xff] }
  0xe4   : > { %1021 = vmatpush.msrb.mxu2 %v516_v4  ;;  %1041 = vmatpush.msrb.mxu3 %v644_v5  ;;  %v1134_v4 = vld [vmem:[%s14118_s5 + $0x130] sm:$0xff]  ;;  %v1147_v5 = vld [vmem:[%s14118_s5 + $0x198] sm:$0xff] }
  0xe5   : > { %1061 = vmatpush.msra.mxu0 %v517_v6  ;;  %1081 = vmatpush.msra.mxu1 %v645_v7  ;;  %v1190_v6 = vld [vmem:[%s14118_s5 + $0x2f0] sm:$0xff]  ;;  %v1097_v7 = vld [vmem:[%s14118_s5 + $0x8] sm:$0xff] }
  0xe6   : > { %1022 = vmatpush.msrb.mxu2 %v508_v8  ;;  %1042 = vmatpush.msrb.mxu3 %v636_v9  ;;  %v1133_v8 = vld [vmem:[%s14118_s5 + $0x128] sm:$0xff]  ;;  %v1146_v9 = vld [vmem:[%s14118_s5 + $0x190] sm:$0xff] }
  0xe7   : > { %1062 = vmatpush.msra.mxu0 %v509_v10  ;;  %1082 = vmatpush.msra.mxu1 %v637_v11  ;;  %v1189_v10 = vld [vmem:[%s14118_s5 + $0x2e8] sm:$0xff]  ;;  %v1096_v11 = vld [vmem:[%s14118_s5] sm:$0xff] }
  0xe8   : > { %1023 = vmatpush.msrb.mxu2 %v500_v14  ;;  %1043 = vmatpush.msrb.mxu3 %v628_v15  ;;  %v1132_v14 = vld [vmem:[%s14118_s5 + $0x120] sm:$0xff]  ;;  %v1145_v15 = vld [vmem:[%s14118_s5 + $0x188] sm:$0xff] }
  0xe9   : > { %1063 = vmatpush.msra.mxu0 %v501_v16  ;;  %1083 = vmatpush.msra.mxu1 %v629_v17  ;;  %v1175_v16 = vld [vmem:[%s14118_s5 + $0x278] sm:$0xff]  ;;  %v1188_v17 = vld [vmem:[%s14118_s5 + $0x2e0] sm:$0xff] }
  0xea   : > { %1024 = vmatmul.f32.vlgmr.msrb.gmra.mxu2 %v9573_v12  ;;  %1044 = vmatmul.f32.vlgmr.msrb.gmra.mxu3 %v9575_v13 }
  0xeb   : > { %1064 = vmatmul.f32.vlgmr.msra.gmra.mxu0 %v9573_v12  ;;  %1084 = vmatmul.f32.vlgmr.msra.gmra.mxu1 %v9575_v13  ;;  %v1142_v12 = vld [vmem:[%s14118_s5 + $0x170] sm:$0xff]  ;;  %v1125_v13 = vld [vmem:[%s14118_s5 + $0xe8] sm:$0xff] }
  0xec   : > { %1245 = vmatpush.msra.mxu3 %v1127_v18  ;;  %1225 = vmatpush.msra.mxu2 %v1111_v19  ;;  %v1131_v18 = vld [vmem:[%s14118_s5 + $0x118] sm:$0xff]  ;;  %v1144_v19 = vld [vmem:[%s14118_s5 + $0x180] sm:$0xff] }
  0xed   : > { %1285 = vmatpush.msrb.mxu1 %v1159_v20  ;;  %1265 = vmatpush.msrb.mxu0 %v1143_v21  ;;  %v1174_v20 = vld [vmem:[%s14118_s5 + $0x270] sm:$0xff]  ;;  %v1187_v21 = vld [vmem:[%s14118_s5 + $0x2d8] sm:$0xff] }
  0xee   : > { %1246 = vmatpush.msra.mxu3 %v1126_v22  ;;  %1226 = vmatpush.msra.mxu2 %v1110_v23  ;;  %v1130_v22 = vld [vmem:[%s14118_s5 + $0x110] sm:$0xff]  ;;  %v1173_v23 = vld [vmem:[%s14118_s5 + $0x268] sm:$0xff] }
  0xef   : > { %1286 = vmatpush.msrb.mxu1 %v1158_v24  ;;  %1266 = vmatpush.msrb.mxu0 %v1142_v12  ;;  %v1186_v24 = vld [vmem:[%s14118_s5 + $0x2d0] sm:$0xff]  ;;  %v1129_v12 = vld [vmem:[%s14118_s5 + $0x108] sm:$0xff] }
  0xf0   : > { %1247 = vmatpush.msra.mxu3 %v1125_v13  ;;  %1227 = vmatpush.msra.mxu2 %v1109_v25  ;;  %v1172_v13 = vld [vmem:[%s14118_s5 + $0x260] sm:$0xff]  ;;  %v1185_v25 = vld [vmem:[%s14118_s5 + $0x2c8] sm:$0xff] }
  0xf1   : > { %1287 = vmatpush.msrb.mxu1 %v1157_v26  ;;  %1267 = vmatpush.msrb.mxu0 %v1141_v27  ;;  %v1128_v26 = vld [vmem:[%s14118_s5 + $0x100] sm:$0xff] }
  0xf2   : > { %1248 = vmatpush.msra.mxu3 %v1124_v28  ;;  %1228 = vmatpush.msra.mxu2 %v1108_v29  ;;  %v10205_v27 = vld [vmem:[%s14117_s4] sm:$0xff]  ;;  %v1171_v28 = vld [vmem:[%s14118_s5 + $0x258] sm:$0xff] }
  0xf3   : > { %1288 = vmatpush.msrb.mxu1 %v1156_v30  ;;  %1268 = vmatpush.msrb.mxu0 %v1140_v31  ;;  %v1184_v29 = vld [vmem:[%s14118_s5 + $0x2c0] sm:$0xff]  ;;  %v1170_v30 = vld [vmem:[%s14118_s5 + $0x250] sm:$0xff]  ;;  %v753_v31 = vperm.slane %v10205_v27, 1 }
  0xf4   : > { %1249 = vmatpush.msra.mxu3 %v1123_v32  ;;  %1229 = vmatpush.msra.mxu2 %v1107_v33  ;;  %v1183_v32 = vld [vmem:[%s14118_s5 + $0x2b8] sm:$0xff]  ;;  %v1169_v33 = vld [vmem:[%s14118_s5 + $0x248] sm:$0xff] }
  0xf5   : > { %1289 = vmatpush.msrb.mxu1 %v1155_v34  ;;  %1269 = vmatpush.msrb.mxu0 %v1139_v35  ;;  %v1182_v34 = vld [vmem:[%s14118_s5 + $0x2b0] sm:$0xff] }
  0xf6   : > { %1250 = vmatpush.msra.mxu3 %v1122_v36  ;;  %1230 = vmatpush.msra.mxu2 %v1106_v37  ;;  %v1168_v36 = vld [vmem:[%s14118_s5 + $0x240] sm:$0xff] }
  0xf7   : > { %1290 = vmatpush.msrb.mxu1 %v1154_v38  ;;  %1270 = vmatpush.msrb.mxu0 %v1138_v52  ;;  %v1181_v38 = vld [vmem:[%s14118_s5 + $0x2a8] sm:$0xff] }
  0xf8   : > { %1251 = vmatpush.msra.mxu3 %v1121_v39  ;;  %1231 = vmatpush.msra.mxu2 %v1105_v40  ;;  %v752_v40 = vperm.slane %v10205_v27, 0  ;;  %v1165_v52 = vld [vmem:[%s14118_s5 + $0x228] sm:$0xff] }
  0xf9   : > { %1291 = vmatpush.msrb.mxu1 %v1153_v41  ;;  %1271 = vmatpush.msrb.mxu0 %v1137_v56  ;;  %v1167_v41 = vld [vmem:[%s14118_s5 + $0x238] sm:$0xff] }
  0xfa   : > { %1252 = vmatpush.msra.mxu3 %v1120_v42  ;;  %1232 = vmatpush.msra.mxu2 %v1104_v43  ;;  %v1180_v43 = vld [vmem:[%s14118_s5 + $0x2a0] sm:$0xff] }
  0xfb   : > { %1292 = vmatpush.msrb.mxu1 %v1152_v44  ;;  %1272 = vmatpush.msrb.mxu0 %v1136_v60  ;;  %v754_v60 = vperm.slane %v10205_v27, 2 }
  0xfc   : > { %1253 = vmatpush.msra.mxu3 %v1119_v45  ;;  %1233 = vmatpush.msra.mxu2 %v1103_v46 }
  0xfd   : > { %1293 = vmatpush.msrb.mxu1 %v1151_v53  ;;  %1273 = vmatpush.msrb.mxu0 %v1135_v0  ;;  %v1178_v53 = vld [vmem:[%s14118_s5 + $0x290] sm:$0xff]  ;;  %v1223_v0 = vld [vmem:[%s14118_s5 + $0x3f8] sm:$0xff] }
  0xfe   : > { %1254 = vmatpush.msra.mxu3 %v1118_v47  ;;  %1234 = vmatpush.msra.mxu2 %v1102_v50  ;;  %v1166_v47 = vld [vmem:[%s14118_s5 + $0x230] sm:$0xff]  ;;  %v755_v50 = vperm.slane %v10205_v27, 3 }
  0xff   : > { %1294 = vmatpush.msrb.mxu1 %v1150_v57  ;;  %1274 = vmatpush.msrb.mxu0 %v1134_v4 }
 0x100   : > { %1255 = vmatpush.msra.mxu3 %v1117_v48  ;;  %1235 = vmatpush.msra.mxu2 %v1101_v54  ;;  %v1179_v48 = vld [vmem:[%s14118_s5 + $0x298] sm:$0xff]  ;;  %v1164_v54 = vld [vmem:[%s14118_s5 + $0x220] sm:$0xff] }
 0x101   : > { %1295 = vmatpush.msrb.mxu1 %v1149_v61  ;;  %1275 = vmatpush.msrb.mxu0 %v1133_v8  ;;  %v1163_v61 = vld [vmem:[%s14118_s5 + $0x218] sm:$0xff]  ;;  %v1160_v8 = vld [vmem:[%s14118_s5 + $0x200] sm:$0xff] }
 0x102   : > { %1256 = vmatpush.msra.mxu3 %v1116_v49  ;;  %1236 = vmatpush.msra.mxu2 %v1100_v58 }
 0x103   : > { %1296 = vmatpush.msrb.mxu1 %v1148_v1  ;;  %1276 = vmatpush.msrb.mxu0 %v1132_v14  ;;  %v1162_v1 = vld [vmem:[%s14118_s5 + $0x210] sm:$0xff] }
 0x104   : > { %1257 = vmatpush.msra.mxu3 %v1115_v51  ;;  %1237 = vmatpush.msra.mxu2 %v1099_v62  ;;  %v1176_v62 = vld [vmem:[%s14118_s5 + $0x280] sm:$0xff]  ;;  %v1206_v14 = vld [vmem:[%s14118_s5 + $0x370] sm:$0xff] }
 0x105   : > { %1297 = vmatpush.msrb.mxu1 %v1147_v5  ;;  %1277 = vmatpush.msrb.mxu0 %v1131_v18  ;;  %v1205_v18 = vld [vmem:[%s14118_s5 + $0x368] sm:$0xff] }
 0x106   : > { %1258 = vmatpush.msra.mxu3 %v1114_v55  ;;  %1238 = vmatpush.msra.mxu2 %v1098_v3  ;;  %v1177_v55 = vld [vmem:[%s14118_s5 + $0x288] sm:$0xff] }
 0x107   : > { %1298 = vmatpush.msrb.mxu1 %v1146_v9  ;;  %1278 = vmatpush.msrb.mxu0 %v1130_v22  ;;  %v1161_v3 = vld [vmem:[%s14118_s5 + $0x208] sm:$0xff]  ;;  %v1207_v9 = vld [vmem:[%s14118_s5 + $0x378] sm:$0xff] }
 0x108   : > { %1259 = vmatpush.msra.mxu3 %v1113_v59  ;;  %1239 = vmatpush.msra.mxu2 %v1097_v7  ;;  %v1203_v22 = vld [vmem:[%s14118_s5 + $0x358] sm:$0xff] }
 0x109   : > { %1299 = vmatpush.msrb.mxu1 %v1145_v15  ;;  %1279 = vmatpush.msrb.mxu0 %v1129_v12  ;;  %v1215_v12 = vld [vmem:[%s14118_s5 + $0x3b8] sm:$0xff] }
 0x10a   : > { %1260 = vmatpush.msra.mxu3 %v1112_v63  ;;  %1240 = vmatpush.msra.mxu2 %v1096_v11  ;;  %v1220_v11 = vld [vmem:[%s14118_s5 + $0x3e0] sm:$0xff] }
 0x10b   : > { %1300 = vmatpush.msrb.mxu1 %v1144_v19  ;;  %1280 = vmatpush.msrb.mxu0 %v1128_v26  ;;  %v1218_v19 = vld [vmem:[%s14118_s5 + $0x3d0] sm:$0xff]  ;;  %v1200_v26 = vld [vmem:[%s14118_s5 + $0x340] sm:$0xff] }
 0x10c   : > { %1325 = vmatpush.msrb.mxu3 %v1191_v2  ;;  %1305 = vmatpush.msrb.mxu2 %v1175_v16  ;;  %v1222_v2 = vld [vmem:[%s14118_s5 + $0x3f0] sm:$0xff]  ;;  %v1219_v16 = vld [vmem:[%s14118_s5 + $0x3d8] sm:$0xff] }
 0x10d   : > { %1365 = vmatpush.msra.mxu1 %v1223_v0  ;;  %1345 = vmatpush.msra.mxu0 %v1207_v9 }
 0x10e   : > { %1326 = vmatpush.msrb.mxu3 %v1190_v6  ;;  %1306 = vmatpush.msrb.mxu2 %v1174_v20  ;;  %v1221_v6 = vld [vmem:[%s14118_s5 + $0x3e8] sm:$0xff]  ;;  %v1204_v20 = vld [vmem:[%s14118_s5 + $0x360] sm:$0xff] }
 0x10f   : > { %1366 = vmatpush.msra.mxu1 %v1222_v2  ;;  %1346 = vmatpush.msra.mxu0 %v1206_v14  ;;  %v1224_v2 = vld [vmem:[%s14119_s6] sm:$0x1] }
 0x110   : > { %1327 = vmatpush.msrb.mxu3 %v1189_v10  ;;  %1307 = vmatpush.msrb.mxu2 %v1173_v23  ;;  %v1216_v23 = vld [vmem:[%s14118_s5 + $0x3c0] sm:$0xff] }
 0x111   : > { %1367 = vmatpush.msra.mxu1 %v1221_v6  ;;  %1347 = vmatpush.msra.mxu0 %v1205_v18 }
 0x112   : > { %1328 = vmatpush.msrb.mxu3 %v1188_v17  ;;  %1308 = vmatpush.msrb.mxu2 %v1172_v13  ;;  %v1201_v13 = vld [vmem:[%s14118_s5 + $0x348] sm:$0xff] }
 0x113   : > { %1368 = vmatpush.msra.mxu1 %v1220_v11  ;;  %1348 = vmatpush.msra.mxu0 %v1204_v20  ;;  %v8246_v20 = vld [vmem:[%s14120_s7 + $0x18] sm:$0xff] }
 0x114   : > { %1329 = vmatpush.msrb.mxu3 %v1187_v21  ;;  %1309 = vmatpush.msrb.mxu2 %v1171_v28  ;;  %v1217_v21 = vld [vmem:[%s14118_s5 + $0x3c8] sm:$0xff] }
 0x115   : > { %1369 = vmatpush.msra.mxu1 %v1219_v16  ;;  %1349 = vmatpush.msra.mxu0 %v1203_v22  ;;  %v1213_v28 = vld [vmem:[%s14118_s5 + $0x3a8] sm:$0xff]  ;;  %v8247_v22 = vld [vmem:[%s14120_s7 + $0x20] sm:$0xff] }
 0x116   : > { %1330 = vmatpush.msrb.mxu3 %v1186_v24  ;;  %1310 = vmatpush.msrb.mxu2 %v1170_v30  ;;  %v1202_v24 = vld [vmem:[%s14118_s5 + $0x350] sm:$0xff]  ;;  %v757_v30 = vperm.slane %v10205_v27, 5 }
 0x117   : > { %1370 = vmatpush.msra.mxu1 %v1218_v19  ;;  %1350 = vmatpush.msra.mxu0 %v1202_v24  ;;  %v8248_v24 = vld [vmem:[%s14120_s7 + $0x28] sm:$0xff] }
 0x118   : > { %1331 = vmatpush.msrb.mxu3 %v1185_v25  ;;  %1311 = vmatpush.msrb.mxu2 %v1169_v33  ;;  %v1214_v25 = vld [vmem:[%s14118_s5 + $0x3b0] sm:$0xff] }
 0x119   : > { %1371 = vmatpush.msra.mxu1 %v1217_v21  ;;  %1351 = vmatpush.msra.mxu0 %v1201_v13  ;;  %v1427_v21 = vld [vmem:[%s14120_s7] sm:$0xff]  ;;  %v1429_v13 = vld [vmem:[%s14120_s7 + $0x10] sm:$0xff] }
 0x11a   : > { %1332 = vmatpush.msrb.mxu3 %v1184_v29  ;;  %1312 = vmatpush.msrb.mxu2 %v1168_v36  ;;  %v1199_v29 = vld [vmem:[%s14118_s5 + $0x338] sm:$0xff] }
 0x11b   : > { %1372 = vmatpush.msra.mxu1 %v1216_v23  ;;  %1352 = vmatpush.msra.mxu0 %v1200_v26  ;;  %v1428_v23 = vld [vmem:[%s14120_s7 + $0x8] sm:$0xff] }
 0x11c   : > { %1333 = vmatpush.msrb.mxu3 %v1183_v32  ;;  %1313 = vmatpush.msrb.mxu2 %v1167_v41 }
 0x11d   : > { %1373 = vmatpush.msra.mxu1 %v1215_v12  ;;  %1353 = vmatpush.msra.mxu0 %v1199_v29  ;;  %v8262_v12 = vld [vmem:[%s14120_s7 + $0x38] sm:$0xff] }
 0x11e   : > { %1334 = vmatpush.msrb.mxu3 %v1182_v34  ;;  %1314 = vmatpush.msrb.mxu2 %v1166_v47  ;;  %v1198_v34 = vld [vmem:[%s14118_s5 + $0x330] sm:$0xff]  ;;  %v1195_v47 = vld [vmem:[%s14118_s5 + $0x318] sm:$0xff] }
 0x11f   : > { %1374 = vmatpush.msra.mxu1 %v1214_v25  ;;  %1354 = vmatpush.msra.mxu0 %v1198_v34 }
 0x120   : > { %1335 = vmatpush.msrb.mxu3 %v1181_v38  ;;  %1315 = vmatpush.msrb.mxu2 %v1165_v52  ;;  %v1193_v52 = vld [vmem:[%s14118_s5 + $0x308] sm:$0xff] }
 0x121   : > { %1375 = vmatpush.msra.mxu1 %v1213_v28 }
 0x122   : > { %v825_v35 = vpop.f32.mrf.mxu0  ;;  %v845_v39 = vpop.f32.mrf.mxu1  ;;  %1336 = vmatpush.msrb.mxu3 %v1180_v43  ;;  %1316 = vmatpush.msrb.mxu2 %v1164_v54  ;;  %v1196_v43 = vld [vmem:[%s14118_s5 + $0x320] sm:$0xff]  ;;  %v759_v54 = vperm.slane %v10205_v27, 7 }
 0x123   : > { %v826_v37 = vadd.f32 %v825_v35, %v753_v31  ;;  %v1212_v31 = vld [vmem:[%s14118_s5 + $0x3a0] sm:$0xff]  ;;  %v1211_v35 = vld [vmem:[%s14118_s5 + $0x398] sm:$0xff] }
 0x124   : > { %1337 = vmatpush.msrb.mxu3 %v1179_v48  ;;  %1317 = vmatpush.msrb.mxu2 %v1163_v61  ;;  %v1208_v48 = vld [vmem:[%s14118_s5 + $0x380] sm:$0xff] }
 0x125   : > { %v846_v42 = vadd.f32 %v845_v39, %v826_v37  ;;  %1376 = vmatpush.msra.mxu1 %v1212_v31  ;;  %v756_v37 = vperm.slane %v10205_v27, 4  ;;  %v1197_v39 = vld [vmem:[%s14118_s5 + $0x328] sm:$0xff] }
 0x126   : > { %1338 = vmatpush.msrb.mxu3 %v1178_v53  ;;  %1318 = vmatpush.msrb.mxu2 %v1162_v1  ;;  %v1192_v53 = vld [vmem:[%s14118_s5 + $0x300] sm:$0xff] }
 0x127   : > { %v1089_v44 = vmax.f32 %v846_v42, 0.0  ;;  %v785_v45 = vpop.f32.mrf.mxu2  ;;  %v805_v49 = vpop.f32.mrf.mxu3  ;;  %1377 = vmatpush.msra.mxu1 %v1211_v35  ;;  %1355 = vmatpush.msra.mxu0 %v1197_v39 }
 0x128   : > { %v786_v46 = vadd.f32 %v785_v45, %v752_v40  ;;  %1339 = vmatpush.msrb.mxu3 %v1177_v55  ;;  %1319 = vmatpush.msrb.mxu2 %v1161_v3  ;;  %v1210_v40 = vld [vmem:[%s14118_s5 + $0x390] sm:$0xff] }
 0x129   : > { %1261 = vmatmul.f32.vlgmr.msra.gmra.mxu3 %v1089_v44  ;;  %1378 = vmatpush.msra.mxu1 %v1210_v40  ;;  %v1209_v44 = vld [vmem:[%s14118_s5 + $0x388] sm:$0xff] }
 0x12a   : > { %v806_v51 = vadd.f32 %v805_v49, %v786_v46  ;;  %1340 = vmatpush.msrb.mxu3 %v1176_v62  ;;  %1320 = vmatpush.msrb.mxu2 %v1160_v8 }
 0x12b   : > { %1356 = vmatpush.msra.mxu0 %v1196_v43  ;;  %1379 = vmatpush.msra.mxu1 %v1209_v44  ;;  %v8263_v43 = vld [vmem:[%s14120_s7 + $0x40] sm:$0xff] }
 0x12c   : > { %v1088_v56 = vmax.f32 %v806_v51, 0.0  ;;  %v905_v57 = vpop.f32.mrf.mxu0  ;;  %v925_v59 = vpop.f32.mrf.mxu1  ;;  %1482 = vmatpush.msra.mxu3 %v8247_v22 }
 0x12d   : > { %v906_v58 = vadd.f32 %v905_v57, %v755_v50  ;;  %1357 = vmatpush.msra.mxu0 %v1195_v47  ;;  %1380 = vmatpush.msra.mxu1 %v1208_v48  ;;  %v1194_v50 = vld [vmem:[%s14118_s5 + $0x310] sm:$0xff] }
 0x12e   : > { %1241 = vmatmul.f32.vlgmr.msra.gmra.mxu2 %v1088_v56  ;;  %v8261_v48 = vld [vmem:[%s14120_s7 + $0x30] sm:$0xff] }
 0x12f   : > { %v926_v63 = vadd.f32 %v925_v59, %v906_v58  ;;  %1358 = vmatpush.msra.mxu0 %v1194_v50  ;;  %v758_v58 = vperm.slane %v10205_v27, 6  ;;  %8845 = vmatpush.msra.mxu2 %v8246_v20 }
 0x131   : > { %v1091_v4 = vmax.f32 %v926_v63, 0.0  ;;  %v865_v5 = vpop.f32.mrf.mxu2  ;;  %v885_v10 = vpop.f32.mrf.mxu3  ;;  %1359 = vmatpush.msra.mxu0 %v1193_v52  ;;  %v8271_v52 = vld [vmem:[%s14120_s7 + $0x50] sm:$0xff] }
 0x132   : > { %v866_v7 = vadd.f32 %v865_v5, %v754_v60 }
 0x133   : > { %1301 = vmatmul.f32.vlgmr.msrb.gmra.mxu1 %v1091_v4  ;;  %1360 = vmatpush.msra.mxu0 %v1192_v53 }
 0x134   : > { %v886_v15 = vadd.f32 %v885_v10, %v866_v7  ;;  %1532 = vmatpush.msrb.mxu1 %v1427_v21 }
 0x136   : > { %v1090_v17 = vmax.f32 %v886_v15, 0.0 }
 0x138   : > { %1281 = vmatmul.f32.vlgmr.msrb.gmra.mxu0 %v1090_v17 }
 0x139   : > { %1459 = vmatpush.msrb.mxu0 %v8246_v20 }
 0x146   : > { %v985_v32 = vpop.f32.mrf.mxu0  ;;  %v1005_v36 = vpop.f32.mrf.mxu1 }
 0x147   : > { %v986_v33 = vadd.f32 %v985_v32, %v757_v30 }
 0x149   : > { %v1006_v38 = vadd.f32 %v1005_v36, %v986_v33 }
 0x14b   : > { %v1093_v41 = vmax.f32 %v1006_v38, 0.0  ;;  %v945_v42 = vpop.f32.mrf.mxu2  ;;  %v965_v46 = vpop.f32.mrf.mxu3 }
 0x14c   : > { %v946_v45 = vadd.f32 %v945_v42, %v756_v37 }
 0x14d   : > { %1341 = vmatmul.f32.vlgmr.msrb.gmra.mxu3 %v1093_v41 }
 0x14e   : > { %v966_v49 = vadd.f32 %v965_v46, %v946_v45  ;;  %1578 = vmatpush.msrb.mxu3 %v1429_v13  ;;  %v8272_v46 = vld [vmem:[%s14120_s7 + $0x58] sm:$0xff] }
 0x150   : > { %v1092_v51 = vmax.f32 %v966_v49, 0.0  ;;  %v8270_v49 = vld [vmem:[%s14120_s7 + $0x48] sm:$0xff] }
 0x152   : > { %1321 = vmatmul.f32.vlgmr.msrb.gmra.mxu2 %v1092_v51  ;;  %v8279_v51 = vld [vmem:[%s14120_s7 + $0x60] sm:$0xff] }
 0x153   : > { %1555 = vmatpush.msrb.mxu2 %v1428_v23 }
 0x168   : > { %v1065_v55 = vpop.f32.mrf.mxu0  ;;  %v1085_v57 = vpop.f32.mrf.mxu1 }
 0x169   : > { %v1066_v56 = vadd.f32 %v1065_v55, %v759_v54 }
 0x16b   : > { %v1086_v59 = vadd.f32 %v1085_v57, %v1066_v56  ;;  %v8280_v56 = vld [vmem:[%s14120_s7 + $0x68] sm:$0xff]  ;;  %v8281_v57 = vld [vmem:[%s14120_s7 + $0x70] sm:$0xff] }
 0x16d   : > { %v1095_v60 = vmax.f32 %v1086_v59, 0.0  ;;  %v1025_v61 = vpop.f32.mrf.mxu2  ;;  %v1045_v63 = vpop.f32.mrf.mxu3 }
 0x16e   : > { %v1026_v62 = vadd.f32 %v1025_v61, %v758_v58 }
 0x16f   : > { %1381 = vmatmul.f32.vlgmr.msra.gmra.mxu1 %v1095_v60 }
 0x170   : > { %v1046_v0 = vadd.f32 %v1045_v63, %v1026_v62  ;;  %1635 = vmatpush.msra.mxu1 %v8262_v12 }
 0x172   : > { %v1094_v1 = vmax.f32 %v1046_v0, 0.0 }
 0x174   : > { %1361 = vmatmul.f32.vlgmr.msra.gmra.mxu0 %v1094_v1 }
 0x175   : > { %1505 = vmatpush.msra.mxu0 %v8248_v24 }
 0x1ac   : > { %v1262_v5 = vpop.f32.mrf.mxu3 }
 0x1b0   : > { %v1302_v27 = vpop.f32.mrf.mxu1 }
 0x1b1   : > { %v1242_v3 = vpop.f32.mrf.mxu2 }
 0x1b2   : > { %v1243_v4 = vadd.f32 %v1242_v3, %v1224_v2 }
 0x1b4   : > { %v1263_v6 = vadd.f32 %v1262_v5, %v1243_v4 }
 0x1b5   : > { %v1282_v7 = vpop.f32.mrf.mxu0 }
 0x1b6   : > { %v1283_v8 = vadd.f32 %v1282_v7, %v1263_v6 }
 0x1b8   : > { %v1303_v10 = vadd.f32 %v1302_v27, %v1283_v8 }
 0x1d0   : > { %v1342_v14 = vpop.f32.mrf.mxu3 }
 0x1d5   : > { %v1322_v9 = vpop.f32.mrf.mxu2 }
 0x1d6   : > { %v1323_v11 = vadd.f32 %v1322_v9, %v1303_v10 }
 0x1d8   : > { %v1343_v15 = vadd.f32 %v1342_v14, %v1323_v11 }
 0x1ec   : > { %v1382_v18 = vpop.f32.mrf.mxu1 }
 0x1f1   : > { %v1362_v16 = vpop.f32.mrf.mxu0 }
 0x1f2   : > { %v1363_v17 = vadd.f32 %v1362_v16, %v1343_v15  ;;  %v1863_v16 = vlaneseq }
 0x1f4   : > { %v1383_v19 = vadd.f32 %v1382_v18, %v1363_v17 }
 0x1f6   : > { %1396 = vrot.lane.b32.xlu1 %v1383_v19, %s9034_s17  ;;  %1388 = vrot.lane.b32.xlu0 %v1383_v19, %s9035_s23  ;;  %v1386_v28 = vsel %vm1385_vm1, %v1383_v19, 0.0  ;;  %s8847_s17 = smul.u32 96, %s9133_s29 }
 0x1f7   : > { %v1405_v30 = vrot.slane %v1386_v28, 4  ;;  %v10471_v28 = vld [vmem:[%s14121_s8] sm:$0x7] }
 0x1f9   : > { %v1417_v35 = vsel %vm1416_vm2, 0.0, %v1405_v30 }
 0x1fe   : > { %1400 = vrot.lane.b32.xlu1 %v1383_v19, %s9036_s22  ;;  %1392 = vrot.lane.b32.xlu0 %v1383_v19, %s9037_s24  ;;  %v1869_v19 = vand.u32 127, %v1863_v16  ;;  %s8172_s24 = scalar_lea.hbm %s14126_s13, %s8847_s17  ;;  %s8983_s17 = scalar_lea.hbm %s14126_s13, 192 }
 0x1ff   : > { %s8175_s30 = sshll.u32 %s8172_s24, 4  ;;  %s8176_s30 = int_to_ptr.hbm [resolvable:$true] %s8175_s30 }
 0x200   : > { %v1870_v21 = vmul.u32 2, %v1869_v19  ;;  %v2298_v19 = vld [vmem:[#allocation2 + $0x930] sm:$0xff]  ;;  %s8977_s20 = sshra.s32 %s8176_s30, 4  ;;  %s8978_s20 = int_to_ptr.hbm [resolvable:$true] %s8977_s20 }
 0x201   : > { %p8984_p2 = scmp.lt.s32.totalorder %s8978_s20, %s14126_s13 }
 0x202   : > { %v10466_v13 = vadd.s32 4, %v1870_v21 }
 0x204   : > { %14194 = vst [vmem:[#allocation10_spill] sm:$0xff] %v10466_v13 }
 0x268   : > { %v1397_v25 = vpop.permute.xlu1 %1396  ;;  %v1389_v26 = vpop.permute.xlu0 %1388 }
 0x269   : > { %v1391_v29 = vsel %vm1385_vm1, %v1389_v26, 0.0  ;;  %v1399_v32 = vsel %vm1385_vm1, %v1397_v25, 0.0 }
 0x26a   : > { %v1408_v31 = vrot.slane %v1391_v29, 3  ;;  %v1414_v40 = vrot.slane %v1399_v32, 1  ;;  %v10473_v32 = vshrl.u32 %v1863_v16, 7 }
 0x26c   : > { %v1419_v41 = vsel %vm1418_vm4, %v1417_v35, %v1408_v31  ;;  %14195 = vst [vmem:[#allocation11_spill] sm:$0xff] %v10473_v32  ;;  %vm1872_vm8 = vcmp.eq.s32.totalorder %v10473_v32, %v10466_v13  ;;  %v1867_v21 = vadd.s32 24, %v10473_v32 }
 0x270   : > { %v1401_v33 = vpop.permute.xlu1 %1400  ;;  %v1393_v34 = vpop.permute.xlu0 %1392 }
 0x271   : > { %v1403_v36 = vsel %vm1385_vm1, %v1401_v33, 0.0  ;;  %v1395_v37 = vsel %vm1385_vm1, %v1393_v34, 0.0  ;;  %v10476_v33 = vadd.s32 1, %v10466_v13 }
 0x272   : > { %v1425_v38 = vsel %vm1424_vm3, %v1403_v36, 0.0  ;;  %v1411_v39 = vrot.slane %v1395_v37, 2  ;;  %v1845_v36 = vperm.slane %v10471_v28, 0 }
 0x273   : > { %v1437_v42 = vrot.slane %v1425_v38, 1  ;;  %v1591_v54 = vrot.slane %v1425_v38, 2  ;;  %v1677_v59 = vrot.slane %v1425_v38, 3  ;;  %v1763_v62 = vrot.slane %v1425_v38, 4  ;;  %14196 = vst [vmem:[#allocation12_spill] sm:$0xff] %v10476_v33 }
 0x274   : > { %v1421_v44 = vsel %vm1420_vm5, %v1419_v41, %v1411_v39  ;;  %vm1877_vm9 = vcmp.eq.s32.totalorder %v10473_v32, %v10476_v33 }
 0x275   : > { %v1423_v45 = vsel %vm1422_vm6, %v1421_v44, %v1414_v40  ;;  %8250 = vmatmul.msk.f32.vlgmr.msra.gmra.mxu2 %vm1439_vm7, %v1437_v42  ;;  %vm1881_vm10 = vmor %vm1872_vm8, %vm1877_vm9  ;;  %vm2466_vm9 = vcmask 261120  }
 0x276   : > { %8255 = vmatmul.msk.f32.vlgmr.msrb.gmra.mxu1 %vm1439_vm7, %v1423_v45  ;;  %v1436_v47 = vrot.slane %v1423_v45, 1  ;;  %1658 = vmatpush.msra.mxu2 %v8263_v43  ;;  %v1590_v53 = vrot.slane %v1423_v45, 2  ;;  %v1676_v58 = vrot.slane %v1423_v45, 3  ;;  %v1762_v61 = vrot.slane %v1423_v45, 4 }
 0x277   : > { %1744 = vmatpush.msrb.mxu1 %v8272_v46 }
 0x278   : > { %v1438_v50 = vsel %vm1422_vm6, %v1436_v47, %v1437_v42  ;;  %v1592_v55 = vsel %vm1420_vm5, %v1590_v53, %v1591_v54  ;;  %v1678_v60 = vsel %vm1418_vm4, %v1676_v58, %v1677_v59  ;;  %v1764_v63 = vsel %vm1416_vm2, %v1762_v61, %v1763_v62 }
 0x279   : > { %8249 = vmatmul.msk.f32.vlgmr.msrb.gmra.mxu0 %vm1439_vm7, %v1438_v50  ;;  %8251 = vmatmul.msk.f32.vlgmr.msra.gmra.mxu3 %vm1439_vm7, %v1438_v50 }
 0x27a   : > { %1612 = vmatpush.msrb.mxu0 %v8261_v48  ;;  %1698 = vmatpush.msra.mxu3 %v8270_v49  ;;  %v1865_v48 = vadd.s32 8, %v10473_v32 }
 0x27c   : > { %vm1873_vm12 = vcmp.eq.s32.totalorder %v1865_v48, %v10466_v13  ;;  %vm1878_vm13 = vcmp.eq.s32.totalorder %v1865_v48, %v10476_v33  ;;  %v2238_v48 = vld [vmem:[#allocation2 + $0x750] sm:$0xff] }
 0x27d   : > { %8257 = vmatmul.msk.f32.vlgmr.msrb.gmra.mxu2 %vm1439_vm7, %v1423_v45  ;;  %vm1882_vm14 = vmor %vm1873_vm12, %vm1878_vm13 }
 0x27e   : > { %8256 = vmatmul.msk.f32.gmra.mxu1 %vm1439_vm7, %v1425_v38  ;;  %1784 = vmatpush.msrb.mxu2 %v8279_v51 }
 0x281   : > { %8252 = vmatmul.msk.f32.gmra.mxu3 %vm1439_vm7, %v1437_v42  ;;  %8253 = vmatmul.msk.f32.vlgmr.msra.gmra.mxu0 %vm1439_vm7, %v1438_v50 }
 0x282   : > { %1721 = vmatpush.msra.mxu0 %v8271_v52 }
 0x285   : > { %8258 = vmatmul.msk.f32.gmra.mxu2 %vm1439_vm7, %v1425_v38 }
 0x286   : > { %8266 = vmatmul.msk.f32.vlgmr.msra.gmra.mxu1 %vm1439_vm7, %v1592_v55 }
 0x289   : > { %8254 = vmatmul.msk.f32.gmra.mxu0 %vm1439_vm7, %v1437_v42  ;;  %8259 = vmatmul.msk.f32.vlgmr.msrb.gmra.mxu3 %vm1439_vm7, %v1423_v45 }
 0x28a   : > { %1807 = vmatpush.msrb.mxu3 %v8280_v56 }
 0x28d   : > { %8268 = vmatmul.msk.f32.vlgmr.msra.gmra.mxu2 %vm1439_vm7, %v1592_v55 }
 0x28e   : > { %8267 = vmatmul.msk.f32.gmra.mxu1 %vm1439_vm7, %v1591_v54 }
 0x291   : > { %8260 = vmatmul.msk.f32.gmra.mxu3 %vm1439_vm7, %v1425_v38  ;;  %8264 = vmatmul.msk.f32.vlgmr.msrb.gmra.mxu0 %vm1439_vm7, %v1592_v55 }
 0x292   : > { %1830 = vmatpush.msrb.mxu0 %v8281_v57 }
 0x295   : > { %8269 = vmatmul.msk.f32.gmra.mxu2 %vm1439_vm7, %v1591_v54 }
 0x296   : > { %8277 = vmatmul.msk.f32.vlgmr.msrb.gmra.mxu1 %vm1439_vm7, %v1678_v60 }
 0x299   : > { %8265 = vmatmul.msk.f32.gmra.mxu0 %vm1439_vm7, %v1591_v54  ;;  %8273 = vmatmul.msk.f32.vlgmr.msra.gmra.mxu3 %vm1439_vm7, %v1678_v60  ;;  %v14128_v54 = vmov 0.0  }
 0x29a   : > { %v10486_v55 = vsel %vm1881_vm10, 1.0, %v14128_v54  ;;  %vm5687_vm10 = vcmask 179200  }
 0x29d   : > { %8282 = vmatmul.msk.f32.vlgmr.msrb.gmra.mxu2 %vm1439_vm7, %v1764_v63 }
 0x29e   : > { %8278 = vmatmul.msk.f32.gmra.mxu1 %vm1439_vm7, %v1677_v59 }
 0x2a1   : > { %8274 = vmatmul.msk.f32.gmra.mxu3 %vm1439_vm7, %v1677_v59  ;;  %8275 = vmatmul.msk.f32.vlgmr.msra.gmra.mxu0 %vm1439_vm7, %v1678_v60 }
 0x2a5   : > { %8283 = vmatmul.msk.f32.gmra.mxu2 %vm1439_vm7, %v1763_v62 }
 0x2a9   : > { %8276 = vmatmul.msk.f32.gmra.mxu0 %vm1439_vm7, %v1677_v59  ;;  %8284 = vmatmul.msk.f32.vlgmr.msrb.gmra.mxu3 %vm1439_vm7, %v1764_v63 }
 0x2b1   : > { %8285 = vmatmul.msk.f32.gmra.mxu3 %vm1439_vm7, %v1763_v62  ;;  %8286 = vmatmul.msk.f32.vlgmr.msrb.gmra.mxu0 %vm1439_vm7, %v1764_v63  ;;  %v1846_v63 = vperm.slane %v10471_v28, 1 }
 0x2b9   : > { %8287 = vmatmul.msk.f32.gmra.mxu0 %vm1439_vm7, %v1763_v62  ;;  %vm1880_vm7 = vcmp.eq.s32.totalorder %v1867_v21, %v10476_v33 }
 0x2f3   : > { %v1534_v4 = vpop.f32.mrf.mxu1 }
 0x2f6   : > { %v1461_v0 = vpop.f32.mrf.mxu0 }
 0x2f7   : > { %v1535_v12 = vadd.f32 %v1534_v4, %v1461_v0  ;;  %v1847_v4 = vperm.slane %v10471_v28, 2  ;;  %v2299_v28 = vld [vmem:[#allocation2 + $0x938] sm:$0xff] }
 0x2f8   : > { %v1464_v1 = vpop.f32.mrf.mxu2 }
 0x2fb   : > { %v1537_v27 = vpop.f32.mrf.mxu1 }
 0x2fc   : > { %v1484_v2 = vpop.f32.mrf.mxu3  ;;  %v1538_v25 = vadd.f32 %v1537_v27, %v1464_v1  ;;  %v1866_v1 = vadd.s32 16, %v10473_v32  ;;  %v3525_v32 = vld [vmem:[#allocation2 + $0x10e8] sm:$0xff] }
 0x2fe   : > { %v1507_v3 = vpop.f32.mrf.mxu0  ;;  %vm1874_vm15 = vcmp.eq.s32.totalorder %v1866_v1, %v10466_v13  ;;  %vm1879_vm0 = vcmp.eq.s32.totalorder %v1866_v1, %v10476_v33  ;;  %v2365_v1 = vld [vmem:[#allocation2 + $0xb48] sm:$0xff] }
 0x2ff   : > { %vm1883_vm1 = vmor %vm1874_vm15, %vm1879_vm0  ;;  %v3593_v33 = vld [vmem:[#allocation2 + $0x1308] sm:$0xff] }
 0x300   : > { %v1557_v5 = vpop.f32.mrf.mxu2 }
 0x301   : > { %v1558_v41 = vadd.f32 %v1557_v5, %v1484_v2 }
 0x303   : > { %v1637_v14 = vpop.f32.mrf.mxu1 }
 0x304   : > { %v1487_v6 = vpop.f32.mrf.mxu3  ;;  %v1667_v49 = vadd.f32 %v1637_v14, %v1558_v41  ;;  %v2418_v41 = vld [vmem:[#allocation2 + $0xcf0] sm:$0xff] }
 0x306   : > { %v1510_v7 = vpop.f32.mrf.mxu0 }
 0x308   : > { %v1560_v8 = vpop.f32.mrf.mxu2 }
 0x309   : > { %v1561_v44 = vadd.f32 %v1560_v8, %v1487_v6 }
 0x30b   : > { %v1640_v22 = vpop.f32.mrf.mxu1 }
 0x30c   : > { %v1580_v9 = vpop.f32.mrf.mxu3  ;;  %v1670_v56 = vadd.f32 %v1640_v22, %v1561_v44  ;;  %v2292_v22 = vld [vmem:[#allocation2 + $0x900] sm:$0xff]  ;;  %v2250_v44 = vld [vmem:[#allocation2 + $0x7b0] sm:$0xff] }
 0x30d   : > { %v1581_v45 = vadd.f32 %v1580_v9, %v1507_v3  ;;  %v10496_v9 = vsel %vm1882_vm14, 1.0, %v14128_v54 }
 0x30e   : > { %v1614_v10 = vpop.f32.mrf.mxu0  ;;  %14197 = vst [vmem:[#allocation13_spill] sm:$0xff] %v10496_v9 }
 0x30f   : > { %v1666_v26 = vadd.f32 %v1614_v10, %v1535_v12  ;;  %v2310_v10 = vld [vmem:[#allocation2 + $0x990] sm:$0xff] }
 0x310   : > { %v1660_v11 = vpop.f32.mrf.mxu2  ;;  %2473 = vmatpush.msra.mxu0 %v2310_v10  ;;  %v2286_v12 = vld [vmem:[#allocation2 + $0x8d0] sm:$0xff] }
 0x311   : > { %v1668_v50 = vadd.f32 %v1660_v11, %v1581_v45  ;;  %v2304_v11 = vld [vmem:[#allocation2 + $0x960] sm:$0xff]  ;;  %v2269_v45 = vld [vmem:[#allocation2 + $0x848] sm:$0xff]  ;;  %v2394_v10 = vld [vmem:[#allocation2 + $0xc30] sm:$0xff] }
 0x312   : > { %2474 = vmatpush.msra.mxu0 %v2304_v11  ;;  %v2341_v11 = vld [vmem:[#allocation2 + $0xa88] sm:$0xff] }
 0x313   : > { %v1746_v38 = vpop.f32.mrf.mxu1 }
 0x314   : > { %v1583_v15 = vpop.f32.mrf.mxu3  ;;  %v1754_v60 = vadd.f32 %v1746_v38, %v1668_v50  ;;  %2475 = vmatpush.msra.mxu0 %v2298_v19  ;;  %v2424_v38 = vld [vmem:[#allocation2 + $0xd20] sm:$0xff] }
 0x315   : > { %v1584_v52 = vadd.f32 %v1583_v15, %v1510_v7  ;;  %v2232_v50 = vld [vmem:[#allocation2 + $0x720] sm:$0xff] }
 0x316   : > { %v1617_v17 = vpop.f32.mrf.mxu0  ;;  %2476 = vmatpush.msra.mxu0 %v2292_v22  ;;  %v2408_v19 = vld [vmem:[#allocation2 + $0xca0] sm:$0xff]  ;;  %v2294_v22 = vld [vmem:[#allocation2 + $0x910] sm:$0xff] }
 0x317   : > { %v1669_v30 = vadd.f32 %v1617_v17, %v1538_v25  ;;  %v2305_v25 = vld [vmem:[#allocation2 + $0x968] sm:$0xff] }
 0x318   : > { %v1663_v18 = vpop.f32.mrf.mxu2  ;;  %2477 = vmatpush.msra.mxu0 %v2286_v12  ;;  %v2376_v12 = vld [vmem:[#allocation2 + $0xba0] sm:$0xff] }
 0x319   : > { %v1671_v57 = vadd.f32 %v1663_v18, %v1584_v52  ;;  %v2226_v52 = vld [vmem:[#allocation2 + $0x6f0] sm:$0xff] }
 0x31b   : > { %v1749_v59 = vpop.f32.mrf.mxu1 }
 0x31c   : > { %v1700_v20 = vpop.f32.mrf.mxu3  ;;  %v1757_v2 = vadd.f32 %v1749_v59, %v1671_v57  ;;  %v2407_v57 = vld [vmem:[#allocation2 + $0xc98] sm:$0xff]  ;;  %v2401_v59 = vld [vmem:[#allocation2 + $0xc68] sm:$0xff] }
 0x31d   : > { %v1752_v31 = vadd.f32 %v1700_v20, %v1666_v26  ;;  %v2280_v26 = vld [vmem:[#allocation2 + $0x8a0] sm:$0xff] }
 0x31e   : > { %v1723_v23 = vpop.f32.mrf.mxu0  ;;  %2478 = vmatpush.msra.mxu0 %v2280_v26  ;;  %v2288_v26 = vld [vmem:[#allocation2 + $0x8e0] sm:$0xff] }
 0x31f   : > { %v1753_v58 = vadd.f32 %v1723_v23, %v1667_v49  ;;  %v2311_v23 = vld [vmem:[#allocation2 + $0x998] sm:$0xff]  ;;  %v2257_v49 = vld [vmem:[#allocation2 + $0x7e8] sm:$0xff] }
 0x320   : > { %v1786_v24 = vpop.f32.mrf.mxu2 }
 0x321   : > { %v1838_v35 = vadd.f32 %v1786_v24, %v1752_v31  ;;  %v10508_v24 = vsel %vm1883_vm1, 1.0, %v14128_v54  ;;  %v2268_v31 = vld [vmem:[#allocation2 + $0x840] sm:$0xff] }
 0x322   : > { %14198 = vst [vmem:[#allocation14_spill] sm:$0xff] %v10508_v24 }
 0x323   : > { %v1851_v42 = vadd.f32 %v1845_v36, %v1838_v35  ;;  %v2287_v35 = vld [vmem:[#allocation2 + $0x8d8] sm:$0xff] }
 0x324   : > { %v1703_v29 = vpop.f32.mrf.mxu3 }
 0x325   : > { %v1755_v37 = vadd.f32 %v1703_v29, %v1669_v30  ;;  %v1857_v53 = vmax.f32 %v1851_v42, 0.0  ;;  %v2274_v29 = vld [vmem:[#allocation2 + $0x870] sm:$0xff]  ;;  %v2293_v30 = vld [vmem:[#allocation2 + $0x908] sm:$0xff] }
 0x326   : > { %v1726_v34 = vpop.f32.mrf.mxu0  ;;  %2479 = vmatpush.msra.mxu0 %v2274_v29  ;;  %v2406_v42 = vld [vmem:[#allocation2 + $0xc90] sm:$0xff] }
 0x327   : > { %v1756_v61 = vadd.f32 %v1726_v34, %v1670_v56  ;;  %v2430_v34 = vld [vmem:[#allocation2 + $0xd50] sm:$0xff]  ;;  %v2220_v56 = vld [vmem:[#allocation2 + $0x6c0] sm:$0xff] }
 0x328   : > { %v1789_v39 = vpop.f32.mrf.mxu2  ;;  %2480 = vmatpush.msra.mxu0 %v2268_v31  ;;  %v2370_v29 = vld [vmem:[#allocation2 + $0xb70] sm:$0xff] }
 0x329   : > { %v1841_v40 = vadd.f32 %v1789_v39, %v1755_v37  ;;  %v2262_v37 = vld [vmem:[#allocation2 + $0x810] sm:$0xff]  ;;  %v2281_v39 = vld [vmem:[#allocation2 + $0x8a8] sm:$0xff] }
 0x32a   : > { %2481 = vmatpush.msra.mxu0 %v2262_v37  ;;  %v2282_v31 = vld [vmem:[#allocation2 + $0x8b0] sm:$0xff]  ;;  %v2276_v37 = vld [vmem:[#allocation2 + $0x880] sm:$0xff] }
 0x32b   : > { %v1854_v43 = vadd.f32 %v1845_v36, %v1841_v40  ;;  %v2256_v40 = vld [vmem:[#allocation2 + $0x7e0] sm:$0xff] }
 0x32c   : > { %v1809_v46 = vpop.f32.mrf.mxu3  ;;  %2482 = vmatpush.msra.mxu0 %v2256_v40  ;;  %v2270_v40 = vld [vmem:[#allocation2 + $0x850] sm:$0xff] }
 0x32d   : > { %v1860_v47 = vmax.f32 %v1854_v43, 0.0  ;;  %v1839_v62 = vadd.f32 %v1809_v46, %v1753_v58  ;;  %v2275_v43 = vld [vmem:[#allocation2 + $0x878] sm:$0xff]  ;;  %v2244_v46 = vld [vmem:[#allocation2 + $0x780] sm:$0xff] }
 0x32e   : > { %v1832_v51 = vpop.f32.mrf.mxu0  ;;  %2483 = vmatpush.msra.mxu0 %v2250_v44  ;;  %v2239_v58 = vld [vmem:[#allocation2 + $0x758] sm:$0xff]  ;;  %v2372_v44 = vld [vmem:[#allocation2 + $0xb80] sm:$0xff] }
 0x32f   : > { %8292 = vmatpush.msk.msra.mxu1 %vm1424_vm3, %v1860_v47  ;;  %v1840_v3 = vadd.f32 %v1832_v51, %v1754_v60  ;;  %v1852_v7 = vadd.f32 %v1846_v63, %v1839_v62  ;;  %v2263_v47 = vld [vmem:[#allocation2 + $0x818] sm:$0xff] }
 0x330   : > { %2484 = vmatpush.msra.mxu0 %v2244_v46  ;;  %v2251_v51 = vld [vmem:[#allocation2 + $0x7b8] sm:$0xff]  ;;  %v2258_v46 = vld [vmem:[#allocation2 + $0x7f0] sm:$0xff] }
 0x331   : > { %1930 = vmatpush.msra.mxu1 %v1857_v53  ;;  %v1853_v14 = vadd.f32 %v1847_v4, %v1840_v3  ;;  %v1858_v18 = vmax.f32 %v1852_v7, 0.0  ;;  %v2245_v53 = vld [vmem:[#allocation2 + $0x788] sm:$0xff]  ;;  %v2395_v60 = vld [vmem:[#allocation2 + $0xc38] sm:$0xff] }
 0x332   : > { %8293 = vmatmul.msk.f32.vlgmr.msra.gmra.mxu1 %vm1893_vm11, %v10486_v55  ;;  %2485 = vmatpush.msra.mxu0 %v2238_v48  ;;  %v2383_v62 = vld [vmem:[#allocation2 + $0xbd8] sm:$0xff]  ;;  %v2353_v3 = vld [vmem:[#allocation2 + $0xae8] sm:$0xff]  ;;  %v2340_v48 = vld [vmem:[#allocation2 + $0xa80] sm:$0xff] }
 0x333   : > { %v1859_v20 = vmax.f32 %v1853_v14, 0.0  ;;  %2499 = vmatpush.msrb.mxu1 %v2406_v42  ;;  %v2347_v7 = vld [vmem:[#allocation2 + $0xab8] sm:$0xff]  ;;  %v2306_v14 = vld [vmem:[#allocation2 + $0x970] sm:$0xff]  ;;  %v2352_v42 = vld [vmem:[#allocation2 + $0xae0] sm:$0xff] }
 0x334   : > { %v1812_v0 = vpop.f32.mrf.mxu3  ;;  %2486 = vmatpush.msra.mxu0 %v2232_v50  ;;  %v2360_v50 = vld [vmem:[#allocation2 + $0xb20] sm:$0xff] }
 0x335   : > { %v1842_v5 = vadd.f32 %v1812_v0, %v1756_v61  ;;  %v2389_v61 = vld [vmem:[#allocation2 + $0xc08] sm:$0xff]  ;;  %v2371_v0 = vld [vmem:[#allocation2 + $0xb78] sm:$0xff] }
 0x336   : > { %v1835_v6 = vpop.f32.mrf.mxu0  ;;  %2487 = vmatpush.msra.mxu0 %v2226_v52  ;;  %v2246_v52 = vld [vmem:[#allocation2 + $0x790] sm:$0xff] }
 0x337   : > { %v1855_v8 = vadd.f32 %v1846_v63, %v1842_v5  ;;  %v1843_v27 = vadd.f32 %v1835_v6, %v1757_v2  ;;  %v2377_v63 = vld [vmem:[#allocation2 + $0xba8] sm:$0xff]  ;;  %v2359_v2 = vld [vmem:[#allocation2 + $0xb18] sm:$0xff]  ;;  %v2400_v6 = vld [vmem:[#allocation2 + $0xc60] sm:$0xff] }
 0x338   : > { %2488 = vmatpush.msra.mxu0 %v2220_v56  ;;  %v2233_v5 = vld [vmem:[#allocation2 + $0x728] sm:$0xff]  ;;  %2500 = vmatpush.msrb.mxu1 %v2400_v6  ;;  %v2328_v56 = vld [vmem:[#allocation2 + $0xa20] sm:$0xff] }
 0x339   : > { %v1861_v15 = vmax.f32 %v1855_v8, 0.0  ;;  %v1856_v16 = vadd.f32 %v1847_v4, %v1843_v27  ;;  %v2412_v4 = vld [vmem:[#allocation2 + $0xcc0] sm:$0xff]  ;;  %v2227_v27 = vld [vmem:[#allocation2 + $0x6f8] sm:$0xff] }
 0x33a   : > { %8294 = vmatmul.msk.f32.gmra.mxu1 %vm1893_vm11, %v10496_v9  ;;  %2577 = vmatpush.msrb.mxu0 %v2407_v57  ;;  %v2312_v8 = vld [vmem:[#allocation2 + $0x9a0] sm:$0xff] }
 0x33b   : > { %v1862_v17 = vmax.f32 %v1856_v16, 0.0  ;;  %8297 = vmatpush.msk.msra.mxu2 %vm1424_vm3, %v1861_v15  ;;  %v2221_v15 = vld [vmem:[#allocation2 + $0x6c8] sm:$0xff]  ;;  %v2388_v16 = vld [vmem:[#allocation2 + $0xc00] sm:$0xff]  ;;  %2501 = vmatpush.msrb.mxu1 %v2394_v10 }
 0x33c   : > { %2578 = vmatpush.msrb.mxu0 %v2401_v59  ;;  %v2240_v57 = vld [vmem:[#allocation2 + $0x760] sm:$0xff]  ;;  %v2322_v59 = vld [vmem:[#allocation2 + $0x9f0] sm:$0xff] }
 0x33d   : > { %1959 = vmatpush.msra.mxu2 %v1858_v18  ;;  %8302 = vmatpush.msk.msra.mxu3 %vm1424_vm3, %v1862_v17  ;;  %vm1875_vm3 = vcmp.eq.s32.totalorder %v1867_v21, %v10466_v13  ;;  %v2335_v17 = vld [vmem:[#allocation2 + $0xa58] sm:$0xff]  ;;  %v2300_v18 = vld [vmem:[#allocation2 + $0x940] sm:$0xff]  ;;  %v2329_v21 = vld [vmem:[#allocation2 + $0xa28] sm:$0xff] }
 0x33e   : > { %8298 = vmatmul.msk.f32.vlgmr.msra.gmra.mxu2 %vm1893_vm11, %v10486_v55  ;;  %vm1884_vm8 = vmor %vm1875_vm3, %vm1880_vm7  ;;  %2579 = vmatpush.msrb.mxu0 %v2395_v60  ;;  %v2234_v60 = vld [vmem:[#allocation2 + $0x730] sm:$0xff]  ;;  %v3467_v13 = vld [vmem:[#allocation2 + $0xf18] sm:$0xff] }
 0x33f   : > { %1988 = vmatpush.msra.mxu3 %v1859_v20  ;;  %v10519_v36 = vsel %vm1884_vm8, 1.0, %v14128_v54  ;;  %2537 = vmatpush.msrb.mxu2 %v2430_v34  ;;  %v2382_v20 = vld [vmem:[#allocation2 + $0xbd0] sm:$0xff]  ;;  %vm6279_vm8 = vcmask 523264  }
 0x340   : > { %8303 = vmatmul.msk.f32.vlgmr.msra.gmra.mxu3 %vm1893_vm11, %v10486_v55  ;;  %14199 = vst [vmem:[#allocation15_spill] sm:$0xff] %v10519_v36  ;;  %2580 = vmatpush.msrb.mxu0 %v2389_v61  ;;  %v2390_v34 = vld [vmem:[#allocation2 + $0xc10] sm:$0xff] }
 0x341   : > { %2551 = vmatpush.msrb.mxu3 %v2311_v23  ;;  %2538 = vmatpush.msrb.mxu2 %v2424_v38  ;;  %v2402_v23 = vld [vmem:[#allocation2 + $0xc70] sm:$0xff]  ;;  %v2384_v38 = vld [vmem:[#allocation2 + $0xbe0] sm:$0xff] }
 0x342   : > { %8295 = vmatmul.msk.f32.gmra.mxu1 %vm1893_vm11, %v10508_v24  ;;  %2581 = vmatpush.msrb.mxu0 %v2383_v62  ;;  %v2342_v61 = vld [vmem:[#allocation2 + $0xa90] sm:$0xff]  ;;  %v2316_v62 = vld [vmem:[#allocation2 + $0x9c0] sm:$0xff] }
 0x343   : > { %2552 = vmatpush.msrb.mxu3 %v2305_v25  ;;  %2539 = vmatpush.msrb.mxu2 %v2418_v41  ;;  %v2323_v25 = vld [vmem:[#allocation2 + $0x9f8] sm:$0xff]  ;;  %v2378_v41 = vld [vmem:[#allocation2 + $0xbb0] sm:$0xff] }
 0x344   : > { %2582 = vmatpush.msrb.mxu0 %v2377_v63  ;;  %2502 = vmatpush.msrb.mxu1 %v2388_v16  ;;  %v2228_v63 = vld [vmem:[#allocation2 + $0x700] sm:$0xff] }
 0x345   : > { %2553 = vmatpush.msrb.mxu3 %v2299_v28  ;;  %2540 = vmatpush.msrb.mxu2 %v2412_v4  ;;  %v2396_v28 = vld [vmem:[#allocation2 + $0xc40] sm:$0xff] }
 0x346   : > { %8299 = vmatmul.msk.f32.gmra.mxu2 %vm1893_vm11, %v10496_v9  ;;  %2583 = vmatpush.msrb.mxu0 %v2371_v0  ;;  %v2336_v0 = vld [vmem:[#allocation2 + $0xa60] sm:$0xff] }
 0x347   : > { %2554 = vmatpush.msrb.mxu3 %v2293_v30  ;;  %2629 = vmatpush.msra.mxu2 %v2312_v8  ;;  %v2317_v30 = vld [vmem:[#allocation2 + $0x9c8] sm:$0xff]  ;;  %v2324_v4 = vld [vmem:[#allocation2 + $0xa00] sm:$0xff] }
 0x348   : > { %8304 = vmatmul.msk.f32.gmra.mxu3 %vm1893_vm11, %v10496_v9  ;;  %2584 = vmatpush.msrb.mxu0 %v2365_v1  ;;  %v2222_v1 = vld [vmem:[#allocation2 + $0x6d0] sm:$0xff] }
 0x349   : > { %2555 = vmatpush.msrb.mxu3 %v2287_v35  ;;  %2630 = vmatpush.msra.mxu2 %v2306_v14  ;;  %v2364_v35 = vld [vmem:[#allocation2 + $0xb40] sm:$0xff]  ;;  %v2301_v14 = vld [vmem:[#allocation2 + $0x948] sm:$0xff] }
 0x34a   : > { %8296 = vmatmul.msk.f32.gmra.mxu1 %vm1893_vm11, %v10519_v36  ;;  %2585 = vmatpush.msrb.mxu0 %v2359_v2  ;;  %v2330_v2 = vld [vmem:[#allocation2 + $0xa30] sm:$0xff] }
 0x34b   : > { %2556 = vmatpush.msrb.mxu3 %v2281_v39  ;;  %2631 = vmatpush.msra.mxu2 %v2300_v18  ;;  %v2358_v39 = vld [vmem:[#allocation2 + $0xb10] sm:$0xff] }
 0x34c   : > { %2586 = vmatpush.msrb.mxu0 %v2353_v3  ;;  %2503 = vmatpush.msrb.mxu1 %v2382_v20 }
 0x34d   : > { %2557 = vmatpush.msrb.mxu3 %v2275_v43  ;;  %2632 = vmatpush.msra.mxu2 %v2294_v22  ;;  %v2264_v43 = vld [vmem:[#allocation2 + $0x820] sm:$0xff] }
 0x34e   : > { %8300 = vmatmul.msk.f32.gmra.mxu2 %vm1893_vm11, %v10508_v24  ;;  %2587 = vmatpush.msrb.mxu0 %v2347_v7 }
 0x34f   : > { %2558 = vmatpush.msrb.mxu3 %v2269_v45  ;;  %2504 = vmatpush.msrb.mxu1 %v2376_v12  ;;  %v2346_v45 = vld [vmem:[#allocation2 + $0xab0] sm:$0xff] }
 0x350   : > { %8305 = vmatmul.msk.f32.gmra.mxu3 %vm1893_vm11, %v10508_v24  ;;  %2588 = vmatpush.msrb.mxu0 %v2341_v11  ;;  %v2307_v11 = vld [vmem:[#allocation2 + $0x978] sm:$0xff] }
 0x351   : > { %2559 = vmatpush.msrb.mxu3 %v2263_v47  ;;  %2633 = vmatpush.msra.mxu2 %v2288_v26  ;;  %v2366_v47 = vld [vmem:[#allocation2 + $0xb50] sm:$0xff]  ;;  %v2413_v26 = vld [vmem:[#allocation2 + $0xcc8] sm:$0xff] }
 0x352   : > { %2589 = vmatpush.msrb.mxu0 %v2335_v17  ;;  %2505 = vmatpush.msrb.mxu1 %v2370_v29  ;;  %v2295_v17 = vld [vmem:[#allocation2 + $0x918] sm:$0xff]  ;;  %v2277_v29 = vld [vmem:[#allocation2 + $0x888] sm:$0xff] }
 0x353   : > { %2560 = vmatpush.msrb.mxu3 %v2257_v49  ;;  %2634 = vmatpush.msra.mxu2 %v2282_v31  ;;  %v2252_v49 = vld [vmem:[#allocation2 + $0x7c0] sm:$0xff]  ;;  %v2271_v31 = vld [vmem:[#allocation2 + $0x858] sm:$0xff] }
 0x354   : > { %2590 = vmatpush.msrb.mxu0 %v2329_v21  ;;  %2506 = vmatpush.msrb.mxu1 %v2364_v35  ;;  %v2289_v21 = vld [vmem:[#allocation2 + $0x8e8] sm:$0xff] }
 0x355   : > { %2561 = vmatpush.msrb.mxu3 %v2251_v51  ;;  %2635 = vmatpush.msra.mxu2 %v2276_v37  ;;  %v2334_v51 = vld [vmem:[#allocation2 + $0xa50] sm:$0xff]  ;;  %v2265_v37 = vld [vmem:[#allocation2 + $0x828] sm:$0xff] }
 0x356   : > { %8301 = vmatmul.msk.f32.gmra.mxu2 %vm1893_vm11, %v10519_v36  ;;  %2591 = vmatpush.msrb.mxu0 %v2323_v25  ;;  %v2283_v25 = vld [vmem:[#allocation2 + $0x8b8] sm:$0xff] }
 0x357   : > { %2562 = vmatpush.msrb.mxu3 %v2245_v53  ;;  %2507 = vmatpush.msrb.mxu1 %v2358_v39  ;;  %v2354_v53 = vld [vmem:[#allocation2 + $0xaf0] sm:$0xff] }
 0x358   : > { %8306 = vmatmul.msk.f32.gmra.mxu3 %vm1893_vm11, %v10519_v36  ;;  %2592 = vmatpush.msrb.mxu0 %v2317_v30  ;;  %v2427_v30 = vld [vmem:[#allocation2 + $0xd38] sm:$0xff] }
 0x359   : > { %2563 = vmatpush.msrb.mxu3 %v2239_v58  ;;  %2636 = vmatpush.msra.mxu2 %v2270_v40  ;;  %v2348_v58 = vld [vmem:[#allocation2 + $0xac0] sm:$0xff]  ;;  %v2415_v40 = vld [vmem:[#allocation2 + $0xcd8] sm:$0xff] }
 0x35a   : > { %2508 = vmatpush.msrb.mxu1 %v2352_v42  ;;  %v2259_v42 = vld [vmem:[#allocation2 + $0x7f8] sm:$0xff] }
 0x35b   : > { %2564 = vmatpush.msrb.mxu3 %v2233_v5  ;;  %2637 = vmatpush.msra.mxu2 %v2264_v43  ;;  %v2318_v5 = vld [vmem:[#allocation2 + $0x9d0] sm:$0xff]  ;;  %v2432_v43 = vld [vmem:[#allocation2 + $0xd60] sm:$0xff] }
 0x35c   : > { %2509 = vmatpush.msrb.mxu1 %v2346_v45 }
 0x35d   : > { %2565 = vmatpush.msrb.mxu3 %v2227_v27  ;;  %2638 = vmatpush.msra.mxu2 %v2258_v46  ;;  %v2313_v27 = vld [vmem:[#allocation2 + $0x9a8] sm:$0xff] }
 0x35e   : > { %2510 = vmatpush.msrb.mxu1 %v2340_v48  ;;  %v2409_v48 = vld [vmem:[#allocation2 + $0xca8] sm:$0xff] }
 0x35f   : > { %2566 = vmatpush.msrb.mxu3 %v2221_v15  ;;  %2639 = vmatpush.msra.mxu2 %v2252_v49  ;;  %v2431_v15 = vld [vmem:[#allocation2 + $0xd58] sm:$0xff] }
 0x360   : > { %2511 = vmatpush.msrb.mxu1 %v2334_v51  ;;  %v2247_v51 = vld [vmem:[#allocation2 + $0x798] sm:$0xff] }
 0x361   : > { %2655 = vmatpush.msra.mxu3 %v2408_v19  ;;  %2640 = vmatpush.msra.mxu2 %v2246_v52  ;;  %v2425_v19 = vld [vmem:[#allocation2 + $0xd28] sm:$0xff]  ;;  %v2403_v52 = vld [vmem:[#allocation2 + $0xc78] sm:$0xff] }
 0x362   : > { %2512 = vmatpush.msrb.mxu1 %v2328_v56  ;;  %v2241_v56 = vld [vmem:[#allocation2 + $0x768] sm:$0xff] }
 0x363   : > { %2656 = vmatpush.msra.mxu3 %v2402_v23  ;;  %2641 = vmatpush.msra.mxu2 %v2240_v57  ;;  %v2419_v23 = vld [vmem:[#allocation2 + $0xcf8] sm:$0xff]  ;;  %v2397_v57 = vld [vmem:[#allocation2 + $0xc48] sm:$0xff] }
 0x364   : > { %2513 = vmatpush.msrb.mxu1 %v2322_v59 }
 0x365   : > { %2657 = vmatpush.msra.mxu3 %v2396_v28  ;;  %2642 = vmatpush.msra.mxu2 %v2234_v60  ;;  %v2433_v28 = vld [vmem:[#allocation2 + $0xd68] sm:$0xff]  ;;  %v2235_v60 = vld [vmem:[#allocation2 + $0x738] sm:$0xff] }
 0x366   : > { %2514 = vmatpush.msrb.mxu1 %v2316_v62 }
 0x367   : > { %2658 = vmatpush.msra.mxu3 %v2390_v34  ;;  %2643 = vmatpush.msra.mxu2 %v2228_v63  ;;  %v2421_v34 = vld [vmem:[#allocation2 + $0xd08] sm:$0xff] }
 0x368   : > { %2615 = vmatpush.msra.mxu1 %v2431_v15  ;;  %v2367_v15 = vld [vmem:[#allocation2 + $0xb58] sm:$0xff] }
 0x369   : > { %2659 = vmatpush.msra.mxu3 %v2384_v38  ;;  %2644 = vmatpush.msra.mxu2 %v2222_v1  ;;  %v2229_v1 = vld [vmem:[#allocation2 + $0x708] sm:$0xff] }
 0x36a   : > { %2616 = vmatpush.msra.mxu1 %v2425_v19  ;;  %v2361_v19 = vld [vmem:[#allocation2 + $0xb28] sm:$0xff] }
 0x36b   : > { %2660 = vmatpush.msra.mxu3 %v2378_v41 }
 0x36c   : > { %2617 = vmatpush.msra.mxu1 %v2419_v23  ;;  %v2392_v23 = vld [vmem:[#allocation2 + $0xc20] sm:$0xff] }
 0x36d   : > { %2661 = vmatpush.msra.mxu3 %v2372_v44 }
 0x36e   : > { %2618 = vmatpush.msra.mxu1 %v2413_v26  ;;  %v2428_v26 = vld [vmem:[#allocation2 + $0xd40] sm:$0xff] }
 0x36f   : > { %2662 = vmatpush.msra.mxu3 %v2366_v47  ;;  %v2253_v47 = vld [vmem:[#allocation2 + $0x7c8] sm:$0xff] }
 0x371   : > { %2663 = vmatpush.msra.mxu3 %v2360_v50  ;;  %v2426_v50 = vld [vmem:[#allocation2 + $0xd30] sm:$0xff] }
 0x373   : > { %2664 = vmatpush.msra.mxu3 %v2354_v53 }
 0x375   : > { %2665 = vmatpush.msra.mxu3 %v2348_v58 }
 0x377   : > { %2666 = vmatpush.msra.mxu3 %v2342_v61  ;;  %v2391_v61 = vld [vmem:[#allocation2 + $0xc18] sm:$0xff] }
 0x379   : > { %2667 = vmatpush.msra.mxu3 %v2336_v0  ;;  %v2420_v0 = vld [vmem:[#allocation2 + $0xd00] sm:$0xff] }
 0x37b   : > { %2668 = vmatpush.msra.mxu3 %v2330_v2  ;;  %v2385_v2 = vld [vmem:[#allocation2 + $0xbe8] sm:$0xff] }
 0x37d   : > { %2669 = vmatpush.msra.mxu3 %v2324_v4 }
 0x37f   : > { %2670 = vmatpush.msra.mxu3 %v2318_v5  ;;  %v2414_v5 = vld [vmem:[#allocation2 + $0xcd0] sm:$0xff] }
 0x3af   : > { %v10533_v3 = vpop.f32.mrf.mxu1 }
 0x3b0   : > { %v2445_v6 = vrot.slane %v10533_v3, 1 }
 0x3b7   : > { %v10536_v7 = vpop.f32.mrf.mxu1 }
 0x3b8   : > { %v2446_v8 = vrot.slane %v10536_v7, 1 }
 0x3ba   : > { %v10540_v10 = vsel %vm1422_vm6, %v2445_v6, %v2446_v8  ;;  %v2223_v6 = vld [vmem:[#allocation2 + $0x6d8] sm:$0xff] }
 0x3bb   : > { %2489 = vmatmul.f32.vlgmr.msra.gmra.mxu0 %v10540_v10  ;;  %2567 = vmatmul.f32.vlgmr.msrb.gmra.mxu3 %v10540_v10 }
 0x3bc   : > { %2707 = vmatpush.msra.mxu0 %v2313_v27  ;;  %2771 = vmatpush.msrb.mxu3 %v2433_v28  ;;  %v2410_v27 = vld [vmem:[#allocation2 + $0xcb0] sm:$0xff] }
 0x3bd   : > { %v2386_v28 = vld [vmem:[#allocation2 + $0xbf0] sm:$0xff] }
 0x3be   : > { %2708 = vmatpush.msra.mxu0 %v2307_v11  ;;  %2772 = vmatpush.msrb.mxu3 %v2427_v30  ;;  %v2373_v11 = vld [vmem:[#allocation2 + $0xb88] sm:$0xff]  ;;  %v2422_v30 = vld [vmem:[#allocation2 + $0xd10] sm:$0xff] }
 0x3bf   : > { %v10544_v16 = vpop.f32.mrf.mxu1 }
 0x3c0   : > { %2709 = vmatpush.msra.mxu0 %v2301_v14  ;;  %v10547_v18 = vrot.slane %v10544_v16, 1  ;;  %2773 = vmatpush.msrb.mxu3 %v2421_v34  ;;  %v2404_v14 = vld [vmem:[#allocation2 + $0xc80] sm:$0xff]  ;;  %v2343_v34 = vld [vmem:[#allocation2 + $0xa98] sm:$0xff] }
 0x3c1   : > { %v10549_v20 = vpop.f32.mrf.mxu2 }
 0x3c2   : > { %2710 = vmatpush.msra.mxu0 %v2295_v17  ;;  %v10553_v22 = vsel %vm1422_vm6, %v2446_v8, %v10547_v18  ;;  %v2448_v38 = vrot.slane %v10549_v20, 1  ;;  %2774 = vmatpush.msrb.mxu3 %v2415_v40  ;;  %v2379_v8 = vld [vmem:[#allocation2 + $0xbb8] sm:$0xff]  ;;  %v2398_v17 = vld [vmem:[#allocation2 + $0xc50] sm:$0xff]  ;;  %v2308_v40 = vld [vmem:[#allocation2 + $0x980] sm:$0xff] }
 0x3c3   : > { %v10555_v12 = vpop.f32.mrf.mxu3  ;;  %2492 = vmatmul.f32.gmra.mxu0 %v10553_v22  ;;  %2570 = vmatmul.f32.gmra.mxu3 %v10553_v22 }
 0x3c4   : > { %2711 = vmatpush.msra.mxu0 %v2289_v21  ;;  %v2451_v45 = vrot.slane %v10555_v12, 1  ;;  %v2434_v21 = vld [vmem:[#allocation2 + $0xd70] sm:$0xff] }
 0x3c6   : > { %2712 = vmatpush.msra.mxu0 %v2283_v25  ;;  %v2355_v25 = vld [vmem:[#allocation2 + $0xaf8] sm:$0xff] }
 0x3c8   : > { %2713 = vmatpush.msra.mxu0 %v2277_v29  ;;  %v2349_v29 = vld [vmem:[#allocation2 + $0xac8] sm:$0xff] }
 0x3c9   : > { %v10559_v35 = vpop.f32.mrf.mxu2 }
 0x3ca   : > { %2714 = vmatpush.msra.mxu0 %v2271_v31  ;;  %v2449_v39 = vrot.slane %v10559_v35, 1  ;;  %v2380_v31 = vld [vmem:[#allocation2 + $0xbc0] sm:$0xff] }
 0x3cb   : > { %v10563_v41 = vpop.f32.mrf.mxu3  ;;  %2495 = vmatmul.f32.gmra.mxu0 %v10547_v18  ;;  %2573 = vmatmul.f32.gmra.mxu3 %v10547_v18 }
 0x3cc   : > { %2715 = vmatpush.msra.mxu0 %v2265_v37  ;;  %v10568_v44 = vsel %vm1422_vm6, %v2448_v38, %v2449_v39  ;;  %v2452_v46 = vrot.slane %v10563_v41, 1  ;;  %v2314_v37 = vld [vmem:[#allocation2 + $0x9b0] sm:$0xff] }
 0x3cd   : > { %2515 = vmatmul.f32.vlgmr.msrb.gmra.mxu1 %v10568_v44  ;;  %v2374_v38 = vld [vmem:[#allocation2 + $0xb90] sm:$0xff] }
 0x3ce   : > { %2716 = vmatpush.msra.mxu0 %v2259_v42  ;;  %v10574_v49 = vsel %vm1422_vm6, %v2451_v45, %v2452_v46  ;;  %2693 = vmatpush.msrb.mxu1 %v2432_v43  ;;  %v2368_v42 = vld [vmem:[#allocation2 + $0xb60] sm:$0xff]  ;;  %v2331_v45 = vld [vmem:[#allocation2 + $0xa38] sm:$0xff] }
 0x3cf   : > { %8307 = vmatmul.msk.f32.vlgmr.msrb.gmra.mxu2 %vm2466_vm9, %v10574_v49  ;;  %v2416_v43 = vld [vmem:[#allocation2 + $0xce0] sm:$0xff] }
 0x3d0   : > { %2717 = vmatpush.msra.mxu0 %v2253_v47  ;;  %2733 = vmatpush.msrb.mxu2 %v2409_v48  ;;  %v2362_v47 = vld [vmem:[#allocation2 + $0xb30] sm:$0xff]  ;;  %v2325_v48 = vld [vmem:[#allocation2 + $0xa08] sm:$0xff] }
 0x3d1   : > { %v10578_v53 = vpop.f32.mrf.mxu2  ;;  %2694 = vmatpush.msrb.mxu1 %v2426_v50  ;;  %v2356_v50 = vld [vmem:[#allocation2 + $0xb00] sm:$0xff] }
 0x3d2   : > { %2718 = vmatpush.msra.mxu0 %v2247_v51  ;;  %2734 = vmatpush.msrb.mxu2 %v2403_v52  ;;  %v10581_v58 = vrot.slane %v10578_v53, 1  ;;  %v2319_v51 = vld [vmem:[#allocation2 + $0x9d8] sm:$0xff]  ;;  %v2296_v52 = vld [vmem:[#allocation2 + $0x920] sm:$0xff] }
 0x3d3   : > { %v10583_v59 = vpop.f32.mrf.mxu3  ;;  %2593 = vmatmul.f32.vlgmr.msrb.gmra.mxu0 %v10568_v44  ;;  %2671 = vmatmul.f32.vlgmr.msra.gmra.mxu3 %v10568_v44 }
 0x3d4   : > { %2719 = vmatpush.msra.mxu0 %v2241_v56  ;;  %2735 = vmatpush.msrb.mxu2 %v2397_v57  ;;  %v10589_v62 = vsel %vm1422_vm6, %v2449_v39, %v10581_v58  ;;  %v10592_v63 = vrot.slane %v10583_v59, 1  ;;  %v2337_v39 = vld [vmem:[#allocation2 + $0xa68] sm:$0xff]  ;;  %v2350_v56 = vld [vmem:[#allocation2 + $0xad0] sm:$0xff]  ;;  %v2315_v57 = vld [vmem:[#allocation2 + $0x9b8] sm:$0xff]  ;;  %v4378_v9 = vrot.slane %v10583_v59, 3 }
 0x3d5   : > { %2518 = vmatmul.f32.gmra.mxu1 %v10589_v62  ;;  %2849 = vmatpush.msra.mxu3 %v2434_v21  ;;  %v2285_v21 = vld [vmem:[#allocation2 + $0x8c8] sm:$0xff] }
 0x3d6   : > { %2720 = vmatpush.msra.mxu0 %v2235_v60  ;;  %2736 = vmatpush.msrb.mxu2 %v2391_v61  ;;  %v10597_v4 = vsel %vm1422_vm6, %v2452_v46, %v10592_v63  ;;  %v2302_v46 = vld [vmem:[#allocation2 + $0x950] sm:$0xff]  ;;  %v2344_v61 = vld [vmem:[#allocation2 + $0xaa0] sm:$0xff] }
 0x3d7   : > { %8308 = vmatmul.msk.f32.gmra.mxu2 %vm2466_vm9, %v10597_v4  ;;  %2695 = vmatpush.msrb.mxu1 %v2420_v0  ;;  %v2290_v60 = vld [vmem:[#allocation2 + $0x8f0] sm:$0xff]  ;;  %v2309_v0 = vld [vmem:[#allocation2 + $0x988] sm:$0xff] }
 0x3d8   : > { %2721 = vmatpush.msra.mxu0 %v2229_v1  ;;  %2737 = vmatpush.msrb.mxu2 %v2385_v2  ;;  %v2284_v1 = vld [vmem:[#allocation2 + $0x8c0] sm:$0xff]  ;;  %v2435_v2 = vld [vmem:[#allocation2 + $0xd78] sm:$0xff] }
 0x3d9   : > { %2696 = vmatpush.msrb.mxu1 %v2414_v5  ;;  %2850 = vmatpush.msra.mxu3 %v2428_v26  ;;  %v2338_v5 = vld [vmem:[#allocation2 + $0xa70] sm:$0xff]  ;;  %v2279_v26 = vld [vmem:[#allocation2 + $0x898] sm:$0xff] }
 0x3da   : > { %2722 = vmatpush.msra.mxu0 %v2223_v6  ;;  %2738 = vmatpush.msrb.mxu2 %v2379_v8  ;;  %v2303_v6 = vld [vmem:[#allocation2 + $0x958] sm:$0xff]  ;;  %v2332_v8 = vld [vmem:[#allocation2 + $0xa40] sm:$0xff] }
 0x3db   : > { %2674 = vmatmul.f32.gmra.mxu3 %v10589_v62  ;;  %2596 = vmatmul.f32.gmra.mxu0 %v10589_v62 }
 0x3dc   : > { %2811 = vmatpush.msrb.mxu0 %v2410_v27  ;;  %2739 = vmatpush.msrb.mxu2 %v2373_v11  ;;  %v2297_v27 = vld [vmem:[#allocation2 + $0x928] sm:$0xff] }
 0x3dd   : > { %2521 = vmatmul.f32.gmra.mxu1 %v10581_v58  ;;  %2851 = vmatpush.msra.mxu3 %v2422_v30  ;;  %v2429_v11 = vld [vmem:[#allocation2 + $0xd48] sm:$0xff] }
 0x3de   : > { %2812 = vmatpush.msrb.mxu0 %v2404_v14  ;;  %2740 = vmatpush.msrb.mxu2 %v2367_v15  ;;  %v2326_v14 = vld [vmem:[#allocation2 + $0xa10] sm:$0xff]  ;;  %v2291_v15 = vld [vmem:[#allocation2 + $0x8f8] sm:$0xff]  ;;  %v2273_v30 = vld [vmem:[#allocation2 + $0x868] sm:$0xff] }
 0x3df   : > { %8309 = vmatmul.msk.f32.gmra.mxu2 %vm2466_vm9, %v10592_v63  ;;  %2852 = vmatpush.msra.mxu3 %v2416_v43  ;;  %v2069_v43 = vld [vmem:[#allocation2 + $0x210] sm:$0xff] }
 0x3e0   : > { %2813 = vmatpush.msrb.mxu0 %v2398_v17  ;;  %2741 = vmatpush.msrb.mxu2 %v2361_v19  ;;  %v2278_v17 = vld [vmem:[#allocation2 + $0x890] sm:$0xff]  ;;  %v2320_v19 = vld [vmem:[#allocation2 + $0x9e0] sm:$0xff] }
 0x3e2   : > { %2814 = vmatpush.msrb.mxu0 %v2392_v23  ;;  %2742 = vmatpush.msrb.mxu2 %v2355_v25  ;;  %v2093_v23 = vld [vmem:[#allocation2 + $0x2d0] sm:$0xff]  ;;  %v2272_v25 = vld [vmem:[#allocation2 + $0x860] sm:$0xff] }
 0x3e3   : > { %2677 = vmatmul.f32.gmra.mxu3 %v10581_v58  ;;  %2599 = vmatmul.f32.gmra.mxu0 %v10581_v58 }
 0x3e4   : > { %2815 = vmatpush.msrb.mxu0 %v2386_v28  ;;  %2743 = vmatpush.msrb.mxu2 %v2349_v29  ;;  %v2423_v28 = vld [vmem:[#allocation2 + $0xd18] sm:$0xff]  ;;  %v2087_v29 = vld [vmem:[#allocation2 + $0x2a0] sm:$0xff] }
 0x3e5   : > { %8310 = vmatmul.msk.f32.vlgmr.msra.gmra.mxu1 %vm2466_vm9, %v10574_v49 }
 0x3e6   : > { %2816 = vmatpush.msrb.mxu0 %v2380_v31  ;;  %2744 = vmatpush.msrb.mxu2 %v2343_v34  ;;  %v2417_v31 = vld [vmem:[#allocation2 + $0xce8] sm:$0xff]  ;;  %v2081_v34 = vld [vmem:[#allocation2 + $0x270] sm:$0xff] }
 0x3e7   : > { %2785 = vmatpush.msra.mxu1 %v2314_v37  ;;  %2645 = vmatmul.f32.vlgmr.msra.gmra.mxu2 %v10540_v10  ;;  %v2267_v37 = vld [vmem:[#allocation2 + $0x838] sm:$0xff] }
 0x3e8   : > { %2817 = vmatpush.msrb.mxu0 %v2374_v38  ;;  %2745 = vmatpush.msrb.mxu2 %v2337_v39  ;;  %v2266_v38 = vld [vmem:[#allocation2 + $0x830] sm:$0xff]  ;;  %v2075_v39 = vld [vmem:[#allocation2 + $0x240] sm:$0xff] }
 0x3e9   : > { %2786 = vmatpush.msra.mxu1 %v2308_v40  ;;  %v2261_v40 = vld [vmem:[#allocation2 + $0x808] sm:$0xff] }
 0x3ea   : > { %2818 = vmatpush.msrb.mxu0 %v2368_v42  ;;  %2746 = vmatpush.msrb.mxu2 %v2331_v45  ;;  %v2260_v42 = vld [vmem:[#allocation2 + $0x800] sm:$0xff]  ;;  %v2255_v45 = vld [vmem:[#allocation2 + $0x7d8] sm:$0xff] }
 0x3eb   : > { %2787 = vmatpush.msra.mxu1 %v2302_v46  ;;  %8316 = vmatmul.msk.f32.vlgmr.msrb.gmra.mxu3 %vm2466_vm9, %v10574_v49  ;;  %v2254_v46 = vld [vmem:[#allocation2 + $0x7d0] sm:$0xff] }
 0x3ec   : > { %2819 = vmatpush.msrb.mxu0 %v2362_v47  ;;  %2747 = vmatpush.msrb.mxu2 %v2325_v48  ;;  %v2063_v47 = vld [vmem:[#allocation2 + $0x1e0] sm:$0xff]  ;;  %v2249_v48 = vld [vmem:[#allocation2 + $0x7a8] sm:$0xff] }
 0x3ed   : > { %2723 = vmatmul.f32.vlgmr.msra.gmra.mxu0 %v10540_v10  ;;  %8311 = vmatmul.msk.f32.gmra.mxu1 %vm2466_vm9, %v10597_v4 }
 0x3ee   : > { %2820 = vmatpush.msrb.mxu0 %v2356_v50  ;;  %2748 = vmatpush.msrb.mxu2 %v2319_v51  ;;  %v2248_v50 = vld [vmem:[#allocation2 + $0x7a0] sm:$0xff]  ;;  %v2057_v51 = vld [vmem:[#allocation2 + $0x1b0] sm:$0xff] }
 0x3ef   : > { %2788 = vmatpush.msra.mxu1 %v2296_v52  ;;  %2648 = vmatmul.f32.gmra.mxu2 %v10553_v22  ;;  %v2243_v52 = vld [vmem:[#allocation2 + $0x778] sm:$0xff] }
 0x3f0   : > { %2821 = vmatpush.msrb.mxu0 %v2350_v56  ;;  %2863 = vmatpush.msra.mxu2 %v2315_v57  ;;  %v2094_v56 = vld [vmem:[#allocation2 + $0x2d8] sm:$0xff]  ;;  %v2242_v57 = vld [vmem:[#allocation2 + $0x770] sm:$0xff] }
 0x3f1   : > { %2789 = vmatpush.msra.mxu1 %v2290_v60  ;;  %2927 = vmatpush.msrb.mxu3 %v2435_v2  ;;  %v2051_v60 = vld [vmem:[#allocation2 + $0x180] sm:$0xff]  ;;  %v2045_v2 = vld [vmem:[#allocation2 + $0x150] sm:$0xff] }
 0x3f2   : > { %2822 = vmatpush.msrb.mxu0 %v2344_v61  ;;  %2864 = vmatpush.msra.mxu2 %v2309_v0  ;;  %v2237_v61 = vld [vmem:[#allocation2 + $0x748] sm:$0xff]  ;;  %v2236_v0 = vld [vmem:[#allocation2 + $0x740] sm:$0xff] }
 0x3f3   : > { %2790 = vmatpush.msra.mxu1 %v2284_v1  ;;  %8317 = vmatmul.msk.f32.gmra.mxu3 %vm2466_vm9, %v10597_v4  ;;  %v2088_v1 = vld [vmem:[#allocation2 + $0x2a8] sm:$0xff] }
 0x3f4   : > { %2823 = vmatpush.msrb.mxu0 %v2338_v5  ;;  %2865 = vmatpush.msra.mxu2 %v2303_v6  ;;  %v2231_v5 = vld [vmem:[#allocation2 + $0x718] sm:$0xff]  ;;  %v2230_v6 = vld [vmem:[#allocation2 + $0x710] sm:$0xff] }
 0x3f5   : > { %2726 = vmatmul.f32.gmra.mxu0 %v10553_v22  ;;  %8312 = vmatmul.msk.f32.gmra.mxu1 %vm2466_vm9, %v10592_v63 }
 0x3f6   : > { %2824 = vmatpush.msrb.mxu0 %v2332_v8  ;;  %2866 = vmatpush.msra.mxu2 %v2297_v27  ;;  %v2039_v8 = vld [vmem:[#allocation2 + $0x120] sm:$0xff]  ;;  %v2225_v27 = vld [vmem:[#allocation2 + $0x6e8] sm:$0xff] }
 0x3f7   : > { %2928 = vmatpush.msrb.mxu3 %v2429_v11  ;;  %2651 = vmatmul.f32.gmra.mxu2 %v10547_v18  ;;  %v2224_v11 = vld [vmem:[#allocation2 + $0x6e0] sm:$0xff] }
 0x3f8   : > { %2825 = vmatpush.msrb.mxu0 %v2326_v14  ;;  %2867 = vmatpush.msra.mxu2 %v2291_v15  ;;  %v2033_v14 = vld [vmem:[#allocation2 + $0xf0] sm:$0xff] }
 0x3f9   : > { %2791 = vmatpush.msra.mxu1 %v2278_v17  ;;  %2929 = vmatpush.msrb.mxu3 %v2423_v28  ;;  %v2189_v15 = vld [vmem:[#allocation2 + $0x5d0] sm:$0xff]  ;;  %v2411_v17 = vld [vmem:[#allocation2 + $0xcb8] sm:$0xff] }
 0x3fa   : > { %2826 = vmatpush.msrb.mxu0 %v2320_v19  ;;  %2868 = vmatpush.msra.mxu2 %v2285_v21  ;;  %v2027_v19 = vld [vmem:[#allocation2 + $0xc0] sm:$0xff]  ;;  %v2177_v28 = vld [vmem:[#allocation2 + $0x570] sm:$0xff] }
 0x3fb   : > { %2792 = vmatpush.msra.mxu1 %v2272_v25  ;;  %8318 = vmatmul.msk.f32.gmra.mxu3 %vm2466_vm9, %v10592_v63  ;;  %v2183_v21 = vld [vmem:[#allocation2 + $0x5a0] sm:$0xff]  ;;  %v2021_v25 = vld [vmem:[#allocation2 + $0x90] sm:$0xff] }
 0x3fc   : > { %2947 = vmatpush.msra.mxu0 %v2093_v23  ;;  %2869 = vmatpush.msra.mxu2 %v2279_v26  ;;  %v2405_v23 = vld [vmem:[#allocation2 + $0xc88] sm:$0xff]  ;;  %v2082_v26 = vld [vmem:[#allocation2 + $0x278] sm:$0xff] }
 0x3fd   : > { %2729 = vmatmul.f32.gmra.mxu0 %v10547_v18  ;;  %8313 = vmatmul.msk.f32.vlgmr.msrb.gmra.mxu1 %vm2466_vm9, %v10574_v49 }
 0x3fe   : > { %2948 = vmatpush.msra.mxu0 %v2087_v29  ;;  %2870 = vmatpush.msra.mxu2 %v2273_v30  ;;  %v2399_v29 = vld [vmem:[#allocation2 + $0xc58] sm:$0xff]  ;;  %v2015_v30 = vld [vmem:[#allocation2 + $0x60] sm:$0xff] }
 0x3ff   : > { %2930 = vmatpush.msrb.mxu3 %v2417_v31  ;;  %2749 = vmatmul.f32.vlgmr.msrb.gmra.mxu2 %v10568_v44  ;;  %v2171_v31 = vld [vmem:[#allocation2 + $0x540] sm:$0xff] }
 0x400   : > { %2949 = vmatpush.msra.mxu0 %v2081_v34  ;;  %2871 = vmatpush.msra.mxu2 %v2267_v37  ;;  %v2076_v34 = vld [vmem:[#allocation2 + $0x248] sm:$0xff] }
 0x401   : > { %2793 = vmatpush.msra.mxu1 %v2266_v38  ;;  %v2393_v37 = vld [vmem:[#allocation2 + $0xc28] sm:$0xff]  ;;  %v2009_v38 = vld [vmem:[#allocation2 + $0x30] sm:$0xff] }
 0x402   : > { %2950 = vmatpush.msra.mxu0 %v2075_v39  ;;  %2872 = vmatpush.msra.mxu2 %v2261_v40  ;;  %v2165_v39 = vld [vmem:[#allocation2 + $0x510] sm:$0xff]  ;;  %v2070_v40 = vld [vmem:[#allocation2 + $0x218] sm:$0xff] }
 0x403   : > { %2794 = vmatpush.msra.mxu1 %v2260_v42  ;;  %8319 = vmatmul.msk.f32.vlgmr.msra.gmra.mxu3 %vm2466_vm9, %v10574_v49  ;;  %v2387_v42 = vld [vmem:[#allocation2 + $0xbf8] sm:$0xff] }
 0x404   : > { %2951 = vmatpush.msra.mxu0 %v2069_v43  ;;  %2873 = vmatpush.msra.mxu2 %v2255_v45  ;;  %v2003_v43 = vld [vmem:[#allocation2] sm:$0xff] }
 0x405   : > { %2795 = vmatpush.msra.mxu1 %v2254_v46  ;;  %2827 = vmatmul.f32.vlgmr.msrb.gmra.mxu0 %v10568_v44  ;;  %v2159_v45 = vld [vmem:[#allocation2 + $0x4e0] sm:$0xff]  ;;  %v2064_v46 = vld [vmem:[#allocation2 + $0x1e8] sm:$0xff] }
 0x406   : > { %2952 = vmatpush.msra.mxu0 %v2063_v47  ;;  %2874 = vmatpush.msra.mxu2 %v2249_v48  ;;  %v2381_v47 = vld [vmem:[#allocation2 + $0xbc8] sm:$0xff]  ;;  %v2190_v48 = vld [vmem:[#allocation2 + $0x5d8] sm:$0xff] }
 0x407   : > { %8314 = vmatmul.msk.f32.gmra.mxu1 %vm2466_vm9, %v10597_v4  ;;  %3025 = vmatpush.msra.mxu3 %v2094_v56  ;;  %v2184_v56 = vld [vmem:[#allocation2 + $0x5a8] sm:$0xff] }
 0x408   : > { %2796 = vmatpush.msra.mxu1 %v2248_v50  ;;  %2953 = vmatpush.msra.mxu0 %v2057_v51  ;;  %v2153_v50 = vld [vmem:[#allocation2 + $0x4b0] sm:$0xff]  ;;  %v2058_v51 = vld [vmem:[#allocation2 + $0x1b8] sm:$0xff] }
 0x409   : > { %2875 = vmatpush.msra.mxu2 %v2243_v52  ;;  %3026 = vmatpush.msra.mxu3 %v2088_v1  ;;  %v2375_v52 = vld [vmem:[#allocation2 + $0xb98] sm:$0xff] }
 0x40a   : > { %2752 = vmatmul.f32.gmra.mxu2 %v10589_v62  ;;  %2797 = vmatpush.msra.mxu1 %v2242_v57  ;;  %v2147_v57 = vld [vmem:[#allocation2 + $0x480] sm:$0xff]  ;;  %v2046_v1 = vld [vmem:[#allocation2 + $0x158] sm:$0xff] }
 0x40b   : > { %2954 = vmatpush.msra.mxu0 %v2051_v60  ;;  %2876 = vmatpush.msra.mxu2 %v2237_v61  ;;  %v2052_v60 = vld [vmem:[#allocation2 + $0x188] sm:$0xff] }
 0x40c   : > { %2798 = vmatpush.msra.mxu1 %v2236_v0  ;;  %8320 = vmatmul.msk.f32.gmra.mxu3 %vm2466_vm9, %v10597_v4  ;;  %v2369_v61 = vld [vmem:[#allocation2 + $0xb68] sm:$0xff]  ;;  %v2141_v0 = vld [vmem:[#allocation2 + $0x450] sm:$0xff] }
 0x40d   : > { %2955 = vmatpush.msra.mxu0 %v2045_v2  ;;  %2877 = vmatpush.msra.mxu2 %v2231_v5  ;;  %v2363_v2 = vld [vmem:[#allocation2 + $0xb38] sm:$0xff]  ;;  %v2172_v5 = vld [vmem:[#allocation2 + $0x548] sm:$0xff] }
 0x40e   : > { %2799 = vmatpush.msra.mxu1 %v2230_v6  ;;  %2830 = vmatmul.f32.gmra.mxu0 %v10589_v62  ;;  %v2040_v6 = vld [vmem:[#allocation2 + $0x128] sm:$0xff] }
 0x40f   : > { %2956 = vmatpush.msra.mxu0 %v2039_v8  ;;  %2878 = vmatpush.msra.mxu2 %v2225_v27  ;;  %v2135_v8 = vld [vmem:[#allocation2 + $0x420] sm:$0xff]  ;;  %v2357_v27 = vld [vmem:[#allocation2 + $0xb08] sm:$0xff] }
 0x410   : > { %8315 = vmatmul.msk.f32.gmra.mxu1 %vm2466_vm9, %v10592_v63  ;;  %3027 = vmatpush.msra.mxu3 %v2082_v26  ;;  %v2022_v26 = vld [vmem:[#allocation2 + $0x98] sm:$0xff] }
 0x411   : > { %2800 = vmatpush.msra.mxu1 %v2224_v11  ;;  %2957 = vmatpush.msra.mxu0 %v2033_v14  ;;  %v2034_v11 = vld [vmem:[#allocation2 + $0xf8] sm:$0xff]  ;;  %v2129_v14 = vld [vmem:[#allocation2 + $0x3f0] sm:$0xff] }
 0x412   : > { %2973 = vmatpush.msrb.mxu2 %v2189_v15  ;;  %3028 = vmatpush.msra.mxu3 %v2076_v34  ;;  %v2351_v15 = vld [vmem:[#allocation2 + $0xad8] sm:$0xff]  ;;  %v2333_v34 = vld [vmem:[#allocation2 + $0xa48] sm:$0xff] }
 0x413   : > { %2889 = vmatpush.msrb.mxu1 %v2411_v17  ;;  %2755 = vmatmul.f32.gmra.mxu2 %v10581_v58  ;;  %v2160_v17 = vld [vmem:[#allocation2 + $0x4e8] sm:$0xff] }
 0x414   : > { %2958 = vmatpush.msra.mxu0 %v2027_v19  ;;  %2974 = vmatpush.msrb.mxu2 %v2183_v21  ;;  %v2123_v19 = vld [vmem:[#allocation2 + $0x3c0] sm:$0xff]  ;;  %v2028_v21 = vld [vmem:[#allocation2 + $0xc8] sm:$0xff] }
 0x415   : > { %2890 = vmatpush.msrb.mxu1 %v2405_v23  ;;  %8321 = vmatmul.msk.f32.gmra.mxu3 %vm2466_vm9, %v10592_v63  ;;  %v2345_v23 = vld [vmem:[#allocation2 + $0xaa8] sm:$0xff] }
 0x416   : > { %2959 = vmatpush.msra.mxu0 %v2021_v25  ;;  %2975 = vmatpush.msrb.mxu2 %v2177_v28  ;;  %v2154_v25 = vld [vmem:[#allocation2 + $0x4b8] sm:$0xff] }
 0x417   : > { %2891 = vmatpush.msrb.mxu1 %v2399_v29  ;;  %2833 = vmatmul.f32.gmra.mxu0 %v10581_v58  ;;  %v2339_v28 = vld [vmem:[#allocation2 + $0xa78] sm:$0xff]  ;;  %v2148_v29 = vld [vmem:[#allocation2 + $0x488] sm:$0xff] }
 0x418   : > { %2960 = vmatpush.msra.mxu0 %v2015_v30  ;;  %2976 = vmatpush.msrb.mxu2 %v2171_v31  ;;  %v2016_v30 = vld [vmem:[#allocation2 + $0x68] sm:$0xff]  ;;  %v2111_v31 = vld [vmem:[#allocation2 + $0x360] sm:$0xff] }
 0x419   : > { %2892 = vmatpush.msrb.mxu1 %v2393_v37  ;;  %3029 = vmatpush.msra.mxu3 %v2070_v40  ;;  %v2010_v37 = vld [vmem:[#allocation2 + $0x38] sm:$0xff]  ;;  %v2136_v40 = vld [vmem:[#allocation2 + $0x428] sm:$0xff] }
 0x41a   : > { %2801 = vmatmul.f32.vlgmr.msra.gmra.mxu1 %v10540_v10  ;;  %2961 = vmatpush.msra.mxu0 %v2009_v38  ;;  %v2105_v38 = vld [vmem:[#allocation2 + $0x330] sm:$0xff] }
 0x41b   : > { %2977 = vmatpush.msrb.mxu2 %v2165_v39  ;;  %2893 = vmatpush.msrb.mxu1 %v2387_v42  ;;  %v2327_v39 = vld [vmem:[#allocation2 + $0xa18] sm:$0xff]  ;;  %v2099_v42 = vld [vmem:[#allocation2 + $0x300] sm:$0xff] }
 0x41c   : > { %2879 = vmatmul.f32.vlgmr.msra.gmra.mxu2 %v10540_v10  ;;  %2962 = vmatpush.msra.mxu0 %v2003_v43  ;;  %v2178_v10 = vld [vmem:[#allocation2 + $0x578] sm:$0xff]  ;;  %v2004_v43 = vld [vmem:[#allocation2 + $0x8] sm:$0xff] }
 0x41d   : > { %2978 = vmatpush.msrb.mxu2 %v2159_v45  ;;  %3030 = vmatpush.msra.mxu3 %v2064_v46  ;;  %v2321_v45 = vld [vmem:[#allocation2 + $0x9e8] sm:$0xff]  ;;  %v2130_v46 = vld [vmem:[#allocation2 + $0x3f8] sm:$0xff] }
 0x41e   : > { %2894 = vmatpush.msrb.mxu1 %v2381_v47  ;;  %3051 = vmatpush.msrb.mxu0 %v2190_v48  ;;  %v2095_v47 = vld [vmem:[#allocation2 + $0x2e0] sm:$0xff]  ;;  %v10659_v48 = vpop.f32.mrf.mxu3 }
 0x41f   : > { %2979 = vmatpush.msrb.mxu2 %v2153_v50  ;;  %3031 = vmatpush.msra.mxu3 %v2058_v51  ;;  %v2124_v50 = vld [vmem:[#allocation2 + $0x3c8] sm:$0xff]  ;;  %v2089_v51 = vld [vmem:[#allocation2 + $0x2b0] sm:$0xff] }
 0x420   : > { %2895 = vmatpush.msrb.mxu1 %v2375_v52  ;;  %3052 = vmatpush.msrb.mxu0 %v2184_v56  ;;  %v2185_v52 = vld [vmem:[#allocation2 + $0x5b0] sm:$0xff]  ;;  %v2118_v56 = vld [vmem:[#allocation2 + $0x398] sm:$0xff] }
 0x421   : > { %8322 = vmatmul.msk.f32.vlgmr.msrb.gmra.mxu3 %vm2466_vm9, %v10574_v49  ;;  %2963 = vmatmul.f32.vlgmr.msra.gmra.mxu0 %v10533_v3  ;;  %v2166_v49 = vld [vmem:[#allocation2 + $0x518] sm:$0xff] }
 0x422   : > { %2980 = vmatpush.msrb.mxu2 %v2147_v57  ;;  %3032 = vmatpush.msra.mxu3 %v2052_v60  ;;  %v2179_v60 = vld [vmem:[#allocation2 + $0x580] sm:$0xff] }
 0x423   : > { %2896 = vmatpush.msrb.mxu1 %v2369_v61  ;;  %3053 = vmatpush.msrb.mxu0 %v2178_v10  ;;  %v2213_v61 = vld [vmem:[#allocation2 + $0x690] sm:$0xff]  ;;  %v2112_v10 = vld [vmem:[#allocation2 + $0x368] sm:$0xff] }
 0x424   : > { %2804 = vmatmul.f32.gmra.mxu1 %v10553_v22  ;;  %2981 = vmatpush.msrb.mxu2 %v2141_v0  ;;  %v2077_v0 = vld [vmem:[#allocation2 + $0x250] sm:$0xff] }
 0x425   : > { %3033 = vmatpush.msra.mxu3 %v2046_v1  ;;  %2897 = vmatpush.msrb.mxu1 %v2363_v2  ;;  %v2173_v1 = vld [vmem:[#allocation2 + $0x550] sm:$0xff]  ;;  %v2207_v2 = vld [vmem:[#allocation2 + $0x660] sm:$0xff] }
 0x426   : > { %3054 = vmatpush.msrb.mxu0 %v2172_v5  ;;  %2882 = vmatmul.f32.gmra.mxu2 %v10553_v22  ;;  %v2117_v22 = vld [vmem:[#allocation2 + $0x390] sm:$0xff]  ;;  %v2106_v5 = vld [vmem:[#allocation2 + $0x338] sm:$0xff] }
 0x427   : > { %3034 = vmatpush.msra.mxu3 %v2040_v6  ;;  %2982 = vmatpush.msrb.mxu2 %v2135_v8  ;;  %v2167_v6 = vld [vmem:[#allocation2 + $0x520] sm:$0xff]  ;;  %v2100_v8 = vld [vmem:[#allocation2 + $0x308] sm:$0xff] }
 0x428   : > { %2898 = vmatpush.msrb.mxu1 %v2357_v27  ;;  %3055 = vmatpush.msrb.mxu0 %v2166_v49  ;;  %v2065_v49 = vld [vmem:[#allocation2 + $0x1f0] sm:$0xff] }
 0x429   : > { %3035 = vmatpush.msra.mxu3 %v2034_v11  ;;  %2983 = vmatpush.msrb.mxu2 %v2129_v14  ;;  %v2161_v11 = vld [vmem:[#allocation2 + $0x4f0] sm:$0xff] }
 0x42a   : > { %2899 = vmatpush.msrb.mxu1 %v2351_v15  ;;  %3056 = vmatpush.msrb.mxu0 %v2160_v17  ;;  %v2059_v15 = vld [vmem:[#allocation2 + $0x1c0] sm:$0xff] }
 0x42b   : > { %8323 = vmatmul.msk.f32.gmra.mxu3 %vm2466_vm9, %v10597_v4  ;;  %2966 = vmatmul.f32.gmra.mxu0 %v10536_v7  ;;  %v2142_v4 = vld [vmem:[#allocation2 + $0x458] sm:$0xff]  ;;  %v2155_v17 = vld [vmem:[#allocation2 + $0x4c0] sm:$0xff] }
 0x42c   : > { %2984 = vmatpush.msrb.mxu2 %v2123_v19  ;;  %3036 = vmatpush.msra.mxu3 %v2028_v21  ;;  %v10671_v19 = vpop.f32.mrf.mxu1  ;;  %v2215_v21 = vld [vmem:[#allocation2 + $0x6a0] sm:$0xff] }
 0x42d   : > { %2900 = vmatpush.msrb.mxu1 %v2345_v23  ;;  %3057 = vmatpush.msrb.mxu0 %v2154_v25  ;;  %v2201_v23 = vld [vmem:[#allocation2 + $0x630] sm:$0xff] }
 0x42e   : > { %2807 = vmatmul.f32.gmra.mxu1 %v10547_v18  ;;  %2985 = vmatpush.msrb.mxu2 %v2117_v22  ;;  %v2053_v25 = vld [vmem:[#allocation2 + $0x190] sm:$0xff] }
 0x42f   : > { %3037 = vmatpush.msra.mxu3 %v2022_v26  ;;  %2901 = vmatpush.msrb.mxu1 %v2339_v28  ;;  %v2149_v22 = vld [vmem:[#allocation2 + $0x490] sm:$0xff]  ;;  %v2143_v28 = vld [vmem:[#allocation2 + $0x460] sm:$0xff] }
 0x430   : > { %3058 = vmatpush.msrb.mxu0 %v2148_v29  ;;  %2885 = vmatmul.f32.gmra.mxu2 %v10547_v18  ;;  %v2191_v18 = vld [vmem:[#allocation2 + $0x5e0] sm:$0xff]  ;;  %v2209_v26 = vld [vmem:[#allocation2 + $0x670] sm:$0xff] }
 0x431   : > { %3038 = vmatpush.msra.mxu3 %v2016_v30  ;;  %2986 = vmatpush.msrb.mxu2 %v2111_v31  ;;  %v2203_v29 = vld [vmem:[#allocation2 + $0x640] sm:$0xff]  ;;  %v2041_v31 = vld [vmem:[#allocation2 + $0x130] sm:$0xff] }
 0x432   : > { %2902 = vmatpush.msrb.mxu1 %v2333_v34  ;;  %3059 = vmatpush.msrb.mxu0 %v2142_v4  ;;  %v2137_v34 = vld [vmem:[#allocation2 + $0x430] sm:$0xff] }
 0x433   : > { %3039 = vmatpush.msra.mxu3 %v2010_v37  ;;  %2987 = vmatpush.msrb.mxu2 %v2105_v38  ;;  %v2035_v37 = vld [vmem:[#allocation2 + $0x100] sm:$0xff] }
 0x434   : > { %2903 = vmatpush.msrb.mxu1 %v2327_v39  ;;  %3060 = vmatpush.msrb.mxu0 %v2136_v40  ;;  %v2131_v38 = vld [vmem:[#allocation2 + $0x400] sm:$0xff]  ;;  %v2197_v39 = vld [vmem:[#allocation2 + $0x610] sm:$0xff] }
 0x435   : > { %8324 = vmatmul.msk.f32.gmra.mxu3 %vm2466_vm9, %v10592_v63  ;;  %2969 = vmatmul.f32.gmra.mxu0 %v10544_v16  ;;  %v2083_v63 = vld [vmem:[#allocation2 + $0x280] sm:$0xff] }
 0x436   : > { %2988 = vmatpush.msrb.mxu2 %v2099_v42  ;;  %3040 = vmatpush.msra.mxu3 %v2004_v43  ;;  %v2195_v40 = vld [vmem:[#allocation2 + $0x600] sm:$0xff]  ;;  %v10683_v43 = vpop.f32.mrf.mxu2 }
 0x437   : > { %2904 = vmatpush.msrb.mxu1 %v2321_v45  ;;  %3061 = vmatpush.msrb.mxu0 %v2130_v46  ;;  %v2097_v45 = vld [vmem:[#allocation2 + $0x2f0] sm:$0xff] }
 0x438   : > { %3103 = vmatpush.msra.mxu2 %v2095_v47  ;;  %3129 = vmatpush.msrb.mxu3 %v2191_v18  ;;  %v10662_v57 = vpop.f32.mrf.mxu0  ;;  %v2029_v46 = vld [vmem:[#allocation2 + $0xd0] sm:$0xff]  ;;  %v2214_v47 = vld [vmem:[#allocation2 + $0x698] sm:$0xff]  ;;  %v2091_v18 = vld [vmem:[#allocation2 + $0x2c0] sm:$0xff] }
 0x439   : > { %2905 = vmatmul.f32.vlgmr.msrb.gmra.mxu1 %v10568_v44  ;;  %3062 = vmatpush.msrb.mxu0 %v2124_v50  ;;  %v2071_v44 = vld [vmem:[#allocation2 + $0x220] sm:$0xff] }
 0x43a   : > { %3104 = vmatpush.msra.mxu2 %v2089_v51  ;;  %3130 = vmatpush.msrb.mxu3 %v2185_v52  ;;  %v2023_v50 = vld [vmem:[#allocation2 + $0xa0] sm:$0xff] }
 0x43b   : > { %2989 = vmatmul.f32.vlgmr.msrb.gmra.mxu2 %v10549_v20  ;;  %3063 = vmatpush.msrb.mxu0 %v2118_v56  ;;  %v2119_v51 = vld [vmem:[#allocation2 + $0x3a0] sm:$0xff]  ;;  %v2085_v56 = vld [vmem:[#allocation2 + $0x290] sm:$0xff] }
 0x43c   : > { %3105 = vmatpush.msra.mxu2 %v2083_v63  ;;  %3131 = vmatpush.msrb.mxu3 %v2179_v60  ;;  %v2017_v63 = vld [vmem:[#allocation2 + $0x70] sm:$0xff] }
 0x43d   : > { %3011 = vmatpush.msra.mxu1 %v2213_v61  ;;  %3064 = vmatpush.msrb.mxu0 %v2112_v10  ;;  %v2113_v60 = vld [vmem:[#allocation2 + $0x370] sm:$0xff]  ;;  %v2208_v10 = vld [vmem:[#allocation2 + $0x668] sm:$0xff] }
 0x43e   : > { %3106 = vmatpush.msra.mxu2 %v2077_v0  ;;  %3132 = vmatpush.msrb.mxu3 %v2173_v1  ;;  %v10665_v27 = vpop.f32.mrf.mxu3  ;;  %v2079_v0 = vld [vmem:[#allocation2 + $0x260] sm:$0xff] }
 0x43f   : > { %14200 = vst [vmem:[#allocation16_spill] sm:$0xff] %v10665_v27  ;;  %3012 = vmatpush.msra.mxu1 %v2207_v2  ;;  %3041 = vmatmul.f32.vlgmr.msra.gmra.mxu3 %v10533_v3  ;;  %v2011_v1 = vld [vmem:[#allocation2 + $0x40] sm:$0xff]  ;;  %v4357_v27 = vld [vmem:[#allocation2 + $0x1ad8] sm:$0xff] }
 0x440   : > { %3065 = vmatpush.msrb.mxu0 %v2106_v5  ;;  %3107 = vmatpush.msra.mxu2 %v2071_v44  ;;  %v10668_v14 = vpop.f32.mrf.mxu0  ;;  %v2107_v5 = vld [vmem:[#allocation2 + $0x340] sm:$0xff]  ;;  %v2202_v44 = vld [vmem:[#allocation2 + $0x638] sm:$0xff] }
 0x441   : > { %3133 = vmatpush.msrb.mxu3 %v2167_v6  ;;  %2908 = vmatmul.f32.gmra.mxu1 %v10589_v62  ;;  %v2047_v62 = vld [vmem:[#allocation2 + $0x160] sm:$0xff] }
 0x442   : > { %3066 = vmatpush.msrb.mxu0 %v2100_v8  ;;  %3108 = vmatpush.msra.mxu2 %v2065_v49  ;;  %v2073_v8 = vld [vmem:[#allocation2 + $0x230] sm:$0xff] }
 0x443   : > { %3134 = vmatpush.msrb.mxu3 %v2161_v11  ;;  %2992 = vmatmul.f32.gmra.mxu2 %v10559_v35  ;;  %v2005_v49 = vld [vmem:[#allocation2 + $0x10] sm:$0xff] }
 0x444   : > { %3067 = vmatmul.f32.vlgmr.msrb.gmra.mxu0 %v10549_v20  ;;  %3109 = vmatpush.msra.mxu2 %v2059_v15  ;;  %v2101_v11 = vld [vmem:[#allocation2 + $0x310] sm:$0xff]  ;;  %v2192_v15 = vld [vmem:[#allocation2 + $0x5e8] sm:$0xff] }
 0x445   : > { %3135 = vmatpush.msrb.mxu3 %v2155_v17  ;;  %3167 = vmatpush.msra.mxu0 %v2215_v21  ;;  %v2067_v21 = vld [vmem:[#allocation2 + $0x200] sm:$0xff] }
 0x446   : > { %3013 = vmatpush.msra.mxu1 %v2201_v23  ;;  %3110 = vmatpush.msra.mxu2 %v2053_v25  ;;  %v10675_v30 = vpop.f32.mrf.mxu3  ;;  %v2186_v23 = vld [vmem:[#allocation2 + $0x5b8] sm:$0xff]  ;;  %v2196_v25 = vld [vmem:[#allocation2 + $0x608] sm:$0xff] }
 0x447   : > { %3136 = vmatpush.msrb.mxu3 %v2149_v22  ;;  %14201 = vst [vmem:[#allocation17_spill] sm:$0xff] %v10675_v30  ;;  %3168 = vmatpush.msra.mxu0 %v2209_v26  ;;  %v2061_v22 = vld [vmem:[#allocation2 + $0x1d0] sm:$0xff]  ;;  %v2216_v26 = vld [vmem:[#allocation2 + $0x6a8] sm:$0xff] }
 0x448   : > { %3044 = vmatmul.f32.gmra.mxu3 %v10536_v7  ;;  %3111 = vmatpush.msra.mxu2 %v2047_v62  ;;  %v10678_v4 = vpop.f32.mrf.mxu0 }
 0x449   : > { %3137 = vmatpush.msrb.mxu3 %v2143_v28  ;;  %2911 = vmatmul.f32.gmra.mxu1 %v10581_v58  ;;  %v2125_v58 = vld [vmem:[#allocation2 + $0x3d0] sm:$0xff]  ;;  %v2096_v28 = vld [vmem:[#allocation2 + $0x2e8] sm:$0xff] }
 0x44a   : > { %3169 = vmatpush.msra.mxu0 %v2203_v29  ;;  %3112 = vmatpush.msra.mxu2 %v2041_v31  ;;  %v10681_v42 = vpop.f32.mrf.mxu1  ;;  %v2180_v31 = vld [vmem:[#allocation2 + $0x588] sm:$0xff] }
 0x44b   : > { %3138 = vmatpush.msrb.mxu3 %v2137_v34  ;;  %2995 = vmatmul.f32.gmra.mxu2 %v10578_v53  ;;  %v2055_v34 = vld [vmem:[#allocation2 + $0x1a0] sm:$0xff] }
 0x44c   : > { %3070 = vmatmul.f32.gmra.mxu0 %v10559_v35  ;;  %3113 = vmatpush.msra.mxu2 %v2035_v37  ;;  %v2210_v37 = vld [vmem:[#allocation2 + $0x678] sm:$0xff] }
 0x44d   : > { %3139 = vmatpush.msrb.mxu3 %v2131_v38  ;;  %3170 = vmatpush.msra.mxu0 %v2197_v39  ;;  %v2090_v38 = vld [vmem:[#allocation2 + $0x2b8] sm:$0xff] }
 0x44e   : > { %3014 = vmatpush.msra.mxu1 %v2195_v40  ;;  %3114 = vmatpush.msra.mxu2 %v2029_v46  ;;  %v10687_v52 = vpop.f32.mrf.mxu3  ;;  %v2174_v39 = vld [vmem:[#allocation2 + $0x558] sm:$0xff]  ;;  %v2049_v40 = vld [vmem:[#allocation2 + $0x170] sm:$0xff]  ;;  %v2204_v46 = vld [vmem:[#allocation2 + $0x648] sm:$0xff] }
 0x44f   : > { %3259 = vmatpush.msrb.mxu0 %v2097_v45  ;;  %14202 = vst [vmem:[#allocation18_spill] sm:$0xff] %v10687_v52  ;;  %3140 = vmatpush.msrb.mxu3 %v2125_v58  ;;  %v4346_v52 = vld [vmem:[#allocation2 + $0x1a80] sm:$0xff] }
 0x450   : > { %3089 = vmatpush.msrb.mxu1 %v2214_v47  ;;  %3047 = vmatmul.f32.gmra.mxu3 %v10544_v16  ;;  %v10690_v61 = vpop.f32.mrf.mxu0  ;;  %v2084_v47 = vld [vmem:[#allocation2 + $0x288] sm:$0xff] }
 0x451   : > { %3260 = vmatpush.msrb.mxu0 %v2091_v18  ;;  %14203 = vst [vmem:[#allocation19_spill] sm:$0xff] %v10690_v61  ;;  %3115 = vmatpush.msra.mxu2 %v2023_v50  ;;  %v2168_v18 = vld [vmem:[#allocation2 + $0x528] sm:$0xff]  ;;  %v2043_v50 = vld [vmem:[#allocation2 + $0x140] sm:$0xff]  ;;  %v4248_v61 = vld [vmem:[#allocation2 + $0x1770] sm:$0xff] }
 0x452   : > { %3141 = vmatpush.msrb.mxu3 %v2119_v51  ;;  %8325 = vmatmul.msk.f32.vlgmr.msra.gmra.mxu1 %vm2466_vm9, %v10555_v12  ;;  %v10694_v2 = vpop.f32.mrf.mxu1  ;;  %v10696_v6 = vpop.f32.mrf.mxu2  ;;  %v2198_v51 = vld [vmem:[#allocation2 + $0x618] sm:$0xff] }
 0x453   : > { %3261 = vmatpush.msrb.mxu0 %v2085_v56  ;;  %3116 = vmatpush.msra.mxu2 %v2017_v63  ;;  %v2078_v63 = vld [vmem:[#allocation2 + $0x258] sm:$0xff] }
 0x454   : > { %3142 = vmatpush.msrb.mxu3 %v2113_v60  ;;  %3073 = vmatmul.f32.gmra.mxu0 %v10578_v53  ;;  %v2162_v60 = vld [vmem:[#allocation2 + $0x4f8] sm:$0xff] }
 0x455   : > { %3090 = vmatpush.msrb.mxu1 %v2208_v10  ;;  %3262 = vmatpush.msrb.mxu0 %v2079_v0  ;;  %v2037_v0 = vld [vmem:[#allocation2 + $0x110] sm:$0xff] }
 0x456   : > { %3117 = vmatpush.msra.mxu2 %v2011_v1  ;;  %3143 = vmatpush.msrb.mxu3 %v2107_v5  ;;  %v10699_v17 = vpop.f32.mrf.mxu3  ;;  %v2098_v1 = vld [vmem:[#allocation2 + $0x2f8] sm:$0xff]  ;;  %v2072_v5 = vld [vmem:[#allocation2 + $0x228] sm:$0xff] }
 0x457   : > { %3091 = vmatpush.msrb.mxu1 %v2202_v44  ;;  %14204 = vst [vmem:[#allocation20_spill] sm:$0xff] %v10699_v17  ;;  %3263 = vmatpush.msrb.mxu0 %v2073_v8  ;;  %v2156_v44 = vld [vmem:[#allocation2 + $0x4c8] sm:$0xff]  ;;  %v2031_v8 = vld [vmem:[#allocation2 + $0xe0] sm:$0xff]  ;;  %v3555_v17 = vld [vmem:[#allocation2 + $0x11d8] sm:$0xff] }
 0x458   : > { %3118 = vmatpush.msra.mxu2 %v2005_v49  ;;  %3144 = vmatpush.msrb.mxu3 %v2101_v11  ;;  %v10703_v62 = vpop.f32.mrf.mxu0  ;;  %v2092_v49 = vld [vmem:[#allocation2 + $0x2c8] sm:$0xff]  ;;  %v2066_v11 = vld [vmem:[#allocation2 + $0x1f8] sm:$0xff] }
 0x459   : > { %3119 = vmatmul.f32.vlgmr.msra.gmra.mxu2 %v10533_v3  ;;  %3145 = vmatmul.f32.vlgmr.msrb.gmra.mxu3 %v10549_v20  ;;  %14205 = vst [vmem:[#allocation21_spill] sm:$0xff] %v10703_v62  ;;  %v4154_v62 = vld [vmem:[#allocation2 + $0x1480] sm:$0xff] }
 0x45a   : > { %3207 = vmatpush.msrb.mxu2 %v2192_v15  ;;  %3264 = vmatpush.msrb.mxu0 %v2067_v21  ;;  %v10707_v29 = vpop.f32.mrf.mxu1  ;;  %v10711_v45 = vpop.f32.mrf.mxu2  ;;  %v2150_v21 = vld [vmem:[#allocation2 + $0x498] sm:$0xff] }
 0x45b   : > { %8326 = vmatmul.msk.f32.gmra.mxu1 %vm2466_vm9, %v10563_v41  ;;  %3245 = vmatpush.msra.mxu3 %v2216_v26  ;;  %v2060_v26 = vld [vmem:[#allocation2 + $0x1c8] sm:$0xff] }
 0x45c   : > { %3208 = vmatpush.msrb.mxu2 %v2186_v23  ;;  %3092 = vmatpush.msrb.mxu1 %v2196_v25  ;;  %v2025_v23 = vld [vmem:[#allocation2 + $0xb0] sm:$0xff] }
 0x45d   : > { %3265 = vmatpush.msrb.mxu0 %v2061_v22  ;;  %3246 = vmatpush.msra.mxu3 %v2210_v37  ;;  %v2086_v22 = vld [vmem:[#allocation2 + $0x298] sm:$0xff] }
 0x45e   : > { %8331 = vmatmul.msk.f32.vlgmr.msra.gmra.mxu0 %vm2466_vm9, %v10555_v12  ;;  %3181 = vmatpush.msra.mxu1 %v2096_v28  ;;  %v10713_v58 = vpop.f32.mrf.mxu3 }
 0x45f   : > { %3209 = vmatpush.msrb.mxu2 %v2180_v31  ;;  %3266 = vmatpush.msrb.mxu0 %v2055_v34  ;;  %14206 = vst [vmem:[#allocation22_spill] sm:$0xff] %v10713_v58  ;;  %v2144_v31 = vld [vmem:[#allocation2 + $0x468] sm:$0xff]  ;;  %v2019_v34 = vld [vmem:[#allocation2 + $0x80] sm:$0xff]  ;;  %v3491_v58 = vld [vmem:[#allocation2 + $0xfd8] sm:$0xff] }
 0x460   : > { %3182 = vmatpush.msra.mxu1 %v2090_v38  ;;  %3247 = vmatpush.msra.mxu3 %v2204_v46  ;;  %v10716_v56 = vpop.f32.mrf.mxu0  ;;  %v2080_v38 = vld [vmem:[#allocation2 + $0x268] sm:$0xff]  ;;  %v2013_v46 = vld [vmem:[#allocation2 + $0x50] sm:$0xff] }
 0x461   : > { %3210 = vmatpush.msrb.mxu2 %v2174_v39  ;;  %3267 = vmatpush.msrb.mxu0 %v2049_v40  ;;  %14207 = vst [vmem:[#allocation23_spill] sm:$0xff] %v10716_v56  ;;  %v2054_v39 = vld [vmem:[#allocation2 + $0x198] sm:$0xff]  ;;  %v4352_v56 = vld [vmem:[#allocation2 + $0x1ab0] sm:$0xff] }
 0x462   : > { %3122 = vmatmul.f32.gmra.mxu2 %v10536_v7  ;;  %3148 = vmatmul.f32.gmra.mxu3 %v10559_v35  ;;  %v10719_v10 = vpop.f32.mrf.mxu1  ;;  %v10727_v25 = vpop.f32.mrf.mxu2  ;;  %v2138_v40 = vld [vmem:[#allocation2 + $0x438] sm:$0xff] }
 0x463   : > { %3183 = vmatpush.msra.mxu1 %v2084_v47  ;;  %14208 = vst [vmem:[#allocation24_spill] sm:$0xff] %v10719_v10  ;;  %3211 = vmatpush.msrb.mxu2 %v2168_v18  ;;  %v2074_v47 = vld [vmem:[#allocation2 + $0x238] sm:$0xff]  ;;  %v2048_v18 = vld [vmem:[#allocation2 + $0x168] sm:$0xff] }
 0x464   : > { %3268 = vmatpush.msrb.mxu0 %v2043_v50  ;;  %3248 = vmatpush.msra.mxu3 %v2198_v51  ;;  %v2132_v51 = vld [vmem:[#allocation2 + $0x408] sm:$0xff] }
 0x465   : > { %8327 = vmatmul.msk.f32.gmra.mxu1 %vm2466_vm9, %v10583_v59  ;;  %3212 = vmatpush.msrb.mxu2 %v2162_v60  ;;  %v2068_v60 = vld [vmem:[#allocation2 + $0x208] sm:$0xff] }
 0x466   : > { %3184 = vmatpush.msra.mxu1 %v2078_v63  ;;  %3269 = vmatpush.msrb.mxu0 %v2037_v0  ;;  %v10723_v15 = vpop.f32.mrf.mxu3  ;;  %v2007_v63 = vld [vmem:[#allocation2 + $0x20] sm:$0xff]  ;;  %v2194_v0 = vld [vmem:[#allocation2 + $0x5f8] sm:$0xff] }
 0x467   : > { %3337 = vmatpush.msrb.mxu3 %v2098_v1  ;;  %14209 = vst [vmem:[#allocation25_spill] sm:$0xff] %v10723_v15  ;;  %8332 = vmatmul.msk.f32.gmra.mxu0 %vm2466_vm9, %v10563_v41  ;;  %v2042_v1 = vld [vmem:[#allocation2 + $0x138] sm:$0xff] }
 0x468   : > { %3185 = vmatpush.msra.mxu1 %v2072_v5  ;;  %3213 = vmatpush.msrb.mxu2 %v2156_v44  ;;  %v2126_v5 = vld [vmem:[#allocation2 + $0x3d8] sm:$0xff] }
 0x469   : > { %3270 = vmatpush.msrb.mxu0 %v2031_v8  ;;  %3338 = vmatpush.msrb.mxu3 %v2092_v49  ;;  %v2062_v8 = vld [vmem:[#allocation2 + $0x1d8] sm:$0xff]  ;;  %v2188_v49 = vld [vmem:[#allocation2 + $0x5c8] sm:$0xff] }
 0x46a   : > { %3186 = vmatpush.msra.mxu1 %v2066_v11  ;;  %v10729_v28 = vpop.f32.mrf.mxu0  ;;  %3214 = vmatpush.msrb.mxu2 %v2150_v21  ;;  %v10731_v37 = vpop.f32.mrf.mxu1  ;;  %v2036_v21 = vld [vmem:[#allocation2 + $0x108] sm:$0xff]  ;;  %v3503_v15 = vld [vmem:[#allocation2 + $0x1038] sm:$0xff] }
 0x46b   : > { %14210 = vst [vmem:[#allocation26_spill] sm:$0xff] %v10729_v28  ;;  %3271 = vmatpush.msrb.mxu0 %v2025_v23  ;;  %3339 = vmatpush.msrb.mxu3 %v2086_v22  ;;  %v10741_v44 = vpop.f32.mrf.mxu2  ;;  %v2120_v23 = vld [vmem:[#allocation2 + $0x3a8] sm:$0xff]  ;;  %v3615_v28 = vld [vmem:[#allocation2 + $0x13b8] sm:$0xff] }
 0x46c   : > { %14211 = vst [vmem:[#allocation27_spill] sm:$0xff] %v10731_v37  ;;  %3125 = vmatmul.f32.gmra.mxu2 %v10544_v16  ;;  %3151 = vmatmul.f32.gmra.mxu3 %v10578_v53  ;;  %v4292_v37 = vld [vmem:[#allocation2 + $0x18d0] sm:$0xff] }
 0x46d   : > { %3187 = vmatpush.msra.mxu1 %v2060_v26  ;;  %3215 = vmatpush.msrb.mxu2 %v2144_v31  ;;  %14213 = vst [vmem:[#allocation29_spill] sm:$0xff] %v10741_v44  ;;  %v2182_v26 = vld [vmem:[#allocation2 + $0x598] sm:$0xff]  ;;  %v2056_v31 = vld [vmem:[#allocation2 + $0x1a8] sm:$0xff]  ;;  %v14250_v44 = vrot.slane %v10536_v7, 2 }
 0x46e   : > { %3272 = vmatpush.msrb.mxu0 %v2019_v34  ;;  %3340 = vmatpush.msrb.mxu3 %v2080_v38  ;;  %v10737_v50 = vpop.f32.mrf.mxu3  ;;  %v2030_v34 = vld [vmem:[#allocation2 + $0xd8] sm:$0xff] }
 0x46f   : > { %8328 = vmatmul.msk.f32.vlgmr.msrb.gmra.mxu1 %vm2466_vm9, %v10555_v12  ;;  %14212 = vst [vmem:[#allocation28_spill] sm:$0xff] %v10737_v50  ;;  %3216 = vmatpush.msrb.mxu2 %v2138_v40  ;;  %v2114_v38 = vld [vmem:[#allocation2 + $0x378] sm:$0xff]  ;;  %v2176_v40 = vld [vmem:[#allocation2 + $0x568] sm:$0xff]  ;;  %v3584_v50 = vld [vmem:[#allocation2 + $0x12c0] sm:$0xff] }
 0x470   : > { %3188 = vmatpush.msra.mxu1 %v2054_v39  ;;  %3273 = vmatpush.msrb.mxu0 %v2013_v46  ;;  %v2050_v39 = vld [vmem:[#allocation2 + $0x178] sm:$0xff] }
 0x471   : > { %3341 = vmatpush.msrb.mxu3 %v2074_v47  ;;  %8333 = vmatmul.msk.f32.gmra.mxu0 %vm2466_vm9, %v10583_v59  ;;  %v2024_v47 = vld [vmem:[#allocation2 + $0xa8] sm:$0xff] }
 0x472   : > { %3189 = vmatpush.msra.mxu1 %v2048_v18  ;;  %3217 = vmatpush.msrb.mxu2 %v2132_v51  ;;  %v10743_v11 = vpop.f32.mrf.mxu0  ;;  %v10745_v22 = vpop.f32.mrf.mxu1  ;;  %v2108_v18 = vld [vmem:[#allocation2 + $0x348] sm:$0xff] }
 0x473   : > { %3274 = vmatpush.msrb.mxu0 %v2007_v63  ;;  %14214 = vst [vmem:[#allocation30_spill] sm:$0xff] %v10743_v11  ;;  %3342 = vmatpush.msrb.mxu3 %v2068_v60  ;;  %v2044_v51 = vld [vmem:[#allocation2 + $0x148] sm:$0xff]  ;;  %v2170_v63 = vld [vmem:[#allocation2 + $0x538] sm:$0xff] }
 0x474   : > { %14215 = vst [vmem:[#allocation31_spill] sm:$0xff] %v10745_v22  ;;  %3190 = vmatpush.msra.mxu1 %v2042_v1  ;;  %3218 = vmatpush.msrb.mxu2 %v2126_v5  ;;  %v2018_v60 = vld [vmem:[#allocation2 + $0x78] sm:$0xff]  ;;  %v10753_v5 = vpop.f32.mrf.mxu2 }
 0x475   : > { %3363 = vmatpush.msra.mxu0 %v2194_v0  ;;  %3343 = vmatpush.msrb.mxu3 %v2062_v8  ;;  %v2102_v0 = vld [vmem:[#allocation2 + $0x318] sm:$0xff]  ;;  %14217 = vst [vmem:[#allocation33_spill] sm:$0xff] %v10753_v5 }
 0x476   : > { %3191 = vmatpush.msra.mxu1 %v2036_v21  ;;  %3219 = vmatpush.msrb.mxu2 %v2120_v23  ;;  %v10749_v46 = vpop.f32.mrf.mxu3  ;;  %v2038_v1 = vld [vmem:[#allocation2 + $0x118] sm:$0xff]  ;;  %v2012_v23 = vld [vmem:[#allocation2 + $0x48] sm:$0xff] }
 0x477   : > { %3364 = vmatpush.msra.mxu0 %v2188_v49  ;;  %8334 = vmatmul.msk.f32.vlgmr.msra.gmra.mxu3 %vm2466_vm9, %v10555_v12  ;;  %14216 = vst [vmem:[#allocation32_spill] sm:$0xff] %v10749_v46  ;;  %v2164_v49 = vld [vmem:[#allocation2 + $0x508] sm:$0xff]  ;;  %v2122_v46 = vld [vmem:[#allocation2 + $0x3b8] sm:$0xff] }
 0x478   : > { %3344 = vmatpush.msrb.mxu3 %v2056_v31  ;;  %8329 = vmatmul.msk.f32.gmra.mxu1 %vm2466_vm9, %v10563_v41  ;;  %v2158_v31 = vld [vmem:[#allocation2 + $0x4d8] sm:$0xff] }
 0x479   : > { %3365 = vmatpush.msra.mxu0 %v2182_v26  ;;  %3192 = vmatpush.msra.mxu1 %v2030_v34  ;;  %v2032_v26 = vld [vmem:[#allocation2 + $0xe8] sm:$0xff]  ;;  %v2217_v34 = vld [vmem:[#allocation2 + $0x6b0] sm:$0xff]  ;;  %v3479_v5 = vld [vmem:[#allocation2 + $0xf78] sm:$0xff] }
 0x47a   : > { %3220 = vmatpush.msrb.mxu2 %v2114_v38  ;;  %3345 = vmatpush.msrb.mxu3 %v2050_v39  ;;  %v10755_v8 = vpop.f32.mrf.mxu1  ;;  %v10758_v21 = vpop.f32.mrf.mxu0  ;;  %v2006_v39 = vld [vmem:[#allocation2 + $0x18] sm:$0xff] }
 0x47b   : > { %3366 = vmatpush.msra.mxu0 %v2176_v40  ;;  %3193 = vmatpush.msra.mxu1 %v2024_v47  ;;  %14218 = vst [vmem:[#allocation34_spill] sm:$0xff] %v10755_v8  ;;  %v2026_v40 = vld [vmem:[#allocation2 + $0xb8] sm:$0xff]  ;;  %v2193_v47 = vld [vmem:[#allocation2 + $0x5f0] sm:$0xff] }
 0x47c   : > { %3221 = vmatpush.msrb.mxu2 %v2108_v18  ;;  %3275 = vmatmul.f32.vlgmr.msrb.gmra.mxu0 %v10533_v3  ;;  %14219 = vst [vmem:[#allocation35_spill] sm:$0xff] %v10758_v21  ;;  %v2152_v18 = vld [vmem:[#allocation2 + $0x4a8] sm:$0xff]  ;;  %v3476_v21 = vld [vmem:[#allocation2 + $0xf60] sm:$0xff]  ;;  %v4177_v22 = vld [vmem:[#allocation2 + $0x1538] sm:$0xff] }
 0x47d   : > { %3346 = vmatpush.msrb.mxu3 %v2044_v51  ;;  %3367 = vmatpush.msra.mxu0 %v2170_v63  ;;  %v2211_v51 = vld [vmem:[#allocation2 + $0x680] sm:$0xff]  ;;  %v2020_v63 = vld [vmem:[#allocation2 + $0x88] sm:$0xff] }
 0x47e   : > { %3194 = vmatpush.msra.mxu1 %v2018_v60  ;;  %3222 = vmatpush.msrb.mxu2 %v2102_v0  ;;  %v10761_v38 = vpop.f32.mrf.mxu3  ;;  %v2187_v60 = vld [vmem:[#allocation2 + $0x5c0] sm:$0xff] }
 0x47f   : > { %3347 = vmatpush.msrb.mxu3 %v2038_v1  ;;  %3223 = vmatmul.f32.vlgmr.msrb.gmra.mxu2 %v10549_v20  ;;  %14220 = vst [vmem:[#allocation36_spill] sm:$0xff] %v10761_v38  ;;  %v2146_v1 = vld [vmem:[#allocation2 + $0x478] sm:$0xff]  ;;  %v3506_v38 = vld [vmem:[#allocation2 + $0x1050] sm:$0xff] }
 0x480   : > { %3368 = vmatpush.msra.mxu0 %v2164_v49  ;;  %3195 = vmatpush.msra.mxu1 %v2012_v23  ;;  %v2205_v49 = vld [vmem:[#allocation2 + $0x650] sm:$0xff]  ;;  %v2014_v23 = vld [vmem:[#allocation2 + $0x58] sm:$0xff] }
 0x481   : > { %8335 = vmatmul.msk.f32.gmra.mxu3 %vm2466_vm9, %v10563_v41  ;;  %8330 = vmatmul.msk.f32.gmra.mxu1 %vm2466_vm9, %v10583_v59 }
 0x482   : > { %3348 = vmatpush.msrb.mxu3 %v2032_v26  ;;  %3369 = vmatpush.msra.mxu0 %v2158_v31  ;;  %v10770_v26 = vpop.f32.mrf.mxu2  ;;  %v2181_v31 = vld [vmem:[#allocation2 + $0x590] sm:$0xff] }
 0x483   : > { %3323 = vmatpush.msra.mxu2 %v2217_v34  ;;  %3196 = vmatpush.msra.mxu1 %v2006_v39  ;;  %14222 = vst [vmem:[#allocation38_spill] sm:$0xff] %v10770_v26  ;;  %v2140_v34 = vld [vmem:[#allocation2 + $0x448] sm:$0xff]  ;;  %v10772_v39 = vpop.f32.mrf.mxu0 }
 0x484   : > { %3349 = vmatpush.msrb.mxu3 %v2026_v40  ;;  %v10767_v0 = vpop.f32.mrf.mxu1  ;;  %3370 = vmatpush.msra.mxu0 %v2152_v18  ;;  %14223 = vst [vmem:[#allocation39_spill] sm:$0xff] %v10772_v39  ;;  %v2199_v40 = vld [vmem:[#allocation2 + $0x620] sm:$0xff] }
 0x485   : > { %14221 = vst [vmem:[#allocation37_spill] sm:$0xff] %v10767_v0  ;;  %3285 = vmatpush.msrb.mxu1 %v2193_v47  ;;  %3278 = vmatmul.f32.gmra.mxu0 %v10536_v7  ;;  %v2008_v47 = vld [vmem:[#allocation2 + $0x28] sm:$0xff]  ;;  %v2175_v18 = vld [vmem:[#allocation2 + $0x560] sm:$0xff] }
 0x486   : > { %3324 = vmatpush.msra.mxu2 %v2211_v51  ;;  %3350 = vmatpush.msrb.mxu3 %v2020_v63  ;;  %v10775_v54 = vpop.f32.mrf.mxu3  ;;  %v2134_v51 = vld [vmem:[#allocation2 + $0x418] sm:$0xff]  ;;  %v3602_v63 = vld [vmem:[#allocation2 + $0x1350] sm:$0xff]  ;;  %v3620_v39 = vld [vmem:[#allocation2 + $0x13e0] sm:$0xff] }
 0x487   : > { %3286 = vmatpush.msrb.mxu1 %v2187_v60  ;;  %3371 = vmatpush.msra.mxu0 %v2146_v1  ;;  %14224 = vst [vmem:[#allocation40_spill] sm:$0xff] %v10775_v54  ;;  %v2169_v60 = vld [vmem:[#allocation2 + $0x530] sm:$0xff]  ;;  %v2128_v1 = vld [vmem:[#allocation2 + $0x3e8] sm:$0xff] }
 0x488   : > { %3325 = vmatpush.msra.mxu2 %v2205_v49  ;;  %3351 = vmatpush.msrb.mxu3 %v2014_v23  ;;  %v3500_v49 = vld [vmem:[#allocation2 + $0x1020] sm:$0xff]  ;;  %v3494_v54 = vld [vmem:[#allocation2 + $0xff0] sm:$0xff] }
 0x489   : > { %3226 = vmatmul.f32.gmra.mxu2 %v10559_v35  ;;  %3287 = vmatpush.msrb.mxu1 %v2181_v31  ;;  %v3596_v23 = vld [vmem:[#allocation2 + $0x1320] sm:$0xff] }
 0x48a   : > { %3372 = vmatpush.msra.mxu0 %v2140_v34  ;;  %8336 = vmatmul.msk.f32.gmra.mxu3 %vm2466_vm9, %v10583_v59  ;;  %v2163_v31 = vld [vmem:[#allocation2 + $0x500] sm:$0xff] }
 0x48b   : > { %3326 = vmatpush.msra.mxu2 %v2199_v40  ;;  %3352 = vmatpush.msrb.mxu3 %v2008_v47  ;;  %v3590_v40 = vld [vmem:[#allocation2 + $0x12f0] sm:$0xff]  ;;  %v10782_v47 = vpop.f32.mrf.mxu2 }
 0x48c   : > { %3288 = vmatpush.msrb.mxu1 %v2175_v18  ;;  %3373 = vmatpush.msra.mxu0 %v2134_v51  ;;  %14226 = vst [vmem:[#allocation42_spill] sm:$0xff] %v10782_v47  ;;  %v2116_v18 = vld [vmem:[#allocation2 + $0x388] sm:$0xff]  ;;  %v10785_v51 = vpop.f32.mrf.mxu0 }
 0x48d   : > { %3659 = vmatpush.msrb.mxu2 %v3506_v38  ;;  %3685 = vmatpush.msra.mxu3 %v3602_v63  ;;  %v10780_v34 = vpop.f32.mrf.mxu1  ;;  %v2157_v38 = vld [vmem:[#allocation2 + $0x4d0] sm:$0xff]  ;;  %14227 = vst [vmem:[#allocation43_spill] sm:$0xff] %v10785_v51  ;;  %v3488_v63 = vld [vmem:[#allocation2 + $0xfc0] sm:$0xff] }
 0x48e   : > { %3197 = vmatmul.f32.vlgmr.msra.gmra.mxu1 %v10533_v3  ;;  %14225 = vst [vmem:[#allocation41_spill] sm:$0xff] %v10780_v34  ;;  %3374 = vmatpush.msra.mxu0 %v2128_v1  ;;  %v2151_v1 = vld [vmem:[#allocation2 + $0x4a0] sm:$0xff] }
 0x48f   : > { %3289 = vmatpush.msrb.mxu1 %v2169_v60  ;;  %3660 = vmatpush.msrb.mxu2 %v3500_v49  ;;  %v10787_v60 = vpop.f32.mrf.mxu3  ;;  %v2110_v49 = vld [vmem:[#allocation2 + $0x358] sm:$0xff] }
 0x490   : > { %3686 = vmatpush.msra.mxu3 %v3596_v23  ;;  %3281 = vmatmul.f32.gmra.mxu0 %v10544_v16  ;;  %14228 = vst [vmem:[#allocation44_spill] sm:$0xff] %v10787_v60  ;;  %v3482_v23 = vld [vmem:[#allocation2 + $0xf90] sm:$0xff]  ;;  %v3572_v60 = vld [vmem:[#allocation2 + $0x1260] sm:$0xff] }
 0x491   : > { %3290 = vmatpush.msrb.mxu1 %v2163_v31  ;;  %3375 = vmatpush.msra.mxu0 %v2122_v46  ;;  %v3578_v31 = vld [vmem:[#allocation2 + $0x1290] sm:$0xff] }
 0x492   : > { %3661 = vmatpush.msrb.mxu2 %v3494_v54  ;;  %3687 = vmatpush.msra.mxu3 %v3590_v40  ;;  %v2145_v46 = vld [vmem:[#allocation2 + $0x470] sm:$0xff]  ;;  %v2104_v54 = vld [vmem:[#allocation2 + $0x328] sm:$0xff]  ;;  %v2139_v40 = vld [vmem:[#allocation2 + $0x440] sm:$0xff] }
 0x493   : > { %3229 = vmatmul.f32.gmra.mxu2 %v10578_v53  ;;  %3291 = vmatpush.msrb.mxu1 %v2157_v38 }
 0x494   : > { %3376 = vmatpush.msra.mxu0 %v2116_v18  ;;  %3662 = vmatpush.msrb.mxu2 %v3488_v63  ;;  %v3470_v18 = vld [vmem:[#allocation2 + $0xf30] sm:$0xff] }
 0x495   : > { %3688 = vmatpush.msra.mxu3 %v3584_v50  ;;  %3292 = vmatpush.msrb.mxu1 %v2151_v1  ;;  %v3566_v50 = vld [vmem:[#allocation2 + $0x1230] sm:$0xff]  ;;  %v10794_v1 = vpop.f32.mrf.mxu2 }
 0x496   : > { %3353 = vmatmul.f32.vlgmr.msrb.gmra.mxu3 %v10533_v3  ;;  %3377 = vmatpush.msra.mxu0 %v2110_v49  ;;  %v2133_v63 = vld [vmem:[#allocation2 + $0x410] sm:$0xff]  ;;  %14230 = vst [vmem:[#allocation46_spill] sm:$0xff] %v10794_v1  ;;  %v3464_v49 = vld [vmem:[#allocation2 + $0xf00] sm:$0xff] }
 0x497   : > { %3663 = vmatpush.msrb.mxu2 %v3482_v23  ;;  %3689 = vmatpush.msra.mxu3 %v3578_v31  ;;  %v10792_v38 = vpop.f32.mrf.mxu1  ;;  %v3560_v23 = vld [vmem:[#allocation2 + $0x1200] sm:$0xff]  ;;  %v10797_v31 = vpop.f32.mrf.mxu0 }
 0x498   : > { %3200 = vmatmul.f32.gmra.mxu1 %v10536_v7  ;;  %14229 = vst [vmem:[#allocation45_spill] sm:$0xff] %v10792_v38  ;;  %3378 = vmatpush.msra.mxu0 %v2104_v54  ;;  %v10799_v51 = vpop.f32.mrf.mxu3  ;;  %v3554_v54 = vld [vmem:[#allocation2 + $0x11d0] sm:$0xff] }
 0x499   : > { %3293 = vmatpush.msrb.mxu1 %v2145_v46  ;;  %3664 = vmatpush.msrb.mxu2 %v3476_v21  ;;  %14231 = vst [vmem:[#allocation47_spill] sm:$0xff] %v10797_v31  ;;  %v3626_v46 = vld [vmem:[#allocation2 + $0x1410] sm:$0xff]  ;;  %v2127_v21 = vld [vmem:[#allocation2 + $0x3e0] sm:$0xff] }
 0x49a   : > { %3690 = vmatpush.msra.mxu3 %v3572_v60  ;;  %3379 = vmatmul.f32.vlgmr.msra.gmra.mxu0 %v10549_v20  ;;  %14232 = vst [vmem:[#allocation48_spill] sm:$0xff] %v10799_v51  ;;  %v3458_v60 = vld [vmem:[#allocation2 + $0xed0] sm:$0xff]  ;;  %v2115_v31 = vld [vmem:[#allocation2 + $0x380] sm:$0xff] }
 0x49b   : > { %3294 = vmatpush.msrb.mxu1 %v2139_v40  ;;  %3665 = vmatpush.msrb.mxu2 %v3470_v18  ;;  %v3452_v40 = vld [vmem:[#allocation2 + $0xea0] sm:$0xff]  ;;  %v2121_v51 = vld [vmem:[#allocation2 + $0x3b0] sm:$0xff] }
 0x49c   : > { %3691 = vmatpush.msra.mxu3 %v3566_v50  ;;  %8337 = vmatmul.msk.f32.vlgmr.msra.gmra.mxu2 %vm2466_vm9, %v10555_v12  ;;  %v3548_v18 = vld [vmem:[#allocation2 + $0x11a0] sm:$0xff]  ;;  %v3614_v50 = vld [vmem:[#allocation2 + $0x13b0] sm:$0xff] }
 0x49d   : > { %3295 = vmatpush.msrb.mxu1 %v2133_v63  ;;  %3666 = vmatpush.msrb.mxu2 %v3464_v49  ;;  %v3446_v63 = vld [vmem:[#allocation2 + $0xe70] sm:$0xff]  ;;  %v10807_v38 = vpop.f32.mrf.mxu2 }
 0x49e   : > { %3692 = vmatpush.msra.mxu3 %v3560_v23  ;;  %3723 = vmatpush.msrb.mxu0 %v3626_v46  ;;  %v3542_v23 = vld [vmem:[#allocation2 + $0x1170] sm:$0xff]  ;;  %v3608_v46 = vld [vmem:[#allocation2 + $0x1380] sm:$0xff]  ;;  %14234 = vst [vmem:[#allocation50_spill] sm:$0xff] %v10807_v38 }
 0x49f   : > { %3356 = vmatmul.f32.gmra.mxu3 %v10536_v7  ;;  %3296 = vmatpush.msrb.mxu1 %v2127_v21  ;;  %v3508_v21 = vld [vmem:[#allocation2 + $0x1060] sm:$0xff]  ;;  %v3530_v38 = vld [vmem:[#allocation2 + $0x1110] sm:$0xff] }
 0x4a0   : > { %3667 = vmatpush.msrb.mxu2 %v3458_v60  ;;  %3693 = vmatpush.msra.mxu3 %v3554_v54  ;;  %v2109_v60 = vld [vmem:[#allocation2 + $0x350] sm:$0xff]  ;;  %v10810_v54 = vpop.f32.mrf.mxu0 }
 0x4a1   : > { %3724 = vmatpush.msrb.mxu0 %v3620_v39  ;;  %3203 = vmatmul.f32.gmra.mxu1 %v10544_v16  ;;  %v10805_v49 = vpop.f32.mrf.mxu1  ;;  %v3536_v39 = vld [vmem:[#allocation2 + $0x1140] sm:$0xff] }
 0x4a2   : > { %3668 = vmatpush.msrb.mxu2 %v3452_v40  ;;  %14233 = vst [vmem:[#allocation49_spill] sm:$0xff] %v10805_v49  ;;  %3297 = vmatpush.msrb.mxu1 %v2121_v51  ;;  %v3440_v51 = vld [vmem:[#allocation2 + $0xe40] sm:$0xff] }
 0x4a3   : > { %3694 = vmatpush.msra.mxu3 %v3548_v18  ;;  %3725 = vmatpush.msrb.mxu0 %v3614_v50  ;;  %v3502_v18 = vld [vmem:[#allocation2 + $0x1030] sm:$0xff]  ;;  %v2103_v50 = vld [vmem:[#allocation2 + $0x320] sm:$0xff] }
 0x4a4   : > { %3669 = vmatpush.msrb.mxu2 %v3446_v63  ;;  %3382 = vmatmul.f32.gmra.mxu0 %v10559_v35  ;;  %v10812_v40 = vpop.f32.mrf.mxu3  ;;  %v3434_v63 = vld [vmem:[#allocation2 + $0xe10] sm:$0xff] }
 0x4a5   : > { %3298 = vmatpush.msrb.mxu1 %v2115_v31  ;;  %14235 = vst [vmem:[#allocation51_spill] sm:$0xff] %v10812_v40  ;;  %3695 = vmatpush.msra.mxu3 %v3542_v23  ;;  %v3496_v31 = vld [vmem:[#allocation2 + $0x1000] sm:$0xff] }
 0x4a6   : > { %3726 = vmatpush.msrb.mxu0 %v3608_v46  ;;  %8338 = vmatmul.msk.f32.gmra.mxu2 %vm2466_vm9, %v10563_v41  ;;  %v3428_v40 = vld [vmem:[#allocation2 + $0xde0] sm:$0xff]  ;;  %v2218_v46 = vld [vmem:[#allocation2 + $0x6b8] sm:$0xff] }
 0x4a7   : > { %3299 = vmatpush.msrb.mxu1 %v2109_v60  ;;  %3696 = vmatpush.msra.mxu3 %v3536_v39  ;;  %v3524_v23 = vld [vmem:[#allocation2 + $0x10e0] sm:$0xff]  ;;  %v3422_v60 = vld [vmem:[#allocation2 + $0xdb0] sm:$0xff] }
 0x4a8   : > { %3815 = vmatpush.msra.mxu0 %v3508_v21  ;;  %3670 = vmatpush.msrb.mxu2 %v3440_v51  ;;  %v3490_v21 = vld [vmem:[#allocation2 + $0xfd0] sm:$0xff]  ;;  %v3484_v51 = vld [vmem:[#allocation2 + $0xfa0] sm:$0xff]  ;;  %v10824_v1 = vpop.f32.mrf.mxu0 }
 0x4a9   : > { %3359 = vmatmul.f32.gmra.mxu3 %v10544_v16  ;;  %3300 = vmatpush.msrb.mxu1 %v2103_v50  ;;  %v3518_v39 = vld [vmem:[#allocation2 + $0x10b0] sm:$0xff]  ;;  %v2206_v50 = vld [vmem:[#allocation2 + $0x658] sm:$0xff] }
 0x4aa   : > { %3816 = vmatpush.msra.mxu0 %v3502_v18  ;;  %3671 = vmatpush.msrb.mxu2 %v3434_v63  ;;  %v2212_v18 = vld [vmem:[#allocation2 + $0x688] sm:$0xff]  ;;  %v10822_v63 = vpop.f32.mrf.mxu2 }
 0x4ab   : > { %3697 = vmatpush.msra.mxu3 %v3530_v38  ;;  %3301 = vmatmul.f32.vlgmr.msrb.gmra.mxu1 %v10549_v20  ;;  %v10818_v49 = vpop.f32.mrf.mxu1  ;;  %14237 = vst [vmem:[#allocation53_spill] sm:$0xff] %v10822_v63  ;;  %v3416_v38 = vld [vmem:[#allocation2 + $0xd80] sm:$0xff]  ;;  %v3597_v63 = vld [vmem:[#allocation2 + $0x1328] sm:$0xff] }
 0x4ac   : > { %3817 = vmatpush.msra.mxu0 %v3496_v31  ;;  %14236 = vst [vmem:[#allocation52_spill] sm:$0xff] %v10818_v49  ;;  %3672 = vmatpush.msrb.mxu2 %v3428_v40  ;;  %v3512_v31 = vld [vmem:[#allocation2 + $0x1080] sm:$0xff]  ;;  %v3635_v40 = vrot.slane %v10549_v20, 2  ;;  %v2200_v49 = vld [vmem:[#allocation2 + $0x628] sm:$0xff] }
 0x4ad   : > { %3698 = vmatpush.msra.mxu3 %v3524_v23  ;;  %3385 = vmatmul.f32.gmra.mxu0 %v10578_v53  ;;  %v3603_v23 = vld [vmem:[#allocation2 + $0x1358] sm:$0xff] }
 0x4ae   : > { %3401 = vmatpush.msra.mxu1 %v2218_v46  ;;  %3818 = vmatpush.msra.mxu0 %v3490_v21  ;;  %v10826_v11 = vpop.f32.mrf.mxu3  ;;  %v3478_v46 = vld [vmem:[#allocation2 + $0xf70] sm:$0xff]  ;;  %v14239_v21 = vrot.slane %v10559_v35, 2 }
 0x4af   : > { %3673 = vmatpush.msrb.mxu2 %v3422_v60  ;;  %14238 = vst [vmem:[#allocation54_spill] sm:$0xff] %v10826_v11  ;;  %3699 = vmatpush.msra.mxu3 %v3518_v39  ;;  %v14130_v39 = vrot.slane %v10563_v41, 2  ;;  %v3472_v11 = vld [vmem:[#allocation2 + $0xf40] sm:$0xff] }
 0x4b0   : > { %8339 = vmatmul.msk.f32.gmra.mxu2 %vm2466_vm9, %v10583_v59  ;;  %3819 = vmatpush.msra.mxu0 %v3484_v51  ;;  %v10834_v60 = vsel %vm1420_vm5, %v3635_v40, %v14239_v21  ;;  %v3627_v51 = vld [vmem:[#allocation2 + $0x1418] sm:$0xff]  ;;  %v3621_v21 = vld [vmem:[#allocation2 + $0x13e8] sm:$0xff] }
 0x4b1   : > { %3402 = vmatpush.msra.mxu1 %v2212_v18  ;;  %3674 = vmatpush.msrb.mxu2 %v3416_v38  ;;  %v3638_v18 = vrot.slane %v10555_v12, 2  ;;  %v3507_v38 = vld [vmem:[#allocation2 + $0x1058] sm:$0xff] }
 0x4b2   : > { %3700 = vmatpush.msra.mxu3 %v3512_v31  ;;  %3820 = vmatpush.msra.mxu0 %v3478_v46  ;;  %v3591_v31 = vld [vmem:[#allocation2 + $0x12f8] sm:$0xff]  ;;  %v3632_v46 = vrot.slane %v10533_v3, 2  ;;  %v10856_v34 = vpop.f32.mrf.mxu0 }
 0x4b3   : > { %3701 = vmatmul.f32.vlgmr.msra.gmra.mxu3 %v10834_v60  ;;  %3763 = vmatpush.msra.mxu2 %v3603_v23  ;;  %v10843_v40 = vsel %vm1420_vm5, %v3638_v18, %v14130_v39  ;;  %v3466_v23 = vld [vmem:[#allocation2 + $0xf10] sm:$0xff]  ;;  %v10852_v18 = vrot.slane %v10578_v53, 2  ;;  %v10854_v39 = vpop.f32.mrf.mxu2 }
 0x4b4   : > { %3403 = vmatpush.msra.mxu1 %v2206_v50  ;;  %3821 = vmatpush.msra.mxu0 %v3472_v11  ;;  %v3585_v11 = vld [vmem:[#allocation2 + $0x12c8] sm:$0xff]  ;;  %14241 = vst [vmem:[#allocation56_spill] sm:$0xff] %v10854_v39  ;;  %v3495_v50 = vld [vmem:[#allocation2 + $0xff8] sm:$0xff]  ;;  %v3454_v39 = vld [vmem:[#allocation2 + $0xeb0] sm:$0xff] }
 0x4b5   : > { %3304 = vmatmul.f32.gmra.mxu1 %v10559_v35  ;;  %3764 = vmatpush.msra.mxu2 %v3597_v63  ;;  %v3501_v63 = vld [vmem:[#allocation2 + $0x1028] sm:$0xff] }
 0x4b6   : > { %3404 = vmatpush.msra.mxu1 %v2200_v49  ;;  %v10847_v47 = vpop.f32.mrf.mxu1  ;;  %3801 = vmatpush.msrb.mxu3 %v3627_v51  ;;  %v3460_v49 = vld [vmem:[#allocation2 + $0xee0] sm:$0xff] }
 0x4b7   : > { %14240 = vst [vmem:[#allocation55_spill] sm:$0xff] %v10847_v47  ;;  %8343 = vmatmul.msk.f32.vlgmr.msrb.gmra.mxu0 %vm2466_vm9, %v10843_v40  ;;  %3765 = vmatpush.msra.mxu2 %v3591_v31  ;;  %v14243_v47 = vrot.slane %v10536_v7, 2  ;;  %v3579_v31 = vld [vmem:[#allocation2 + $0x1298] sm:$0xff] }
 0x4b8   : > { %3737 = vmatpush.msrb.mxu1 %v3507_v38  ;;  %3822 = vmatpush.msra.mxu0 %v3466_v23  ;;  %v10858_v51 = vpop.f32.mrf.mxu3  ;;  %v3609_v23 = vld [vmem:[#allocation2 + $0x1388] sm:$0xff] }
 0x4b9   : > { %3802 = vmatpush.msrb.mxu3 %v3621_v21  ;;  %14242 = vst [vmem:[#allocation57_spill] sm:$0xff] %v10858_v51  ;;  %3766 = vmatpush.msra.mxu2 %v3585_v11  ;;  %v10863_v38 = vsel %vm1420_vm5, %v3632_v46, %v14243_v47  ;;  %v14244_v21 = vrot.slane %v10559_v35, 2  ;;  %v10873_v11 = vrot.slane %v10583_v59, 2  ;;  %v3489_v47 = vld [vmem:[#allocation2 + $0xfc8] sm:$0xff]  ;;  %v3448_v46 = vld [vmem:[#allocation2 + $0xe80] sm:$0xff]  ;;  %v3567_v51 = vld [vmem:[#allocation2 + $0x1238] sm:$0xff] }
 0x4ba   : > { %3738 = vmatpush.msrb.mxu1 %v3501_v63  ;;  %3823 = vmatpush.msra.mxu0 %v3460_v49  ;;  %v3573_v63 = vld [vmem:[#allocation2 + $0x1268] sm:$0xff] }
 0x4bb   : > { %3675 = vmatmul.f32.vlgmr.msrb.gmra.mxu2 %v10863_v38  ;;  %3803 = vmatpush.msrb.mxu3 %v3615_v28  ;;  %v10870_v8 = vsel %vm1420_vm5, %v14244_v21, %v10852_v18  ;;  %v3509_v49 = vld [vmem:[#allocation2 + $0x1068] sm:$0xff]  ;;  %v3483_v28 = vld [vmem:[#allocation2 + $0xf98] sm:$0xff]  ;;  %v10892_v26 = vpop.f32.mrf.mxu2 }
 0x4bc   : > { %3739 = vmatpush.msrb.mxu1 %v3495_v50  ;;  %3704 = vmatmul.f32.gmra.mxu3 %v10870_v8  ;;  %v14246_v50 = vrot.slane %v10563_v41, 2  ;;  %14248 = vst [vmem:[#allocation60_spill] sm:$0xff] %v10892_v26  ;;  %v3418_v26 = vld [vmem:[#allocation2 + $0xd90] sm:$0xff] }
 0x4bd   : > { %3767 = vmatpush.msra.mxu2 %v3579_v31  ;;  %3824 = vmatpush.msra.mxu0 %v3454_v39  ;;  %v3442_v31 = vld [vmem:[#allocation2 + $0xe50] sm:$0xff]  ;;  %v3477_v39 = vld [vmem:[#allocation2 + $0xf68] sm:$0xff] }
 0x4be   : > { %3804 = vmatpush.msrb.mxu3 %v3609_v23  ;;  %3307 = vmatmul.f32.gmra.mxu1 %v10578_v53  ;;  %v10877_v21 = vpop.f32.mrf.mxu1  ;;  %v10883_v0 = vsel %vm1420_vm5, %v14246_v50, %v10873_v11  ;;  %v3561_v23 = vld [vmem:[#allocation2 + $0x1208] sm:$0xff] }
 0x4bf   : > { %3768 = vmatpush.msra.mxu2 %v3573_v63  ;;  %14245 = vst [vmem:[#allocation58_spill] sm:$0xff] %v10877_v21  ;;  %3740 = vmatpush.msrb.mxu1 %v3489_v47  ;;  %v10888_v63 = vrot.slane %v10544_v16, 2  ;;  %v3436_v47 = vld [vmem:[#allocation2 + $0xe20] sm:$0xff] }
 0x4c0   : > { %3825 = vmatpush.msra.mxu0 %v3448_v46  ;;  %3893 = vmatpush.msra.mxu3 %v3509_v49  ;;  %v3497_v46 = vld [vmem:[#allocation2 + $0x1008] sm:$0xff]  ;;  %v3471_v49 = vld [vmem:[#allocation2 + $0xf38] sm:$0xff] }
 0x4c1   : > { %8344 = vmatmul.msk.f32.gmra.mxu0 %vm2466_vm9, %v10883_v0  ;;  %v10890_v21 = vpop.f32.mrf.mxu0  ;;  %3741 = vmatpush.msrb.mxu1 %v3483_v28  ;;  %v10900_v28 = vsel %vm1420_vm5, %v14250_v44, %v10888_v63  ;;  %v3459_v44 = vld [vmem:[#allocation2 + $0xed8] sm:$0xff] }
 0x4c2   : > { %14247 = vst [vmem:[#allocation59_spill] sm:$0xff] %v10890_v21  ;;  %3769 = vmatpush.msra.mxu2 %v3567_v51  ;;  %3826 = vmatpush.msra.mxu0 %v3442_v31  ;;  %v10894_v50 = vpop.f32.mrf.mxu3  ;;  %v3430_v51 = vld [vmem:[#allocation2 + $0xdf0] sm:$0xff]  ;;  %v3465_v31 = vld [vmem:[#allocation2 + $0xf08] sm:$0xff] }
 0x4c3   : > { %3894 = vmatpush.msra.mxu3 %v3503_v15  ;;  %14249 = vst [vmem:[#allocation61_spill] sm:$0xff] %v10894_v50  ;;  %3742 = vmatpush.msrb.mxu1 %v3477_v39  ;;  %v3549_v15 = vld [vmem:[#allocation2 + $0x11a8] sm:$0xff]  ;;  %v3424_v39 = vld [vmem:[#allocation2 + $0xdc0] sm:$0xff] }
 0x4c4   : > { %3770 = vmatpush.msra.mxu2 %v3561_v23  ;;  %3827 = vmatpush.msra.mxu0 %v3436_v47  ;;  %v3485_v47 = vld [vmem:[#allocation2 + $0xfa8] sm:$0xff] }
 0x4c5   : > { %3895 = vmatpush.msra.mxu3 %v3497_v46  ;;  %3678 = vmatmul.f32.gmra.mxu2 %v10900_v28  ;;  %v3543_v46 = vld [vmem:[#allocation2 + $0x1178] sm:$0xff] }
 0x4c6   : > { %3707 = vmatmul.f32.gmra.mxu3 %v10852_v18  ;;  %3743 = vmatpush.msrb.mxu1 %v3471_v49  ;;  %v10904_v23 = vpop.f32.mrf.mxu1  ;;  %v3453_v49 = vld [vmem:[#allocation2 + $0xea8] sm:$0xff] }
 0x4c7   : > { %3771 = vmatpush.msra.mxu2 %v3555_v17  ;;  %14251 = vst [vmem:[#allocation62_spill] sm:$0xff] %v10904_v23  ;;  %3828 = vmatpush.msra.mxu0 %v3430_v51  ;;  %v3605_v17 = vld [vmem:[#allocation2 + $0x1368] sm:$0xff]  ;;  %v10914_v23 = vpop.f32.mrf.mxu2 }
 0x4c8   : > { %3896 = vmatpush.msra.mxu3 %v3491_v58  ;;  %8340 = vmatmul.msk.f32.vlgmr.msra.gmra.mxu1 %vm2466_vm9, %v10555_v12  ;;  %v3537_v51 = vld [vmem:[#allocation2 + $0x1148] sm:$0xff] }
 0x4c9   : > { %3772 = vmatpush.msra.mxu2 %v3549_v15  ;;  %3744 = vmatpush.msrb.mxu1 %v3465_v31  ;;  %v10908_v36 = vpop.f32.mrf.mxu0  ;;  %v3473_v15 = vld [vmem:[#allocation2 + $0xf48] sm:$0xff]  ;;  %v3599_v31 = vld [vmem:[#allocation2 + $0x1338] sm:$0xff] }
 0x4ca   : > { %3829 = vmatpush.msra.mxu0 %v3424_v39  ;;  %14252 = vst [vmem:[#allocation63_spill] sm:$0xff] %v10908_v36  ;;  %3897 = vmatpush.msra.mxu3 %v3485_v47  ;;  %v3447_v39 = vld [vmem:[#allocation2 + $0xe78] sm:$0xff]  ;;  %v3557_v36 = vld [vmem:[#allocation2 + $0x11e8] sm:$0xff] }
 0x4cb   : > { %8345 = vmatmul.msk.f32.gmra.mxu0 %vm2466_vm9, %v10873_v11  ;;  %v10912_v58 = vpop.f32.mrf.mxu3  ;;  %3745 = vmatpush.msrb.mxu1 %v3459_v44  ;;  %v3531_v47 = vld [vmem:[#allocation2 + $0x1118] sm:$0xff] }
 0x4cc   : > { %14253 = vst [vmem:[#allocation64_spill] sm:$0xff] %v10912_v58  ;;  %3773 = vmatpush.msra.mxu2 %v3543_v46  ;;  %3830 = vmatpush.msra.mxu0 %v3418_v26  ;;  %v3441_v46 = vld [vmem:[#allocation2 + $0xe48] sm:$0xff]  ;;  %v3587_v26 = vld [vmem:[#allocation2 + $0x12d8] sm:$0xff] }
 0x4cd   : > { %3898 = vmatpush.msra.mxu3 %v3479_v5  ;;  %3746 = vmatpush.msrb.mxu1 %v3453_v49  ;;  %v3461_v5 = vld [vmem:[#allocation2 + $0xee8] sm:$0xff]  ;;  %v3519_v49 = vld [vmem:[#allocation2 + $0x10b8] sm:$0xff] }
 0x4ce   : > { %3919 = vmatpush.msrb.mxu0 %v3605_v17  ;;  %3774 = vmatpush.msra.mxu2 %v3537_v51  ;;  %v3435_v17 = vld [vmem:[#allocation2 + $0xe18] sm:$0xff] }
 0x4cf   : > { %3899 = vmatpush.msra.mxu3 %v3473_v15  ;;  %3681 = vmatmul.f32.gmra.mxu2 %v10888_v63  ;;  %v10917_v44 = vpop.f32.mrf.mxu1  ;;  %v3455_v51 = vld [vmem:[#allocation2 + $0xeb8] sm:$0xff]  ;;  %v10927_v24 = vpop.f32.mrf.mxu2 }
 0x4d0   : > { %3920 = vmatpush.msrb.mxu0 %v3599_v31  ;;  %3747 = vmatpush.msrb.mxu1 %v3447_v39  ;;  %v3581_v39 = vld [vmem:[#allocation2 + $0x12a8] sm:$0xff] }
 0x4d1   : > { %3775 = vmatpush.msra.mxu2 %v3531_v47  ;;  %8346 = vmatmul.msk.f32.vlgmr.msrb.gmra.mxu3 %vm2466_vm9, %v10843_v40  ;;  %v10923_v15 = vpop.f32.mrf.mxu0  ;;  %v3429_v47 = vld [vmem:[#allocation2 + $0xde8] sm:$0xff] }
 0x4d2   : > { %3921 = vmatpush.msrb.mxu0 %v3593_v33  ;;  %3900 = vmatpush.msra.mxu3 %v3467_v13  ;;  %14254 = vst [vmem:[#allocation65_spill] sm:$0xff] %v10923_v15  ;;  %v3513_v33 = vld [vmem:[#allocation2 + $0x1088] sm:$0xff]  ;;  %v3443_v15 = vld [vmem:[#allocation2 + $0xe58] sm:$0xff] }
 0x4d3   : > { %8341 = vmatmul.msk.f32.gmra.mxu1 %vm2466_vm9, %v10563_v41  ;;  %3776 = vmatpush.msra.mxu2 %v3525_v32  ;;  %v10925_v31 = vpop.f32.mrf.mxu3  ;;  %v3449_v13 = vld [vmem:[#allocation2 + $0xe88] sm:$0xff]  ;;  %v3423_v32 = vld [vmem:[#allocation2 + $0xdb8] sm:$0xff] }
 0x4d4   : > { %3748 = vmatpush.msrb.mxu1 %v3441_v46  ;;  %14255 = vst [vmem:[#allocation66_spill] sm:$0xff] %v10925_v31  ;;  %3901 = vmatpush.msra.mxu3 %v3461_v5  ;;  %v3575_v46 = vld [vmem:[#allocation2 + $0x1278] sm:$0xff]  ;;  %v3569_v5 = vld [vmem:[#allocation2 + $0x1248] sm:$0xff] }
 0x4d5   : > { %3922 = vmatpush.msrb.mxu0 %v3587_v26  ;;  %3777 = vmatpush.msra.mxu2 %v3519_v49  ;;  %v3417_v49 = vld [vmem:[#allocation2 + $0xd88] sm:$0xff] }
 0x4d6   : > { %3749 = vmatpush.msrb.mxu1 %v3435_v17  ;;  %3831 = vmatmul.f32.vlgmr.msra.gmra.mxu0 %v10863_v38  ;;  %v3628_v17 = vld [vmem:[#allocation2 + $0x1420] sm:$0xff] }
 0x4d7   : > { %3902 = vmatpush.msra.mxu3 %v3455_v51  ;;  %3923 = vmatpush.msrb.mxu0 %v3581_v39  ;;  %v3437_v51 = vld [vmem:[#allocation2 + $0xe28] sm:$0xff]  ;;  %v3604_v39 = vld [vmem:[#allocation2 + $0x1360] sm:$0xff]  ;;  %v10942_v31 = vpop.f32.mrf.mxu2 }
 0x4d8   : > { %3750 = vmatpush.msrb.mxu1 %v3429_v47  ;;  %3778 = vmatpush.msra.mxu2 %v3513_v33  ;;  %v10930_v26 = vpop.f32.mrf.mxu1  ;;  %v3563_v47 = vld [vmem:[#allocation2 + $0x1218] sm:$0xff]  ;;  %v3622_v33 = vld [vmem:[#allocation2 + $0x13f0] sm:$0xff] }
 0x4d9   : > { %3903 = vmatpush.msra.mxu3 %v3449_v13  ;;  %3779 = vmatmul.f32.vlgmr.msra.gmra.mxu2 %v10834_v60 }
 0x4da   : > { %3924 = vmatpush.msrb.mxu0 %v3575_v46  ;;  %3751 = vmatpush.msrb.mxu1 %v3423_v32  ;;  %v3431_v46 = vld [vmem:[#allocation2 + $0xdf8] sm:$0xff]  ;;  %v3598_v32 = vld [vmem:[#allocation2 + $0x1330] sm:$0xff] }
 0x4db   : > { %8347 = vmatmul.msk.f32.gmra.mxu3 %vm2466_vm9, %v10883_v0  ;;  %8342 = vmatmul.msk.f32.gmra.mxu1 %vm2466_vm9, %v10583_v59  ;;  %v10939_v21 = vpop.f32.mrf.mxu0 }
 0x4dc   : > { %3904 = vmatpush.msra.mxu3 %v3443_v15  ;;  %3925 = vmatpush.msrb.mxu0 %v3569_v5  ;;  %v10937_v13 = vpop.f32.mrf.mxu3  ;;  %14257 = vst [vmem:[#allocation68_spill] sm:$0xff] %v10939_v21  ;;  %v3616_v15 = vld [vmem:[#allocation2 + $0x13c0] sm:$0xff]  ;;  %v3425_v5 = vld [vmem:[#allocation2 + $0xdc8] sm:$0xff]  ;;  %v3510_v21 = vld [vmem:[#allocation2 + $0x1070] sm:$0xff] }
 0x4dd   : > { %3879 = vmatpush.msrb.mxu2 %v3628_v17  ;;  %14256 = vst [vmem:[#allocation67_spill] sm:$0xff] %v10937_v13  ;;  %3752 = vmatpush.msrb.mxu1 %v3417_v49  ;;  %v3592_v17 = vld [vmem:[#allocation2 + $0x1300] sm:$0xff]  ;;  %v3551_v13 = vld [vmem:[#allocation2 + $0x11b8] sm:$0xff]  ;;  %v3610_v49 = vld [vmem:[#allocation2 + $0x1390] sm:$0xff] }
 0x4de   : > { %3905 = vmatpush.msra.mxu3 %v3437_v51  ;;  %3926 = vmatpush.msrb.mxu0 %v3563_v47  ;;  %v3419_v51 = vld [vmem:[#allocation2 + $0xd98] sm:$0xff] }
 0x4df   : > { %3841 = vmatpush.msra.mxu1 %v3604_v39  ;;  %3834 = vmatmul.f32.gmra.mxu0 %v10900_v28  ;;  %v3586_v39 = vld [vmem:[#allocation2 + $0x12d0] sm:$0xff] }
 0x4e0   : > { %3880 = vmatpush.msrb.mxu2 %v3622_v33  ;;  %3906 = vmatpush.msra.mxu3 %v3431_v46  ;;  %v3545_v33 = vld [vmem:[#allocation2 + $0x1188] sm:$0xff]  ;;  %v3606_v46 = vld [vmem:[#allocation2 + $0x1370] sm:$0xff] }
 0x4e1   : > { %3842 = vmatpush.msra.mxu1 %v3598_v32  ;;  %3927 = vmatpush.msrb.mxu0 %v3557_v36  ;;  %v3580_v36 = vld [vmem:[#allocation2 + $0x12a0] sm:$0xff]  ;;  %v3539_v32 = vld [vmem:[#allocation2 + $0x1158] sm:$0xff] }
 0x4e2   : > { %3881 = vmatpush.msrb.mxu2 %v3616_v15  ;;  %3907 = vmatpush.msra.mxu3 %v3425_v5  ;;  %v10945_v47 = vpop.f32.mrf.mxu1  ;;  %v3504_v15 = vld [vmem:[#allocation2 + $0x1040] sm:$0xff] }
 0x4e3   : > { %3782 = vmatmul.f32.gmra.mxu2 %v10870_v8  ;;  %3843 = vmatpush.msra.mxu1 %v3592_v17  ;;  %v3600_v5 = vld [vmem:[#allocation2 + $0x1340] sm:$0xff]  ;;  %v10952_v17 = vpop.f32.mrf.mxu2 }
 0x4e4   : > { %3928 = vmatpush.msrb.mxu0 %v3551_v13  ;;  %8348 = vmatmul.msk.f32.gmra.mxu3 %vm2466_vm9, %v10873_v11  ;;  %v3574_v13 = vld [vmem:[#allocation2 + $0x1270] sm:$0xff]  ;;  %14259 = vst [vmem:[#allocation70_spill] sm:$0xff] %v10952_v17  ;;  %v10954_v58 = vpop.f32.mrf.mxu0 }
 0x4e5   : > { %3882 = vmatpush.msrb.mxu2 %v3610_v49  ;;  %3908 = vmatpush.msra.mxu3 %v3419_v51  ;;  %v10949_v50 = vpop.f32.mrf.mxu3  ;;  %14260 = vst [vmem:[#allocation71_spill] sm:$0xff] %v10954_v58  ;;  %v3533_v49 = vld [vmem:[#allocation2 + $0x1128] sm:$0xff]  ;;  %v3498_v51 = vld [vmem:[#allocation2 + $0x1010] sm:$0xff] }
 0x4e6   : > { %3844 = vmatpush.msra.mxu1 %v3586_v39  ;;  %3929 = vmatpush.msrb.mxu0 %v3545_v33  ;;  %14258 = vst [vmem:[#allocation69_spill] sm:$0xff] %v10949_v50  ;;  %v3594_v39 = vld [vmem:[#allocation2 + $0x1310] sm:$0xff]  ;;  %v3527_v33 = vld [vmem:[#allocation2 + $0x10f8] sm:$0xff]  ;;  %v3588_v50 = vld [vmem:[#allocation2 + $0x12e0] sm:$0xff] }
 0x4e7   : > { %3971 = vmatpush.msra.mxu2 %v3510_v21  ;;  %3997 = vmatpush.msrb.mxu3 %v3606_v46  ;;  %v3568_v21 = vld [vmem:[#allocation2 + $0x1240] sm:$0xff]  ;;  %v3562_v58 = vld [vmem:[#allocation2 + $0x1210] sm:$0xff] }
 0x4e8   : > { %3753 = vmatmul.f32.vlgmr.msrb.gmra.mxu1 %v10863_v38  ;;  %3930 = vmatpush.msrb.mxu0 %v3539_v32  ;;  %v3492_v46 = vld [vmem:[#allocation2 + $0xfe0] sm:$0xff]  ;;  %v3521_v32 = vld [vmem:[#allocation2 + $0x10c8] sm:$0xff] }
 0x4e9   : > { %3845 = vmatpush.msra.mxu1 %v3580_v36  ;;  %3972 = vmatpush.msra.mxu2 %v3504_v15  ;;  %v3486_v15 = vld [vmem:[#allocation2 + $0xfb0] sm:$0xff] }
 0x4ea   : > { %3998 = vmatpush.msrb.mxu3 %v3600_v5  ;;  %3837 = vmatmul.f32.gmra.mxu0 %v10888_v63  ;;  %v3582_v5 = vld [vmem:[#allocation2 + $0x12b0] sm:$0xff] }
 0x4eb   : > { %3846 = vmatpush.msra.mxu1 %v3574_v13  ;;  %3931 = vmatpush.msrb.mxu0 %v3533_v49  ;;  %v3556_v13 = vld [vmem:[#allocation2 + $0x11e0] sm:$0xff]  ;;  %v3515_v49 = vld [vmem:[#allocation2 + $0x1098] sm:$0xff] }
 0x4ec   : > { %3973 = vmatpush.msra.mxu2 %v3498_v51  ;;  %3999 = vmatpush.msrb.mxu3 %v3594_v39  ;;  %v10958_v36 = vpop.f32.mrf.mxu1  ;;  %v3480_v51 = vld [vmem:[#allocation2 + $0xf80] sm:$0xff] }
 0x4ed   : > { %3785 = vmatmul.f32.gmra.mxu2 %v10852_v18  ;;  %14261 = vst [vmem:[#allocation72_spill] sm:$0xff] %v10958_v36  ;;  %3847 = vmatpush.msra.mxu1 %v3568_v21  ;;  %v3576_v39 = vld [vmem:[#allocation2 + $0x1280] sm:$0xff]  ;;  %v3550_v21 = vld [vmem:[#allocation2 + $0x11b0] sm:$0xff] }
 0x4ee   : > { %3932 = vmatpush.msrb.mxu0 %v3527_v33  ;;  %3974 = vmatpush.msra.mxu2 %v3492_v46  ;;  %v10964_v33 = vpop.f32.mrf.mxu2  ;;  %v10966_v46 = vpop.f32.mrf.mxu0 }
 0x4ef   : > { %4000 = vmatpush.msrb.mxu3 %v3588_v50  ;;  %3848 = vmatpush.msra.mxu1 %v3562_v58  ;;  %v10961_v17 = vpop.f32.mrf.mxu3  ;;  %14263 = vst [vmem:[#allocation74_spill] sm:$0xff] %v10964_v33  ;;  %v3474_v50 = vld [vmem:[#allocation2 + $0xf50] sm:$0xff] }
 0x4f0   : > { %3909 = vmatmul.f32.vlgmr.msra.gmra.mxu3 %v10863_v38  ;;  %3933 = vmatpush.msrb.mxu0 %v3521_v32  ;;  %14262 = vst [vmem:[#allocation73_spill] sm:$0xff] %v10961_v17  ;;  %v3570_v58 = vld [vmem:[#allocation2 + $0x1250] sm:$0xff]  ;;  %v3544_v32 = vld [vmem:[#allocation2 + $0x1180] sm:$0xff] }
 0x4f1   : > { %3975 = vmatpush.msra.mxu2 %v3486_v15  ;;  %4001 = vmatpush.msrb.mxu3 %v3582_v5  ;;  %14264 = vst [vmem:[#allocation75_spill] sm:$0xff] %v10966_v46  ;;  %v3468_v15 = vld [vmem:[#allocation2 + $0xf20] sm:$0xff]  ;;  %v3630_v5 = vld [vmem:[#allocation2 + $0x1430] sm:$0xff] }
 0x4f2   : > { %3756 = vmatmul.f32.gmra.mxu1 %v10900_v28  ;;  %3934 = vmatpush.msrb.mxu0 %v3515_v49  ;;  %v3564_v17 = vld [vmem:[#allocation2 + $0x1220] sm:$0xff]  ;;  %v3538_v46 = vld [vmem:[#allocation2 + $0x1150] sm:$0xff] }
 0x4f3   : > { %3849 = vmatpush.msra.mxu1 %v3556_v13  ;;  %3976 = vmatpush.msra.mxu2 %v3480_v51  ;;  %v3462_v13 = vld [vmem:[#allocation2 + $0xef0] sm:$0xff] }
 0x4f4   : > { %4002 = vmatpush.msrb.mxu3 %v3576_v39  ;;  %3935 = vmatmul.f32.vlgmr.msrb.gmra.mxu0 %v10834_v60  ;;  %v3558_v51 = vld [vmem:[#allocation2 + $0x11f0] sm:$0xff]  ;;  %v3624_v39 = vld [vmem:[#allocation2 + $0x1400] sm:$0xff] }
 0x4f5   : > { %3850 = vmatpush.msra.mxu1 %v3550_v21  ;;  %3977 = vmatpush.msra.mxu2 %v3474_v50  ;;  %v10971_v49 = vpop.f32.mrf.mxu1  ;;  %v3456_v21 = vld [vmem:[#allocation2 + $0xec0] sm:$0xff]  ;;  %v3450_v33 = vld [vmem:[#allocation2 + $0xe90] sm:$0xff] }
 0x4f6   : > { %4003 = vmatpush.msrb.mxu3 %v3570_v58  ;;  %8349 = vmatmul.msk.f32.vlgmr.msrb.gmra.mxu2 %vm2466_vm9, %v10843_v40  ;;  %14265 = vst [vmem:[#allocation76_spill] sm:$0xff] %v10971_v49  ;;  %v3532_v50 = vld [vmem:[#allocation2 + $0x1120] sm:$0xff]  ;;  %v3514_v49 = vld [vmem:[#allocation2 + $0x1090] sm:$0xff] }
 0x4f7   : > { %3851 = vmatpush.msra.mxu1 %v3544_v32  ;;  %3978 = vmatpush.msra.mxu2 %v3468_v15  ;;  %v3552_v58 = vld [vmem:[#allocation2 + $0x11c0] sm:$0xff]  ;;  %v3618_v32 = vld [vmem:[#allocation2 + $0x13d0] sm:$0xff]  ;;  %v10977_v15 = vpop.f32.mrf.mxu2 }
 0x4f8   : > { %4004 = vmatpush.msrb.mxu3 %v3564_v17  ;;  %4035 = vmatpush.msra.mxu0 %v3630_v5  ;;  %v3526_v17 = vld [vmem:[#allocation2 + $0x10f0] sm:$0xff]  ;;  %14267 = vst [vmem:[#allocation78_spill] sm:$0xff] %v10977_v15  ;;  %v4230_v15 = vld [vmem:[#allocation2 + $0x16e0] sm:$0xff] }
 0x4f9   : > { %3912 = vmatmul.f32.gmra.mxu3 %v10900_v28  ;;  %3852 = vmatpush.msra.mxu1 %v3538_v46  ;;  %v10979_v5 = vpop.f32.mrf.mxu0  ;;  %v3546_v46 = vld [vmem:[#allocation2 + $0x1190] sm:$0xff] }
 0x4fa   : > { %3979 = vmatpush.msra.mxu2 %v3462_v13  ;;  %4005 = vmatpush.msrb.mxu3 %v3558_v51  ;;  %v10974_v36 = vpop.f32.mrf.mxu3  ;;  %14268 = vst [vmem:[#allocation79_spill] sm:$0xff] %v10979_v5  ;;  %v3612_v13 = vld [vmem:[#allocation2 + $0x13a0] sm:$0xff]  ;;  %v4236_v51 = vld [vmem:[#allocation2 + $0x1710] sm:$0xff] }
 0x4fb   : > { %4036 = vmatpush.msra.mxu0 %v3624_v39  ;;  %14266 = vst [vmem:[#allocation77_spill] sm:$0xff] %v10974_v36  ;;  %3759 = vmatmul.f32.gmra.mxu1 %v10888_v63  ;;  %v3520_v39 = vld [vmem:[#allocation2 + $0x10c0] sm:$0xff] }
 0x4fc   : > { %3980 = vmatpush.msra.mxu2 %v3456_v21  ;;  %3853 = vmatpush.msra.mxu1 %v3532_v50  ;;  %v3540_v36 = vld [vmem:[#allocation2 + $0x1160] sm:$0xff]  ;;  %v3534_v50 = vld [vmem:[#allocation2 + $0x1130] sm:$0xff] }
 0x4fd   : > { %4006 = vmatpush.msrb.mxu3 %v3552_v58  ;;  %4037 = vmatpush.msra.mxu0 %v3618_v32  ;;  %v3444_v21 = vld [vmem:[#allocation2 + $0xe60] sm:$0xff]  ;;  %v4224_v58 = vld [vmem:[#allocation2 + $0x16b0] sm:$0xff] }
 0x4fe   : > { %3981 = vmatpush.msra.mxu2 %v3450_v33  ;;  %3938 = vmatmul.f32.gmra.mxu0 %v10870_v8  ;;  %v10982_v5 = vpop.f32.mrf.mxu1  ;;  %v3438_v33 = vld [vmem:[#allocation2 + $0xe30] sm:$0xff]  ;;  %v3432_v32 = vld [vmem:[#allocation2 + $0xe00] sm:$0xff] }
 0x4ff   : > { %3854 = vmatpush.msra.mxu1 %v3526_v17  ;;  %4007 = vmatpush.msrb.mxu3 %v3546_v46  ;;  %14269 = vst [vmem:[#allocation80_spill] sm:$0xff] %v10982_v5  ;;  %v3528_v17 = vld [vmem:[#allocation2 + $0x1100] sm:$0xff] }
 0x500   : > { %4038 = vmatpush.msra.mxu0 %v3612_v13  ;;  %8350 = vmatmul.msk.f32.gmra.mxu2 %vm2466_vm9, %v10883_v0  ;;  %v3629_v13 = vld [vmem:[#allocation2 + $0x1428] sm:$0xff] }
 0x501   : > { %3855 = vmatpush.msra.mxu1 %v3520_v39  ;;  %4008 = vmatpush.msrb.mxu3 %v3540_v36  ;;  %v4218_v36 = vld [vmem:[#allocation2 + $0x1680] sm:$0xff]  ;;  %v3426_v39 = vld [vmem:[#allocation2 + $0xdd0] sm:$0xff] }
 0x502   : > { %4398 = vmatpush.msrb.mxu0 %v4236_v51  ;;  %3982 = vmatpush.msra.mxu2 %v3444_v21  ;;  %v10987_v46 = vpop.f32.mrf.mxu2  ;;  %v10992_v21 = vpop.f32.mrf.mxu0 }
 0x503   : > { %3915 = vmatmul.f32.gmra.mxu3 %v10888_v63  ;;  %3856 = vmatpush.msra.mxu1 %v3514_v49  ;;  %14270 = vst [vmem:[#allocation81_spill] sm:$0xff] %v10987_v46  ;;  %v4212_v49 = vld [vmem:[#allocation2 + $0x1650] sm:$0xff]  ;;  %v3623_v46 = vld [vmem:[#allocation2 + $0x13f8] sm:$0xff] }
 0x504   : > { %4399 = vmatpush.msrb.mxu0 %v4230_v15  ;;  %3983 = vmatpush.msra.mxu2 %v3438_v33  ;;  %v10989_v51 = vpop.f32.mrf.mxu3  ;;  %14272 = vst [vmem:[#allocation83_spill] sm:$0xff] %v10992_v21  ;;  %v3522_v15 = vld [vmem:[#allocation2 + $0x10d0] sm:$0xff]  ;;  %v3420_v33 = vld [vmem:[#allocation2 + $0xda0] sm:$0xff] }
 0x505   : > { %4009 = vmatpush.msrb.mxu3 %v3534_v50  ;;  %14271 = vst [vmem:[#allocation82_spill] sm:$0xff] %v10989_v51  ;;  %3857 = vmatmul.f32.vlgmr.msra.gmra.mxu1 %v10834_v60  ;;  %v3516_v50 = vld [vmem:[#allocation2 + $0x10a0] sm:$0xff] }
 0x506   : > { %4400 = vmatpush.msrb.mxu0 %v4224_v58  ;;  %3984 = vmatpush.msra.mxu2 %v3432_v32  ;;  %v3607_v58 = vld [vmem:[#allocation2 + $0x1378] sm:$0xff]  ;;  %v4206_v51 = vld [vmem:[#allocation2 + $0x1620] sm:$0xff]  ;;  %v3617_v32 = vld [vmem:[#allocation2 + $0x13c8] sm:$0xff] }
 0x507   : > { %4010 = vmatpush.msrb.mxu3 %v3528_v17  ;;  %3941 = vmatmul.f32.gmra.mxu0 %v10852_v18 }
 0x508   : > { %3957 = vmatpush.msrb.mxu1 %v3629_v13  ;;  %4401 = vmatpush.msrb.mxu0 %v4218_v36  ;;  %v3601_v13 = vld [vmem:[#allocation2 + $0x1348] sm:$0xff]  ;;  %v4200_v36 = vld [vmem:[#allocation2 + $0x15f0] sm:$0xff] }
 0x509   : > { %3985 = vmatpush.msra.mxu2 %v3426_v39  ;;  %4011 = vmatpush.msrb.mxu3 %v3522_v15  ;;  %v3611_v39 = vld [vmem:[#allocation2 + $0x1398] sm:$0xff] }
 0x50a   : > { %8351 = vmatmul.msk.f32.gmra.mxu2 %vm2466_vm9, %v10873_v11  ;;  %4402 = vmatpush.msrb.mxu0 %v4212_v49  ;;  %v3631_v15 = vld [vmem:[#allocation2 + $0x1438] sm:$0xff] }
 0x50b   : > { %3958 = vmatpush.msrb.mxu1 %v3623_v46  ;;  %v10997_v17 = vpop.f32.mrf.mxu1  ;;  %3986 = vmatpush.msra.mxu2 %v3420_v33  ;;  %v3511_v46 = vld [vmem:[#allocation2 + $0x1078] sm:$0xff]  ;;  %v4194_v33 = vld [vmem:[#allocation2 + $0x15c0] sm:$0xff] }
 0x50c   : > { %14273 = vst [vmem:[#allocation84_spill] sm:$0xff] %v10997_v17  ;;  %4012 = vmatpush.msrb.mxu3 %v3516_v50  ;;  %4403 = vmatpush.msrb.mxu0 %v4206_v51  ;;  %v11000_v21 = vpop.f32.mrf.mxu2  ;;  %v3595_v49 = vld [vmem:[#allocation2 + $0x1318] sm:$0xff]  ;;  %v3625_v50 = vld [vmem:[#allocation2 + $0x1408] sm:$0xff] }
 0x50d   : > { %4013 = vmatmul.f32.vlgmr.msrb.gmra.mxu3 %v10834_v60  ;;  %4075 = vmatpush.msrb.mxu2 %v3607_v58  ;;  %14274 = vst [vmem:[#allocation85_spill] sm:$0xff] %v11000_v21  ;;  %v11003_v5 = vpop.f32.mrf.mxu3  ;;  %v11005_v17 = vpop.f32.mrf.mxu0  ;;  %v3505_v51 = vld [vmem:[#allocation2 + $0x1048] sm:$0xff]  ;;  %v3499_v21 = vld [vmem:[#allocation2 + $0x1018] sm:$0xff] }
 0x50e   : > { %3959 = vmatpush.msrb.mxu1 %v3617_v32  ;;  %14275 = vst [vmem:[#allocation86_spill] sm:$0xff] %v11003_v5  ;;  %4404 = vmatpush.msrb.mxu0 %v4200_v36  ;;  %v3589_v58 = vld [vmem:[#allocation2 + $0x12e8] sm:$0xff]  ;;  %v4188_v32 = vld [vmem:[#allocation2 + $0x1590] sm:$0xff]  ;;  %v3583_v36 = vld [vmem:[#allocation2 + $0x12b8] sm:$0xff] }
 0x50f   : > { %3860 = vmatmul.f32.gmra.mxu1 %v10870_v8  ;;  %4076 = vmatpush.msrb.mxu2 %v3601_v13  ;;  %14276 = vst [vmem:[#allocation87_spill] sm:$0xff] %v11005_v17  ;;  %v3619_v13 = vld [vmem:[#allocation2 + $0x13d8] sm:$0xff]  ;;  %v3577_v17 = vld [vmem:[#allocation2 + $0x1288] sm:$0xff] }
 0x510   : > { %3960 = vmatpush.msrb.mxu1 %v3611_v39  ;;  %4113 = vmatpush.msra.mxu3 %v3631_v15  ;;  %v4182_v39 = vld [vmem:[#allocation2 + $0x1560] sm:$0xff]  ;;  %v3613_v15 = vld [vmem:[#allocation2 + $0x13a8] sm:$0xff] }
 0x511   : > { %8355 = vmatmul.msk.f32.vlgmr.msra.gmra.mxu0 %vm2466_vm9, %v10843_v40  ;;  %4077 = vmatpush.msrb.mxu2 %v3595_v49  ;;  %v4176_v49 = vld [vmem:[#allocation2 + $0x1530] sm:$0xff] }
 0x512   : > { %4049 = vmatpush.msra.mxu1 %v3511_v46  ;;  %4405 = vmatpush.msrb.mxu0 %v4194_v33  ;;  %v3493_v46 = vld [vmem:[#allocation2 + $0xfe8] sm:$0xff]  ;;  %v4237_v33 = vld [vmem:[#allocation2 + $0x1718] sm:$0xff] }
 0x513   : > { %4114 = vmatpush.msra.mxu3 %v3625_v50  ;;  %4078 = vmatpush.msrb.mxu2 %v3589_v58  ;;  %v3571_v58 = vld [vmem:[#allocation2 + $0x1258] sm:$0xff] }
 0x514   : > { %4050 = vmatpush.msra.mxu1 %v3505_v51  ;;  %4406 = vmatpush.msrb.mxu0 %v4188_v32  ;;  %v3487_v51 = vld [vmem:[#allocation2 + $0xfb8] sm:$0xff] }
 0x515   : > { %3987 = vmatmul.f32.vlgmr.msra.gmra.mxu2 %v10863_v38  ;;  %v11010_v5 = vpop.f32.mrf.mxu1  ;;  %4115 = vmatpush.msra.mxu3 %v3619_v13  ;;  %v4231_v13 = vld [vmem:[#allocation2 + $0x16e8] sm:$0xff] }
 0x516   : > { %14277 = vst [vmem:[#allocation88_spill] sm:$0xff] %v11010_v5  ;;  %4051 = vmatpush.msra.mxu1 %v3499_v21  ;;  %4016 = vmatmul.f32.gmra.mxu3 %v10870_v8  ;;  %v11013_v50 = vpop.f32.mrf.mxu2  ;;  %v4170_v21 = vld [vmem:[#allocation2 + $0x1500] sm:$0xff] }
 0x517   : > { %4079 = vmatpush.msrb.mxu2 %v3583_v36  ;;  %4407 = vmatpush.msrb.mxu0 %v4182_v39  ;;  %14278 = vst [vmem:[#allocation89_spill] sm:$0xff] %v11013_v50  ;;  %v11018_v5 = vpop.f32.mrf.mxu0  ;;  %v3481_v36 = vld [vmem:[#allocation2 + $0xf88] sm:$0xff]  ;;  %v4146_v50 = vld [vmem:[#allocation2 + $0x1440] sm:$0xff] }
 0x518   : > { %4116 = vmatpush.msra.mxu3 %v3613_v15  ;;  %3863 = vmatmul.f32.gmra.mxu1 %v10852_v18  ;;  %14280 = vst [vmem:[#allocation91_spill] sm:$0xff] %v11018_v5  ;;  %v3565_v39 = vld [vmem:[#allocation2 + $0x1228] sm:$0xff]  ;;  %v4164_v15 = vld [vmem:[#allocation2 + $0x14d0] sm:$0xff] }
 0x519   : > { %4080 = vmatpush.msrb.mxu2 %v3577_v17  ;;  %v11016_v32 = vpop.f32.mrf.mxu3  ;;  %4052 = vmatpush.msra.mxu1 %v3493_v46  ;;  %v4225_v17 = vld [vmem:[#allocation2 + $0x16b8] sm:$0xff]  ;;  %v4219_v5 = vld [vmem:[#allocation2 + $0x1688] sm:$0xff] }
 0x51a   : > { %14279 = vst [vmem:[#allocation90_spill] sm:$0xff] %v11016_v32  ;;  %4408 = vmatpush.msrb.mxu0 %v4176_v49  ;;  %4476 = vmatpush.msrb.mxu3 %v4237_v33  ;;  %v3475_v46 = vld [vmem:[#allocation2 + $0xf58] sm:$0xff]  ;;  %v4158_v32 = vld [vmem:[#allocation2 + $0x14a0] sm:$0xff] }
 0x51b   : > { %8356 = vmatmul.msk.f32.gmra.mxu0 %vm2466_vm9, %v10883_v0  ;;  %4053 = vmatpush.msra.mxu1 %v3487_v51  ;;  %v3559_v49 = vld [vmem:[#allocation2 + $0x11f8] sm:$0xff]  ;;  %v3553_v51 = vld [vmem:[#allocation2 + $0x11c8] sm:$0xff] }
 0x51c   : > { %4081 = vmatpush.msrb.mxu2 %v3571_v58  ;;  %4409 = vmatpush.msrb.mxu0 %v4170_v21  ;;  %v3469_v58 = vld [vmem:[#allocation2 + $0xf28] sm:$0xff]  ;;  %v4152_v21 = vld [vmem:[#allocation2 + $0x1470] sm:$0xff] }
 0x51d   : > { %4477 = vmatpush.msrb.mxu3 %v4231_v13  ;;  %4054 = vmatpush.msra.mxu1 %v3481_v36  ;;  %v4213_v13 = vld [vmem:[#allocation2 + $0x1658] sm:$0xff] }
 0x51e   : > { %4082 = vmatpush.msrb.mxu2 %v3565_v39  ;;  %4410 = vmatpush.msrb.mxu0 %v4164_v15  ;;  %v11022_v33 = vpop.f32.mrf.mxu1  ;;  %v3463_v39 = vld [vmem:[#allocation2 + $0xef8] sm:$0xff] }
 0x51f   : > { %4478 = vmatpush.msrb.mxu3 %v4225_v17  ;;  %14281 = vst [vmem:[#allocation92_spill] sm:$0xff] %v11022_v33  ;;  %3990 = vmatmul.f32.gmra.mxu2 %v10900_v28  ;;  %v11026_v36 = vpop.f32.mrf.mxu2  ;;  %v3547_v15 = vld [vmem:[#allocation2 + $0x1198] sm:$0xff]  ;;  %v4327_v33 = vld [vmem:[#allocation2 + $0x19e8] sm:$0xff] }
 0x520   : > { %4019 = vmatmul.f32.gmra.mxu3 %v10852_v18  ;;  %4055 = vmatpush.msra.mxu1 %v3475_v46  ;;  %14282 = vst [vmem:[#allocation93_spill] sm:$0xff] %v11026_v36  ;;  %v4207_v46 = vld [vmem:[#allocation2 + $0x1628] sm:$0xff] }
 0x521   : > { %4083 = vmatpush.msrb.mxu2 %v3559_v49  ;;  %4411 = vmatpush.msrb.mxu0 %v4158_v32  ;;  %v11032_v49 = vpop.f32.mrf.mxu0  ;;  %v3457_v32 = vld [vmem:[#allocation2 + $0xec8] sm:$0xff] }
 0x522   : > { %4479 = vmatpush.msrb.mxu3 %v4219_v5  ;;  %8352 = vmatmul.msk.f32.vlgmr.msrb.gmra.mxu1 %vm2466_vm9, %v10843_v40  ;;  %v11030_v17 = vpop.f32.mrf.mxu3  ;;  %14284 = vst [vmem:[#allocation95_spill] sm:$0xff] %v11032_v49  ;;  %v4333_v5 = vld [vmem:[#allocation2 + $0x1a18] sm:$0xff]  ;;  %v3541_v36 = vld [vmem:[#allocation2 + $0x1168] sm:$0xff] }
 0x523   : > { %4084 = vmatpush.msrb.mxu2 %v3553_v51  ;;  %14283 = vst [vmem:[#allocation94_spill] sm:$0xff] %v11030_v17  ;;  %4056 = vmatpush.msra.mxu1 %v3469_v58  ;;  %v4201_v51 = vld [vmem:[#allocation2 + $0x15f8] sm:$0xff]  ;;  %v4195_v17 = vld [vmem:[#allocation2 + $0x15c8] sm:$0xff] }
 0x524   : > { %4412 = vmatpush.msrb.mxu0 %v4152_v21  ;;  %4480 = vmatpush.msrb.mxu3 %v4213_v13  ;;  %v3451_v58 = vld [vmem:[#allocation2 + $0xe98] sm:$0xff] }
 0x525   : > { %8357 = vmatmul.msk.f32.gmra.mxu0 %vm2466_vm9, %v10873_v11  ;;  %4057 = vmatpush.msra.mxu1 %v3463_v39  ;;  %v3535_v21 = vld [vmem:[#allocation2 + $0x1138] sm:$0xff]  ;;  %v3445_v39 = vld [vmem:[#allocation2 + $0xe68] sm:$0xff] }
 0x526   : > { %4085 = vmatpush.msrb.mxu2 %v3547_v15  ;;  %4413 = vmatpush.msrb.mxu0 %v4146_v50  ;;  %v4321_v49 = vld [vmem:[#allocation2 + $0x19b8] sm:$0xff]  ;;  %v3529_v15 = vld [vmem:[#allocation2 + $0x1108] sm:$0xff] }
 0x527   : > { %4481 = vmatpush.msrb.mxu3 %v4207_v46  ;;  %4058 = vmatpush.msra.mxu1 %v3457_v32  ;;  %v4189_v50 = vld [vmem:[#allocation2 + $0x1598] sm:$0xff]  ;;  %v4315_v46 = vld [vmem:[#allocation2 + $0x1988] sm:$0xff] }
 0x528   : > { %4502 = vmatpush.msra.mxu0 %v4333_v5  ;;  %4086 = vmatpush.msrb.mxu2 %v3541_v36  ;;  %v11036_v13 = vpop.f32.mrf.mxu1  ;;  %v4365_v36 = vrot.slane %v10533_v3, 3  ;;  %v4366_v5 = vrot.slane %v10536_v7, 3 }
 0x529   : > { %4482 = vmatpush.msrb.mxu3 %v4201_v51  ;;  %14285 = vst [vmem:[#allocation96_spill] sm:$0xff] %v11036_v13  ;;  %3993 = vmatmul.f32.gmra.mxu2 %v10888_v63  ;;  %v11043_v32 = vpop.f32.mrf.mxu2  ;;  %v3523_v51 = vld [vmem:[#allocation2 + $0x10d8] sm:$0xff]  ;;  %v3433_v13 = vld [vmem:[#allocation2 + $0xe08] sm:$0xff] }
 0x52a   : > { %4503 = vmatpush.msra.mxu0 %v4327_v33  ;;  %4059 = vmatpush.msra.mxu1 %v3451_v58  ;;  %14286 = vst [vmem:[#allocation97_spill] sm:$0xff] %v11043_v32  ;;  %v3439_v33 = vld [vmem:[#allocation2 + $0xe38] sm:$0xff]  ;;  %v3517_v32 = vld [vmem:[#allocation2 + $0x10a8] sm:$0xff] }
 0x52b   : > { %4087 = vmatpush.msrb.mxu2 %v3535_v21  ;;  %8358 = vmatmul.msk.f32.vlgmr.msra.gmra.mxu3 %vm2466_vm9, %v10843_v40  ;;  %v4183_v40 = vld [vmem:[#allocation2 + $0x1568] sm:$0xff]  ;;  %v4309_v21 = vld [vmem:[#allocation2 + $0x1958] sm:$0xff] }
 0x52c   : > { %4504 = vmatpush.msra.mxu0 %v4321_v49  ;;  %4483 = vmatpush.msrb.mxu3 %v4195_v17  ;;  %v11047_v58 = vpop.f32.mrf.mxu3  ;;  %v11049_v49 = vpop.f32.mrf.mxu0  ;;  %v11052_v17 = vsel %vm1418_vm4, %v4365_v36, %v4366_v5  ;;  %v4356_v36 = vld [vmem:[#allocation2 + $0x1ad0] sm:$0xff] }
 0x52d   : > { %8353 = vmatmul.msk.f32.gmra.mxu1 %vm2466_vm9, %v10883_v0  ;;  %14287 = vst [vmem:[#allocation98_spill] sm:$0xff] %v11047_v58  ;;  %4088 = vmatpush.msrb.mxu2 %v3529_v15  ;;  %v4303_v58 = vld [vmem:[#allocation2 + $0x1928] sm:$0xff] }
 0x52e   : > { %4060 = vmatpush.msra.mxu1 %v3445_v39  ;;  %14288 = vst [vmem:[#allocation99_spill] sm:$0xff] %v11049_v49  ;;  %4484 = vmatpush.msrb.mxu3 %v4189_v50  ;;  %v3427_v39 = vld [vmem:[#allocation2 + $0xdd8] sm:$0xff]  ;;  %v4171_v15 = vld [vmem:[#allocation2 + $0x1508] sm:$0xff]  ;;  %v4344_v49 = vld [vmem:[#allocation2 + $0x1a70] sm:$0xff] }
 0x52f   : > { %4505 = vmatpush.msra.mxu0 %v4315_v46  ;;  %4089 = vmatpush.msrb.mxu2 %v3523_v51  ;;  %v4297_v50 = vld [vmem:[#allocation2 + $0x18f8] sm:$0xff]  ;;  %v3421_v51 = vld [vmem:[#allocation2 + $0xda8] sm:$0xff] }
 0x530   : > { %4061 = vmatpush.msra.mxu1 %v3439_v33  ;;  %4414 = vmatmul.f32.vlgmr.msrb.gmra.mxu0 %v11052_v17  ;;  %v14141_v33 = vrot.slane %v10544_v16, 3 }
 0x531   : > { %4485 = vmatpush.msrb.mxu3 %v4183_v40  ;;  %4506 = vmatpush.msra.mxu0 %v4309_v21  ;;  %v4165_v40 = vld [vmem:[#allocation2 + $0x14d8] sm:$0xff]  ;;  %v4159_v21 = vld [vmem:[#allocation2 + $0x14a8] sm:$0xff] }
 0x532   : > { %4062 = vmatpush.msra.mxu1 %v3433_v13  ;;  %4090 = vmatpush.msrb.mxu2 %v3517_v32  ;;  %v11055_v46 = vpop.f32.mrf.mxu1  ;;  %v4332_v13 = vld [vmem:[#allocation2 + $0x1a10] sm:$0xff] }
 0x533   : > { %4486 = vmatpush.msrb.mxu3 %v4177_v22  ;;  %14289 = vst [vmem:[#allocation100_spill] sm:$0xff] %v11055_v46  ;;  %4091 = vmatmul.f32.vlgmr.msrb.gmra.mxu2 %v10834_v60  ;;  %v4291_v22 = vld [vmem:[#allocation2 + $0x18c8] sm:$0xff]  ;;  %v11061_v32 = vpop.f32.mrf.mxu2  ;;  %v4350_v60 = vld [vmem:[#allocation2 + $0x1aa0] sm:$0xff] }
 0x534   : > { %4507 = vmatpush.msra.mxu0 %v4303_v58  ;;  %4063 = vmatpush.msra.mxu1 %v3427_v39  ;;  %14290 = vst [vmem:[#allocation101_spill] sm:$0xff] %v11061_v32  ;;  %v4326_v39 = vld [vmem:[#allocation2 + $0x19e0] sm:$0xff] }
 0x535   : > { %8359 = vmatmul.msk.f32.gmra.mxu3 %vm2466_vm9, %v10883_v0  ;;  %8354 = vmatmul.msk.f32.gmra.mxu1 %vm2466_vm9, %v10873_v11  ;;  %v11067_v0 = vpop.f32.mrf.mxu0  ;;  %v4338_v32 = vld [vmem:[#allocation2 + $0x1a40] sm:$0xff] }
 0x536   : > { %4487 = vmatpush.msrb.mxu3 %v4171_v15  ;;  %4508 = vmatpush.msra.mxu0 %v4297_v50  ;;  %v11065_v58 = vpop.f32.mrf.mxu3  ;;  %v11072_v15 = vsel %vm1418_vm4, %v4366_v5, %v14141_v33  ;;  %v4285_v50 = vld [vmem:[#allocation2 + $0x1898] sm:$0xff]  ;;  %v4238_v46 = vld [vmem:[#allocation2 + $0x1720] sm:$0xff] }
 0x537   : > { %4462 = vmatpush.msra.mxu2 %v4356_v36  ;;  %4064 = vmatpush.msra.mxu1 %v3421_v51  ;;  %v4153_v36 = vld [vmem:[#allocation2 + $0x1478] sm:$0xff]  ;;  %v4320_v51 = vld [vmem:[#allocation2 + $0x19b0] sm:$0xff] }
 0x538   : > { %4488 = vmatpush.msrb.mxu3 %v4165_v40  ;;  %4509 = vmatpush.msra.mxu0 %v4291_v22  ;;  %v4279_v40 = vld [vmem:[#allocation2 + $0x1868] sm:$0xff]  ;;  %v4314_v22 = vld [vmem:[#allocation2 + $0x1980] sm:$0xff]  ;;  %v4273_v33 = vld [vmem:[#allocation2 + $0x1838] sm:$0xff] }
 0x539   : > { %4424 = vmatpush.msrb.mxu1 %v4332_v13  ;;  %4417 = vmatmul.f32.gmra.mxu0 %v11072_v15  ;;  %v4147_v13 = vld [vmem:[#allocation2 + $0x1448] sm:$0xff] }
 0x53a   : > { %4463 = vmatpush.msra.mxu2 %v4350_v60  ;;  %4489 = vmatpush.msrb.mxu3 %v4159_v21  ;;  %v4334_v60 = vld [vmem:[#allocation2 + $0x1a20] sm:$0xff]  ;;  %v4380_v21 = vrot.slane %v10671_v19, 3 }
 0x53b   : > { %4425 = vmatpush.msrb.mxu1 %v4326_v39  ;;  %4510 = vmatpush.msra.mxu0 %v4285_v50  ;;  %v11076_v5 = vpop.f32.mrf.mxu1  ;;  %v4267_v39 = vld [vmem:[#allocation2 + $0x1808] sm:$0xff]  ;;  %v4232_v50 = vld [vmem:[#allocation2 + $0x16f0] sm:$0xff] }
 0x53c   : > { %4464 = vmatpush.msra.mxu2 %v4344_v49  ;;  %4490 = vmatpush.msrb.mxu3 %v4153_v36  ;;  %14291 = vst [vmem:[#allocation102_spill] sm:$0xff] %v11076_v5  ;;  %v4308_v49 = vld [vmem:[#allocation2 + $0x1950] sm:$0xff] }
 0x53d   : > { %4094 = vmatmul.f32.gmra.mxu2 %v10870_v8  ;;  %4426 = vmatpush.msrb.mxu1 %v4320_v51  ;;  %v4328_v36 = vld [vmem:[#allocation2 + $0x19f0] sm:$0xff] }
 0x53e   : > { %4511 = vmatpush.msra.mxu0 %v4279_v40  ;;  %8360 = vmatmul.msk.f32.gmra.mxu3 %vm2466_vm9, %v10873_v11  ;;  %v11081_v8 = vpop.f32.mrf.mxu2  ;;  %v4302_v11 = vld [vmem:[#allocation2 + $0x1920] sm:$0xff]  ;;  %v4261_v40 = vld [vmem:[#allocation2 + $0x17d8] sm:$0xff] }
 0x53f   : > { %4465 = vmatpush.msra.mxu2 %v4338_v32  ;;  %4491 = vmatpush.msrb.mxu3 %v4147_v13  ;;  %v11083_v51 = vpop.f32.mrf.mxu3  ;;  %v11086_v32 = vpop.f32.mrf.mxu0  ;;  %v4226_v13 = vld [vmem:[#allocation2 + $0x16c0] sm:$0xff] }
 0x540   : > { %4427 = vmatpush.msrb.mxu1 %v4314_v22  ;;  %4512 = vmatpush.msra.mxu0 %v4273_v33  ;;  %v14292_v22 = vrot.slane %v10544_v16, 3  ;;  %v4296_v33 = vld [vmem:[#allocation2 + $0x18f0] sm:$0xff] }
 0x541   : > { %4554 = vmatpush.msrb.mxu2 %v4238_v46  ;;  %4580 = vmatpush.msra.mxu3 %v4334_v60  ;;  %v4322_v46 = vld [vmem:[#allocation2 + $0x19c0] sm:$0xff]  ;;  %v4220_v60 = vld [vmem:[#allocation2 + $0x1690] sm:$0xff] }
 0x542   : > { %4065 = vmatmul.f32.vlgmr.msra.gmra.mxu1 %v10863_v38  ;;  %4513 = vmatpush.msra.mxu0 %v4267_v39  ;;  %v11091_v5 = vsel %vm1418_vm4, %v14292_v22, %v4380_v21  ;;  %v4255_v38 = vld [vmem:[#allocation2 + $0x17a8] sm:$0xff]  ;;  %v4290_v39 = vld [vmem:[#allocation2 + $0x18c0] sm:$0xff]  ;;  %v4249_v21 = vld [vmem:[#allocation2 + $0x1778] sm:$0xff] }
 0x543   : > { %4428 = vmatpush.msrb.mxu1 %v4308_v49  ;;  %4555 = vmatpush.msrb.mxu2 %v4232_v50  ;;  %v4316_v49 = vld [vmem:[#allocation2 + $0x1990] sm:$0xff]  ;;  %v4214_v50 = vld [vmem:[#allocation2 + $0x1660] sm:$0xff] }
 0x544   : > { %4581 = vmatpush.msra.mxu3 %v4328_v36  ;;  %4420 = vmatmul.f32.gmra.mxu0 %v11091_v5  ;;  %v4310_v36 = vld [vmem:[#allocation2 + $0x1960] sm:$0xff] }
 0x545   : > { %4429 = vmatpush.msrb.mxu1 %v4302_v11  ;;  %4514 = vmatpush.msra.mxu0 %v4261_v40  ;;  %v11095_v10 = vpop.f32.mrf.mxu1  ;;  %v4284_v11 = vld [vmem:[#allocation2 + $0x1890] sm:$0xff]  ;;  %v4243_v40 = vld [vmem:[#allocation2 + $0x1748] sm:$0xff] }
 0x546   : > { %4556 = vmatpush.msrb.mxu2 %v4226_v13  ;;  %4582 = vmatpush.msra.mxu3 %v4322_v46  ;;  %14293 = vst [vmem:[#allocation103_spill] sm:$0xff] %v11095_v10  ;;  %v4304_v46 = vld [vmem:[#allocation2 + $0x1930] sm:$0xff]  ;;  %v4202_v13 = vld [vmem:[#allocation2 + $0x1600] sm:$0xff] }
 0x547   : > { %4097 = vmatmul.f32.gmra.mxu2 %v10852_v18  ;;  %4430 = vmatpush.msrb.mxu1 %v4296_v33  ;;  %v4208_v18 = vld [vmem:[#allocation2 + $0x1630] sm:$0xff]  ;;  %v4298_v10 = vld [vmem:[#allocation2 + $0x1900] sm:$0xff] }
 0x548   : > { %4515 = vmatpush.msra.mxu0 %v4255_v38  ;;  %4557 = vmatpush.msrb.mxu2 %v4220_v60  ;;  %v11099_v22 = vpop.f32.mrf.mxu2  ;;  %v4368_v38 = vrot.slane %v10549_v20, 3  ;;  %v4278_v60 = vld [vmem:[#allocation2 + $0x1860] sm:$0xff] }
 0x549   : > { %4583 = vmatpush.msra.mxu3 %v4316_v49  ;;  %4431 = vmatpush.msrb.mxu1 %v4290_v39  ;;  %v11101_v33 = vpop.f32.mrf.mxu3  ;;  %v11106_v39 = vpop.f32.mrf.mxu0  ;;  %v4196_v49 = vld [vmem:[#allocation2 + $0x15d0] sm:$0xff] }
 0x54a   : > { %4492 = vmatmul.f32.vlgmr.msrb.gmra.mxu3 %v11052_v17  ;;  %4516 = vmatpush.msra.mxu0 %v4249_v21  ;;  %v14294_v21 = vrot.slane %v10559_v35, 3 }
 0x54b   : > { %4558 = vmatpush.msrb.mxu2 %v4214_v50  ;;  %4584 = vmatpush.msra.mxu3 %v4310_v36  ;;  %v4272_v36 = vld [vmem:[#allocation2 + $0x1830] sm:$0xff] }
 0x54c   : > { %4068 = vmatmul.f32.gmra.mxu1 %v10900_v28  ;;  %4517 = vmatpush.msra.mxu0 %v4243_v40  ;;  %v11111_v50 = vsel %vm1418_vm4, %v4368_v38, %v14294_v21  ;;  %v4371_v28 = vrot.slane %v10555_v12, 3  ;;  %v4190_v38 = vld [vmem:[#allocation2 + $0x15a0] sm:$0xff] }
 0x54d   : > { %4432 = vmatpush.msrb.mxu1 %v4284_v11  ;;  %4559 = vmatpush.msrb.mxu2 %v4208_v18  ;;  %v14295_v11 = vrot.slane %v10563_v41, 3  ;;  %v4358_v18 = vld [vmem:[#allocation2 + $0x1ae0] sm:$0xff] }
 0x54e   : > { %4585 = vmatpush.msra.mxu3 %v4304_v46  ;;  %4518 = vmatmul.f32.vlgmr.msra.gmra.mxu0 %v11111_v50  ;;  %v4266_v46 = vld [vmem:[#allocation2 + $0x1800] sm:$0xff] }
 0x54f   : > { %4433 = vmatpush.msrb.mxu1 %v4278_v60  ;;  %4560 = vmatpush.msrb.mxu2 %v4202_v13  ;;  %v11118_v40 = vsel %vm1418_vm4, %v4371_v28, %v14295_v11  ;;  %v4286_v60 = vld [vmem:[#allocation2 + $0x18a0] sm:$0xff]  ;;  %v4376_v13 = vrot.slane %v10578_v53, 3  ;;  %v4280_v28 = vld [vmem:[#allocation2 + $0x1870] sm:$0xff] }
 0x550   : > { %4586 = vmatpush.msra.mxu3 %v4298_v10  ;;  %8361 = vmatmul.msk.f32.vlgmr.msra.gmra.mxu2 %vm2466_vm9, %v11118_v40  ;;  %v11122_v21 = vpop.f32.mrf.mxu1  ;;  %v4184_v10 = vld [vmem:[#allocation2 + $0x1570] sm:$0xff] }
 0x551   : > { %4434 = vmatpush.msrb.mxu1 %v4272_v36  ;;  %14296 = vst [vmem:[#allocation104_spill] sm:$0xff] %v11122_v21  ;;  %4561 = vmatpush.msrb.mxu2 %v4196_v49  ;;  %v4260_v36 = vld [vmem:[#allocation2 + $0x17d0] sm:$0xff]  ;;  %v4178_v21 = vld [vmem:[#allocation2 + $0x1540] sm:$0xff] }
 0x552   : > { %4587 = vmatpush.msra.mxu3 %v4292_v37  ;;  %4618 = vmatpush.msrb.mxu0 %v4358_v18  ;;  %v11126_v11 = vpop.f32.mrf.mxu2  ;;  %v4254_v37 = vld [vmem:[#allocation2 + $0x17a0] sm:$0xff] }
 0x553   : > { %4495 = vmatmul.f32.gmra.mxu3 %v11072_v15  ;;  %4435 = vmatpush.msrb.mxu1 %v4266_v46  ;;  %v11131_v18 = vpop.f32.mrf.mxu0  ;;  %v4274_v46 = vld [vmem:[#allocation2 + $0x1840] sm:$0xff] }
 0x554   : > { %4562 = vmatpush.msrb.mxu2 %v4190_v38  ;;  %4588 = vmatpush.msra.mxu3 %v4286_v60  ;;  %v11128_v49 = vpop.f32.mrf.mxu3  ;;  %14298 = vst [vmem:[#allocation106_spill] sm:$0xff] %v11131_v18  ;;  %v4340_v38 = vld [vmem:[#allocation2 + $0x1a50] sm:$0xff]  ;;  %v14299_v60 = vrot.slane %v10559_v35, 3 }
 0x555   : > { %4619 = vmatpush.msrb.mxu0 %v4352_v56  ;;  %14297 = vst [vmem:[#allocation105_spill] sm:$0xff] %v11128_v49  ;;  %4071 = vmatmul.f32.gmra.mxu1 %v10888_v63  ;;  %v4240_v49 = vld [vmem:[#allocation2 + $0x1730] sm:$0xff] }
 0x556   : > { %4563 = vmatpush.msrb.mxu2 %v4184_v10  ;;  %4436 = vmatpush.msrb.mxu1 %v4260_v36  ;;  %v11137_v56 = vsel %vm1418_vm4, %v14299_v60, %v4376_v13  ;;  %v4268_v63 = vld [vmem:[#allocation2 + $0x1810] sm:$0xff]  ;;  %v14300_v36 = vrot.slane %v10563_v41, 3  ;;  %v4242_v60 = vld [vmem:[#allocation2 + $0x1740] sm:$0xff] }
 0x557   : > { %4589 = vmatpush.msra.mxu3 %v4280_v28  ;;  %4620 = vmatpush.msrb.mxu0 %v4346_v52  ;;  %v4172_v10 = vld [vmem:[#allocation2 + $0x1510] sm:$0xff]  ;;  %v4234_v28 = vld [vmem:[#allocation2 + $0x1700] sm:$0xff] }
 0x558   : > { %4564 = vmatpush.msrb.mxu2 %v4178_v21  ;;  %4521 = vmatmul.f32.gmra.mxu0 %v11137_v56  ;;  %v11143_v52 = vsel %vm1418_vm4, %v14300_v36, %v4378_v9  ;;  %v11145_v18 = vpop.f32.mrf.mxu1  ;;  %v4166_v21 = vld [vmem:[#allocation2 + $0x14e0] sm:$0xff] }
 0x559   : > { %4437 = vmatpush.msrb.mxu1 %v4254_v37  ;;  %4590 = vmatpush.msra.mxu3 %v4274_v46  ;;  %14301 = vst [vmem:[#allocation107_spill] sm:$0xff] %v11145_v18  ;;  %v4262_v37 = vld [vmem:[#allocation2 + $0x17e0] sm:$0xff]  ;;  %v4382_v46 = vrot.slane %v10683_v43, 3  ;;  %v4384_v18 = vrot.slane %v10659_v48, 3 }
 0x55a   : > { %4621 = vmatpush.msrb.mxu0 %v4340_v38  ;;  %8362 = vmatmul.msk.f32.gmra.mxu2 %vm2466_vm9, %v11143_v52  ;;  %v4256_v38 = vld [vmem:[#allocation2 + $0x17b0] sm:$0xff] }
 0x55b   : > { %4438 = vmatpush.msrb.mxu1 %v4248_v61  ;;  %4591 = vmatpush.msra.mxu3 %v4268_v63  ;;  %v4228_v61 = vld [vmem:[#allocation2 + $0x16d0] sm:$0xff] }
 0x55c   : > { %4710 = vmatpush.msra.mxu0 %v4240_v49  ;;  %4565 = vmatpush.msrb.mxu2 %v4172_v10  ;;  %v4160_v49 = vld [vmem:[#allocation2 + $0x14b0] sm:$0xff]  ;;  %v11151_v36 = vpop.f32.mrf.mxu2  ;;  %v4222_v10 = vld [vmem:[#allocation2 + $0x16a0] sm:$0xff]  ;;  %v11157_v30 = vpop.f32.mrf.mxu0 }
 0x55d   : > { %4498 = vmatmul.f32.gmra.mxu3 %v11091_v5  ;;  %4439 = vmatpush.msrb.mxu1 %v4242_v60  ;;  %14302 = vst [vmem:[#allocation108_spill] sm:$0xff] %v11151_v36  ;;  %v4250_v60 = vld [vmem:[#allocation2 + $0x1780] sm:$0xff]  ;;  %v4244_v36 = vld [vmem:[#allocation2 + $0x1750] sm:$0xff] }
 0x55e   : > { %4711 = vmatpush.msra.mxu0 %v4234_v28  ;;  %4566 = vmatpush.msrb.mxu2 %v4166_v21  ;;  %v11154_v63 = vpop.f32.mrf.mxu3  ;;  %14304 = vst [vmem:[#allocation110_spill] sm:$0xff] %v11157_v30  ;;  %v11160_v28 = vsel %vm1418_vm4, %v4376_v13, %v4382_v46  ;;  %v4216_v21 = vld [vmem:[#allocation2 + $0x1670] sm:$0xff]  ;;  %v4335_v13 = vld [vmem:[#allocation2 + $0x1a28] sm:$0xff]  ;;  %v4210_v46 = vld [vmem:[#allocation2 + $0x1640] sm:$0xff] }
 0x55f   : > { %4592 = vmatpush.msra.mxu3 %v4262_v37  ;;  %14303 = vst [vmem:[#allocation109_spill] sm:$0xff] %v11154_v63  ;;  %4440 = vmatmul.f32.vlgmr.msrb.gmra.mxu1 %v11111_v50  ;;  %v4351_v37 = vld [vmem:[#allocation2 + $0x1aa8] sm:$0xff]  ;;  %v11164_v63 = vsel %vm1418_vm4, %v4378_v9, %v4384_v18  ;;  %v4204_v9 = vld [vmem:[#allocation2 + $0x1610] sm:$0xff] }
 0x560   : > { %4712 = vmatpush.msra.mxu0 %v4228_v61  ;;  %4567 = vmatpush.msrb.mxu2 %v4160_v49  ;;  %v4148_v61 = vld [vmem:[#allocation2 + $0x1450] sm:$0xff]  ;;  %v4345_v49 = vld [vmem:[#allocation2 + $0x1a78] sm:$0xff]  ;;  %v4359_v18 = vld [vmem:[#allocation2 + $0x1ae8] sm:$0xff] }
 0x561   : > { %4593 = vmatpush.msra.mxu3 %v4256_v38  ;;  %4524 = vmatmul.f32.gmra.mxu0 %v11160_v28 }
 0x562   : > { %4540 = vmatpush.msra.mxu1 %v4357_v27  ;;  %4713 = vmatpush.msra.mxu0 %v4222_v10  ;;  %v4329_v27 = vld [vmem:[#allocation2 + $0x19f8] sm:$0xff] }
 0x563   : > { %4568 = vmatpush.msrb.mxu2 %v4154_v62  ;;  %4594 = vmatpush.msra.mxu3 %v4250_v60  ;;  %v4339_v62 = vld [vmem:[#allocation2 + $0x1a48] sm:$0xff] }
 0x564   : > { %8363 = vmatmul.msk.f32.gmra.mxu2 %vm2466_vm9, %v11164_v63  ;;  %4714 = vmatpush.msra.mxu0 %v4216_v21  ;;  %v4239_v60 = vld [vmem:[#allocation2 + $0x1728] sm:$0xff] }
 0x565   : > { %4541 = vmatpush.msra.mxu1 %v4351_v37  ;;  %v11168_v38 = vpop.f32.mrf.mxu1  ;;  %4569 = vmatpush.msrb.mxu2 %v4148_v61  ;;  %v4323_v21 = vld [vmem:[#allocation2 + $0x19c8] sm:$0xff]  ;;  %v4353_v61 = vld [vmem:[#allocation2 + $0x1ab8] sm:$0xff] }
 0x566   : > { %14305 = vst [vmem:[#allocation111_spill] sm:$0xff] %v11168_v38  ;;  %4595 = vmatpush.msra.mxu3 %v4244_v36  ;;  %4715 = vmatpush.msra.mxu0 %v4210_v46  ;;  %v11171_v10 = vpop.f32.mrf.mxu2  ;;  %v4198_v36 = vld [vmem:[#allocation2 + $0x15e0] sm:$0xff]  ;;  %v4317_v46 = vld [vmem:[#allocation2 + $0x1998] sm:$0xff]  ;;  %v4227_v38 = vld [vmem:[#allocation2 + $0x16c8] sm:$0xff] }
 0x567   : > { %4596 = vmatmul.f32.vlgmr.msra.gmra.mxu3 %v11111_v50  ;;  %4658 = vmatpush.msra.mxu2 %v4335_v13  ;;  %14306 = vst [vmem:[#allocation112_spill] sm:$0xff] %v11171_v10  ;;  %v11174_v37 = vpop.f32.mrf.mxu3  ;;  %v11176_v30 = vpop.f32.mrf.mxu0  ;;  %v4233_v13 = vld [vmem:[#allocation2 + $0x16f8] sm:$0xff] }
 0x568   : > { %4542 = vmatpush.msra.mxu1 %v4345_v49  ;;  %14307 = vst [vmem:[#allocation113_spill] sm:$0xff] %v11174_v37  ;;  %4716 = vmatpush.msra.mxu0 %v4204_v9  ;;  %v4192_v49 = vld [vmem:[#allocation2 + $0x15b0] sm:$0xff]  ;;  %v4311_v9 = vld [vmem:[#allocation2 + $0x1968] sm:$0xff]  ;;  %v4305_v37 = vld [vmem:[#allocation2 + $0x1938] sm:$0xff] }
 0x569   : > { %4443 = vmatmul.f32.gmra.mxu1 %v11137_v56  ;;  %4659 = vmatpush.msra.mxu2 %v4329_v27  ;;  %14308 = vst [vmem:[#allocation114_spill] sm:$0xff] %v11176_v30  ;;  %v4347_v27 = vld [vmem:[#allocation2 + $0x1a88] sm:$0xff] }
 0x56a   : > { %4543 = vmatpush.msra.mxu1 %v4339_v62  ;;  %4696 = vmatpush.msrb.mxu3 %v4359_v18  ;;  %v4186_v62 = vld [vmem:[#allocation2 + $0x1580] sm:$0xff]  ;;  %v4341_v18 = vld [vmem:[#allocation2 + $0x1a58] sm:$0xff] }
 0x56b   : > { %8367 = vmatmul.msk.f32.vlgmr.msrb.gmra.mxu0 %vm2466_vm9, %v11118_v40  ;;  %4660 = vmatpush.msra.mxu2 %v4323_v21  ;;  %v4180_v21 = vld [vmem:[#allocation2 + $0x1550] sm:$0xff] }
 0x56c   : > { %4632 = vmatpush.msrb.mxu1 %v4239_v60  ;;  %4717 = vmatpush.msra.mxu0 %v4198_v36  ;;  %v4221_v60 = vld [vmem:[#allocation2 + $0x1698] sm:$0xff] }
 0x56d   : > { %4697 = vmatpush.msrb.mxu3 %v4353_v61  ;;  %4661 = vmatpush.msra.mxu2 %v4317_v46  ;;  %v4241_v36 = vld [vmem:[#allocation2 + $0x1738] sm:$0xff]  ;;  %v4299_v46 = vld [vmem:[#allocation2 + $0x1908] sm:$0xff] }
 0x56e   : > { %4633 = vmatpush.msrb.mxu1 %v4233_v13  ;;  %4718 = vmatpush.msra.mxu0 %v4192_v49  ;;  %v4215_v13 = vld [vmem:[#allocation2 + $0x1668] sm:$0xff] }
 0x56f   : > { %4570 = vmatmul.f32.vlgmr.msrb.gmra.mxu2 %v11052_v17  ;;  %v11181_v30 = vpop.f32.mrf.mxu1  ;;  %4698 = vmatpush.msrb.mxu3 %v4347_v27  ;;  %v4235_v27 = vld [vmem:[#allocation2 + $0x1708] sm:$0xff] }
 0x570   : > { %14309 = vst [vmem:[#allocation115_spill] sm:$0xff] %v11181_v30  ;;  %4634 = vmatpush.msrb.mxu1 %v4227_v38  ;;  %4599 = vmatmul.f32.gmra.mxu3 %v11137_v56  ;;  %v11184_v61 = vpop.f32.mrf.mxu2  ;;  %v4174_v38 = vld [vmem:[#allocation2 + $0x1520] sm:$0xff] }
 0x571   : > { %4662 = vmatpush.msra.mxu2 %v4311_v9  ;;  %4719 = vmatpush.msra.mxu0 %v4186_v62  ;;  %14310 = vst [vmem:[#allocation116_spill] sm:$0xff] %v11184_v61  ;;  %v11189_v10 = vpop.f32.mrf.mxu0  ;;  %v4209_v9 = vld [vmem:[#allocation2 + $0x1638] sm:$0xff]  ;;  %v4150_v61 = vld [vmem:[#allocation2 + $0x1460] sm:$0xff] }
 0x572   : > { %4699 = vmatpush.msrb.mxu3 %v4341_v18  ;;  %4446 = vmatmul.f32.gmra.mxu1 %v11160_v28  ;;  %14312 = vst [vmem:[#allocation118_spill] sm:$0xff] %v11189_v10  ;;  %v4293_v62 = vld [vmem:[#allocation2 + $0x18d8] sm:$0xff]  ;;  %v4168_v18 = vld [vmem:[#allocation2 + $0x14f0] sm:$0xff]  ;;  %v4223_v10 = vld [vmem:[#allocation2 + $0x16a8] sm:$0xff] }
 0x573   : > { %4663 = vmatpush.msra.mxu2 %v4305_v37  ;;  %v11187_v49 = vpop.f32.mrf.mxu3  ;;  %4635 = vmatpush.msrb.mxu1 %v4221_v60  ;;  %v4229_v37 = vld [vmem:[#allocation2 + $0x16d8] sm:$0xff]  ;;  %v4203_v60 = vld [vmem:[#allocation2 + $0x1608] sm:$0xff] }
 0x574   : > { %14311 = vst [vmem:[#allocation117_spill] sm:$0xff] %v11187_v49  ;;  %4720 = vmatpush.msra.mxu0 %v4180_v21  ;;  %4788 = vmatpush.msra.mxu3 %v4241_v36  ;;  %v4287_v21 = vld [vmem:[#allocation2 + $0x18a8] sm:$0xff]  ;;  %v4162_v49 = vld [vmem:[#allocation2 + $0x14c0] sm:$0xff] }
 0x575   : > { %8368 = vmatmul.msk.f32.gmra.mxu0 %vm2466_vm9, %v11143_v52  ;;  %4636 = vmatpush.msrb.mxu1 %v4215_v13  ;;  %v4281_v13 = vld [vmem:[#allocation2 + $0x1878] sm:$0xff] }
 0x576   : > { %4664 = vmatpush.msra.mxu2 %v4299_v46  ;;  %4721 = vmatpush.msra.mxu0 %v4174_v38  ;;  %v4197_v46 = vld [vmem:[#allocation2 + $0x15d8] sm:$0xff]  ;;  %v4156_v38 = vld [vmem:[#allocation2 + $0x1490] sm:$0xff] }
 0x577   : > { %4789 = vmatpush.msra.mxu3 %v4235_v27  ;;  %4637 = vmatpush.msrb.mxu1 %v4209_v9  ;;  %v4217_v27 = vld [vmem:[#allocation2 + $0x1678] sm:$0xff] }
 0x578   : > { %4665 = vmatpush.msra.mxu2 %v4293_v62  ;;  %4722 = vmatpush.msra.mxu0 %v4168_v18  ;;  %v11193_v36 = vpop.f32.mrf.mxu1  ;;  %v4191_v62 = vld [vmem:[#allocation2 + $0x15a8] sm:$0xff] }
 0x579   : > { %4790 = vmatpush.msra.mxu3 %v4229_v37  ;;  %14313 = vst [vmem:[#allocation119_spill] sm:$0xff] %v11193_v36  ;;  %4573 = vmatmul.f32.gmra.mxu2 %v11072_v15  ;;  %v11197_v9 = vpop.f32.mrf.mxu2  ;;  %v4275_v18 = vld [vmem:[#allocation2 + $0x1848] sm:$0xff] }
 0x57a   : > { %4602 = vmatmul.f32.gmra.mxu3 %v11160_v28  ;;  %4638 = vmatpush.msrb.mxu1 %v4203_v60  ;;  %14314 = vst [vmem:[#allocation120_spill] sm:$0xff] %v11197_v9  ;;  %v4211_v60 = vld [vmem:[#allocation2 + $0x1648] sm:$0xff]  ;;  %v4269_v9 = vld [vmem:[#allocation2 + $0x1818] sm:$0xff] }
 0x57b   : > { %4666 = vmatpush.msra.mxu2 %v4287_v21  ;;  %4723 = vmatpush.msra.mxu0 %v4162_v49  ;;  %v11203_v21 = vpop.f32.mrf.mxu0  ;;  %v4185_v49 = vld [vmem:[#allocation2 + $0x1578] sm:$0xff]  ;;  %v4331_v36 = vld [vmem:[#allocation2 + $0x1a08] sm:$0xff] }
 0x57c   : > { %4791 = vmatpush.msra.mxu3 %v4223_v10  ;;  %8364 = vmatmul.msk.f32.vlgmr.msra.gmra.mxu1 %vm2466_vm9, %v11118_v40  ;;  %v11201_v37 = vpop.f32.mrf.mxu3  ;;  %14316 = vst [vmem:[#allocation122_spill] sm:$0xff] %v11203_v21  ;;  %v4337_v10 = vld [vmem:[#allocation2 + $0x1a38] sm:$0xff] }
 0x57d   : > { %4667 = vmatpush.msra.mxu2 %v4281_v13  ;;  %14315 = vst [vmem:[#allocation121_spill] sm:$0xff] %v11201_v37  ;;  %4639 = vmatpush.msrb.mxu1 %v4197_v46  ;;  %v4205_v13 = vld [vmem:[#allocation2 + $0x1618] sm:$0xff]  ;;  %v4179_v46 = vld [vmem:[#allocation2 + $0x1548] sm:$0xff] }
 0x57e   : > { %4724 = vmatpush.msra.mxu0 %v4156_v38  ;;  %4792 = vmatpush.msra.mxu3 %v4217_v27  ;;  %v4263_v38 = vld [vmem:[#allocation2 + $0x17e8] sm:$0xff]  ;;  %v4325_v21 = vld [vmem:[#allocation2 + $0x19d8] sm:$0xff] }
 0x57f   : > { %8369 = vmatmul.msk.f32.gmra.mxu0 %vm2466_vm9, %v11164_v63  ;;  %4640 = vmatpush.msrb.mxu1 %v4191_v62  ;;  %v4199_v37 = vld [vmem:[#allocation2 + $0x15e8] sm:$0xff]  ;;  %v4173_v62 = vld [vmem:[#allocation2 + $0x1518] sm:$0xff] }
 0x580   : > { %4668 = vmatpush.msra.mxu2 %v4275_v18  ;;  %4725 = vmatpush.msra.mxu0 %v4150_v61  ;;  %v4257_v18 = vld [vmem:[#allocation2 + $0x17b8] sm:$0xff] }
 0x581   : > { %4793 = vmatpush.msra.mxu3 %v4211_v60  ;;  %4641 = vmatpush.msrb.mxu1 %v4185_v49  ;;  %v4193_v61 = vld [vmem:[#allocation2 + $0x15b8] sm:$0xff]  ;;  %v4319_v60 = vld [vmem:[#allocation2 + $0x19a8] sm:$0xff] }
 0x582   : > { %4814 = vmatpush.msrb.mxu0 %v4337_v10  ;;  %4669 = vmatpush.msra.mxu2 %v4269_v9  ;;  %v11207_v27 = vpop.f32.mrf.mxu1  ;;  %v4167_v9 = vld [vmem:[#allocation2 + $0x14e8] sm:$0xff] }
 0x583   : > { %4794 = vmatpush.msra.mxu3 %v4205_v13  ;;  %14317 = vst [vmem:[#allocation123_spill] sm:$0xff] %v11207_v27  ;;  %4576 = vmatmul.f32.gmra.mxu2 %v11091_v5  ;;  %v11212_v10 = vpop.f32.mrf.mxu2  ;;  %v4251_v49 = vld [vmem:[#allocation2 + $0x1788] sm:$0xff] }
 0x584   : > { %4815 = vmatpush.msrb.mxu0 %v4331_v36  ;;  %4642 = vmatpush.msrb.mxu1 %v4179_v46  ;;  %14318 = vst [vmem:[#allocation124_spill] sm:$0xff] %v11212_v10  ;;  %v4187_v13 = vld [vmem:[#allocation2 + $0x1588] sm:$0xff]  ;;  %v11218_v46 = vpop.f32.mrf.mxu0  ;;  %v4245_v10 = vld [vmem:[#allocation2 + $0x1758] sm:$0xff] }
 0x585   : > { %4670 = vmatpush.msra.mxu2 %v4263_v38  ;;  %8370 = vmatmul.msk.f32.vlgmr.msrb.gmra.mxu3 %vm2466_vm9, %v11118_v40  ;;  %14320 = vst [vmem:[#allocation126_spill] sm:$0xff] %v11218_v46  ;;  %v4161_v38 = vld [vmem:[#allocation2 + $0x14b8] sm:$0xff]  ;;  %v4307_v27 = vld [vmem:[#allocation2 + $0x1948] sm:$0xff] }
 0x586   : > { %4816 = vmatpush.msrb.mxu0 %v4325_v21  ;;  %4795 = vmatpush.msra.mxu3 %v4199_v37  ;;  %v11216_v36 = vpop.f32.mrf.mxu3  ;;  %v4313_v21 = vld [vmem:[#allocation2 + $0x1978] sm:$0xff] }
 0x587   : > { %8365 = vmatmul.msk.f32.gmra.mxu1 %vm2466_vm9, %v11143_v52  ;;  %14319 = vst [vmem:[#allocation125_spill] sm:$0xff] %v11216_v36  ;;  %4671 = vmatpush.msra.mxu2 %v4257_v18  ;;  %v4181_v37 = vld [vmem:[#allocation2 + $0x1558] sm:$0xff]  ;;  %v4155_v36 = vld [vmem:[#allocation2 + $0x1488] sm:$0xff] }
 0x588   : > { %4643 = vmatpush.msrb.mxu1 %v4173_v62  ;;  %4796 = vmatpush.msra.mxu3 %v4193_v61  ;;  %v4175_v62 = vld [vmem:[#allocation2 + $0x1528] sm:$0xff]  ;;  %v4301_v18 = vld [vmem:[#allocation2 + $0x1918] sm:$0xff]  ;;  %v4360_v61 = vld [vmem:[#allocation2 + $0x1af0] sm:$0xff] }
 0x589   : > { %4817 = vmatpush.msrb.mxu0 %v4319_v60  ;;  %4672 = vmatpush.msra.mxu2 %v4251_v49  ;;  %v4149_v60 = vld [vmem:[#allocation2 + $0x1458] sm:$0xff]  ;;  %v4336_v49 = vld [vmem:[#allocation2 + $0x1a30] sm:$0xff] }
 0x58a   : > { %4644 = vmatpush.msrb.mxu1 %v4167_v9  ;;  %4726 = vmatmul.f32.vlgmr.msra.gmra.mxu0 %v11052_v17  ;;  %v4169_v9 = vld [vmem:[#allocation2 + $0x14f8] sm:$0xff] }
 0x58b   : > { %4797 = vmatpush.msra.mxu3 %v4187_v13  ;;  %4818 = vmatpush.msrb.mxu0 %v4313_v21  ;;  %v4295_v13 = vld [vmem:[#allocation2 + $0x18e8] sm:$0xff]  ;;  %v4354_v21 = vld [vmem:[#allocation2 + $0x1ac0] sm:$0xff] }
 0x58c   : > { %4645 = vmatpush.msrb.mxu1 %v4161_v38  ;;  %4673 = vmatpush.msra.mxu2 %v4245_v10  ;;  %v11221_v46 = vpop.f32.mrf.mxu1 }
 0x58d   : > { %4798 = vmatpush.msra.mxu3 %v4181_v37  ;;  %14321 = vst [vmem:[#allocation127_spill] sm:$0xff] %v11221_v46  ;;  %4674 = vmatmul.f32.vlgmr.msra.gmra.mxu2 %v11111_v50  ;;  %v11226_v10 = vpop.f32.mrf.mxu2  ;;  %v4283_v46 = vld [vmem:[#allocation2 + $0x1888] sm:$0xff] }
 0x58e   : > { %4819 = vmatpush.msrb.mxu0 %v4307_v27  ;;  %4646 = vmatpush.msrb.mxu1 %v4155_v36  ;;  %14322 = vst [vmem:[#allocation128_spill] sm:$0xff] %v11226_v10  ;;  %v4163_v27 = vld [vmem:[#allocation2 + $0x14c8] sm:$0xff]  ;;  %v4330_v36 = vld [vmem:[#allocation2 + $0x1a00] sm:$0xff]  ;;  %v11232_v37 = vpop.f32.mrf.mxu0  ;;  %v4157_v10 = vld [vmem:[#allocation2 + $0x1498] sm:$0xff] }
 0x58f   : > { %8371 = vmatmul.msk.f32.gmra.mxu3 %vm2466_vm9, %v11143_v52  ;;  %8366 = vmatmul.msk.f32.gmra.mxu1 %vm2466_vm9, %v11164_v63  ;;  %14324 = vst [vmem:[#allocation130_spill] sm:$0xff] %v11232_v37  ;;  %v4318_v37 = vld [vmem:[#allocation2 + $0x19a0] sm:$0xff] }
 0x590   : > { %4799 = vmatpush.msra.mxu3 %v4175_v62  ;;  %4820 = vmatpush.msrb.mxu0 %v4301_v18  ;;  %v11230_v38 = vpop.f32.mrf.mxu3  ;;  %v4289_v62 = vld [vmem:[#allocation2 + $0x18b8] sm:$0xff]  ;;  %v4348_v18 = vld [vmem:[#allocation2 + $0x1a90] sm:$0xff] }
 0x591   : > { %4774 = vmatpush.msrb.mxu2 %v4360_v61  ;;  %14323 = vst [vmem:[#allocation129_spill] sm:$0xff] %v11230_v38  ;;  %4647 = vmatpush.msrb.mxu1 %v4149_v60  ;;  %v4324_v61 = vld [vmem:[#allocation2 + $0x19d0] sm:$0xff]  ;;  %v4342_v60 = vld [vmem:[#allocation2 + $0x1a60] sm:$0xff] }
 0x592   : > { %4800 = vmatpush.msra.mxu3 %v4169_v9  ;;  %4821 = vmatpush.msrb.mxu0 %v4295_v13  ;;  %v4151_v9 = vld [vmem:[#allocation2 + $0x1468] sm:$0xff]  ;;  %v4277_v13 = vld [vmem:[#allocation2 + $0x1858] sm:$0xff]  ;;  %v4975_v38 = vld [vmem:[#allocation2 + $0x1dd0] sm:$0xff] }
 0x593   : > { %4736 = vmatpush.msra.mxu1 %v4336_v49  ;;  %4729 = vmatmul.f32.gmra.mxu0 %v11072_v15 }
 0x594   : > { %4775 = vmatpush.msrb.mxu2 %v4354_v21  ;;  %4801 = vmatpush.msra.mxu3 %v4163_v27  ;;  %v5071_v21 = vld [vmem:[#allocation2 + $0x20d0] sm:$0xff] }
 0x595   : > { %4737 = vmatpush.msra.mxu1 %v4330_v36  ;;  %4822 = vmatpush.msrb.mxu0 %v4289_v62  ;;  %v11236_v49 = vpop.f32.mrf.mxu1  ;;  %v4312_v27 = vld [vmem:[#allocation2 + $0x1970] sm:$0xff]  ;;  %v4271_v36 = vld [vmem:[#allocation2 + $0x1828] sm:$0xff]  ;;  %v4969_v62 = vld [vmem:[#allocation2 + $0x1da0] sm:$0xff] }
 0x596   : > { %4776 = vmatpush.msrb.mxu2 %v4348_v18  ;;  %4802 = vmatpush.msra.mxu3 %v4157_v10  ;;  %14325 = vst [vmem:[#allocation131_spill] sm:$0xff] %v11236_v49  ;;  %v5065_v18 = vld [vmem:[#allocation2 + $0x20a0] sm:$0xff] }
 0x597   : > { %4677 = vmatmul.f32.gmra.mxu2 %v11137_v56  ;;  %4738 = vmatpush.msra.mxu1 %v4324_v61 }
 0x598   : > { %4823 = vmatpush.msrb.mxu0 %v4283_v46  ;;  %8372 = vmatmul.msk.f32.gmra.mxu3 %vm2466_vm9, %v11164_v63  ;;  %v11240_v10 = vpop.f32.mrf.mxu2  ;;  %v4306_v46 = vld [vmem:[#allocation2 + $0x1940] sm:$0xff]  ;;  %v11245_v61 = vpop.f32.mrf.mxu0 }
 0x599   : > { %4777 = vmatpush.msrb.mxu2 %v4342_v60  ;;  %4803 = vmatpush.msra.mxu3 %v4151_v9  ;;  %14326 = vst [vmem:[#allocation132_spill] sm:$0xff] %v11240_v10  ;;  %v11242_v49 = vpop.f32.mrf.mxu3  ;;  %v4265_v60 = vld [vmem:[#allocation2 + $0x17f8] sm:$0xff]  ;;  %v5059_v9 = vld [vmem:[#allocation2 + $0x2070] sm:$0xff]  ;;  %v5041_v10 = vld [vmem:[#allocation2 + $0x1fe0] sm:$0xff] }
 0x59a   : > { %4739 = vmatpush.msra.mxu1 %v4318_v37  ;;  %4824 = vmatpush.msrb.mxu0 %v4277_v13  ;;  %14327 = vst [vmem:[#allocation133_spill] sm:$0xff] %v11242_v49  ;;  %v4963_v37 = vld [vmem:[#allocation2 + $0x1d70] sm:$0xff]  ;;  %v4259_v13 = vld [vmem:[#allocation2 + $0x17c8] sm:$0xff]  ;;  %v5053_v49 = vld [vmem:[#allocation2 + $0x2040] sm:$0xff] }
 0x59b   : > { %5134 = vmatpush.msra.mxu2 %v4975_v38  ;;  %5160 = vmatpush.msrb.mxu3 %v5071_v21  ;;  %14328 = vst [vmem:[#allocation134_spill] sm:$0xff] %v11245_v61  ;;  %v4300_v38 = vld [vmem:[#allocation2 + $0x1910] sm:$0xff]  ;;  %v4957_v21 = vld [vmem:[#allocation2 + $0x1d40] sm:$0xff] }
 0x59c   : > { %4648 = vmatmul.f32.vlgmr.msrb.gmra.mxu1 %v11052_v17  ;;  %4825 = vmatpush.msrb.mxu0 %v4271_v36  ;;  %v4294_v61 = vld [vmem:[#allocation2 + $0x18e0] sm:$0xff]  ;;  %v4253_v36 = vld [vmem:[#allocation2 + $0x1798] sm:$0xff] }
 0x59d   : > { %4740 = vmatpush.msra.mxu1 %v4312_v27  ;;  %5135 = vmatpush.msra.mxu2 %v4969_v62  ;;  %v4951_v62 = vld [vmem:[#allocation2 + $0x1d10] sm:$0xff] }
 0x59e   : > { %5161 = vmatpush.msrb.mxu3 %v5065_v18  ;;  %4732 = vmatmul.f32.gmra.mxu0 %v11091_v5  ;;  %v5047_v18 = vld [vmem:[#allocation2 + $0x2010] sm:$0xff] }
 0x59f   : > { %4741 = vmatpush.msra.mxu1 %v4306_v46  ;;  %4826 = vmatpush.msrb.mxu0 %v4265_v60  ;;  %v11249_v27 = vpop.f32.mrf.mxu1  ;;  %v4288_v46 = vld [vmem:[#allocation2 + $0x18b0] sm:$0xff]  ;;  %v4247_v60 = vld [vmem:[#allocation2 + $0x1768] sm:$0xff] }
 0x5a0   : > { %5136 = vmatpush.msra.mxu2 %v4963_v37  ;;  %5162 = vmatpush.msrb.mxu3 %v5059_v9  ;;  %14329 = vst [vmem:[#allocation135_spill] sm:$0xff] %v11249_v27  ;;  %v4945_v9 = vld [vmem:[#allocation2 + $0x1ce0] sm:$0xff]  ;;  %v4915_v27 = vld [vmem:[#allocation2 + $0x1bf0] sm:$0xff] }
 0x5a1   : > { %4680 = vmatmul.f32.gmra.mxu2 %v11160_v28  ;;  %4742 = vmatpush.msra.mxu1 %v4300_v38  ;;  %v4282_v38 = vld [vmem:[#allocation2 + $0x1880] sm:$0xff] }
 0x5a2   : > { %4827 = vmatpush.msrb.mxu0 %v4259_v13  ;;  %5137 = vmatpush.msra.mxu2 %v4957_v21  ;;  %v11252_v37 = vpop.f32.mrf.mxu2  ;;  %v11257_v13 = vpop.f32.mrf.mxu0  ;;  %v4933_v21 = vld [vmem:[#allocation2 + $0x1c80] sm:$0xff] }
 0x5a3   : > { %5163 = vmatpush.msrb.mxu3 %v5053_v49  ;;  %4743 = vmatpush.msra.mxu1 %v4294_v61  ;;  %14330 = vst [vmem:[#allocation136_spill] sm:$0xff] %v11252_v37  ;;  %v11254_v30 = vpop.f32.mrf.mxu3  ;;  %v5035_v49 = vld [vmem:[#allocation2 + $0x1fb0] sm:$0xff] }
 0x5a4   : > { %4804 = vmatmul.f32.vlgmr.msra.gmra.mxu3 %v11052_v17  ;;  %4828 = vmatpush.msrb.mxu0 %v4253_v36  ;;  %14331 = vst [vmem:[#allocation137_spill] sm:$0xff] %v11254_v30  ;;  %v4939_v17 = vld [vmem:[#allocation2 + $0x1cb0] sm:$0xff]  ;;  %v5029_v36 = vld [vmem:[#allocation2 + $0x1f80] sm:$0xff] }
 0x5a5   : > { %5138 = vmatpush.msra.mxu2 %v4951_v62  ;;  %5164 = vmatpush.msrb.mxu3 %v5047_v18  ;;  %14332 = vst [vmem:[#allocation138_spill] sm:$0xff] %v11257_v13  ;;  %v4276_v61 = vld [vmem:[#allocation2 + $0x1850] sm:$0xff]  ;;  %v4270_v18 = vld [vmem:[#allocation2 + $0x1820] sm:$0xff] }
 0x5a6   : > { %4651 = vmatmul.f32.gmra.mxu1 %v11072_v15  ;;  %4829 = vmatpush.msrb.mxu0 %v4247_v60  ;;  %v5095_v62 = vld [vmem:[#allocation2 + $0x2190] sm:$0xff] }
 0x5a7   : > { %4744 = vmatpush.msra.mxu1 %v4288_v46  ;;  %5139 = vmatpush.msra.mxu2 %v4945_v9  ;;  %v4927_v46 = vld [vmem:[#allocation2 + $0x1c50] sm:$0xff]  ;;  %v5089_v9 = vld [vmem:[#allocation2 + $0x2160] sm:$0xff] }
 0x5a8   : > { %5165 = vmatpush.msrb.mxu3 %v5041_v10  ;;  %4830 = vmatmul.f32.vlgmr.msrb.gmra.mxu0 %v11111_v50  ;;  %v5023_v10 = vld [vmem:[#allocation2 + $0x1f50] sm:$0xff] }
 0x5a9   : > { %4745 = vmatpush.msra.mxu1 %v4282_v38  ;;  %5140 = vmatpush.msra.mxu2 %v4939_v17  ;;  %v4921_v38 = vld [vmem:[#allocation2 + $0x1c20] sm:$0xff]  ;;  %v4264_v17 = vld [vmem:[#allocation2 + $0x17f0] sm:$0xff] }
 0x5aa   : > { %5166 = vmatpush.msrb.mxu3 %v5035_v49  ;;  %8373 = vmatmul.msk.f32.vlgmr.msrb.gmra.mxu2 %vm2466_vm9, %v11118_v40  ;;  %v11262_v60 = vpop.f32.mrf.mxu1  ;;  %v5017_v49 = vld [vmem:[#allocation2 + $0x1f20] sm:$0xff]  ;;  %v5083_v13 = vld [vmem:[#allocation2 + $0x2130] sm:$0xff] }
 0x5ab   : > { %4746 = vmatpush.msra.mxu1 %v4276_v61  ;;  %14333 = vst [vmem:[#allocation139_spill] sm:$0xff] %v11262_v60  ;;  %5141 = vmatpush.msra.mxu2 %v4933_v21  ;;  %v4258_v21 = vld [vmem:[#allocation2 + $0x17c0] sm:$0xff] }
 0x5ac   : > { %5167 = vmatpush.msrb.mxu3 %v5029_v36  ;;  %5198 = vmatpush.msra.mxu0 %v5095_v62  ;;  %v11265_v61 = vpop.f32.mrf.mxu2  ;;  %v5077_v62 = vld [vmem:[#allocation2 + $0x2100] sm:$0xff] }
 0x5ad   : > { %4807 = vmatmul.f32.gmra.mxu3 %v11072_v15  ;;  %4747 = vmatpush.msra.mxu1 %v4270_v18  ;;  %14334 = vst [vmem:[#allocation140_spill] sm:$0xff] %v11265_v61  ;;  %v11270_v36 = vpop.f32.mrf.mxu0  ;;  %v5011_v15 = vld [vmem:[#allocation2 + $0x1ef0] sm:$0xff]  ;;  %v4977_v18 = vld [vmem:[#allocation2 + $0x1de0] sm:$0xff] }
 0x5ae   : > { %5142 = vmatpush.msra.mxu2 %v4927_v46  ;;  %5168 = vmatpush.msrb.mxu3 %v5023_v10  ;;  %v11267_v30 = vpop.f32.mrf.mxu3  ;;  %v4252_v46 = vld [vmem:[#allocation2 + $0x1790] sm:$0xff]  ;;  %v5005_v10 = vld [vmem:[#allocation2 + $0x1ec0] sm:$0xff] }
 0x5af   : > { %5199 = vmatpush.msra.mxu0 %v5089_v9  ;;  %14335 = vst [vmem:[#allocation141_spill] sm:$0xff] %v11267_v30  ;;  %4654 = vmatmul.f32.gmra.mxu1 %v11091_v5  ;;  %v4909_v9 = vld [vmem:[#allocation2 + $0x1bc0] sm:$0xff] }
 0x5b0   : > { %5143 = vmatpush.msra.mxu2 %v4921_v38  ;;  %4748 = vmatpush.msra.mxu1 %v4264_v17  ;;  %v4971_v38 = vld [vmem:[#allocation2 + $0x1db0] sm:$0xff]  ;;  %v4246_v30 = vld [vmem:[#allocation2 + $0x1760] sm:$0xff] }
 0x5b1   : > { %5169 = vmatpush.msrb.mxu3 %v5017_v49  ;;  %5200 = vmatpush.msra.mxu0 %v5083_v13  ;;  %v4999_v13 = vld [vmem:[#allocation2 + $0x1e90] sm:$0xff]  ;;  %v4965_v17 = vld [vmem:[#allocation2 + $0x1d80] sm:$0xff] }
 0x5b2   : > { %5144 = vmatpush.msra.mxu2 %v4915_v27  ;;  %4833 = vmatmul.f32.gmra.mxu0 %v11137_v56  ;;  %v11273_v60 = vpop.f32.mrf.mxu1  ;;  %v4903_v27 = vld [vmem:[#allocation2 + $0x1b90] sm:$0xff]  ;;  %v4897_v49 = vld [vmem:[#allocation2 + $0x1b60] sm:$0xff] }
 0x5b3   : > { %4749 = vmatpush.msra.mxu1 %v4258_v21  ;;  %5170 = vmatpush.msrb.mxu3 %v5011_v15  ;;  %14336 = vst [vmem:[#allocation142_spill] sm:$0xff] %v11273_v60  ;;  %v4993_v21 = vld [vmem:[#allocation2 + $0x1e60] sm:$0xff]  ;;  %v4960_v60 = vld [vmem:[#allocation2 + $0x1d58] sm:$0xff] }
 0x5b4   : > { %5201 = vmatpush.msra.mxu0 %v5077_v62  ;;  %8374 = vmatmul.msk.f32.gmra.mxu2 %vm2466_vm9, %v11143_v52  ;;  %v4361_v62 = vld [vmem:[#allocation2 + $0x1af8] sm:$0xff] }
 0x5b5   : > { %4750 = vmatpush.msra.mxu1 %v4252_v46  ;;  %5171 = vmatpush.msrb.mxu3 %v5005_v10  ;;  %v4959_v46 = vld [vmem:[#allocation2 + $0x1d50] sm:$0xff] }
 0x5b6   : > { %5290 = vmatpush.msrb.mxu0 %v4977_v18  ;;  %5145 = vmatpush.msra.mxu2 %v4909_v9  ;;  %v11278_v15 = vpop.f32.mrf.mxu2  ;;  %v4891_v10 = vld [vmem:[#allocation2 + $0x1b30] sm:$0xff]  ;;  %v11283_v9 = vpop.f32.mrf.mxu0 }
 0x5b7   : > { %4810 = vmatmul.f32.gmra.mxu3 %v11091_v5  ;;  %4751 = vmatpush.msra.mxu1 %v4246_v30  ;;  %14337 = vst [vmem:[#allocation143_spill] sm:$0xff] %v11278_v15  ;;  %v4987_v5 = vld [vmem:[#allocation2 + $0x1e30] sm:$0xff]  ;;  %v4953_v30 = vld [vmem:[#allocation2 + $0x1d20] sm:$0xff]  ;;  %v5107_v15 = vrot.slane %v10555_v12, 4  ;;  %v5101_v12 = vrot.slane %v10533_v3, 4 }
 0x5b8   : > { %5291 = vmatpush.msrb.mxu0 %v4971_v38  ;;  %5146 = vmatpush.msra.mxu2 %v4903_v27  ;;  %v11280_v18 = vpop.f32.mrf.mxu3  ;;  %v4355_v38 = vld [vmem:[#allocation2 + $0x1ac8] sm:$0xff]  ;;  %v14144_v27 = vrot.slane %v10559_v35, 4 }
 0x5b9   : > { %5172 = vmatpush.msrb.mxu3 %v4999_v13  ;;  %14338 = vst [vmem:[#allocation144_spill] sm:$0xff] %v11280_v18  ;;  %4752 = vmatmul.f32.vlgmr.msra.gmra.mxu1 %v11111_v50  ;;  %v4885_v13 = vld [vmem:[#allocation2 + $0x1b00] sm:$0xff]  ;;  %v5104_v50 = vrot.slane %v10549_v20, 4 }
 0x5ba   : > { %5292 = vmatpush.msrb.mxu0 %v4965_v17  ;;  %5147 = vmatpush.msra.mxu2 %v4897_v49  ;;  %v4981_v18 = vld [vmem:[#allocation2 + $0x1e00] sm:$0xff]  ;;  %v5072_v17 = vld [vmem:[#allocation2 + $0x20d8] sm:$0xff]  ;;  %v4947_v49 = vld [vmem:[#allocation2 + $0x1cf0] sm:$0xff] }
 0x5bb   : > { %5173 = vmatpush.msrb.mxu3 %v4993_v21  ;;  %4836 = vmatmul.f32.gmra.mxu0 %v11160_v28  ;;  %v4349_v21 = vld [vmem:[#allocation2 + $0x1a98] sm:$0xff]  ;;  %v4941_v20 = vld [vmem:[#allocation2 + $0x1cc0] sm:$0xff] }
 0x5bc   : > { %4852 = vmatpush.msrb.mxu1 %v4361_v62  ;;  %5293 = vmatpush.msrb.mxu0 %v4959_v46  ;;  %v11295_v46 = vsel %vm1416_vm2, %v5104_v50, %v14144_v27  ;;  %v5060_v50 = vld [vmem:[#allocation2 + $0x2078] sm:$0xff] }
 0x5bd   : > { %5148 = vmatpush.msra.mxu2 %v4891_v10  ;;  %5174 = vmatpush.msrb.mxu3 %v4987_v5  ;;  %v5066_v10 = vld [vmem:[#allocation2 + $0x20a8] sm:$0xff]  ;;  %v14145_v5 = vrot.slane %v10563_v41, 4 }
 0x5be   : > { %8375 = vmatmul.msk.f32.gmra.mxu2 %vm2466_vm9, %v11164_v63  ;;  %5294 = vmatpush.msrb.mxu0 %v4953_v30  ;;  %v4343_v30 = vld [vmem:[#allocation2 + $0x1a68] sm:$0xff] }
 0x5bf   : > { %4853 = vmatpush.msrb.mxu1 %v4355_v38  ;;  %v11290_v62 = vpop.f32.mrf.mxu1  ;;  %5149 = vmatpush.msra.mxu2 %v4885_v13  ;;  %v5096_v38 = vld [vmem:[#allocation2 + $0x2198] sm:$0xff] }
 0x5c0   : > { %14339 = vst [vmem:[#allocation145_spill] sm:$0xff] %v11290_v62  ;;  %5175 = vmatpush.msrb.mxu3 %v4981_v18  ;;  %5295 = vmatpush.msrb.mxu0 %v4947_v49  ;;  %v11300_v13 = vpop.f32.mrf.mxu2  ;;  %v4976_v18 = vld [vmem:[#allocation2 + $0x1dd8] sm:$0xff]  ;;  %v4935_v49 = vld [vmem:[#allocation2 + $0x1c90] sm:$0xff]  ;;  %v14146_v62 = vrot.slane %v10536_v7, 4 }
 0x5c1   : > { %5176 = vmatmul.f32.vlgmr.msrb.gmra.mxu3 %v11295_v46  ;;  %5238 = vmatpush.msrb.mxu2 %v5072_v17  ;;  %14340 = vst [vmem:[#allocation146_spill] sm:$0xff] %v11300_v13  ;;  %v11303_v27 = vpop.f32.mrf.mxu3  ;;  %v11308_v17 = vsel %vm1416_vm2, %v5107_v15, %v14145_v5  ;;  %v11312_v13 = vpop.f32.mrf.mxu0  ;;  %v4929_v15 = vld [vmem:[#allocation2 + $0x1c60] sm:$0xff]  ;;  %v4964_v5 = vld [vmem:[#allocation2 + $0x1d78] sm:$0xff] }
 0x5c2   : > { %4854 = vmatpush.msrb.mxu1 %v4349_v21  ;;  %14341 = vst [vmem:[#allocation147_spill] sm:$0xff] %v11303_v27  ;;  %5296 = vmatpush.msrb.mxu0 %v4941_v20  ;;  %v5090_v21 = vld [vmem:[#allocation2 + $0x2168] sm:$0xff]  ;;  %v5112_v20 = vrot.slane %v10578_v53, 4  ;;  %v11320_v3 = vsel %vm1416_vm2, %v5101_v12, %v14146_v62  ;;  %v4923_v27 = vld [vmem:[#allocation2 + $0x1c30] sm:$0xff] }
 0x5c3   : > { %4755 = vmatmul.f32.gmra.mxu1 %v11137_v56  ;;  %5239 = vmatpush.msrb.mxu2 %v5066_v10  ;;  %v4970_v56 = vld [vmem:[#allocation2 + $0x1da8] sm:$0xff] }
 0x5c4   : > { %4855 = vmatpush.msrb.mxu1 %v4343_v30  ;;  %5276 = vmatpush.msra.mxu3 %v5096_v38  ;;  %v5054_v10 = vld [vmem:[#allocation2 + $0x2048] sm:$0xff]  ;;  %v5084_v30 = vld [vmem:[#allocation2 + $0x2138] sm:$0xff] }
 0x5c5   : > { %8379 = vmatmul.msk.f32.vlgmr.msra.gmra.mxu0 %vm2466_vm9, %v11308_v17  ;;  %5240 = vmatpush.msrb.mxu2 %v5060_v50  ;;  %v5048_v38 = vld [vmem:[#allocation2 + $0x2018] sm:$0xff]  ;;  %v5078_v53 = vld [vmem:[#allocation2 + $0x2108] sm:$0xff] }
 0x5c6   : > { %5212 = vmatpush.msra.mxu1 %v4976_v18  ;;  %5297 = vmatpush.msrb.mxu0 %v4935_v49  ;;  %v14343_v49 = vrot.slane %v10559_v35, 4  ;;  %v4958_v12 = vld [vmem:[#allocation2 + $0x1d48] sm:$0xff]  ;;  %v5036_v35 = vld [vmem:[#allocation2 + $0x1fb8] sm:$0xff] }
 0x5c7   : > { %5277 = vmatpush.msra.mxu3 %v5090_v21  ;;  %5241 = vmatpush.msrb.mxu2 %v5054_v10  ;;  %v4917_v10 = vld [vmem:[#allocation2 + $0x1c00] sm:$0xff] }
 0x5c8   : > { %5213 = vmatpush.msra.mxu1 %v4970_v56  ;;  %5298 = vmatpush.msrb.mxu0 %v4929_v15  ;;  %v11329_v21 = vsel %vm1416_vm2, %v14343_v49, %v5112_v20  ;;  %v5042_v56 = vld [vmem:[#allocation2 + $0x1fe8] sm:$0xff] }
 0x5c9   : > { %5150 = vmatmul.f32.vlgmr.msra.gmra.mxu2 %v11320_v3  ;;  %v11323_v18 = vpop.f32.mrf.mxu1  ;;  %5278 = vmatpush.msra.mxu3 %v5084_v30  ;;  %v4978_v15 = vld [vmem:[#allocation2 + $0x1de8] sm:$0xff]  ;;  %v4952_v30 = vld [vmem:[#allocation2 + $0x1d18] sm:$0xff] }
 0x5ca   : > { %14342 = vst [vmem:[#allocation148_spill] sm:$0xff] %v11323_v18  ;;  %5214 = vmatpush.msra.mxu1 %v4964_v5  ;;  %5179 = vmatmul.f32.gmra.mxu3 %v11329_v21  ;;  %v11332_v62 = vpop.f32.mrf.mxu2  ;;  %v14345_v5 = vrot.slane %v10583_v59, 4 }
 0x5cb   : > { %5242 = vmatpush.msrb.mxu2 %v5048_v38  ;;  %5299 = vmatpush.msrb.mxu0 %v4923_v27  ;;  %14344 = vst [vmem:[#allocation149_spill] sm:$0xff] %v11332_v62  ;;  %v14346_v38 = vrot.slane %v10563_v41, 4  ;;  %v4911_v27 = vld [vmem:[#allocation2 + $0x1bd0] sm:$0xff]  ;;  %v11344_v18 = vpop.f32.mrf.mxu0  ;;  %v4905_v41 = vld [vmem:[#allocation2 + $0x1ba0] sm:$0xff]  ;;  %v4966_v62 = vld [vmem:[#allocation2 + $0x1d88] sm:$0xff] }
 0x5cc   : > { %5279 = vmatpush.msra.mxu3 %v5078_v53  ;;  %4758 = vmatmul.f32.gmra.mxu1 %v11160_v28  ;;  %v4972_v53 = vld [vmem:[#allocation2 + $0x1db8] sm:$0xff]  ;;  %14347 = vst [vmem:[#allocation150_spill] sm:$0xff] %v11344_v18 }
 0x5cd   : > { %5243 = vmatpush.msrb.mxu2 %v5042_v56  ;;  %v11335_v50 = vpop.f32.mrf.mxu3  ;;  %5215 = vmatpush.msra.mxu1 %v4958_v12  ;;  %v11342_v49 = vsel %vm1416_vm2, %v14346_v38, %v14345_v5  ;;  %v5118_v56 = vrot.slane %v10683_v43, 4  ;;  %v4946_v12 = vld [vmem:[#allocation2 + $0x1ce8] sm:$0xff]  ;;  %v4940_v5 = vld [vmem:[#allocation2 + $0x1cb8] sm:$0xff]  ;;  %v14348_v43 = vrot.slane %v10544_v16, 4 }
 0x5ce   : > { %5300 = vmatpush.msrb.mxu0 %v4917_v10  ;;  %5368 = vmatpush.msrb.mxu3 %v4978_v15  ;;  %v5030_v10 = vld [vmem:[#allocation2 + $0x1f88] sm:$0xff]  ;;  %v5024_v38 = vld [vmem:[#allocation2 + $0x1f58] sm:$0xff]  ;;  %v14349_v15 = vrot.slane %v10536_v7, 4 }
 0x5cf   : > { %8380 = vmatmul.msk.f32.gmra.mxu0 %vm2466_vm9, %v11342_v49  ;;  %5216 = vmatpush.msra.mxu1 %v4952_v30  ;;  %v11351_v28 = vsel %vm1416_vm2, %v5112_v20, %v5118_v56  ;;  %v5018_v20 = vld [vmem:[#allocation2 + $0x1f28] sm:$0xff]  ;;  %v4893_v56 = vld [vmem:[#allocation2 + $0x1b40] sm:$0xff] }
 0x5d0   : > { %5244 = vmatpush.msrb.mxu2 %v5036_v35  ;;  %5301 = vmatpush.msrb.mxu0 %v4911_v27  ;;  %v11358_v30 = vsel %vm1416_vm2, %v14349_v15, %v14348_v43  ;;  %v4899_v35 = vld [vmem:[#allocation2 + $0x1b70] sm:$0xff]  ;;  %v4954_v7 = vld [vmem:[#allocation2 + $0x1d28] sm:$0xff]  ;;  %v14351_v43 = vrot.slane %v10583_v59, 4 }
 0x5d1   : > { %5369 = vmatpush.msrb.mxu3 %v4972_v53  ;;  %5217 = vmatpush.msra.mxu1 %v4946_v12  ;;  %v5120_v53 = vrot.slane %v10659_v48, 4  ;;  %v5012_v48 = vld [vmem:[#allocation2 + $0x1ef8] sm:$0xff]  ;;  %v5006_v59 = vld [vmem:[#allocation2 + $0x1ec8] sm:$0xff] }
 0x5d2   : > { %5245 = vmatpush.msrb.mxu2 %v5030_v10  ;;  %5302 = vmatpush.msrb.mxu0 %v4905_v41  ;;  %v11360_v27 = vpop.f32.mrf.mxu1  ;;  %v4928_v10 = vld [vmem:[#allocation2 + $0x1c58] sm:$0xff] }
 0x5d3   : > { %5370 = vmatpush.msrb.mxu3 %v4966_v62  ;;  %14350 = vst [vmem:[#allocation151_spill] sm:$0xff] %v11360_v27  ;;  %5153 = vmatmul.f32.gmra.mxu2 %v11358_v30  ;;  %v4934_v62 = vld [vmem:[#allocation2 + $0x1c88] sm:$0xff]  ;;  %v11365_v12 = vpop.f32.mrf.mxu2 }
 0x5d4   : > { %5182 = vmatmul.f32.gmra.mxu3 %v11351_v28  ;;  %5218 = vmatpush.msra.mxu1 %v4940_v5  ;;  %v11374_v5 = vsel %vm1416_vm2, %v14351_v43, %v5120_v53  ;;  %v4942_v27 = vld [vmem:[#allocation2 + $0x1cc8] sm:$0xff]  ;;  %v5068_v53 = vld [vmem:[#allocation2 + $0x20b8] sm:$0xff]  ;;  %v14352_v43 = vrot.slane %v10544_v16, 4 }
 0x5d5   : > { %5246 = vmatpush.msrb.mxu2 %v5024_v38  ;;  %5303 = vmatpush.msrb.mxu0 %v4899_v35  ;;  %v4887_v38 = vld [vmem:[#allocation2 + $0x1b10] sm:$0xff]  ;;  %v11376_v15 = vpop.f32.mrf.mxu0  ;;  %v5116_v35 = vrot.slane %v10671_v19, 4  ;;  %v4930_v16 = vld [vmem:[#allocation2 + $0x1c68] sm:$0xff] }
 0x5d6   : > { %5371 = vmatpush.msrb.mxu3 %v4960_v60  ;;  %8376 = vmatmul.msk.f32.vlgmr.msrb.gmra.mxu1 %vm2466_vm9, %v11118_v40  ;;  %v11369_v41 = vpop.f32.mrf.mxu3  ;;  %v4948_v60 = vld [vmem:[#allocation2 + $0x1cf8] sm:$0xff]  ;;  %v5074_v40 = vld [vmem:[#allocation2 + $0x20e8] sm:$0xff] }
 0x5d7   : > { %5247 = vmatpush.msrb.mxu2 %v5018_v20  ;;  %5219 = vmatpush.msra.mxu1 %v4934_v62  ;;  %v4922_v20 = vld [vmem:[#allocation2 + $0x1c28] sm:$0xff]  ;;  %v4916_v62 = vld [vmem:[#allocation2 + $0x1bf8] sm:$0xff]  ;;  %v11384_v19 = vsel %vm1416_vm2, %v14352_v43, %v5116_v35 }
 0x5d8   : > { %5304 = vmatpush.msrb.mxu0 %v4893_v56  ;;  %5372 = vmatpush.msrb.mxu3 %v4954_v7  ;;  %v5000_v56 = vld [vmem:[#allocation2 + $0x1e98] sm:$0xff]  ;;  %v5062_v7 = vld [vmem:[#allocation2 + $0x2088] sm:$0xff] }
 0x5d9   : > { %8381 = vmatmul.msk.f32.gmra.mxu0 %vm2466_vm9, %v11374_v5  ;;  %5220 = vmatpush.msra.mxu1 %v4928_v10  ;;  %v4936_v10 = vld [vmem:[#allocation2 + $0x1c98] sm:$0xff]  ;;  %v4982_v43 = vld [vmem:[#allocation2 + $0x1e08] sm:$0xff] }
 0x5da   : > { %5248 = vmatpush.msrb.mxu2 %v5012_v48  ;;  %5305 = vmatpush.msrb.mxu0 %v4887_v38  ;;  %v4910_v48 = vld [vmem:[#allocation2 + $0x1bc8] sm:$0xff] }
 0x5db   : > { %5373 = vmatpush.msrb.mxu3 %v4948_v60  ;;  %5221 = vmatpush.msra.mxu1 %v4922_v20  ;;  %v4994_v38 = vld [vmem:[#allocation2 + $0x1e68] sm:$0xff]  ;;  %v5056_v60 = vld [vmem:[#allocation2 + $0x2058] sm:$0xff] }
 0x5dc   : > { %5394 = vmatpush.msra.mxu0 %v5074_v40  ;;  %5249 = vmatpush.msrb.mxu2 %v5006_v59  ;;  %v11386_v61 = vpop.f32.mrf.mxu1  ;;  %v4988_v40 = vld [vmem:[#allocation2 + $0x1e38] sm:$0xff] }
 0x5dd   : > { %5374 = vmatpush.msrb.mxu3 %v4942_v27  ;;  %5156 = vmatmul.f32.gmra.mxu2 %v11384_v19  ;;  %v11391_v35 = vpop.f32.mrf.mxu2  ;;  %v4904_v27 = vld [vmem:[#allocation2 + $0x1b98] sm:$0xff] }
 0x5de   : > { %5395 = vmatpush.msra.mxu0 %v5068_v53  ;;  %5222 = vmatpush.msra.mxu1 %v4916_v62  ;;  %v4924_v59 = vld [vmem:[#allocation2 + $0x1c38] sm:$0xff]  ;;  %v11397_v53 = vpop.f32.mrf.mxu0  ;;  %v5050_v62 = vld [vmem:[#allocation2 + $0x2028] sm:$0xff] }
 0x5df   : > { %5250 = vmatpush.msrb.mxu2 %v5000_v56  ;;  %8382 = vmatmul.msk.f32.vlgmr.msra.gmra.mxu3 %vm2466_vm9, %v11308_v17  ;;  %14354 = vst [vmem:[#allocation153_spill] sm:$0xff] %v11397_v53  ;;  %v4898_v56 = vld [vmem:[#allocation2 + $0x1b68] sm:$0xff] }
 0x5e0   : > { %5396 = vmatpush.msra.mxu0 %v5062_v7  ;;  %5375 = vmatpush.msrb.mxu3 %v4936_v10  ;;  %v11395_v20 = vpop.f32.mrf.mxu3  ;;  %v4918_v7 = vld [vmem:[#allocation2 + $0x1c08] sm:$0xff]  ;;  %v4892_v10 = vld [vmem:[#allocation2 + $0x1b38] sm:$0xff] }
 0x5e1   : > { %8377 = vmatmul.msk.f32.gmra.mxu1 %vm2466_vm9, %v11143_v52  ;;  %14353 = vst [vmem:[#allocation152_spill] sm:$0xff] %v11395_v20  ;;  %5251 = vmatpush.msrb.mxu2 %v4994_v38  ;;  %v5044_v52 = vld [vmem:[#allocation2 + $0x1ff8] sm:$0xff]  ;;  %v5038_v38 = vld [vmem:[#allocation2 + $0x1fc8] sm:$0xff] }
 0x5e2   : > { %5223 = vmatpush.msra.mxu1 %v4910_v48  ;;  %5376 = vmatpush.msrb.mxu3 %v4930_v16  ;;  %v4912_v48 = vld [vmem:[#allocation2 + $0x1bd8] sm:$0xff]  ;;  %v5097_v16 = vld [vmem:[#allocation2 + $0x21a0] sm:$0xff]  ;;  %v5026_v53 = vld [vmem:[#allocation2 + $0x1f68] sm:$0xff] }
 0x5e3   : > { %5397 = vmatpush.msra.mxu0 %v5056_v60  ;;  %5252 = vmatpush.msrb.mxu2 %v4988_v40  ;;  %v4886_v60 = vld [vmem:[#allocation2 + $0x1b08] sm:$0xff] }
 0x5e4   : > { %5224 = vmatpush.msra.mxu1 %v4904_v27  ;;  %5306 = vmatmul.f32.vlgmr.msrb.gmra.mxu0 %v11320_v3  ;;  %v4906_v27 = vld [vmem:[#allocation2 + $0x1ba8] sm:$0xff] }
 0x5e5   : > { %5377 = vmatpush.msrb.mxu3 %v4924_v59  ;;  %5398 = vmatpush.msra.mxu0 %v5050_v62  ;;  %v5073_v59 = vld [vmem:[#allocation2 + $0x20e0] sm:$0xff]  ;;  %v5032_v62 = vld [vmem:[#allocation2 + $0x1f98] sm:$0xff] }
 0x5e6   : > { %5225 = vmatpush.msra.mxu1 %v4898_v56  ;;  %5253 = vmatpush.msrb.mxu2 %v4982_v43  ;;  %v11400_v37 = vpop.f32.mrf.mxu1  ;;  %v5091_v56 = vld [vmem:[#allocation2 + $0x2170] sm:$0xff] }
 0x5e7   : > { %5378 = vmatpush.msrb.mxu3 %v4918_v7  ;;  %5254 = vmatmul.f32.vlgmr.msrb.gmra.mxu2 %v11295_v46  ;;  %v11405_v40 = vpop.f32.mrf.mxu2  ;;  %v4900_v7 = vld [vmem:[#allocation2 + $0x1b78] sm:$0xff] }
 0x5e8   : > { %5399 = vmatpush.msra.mxu0 %v5044_v52  ;;  %5226 = vmatpush.msra.mxu1 %v4892_v10  ;;  %v5067_v52 = vld [vmem:[#allocation2 + $0x20b0] sm:$0xff]  ;;  %v11411_v10 = vpop.f32.mrf.mxu0 }
 0x5e9   : > { %8383 = vmatmul.msk.f32.gmra.mxu3 %vm2466_vm9, %v11342_v49  ;;  %8378 = vmatmul.msk.f32.gmra.mxu1 %vm2466_vm9, %v11164_v63  ;;  %14356 = vst [vmem:[#allocation155_spill] sm:$0xff] %v11411_v10  ;;  %v5061_v63 = vld [vmem:[#allocation2 + $0x2080] sm:$0xff]  ;;  %v5055_v10 = vld [vmem:[#allocation2 + $0x2050] sm:$0xff] }
 0x5ea   : > { %5379 = vmatpush.msrb.mxu3 %v4912_v48  ;;  %5400 = vmatpush.msra.mxu0 %v5038_v38  ;;  %v11409_v43 = vpop.f32.mrf.mxu3  ;;  %v5085_v48 = vld [vmem:[#allocation2 + $0x2140] sm:$0xff]  ;;  %v4894_v38 = vld [vmem:[#allocation2 + $0x1b48] sm:$0xff] }
 0x5eb   : > { %5354 = vmatpush.msra.mxu2 %v5097_v16  ;;  %14355 = vst [vmem:[#allocation154_spill] sm:$0xff] %v11409_v43  ;;  %5227 = vmatpush.msra.mxu1 %v4886_v60  ;;  %v5020_v16 = vld [vmem:[#allocation2 + $0x1f38] sm:$0xff]  ;;  %v5079_v60 = vld [vmem:[#allocation2 + $0x2110] sm:$0xff] }
 0x5ec   : > { %5380 = vmatpush.msrb.mxu3 %v4906_v27  ;;  %5401 = vmatpush.msra.mxu0 %v5032_v62  ;;  %v4888_v27 = vld [vmem:[#allocation2 + $0x1b18] sm:$0xff]  ;;  %v5014_v62 = vld [vmem:[#allocation2 + $0x1f08] sm:$0xff]  ;;  %v4979_v43 = vld [vmem:[#allocation2 + $0x1df0] sm:$0xff] }
 0x5ed   : > { %5316 = vmatpush.msrb.mxu1 %v5073_v59  ;;  %5309 = vmatmul.f32.gmra.mxu0 %v11358_v30 }
 0x5ee   : > { %5355 = vmatpush.msra.mxu2 %v5091_v56  ;;  %5381 = vmatpush.msrb.mxu3 %v4900_v7  ;;  %v5075_v56 = vld [vmem:[#allocation2 + $0x20f0] sm:$0xff] }
 0x5ef   : > { %5317 = vmatpush.msrb.mxu1 %v5067_v52  ;;  %5402 = vmatpush.msra.mxu0 %v5026_v53  ;;  %v11415_v59 = vpop.f32.mrf.mxu1  ;;  %v5049_v53 = vld [vmem:[#allocation2 + $0x2020] sm:$0xff]  ;;  %v5008_v52 = vld [vmem:[#allocation2 + $0x1ed8] sm:$0xff] }
 0x5f0   : > { %5356 = vmatpush.msra.mxu2 %v5085_v48  ;;  %5382 = vmatpush.msrb.mxu3 %v4894_v38  ;;  %v4973_v48 = vld [vmem:[#allocation2 + $0x1dc0] sm:$0xff] }
 0x5f1   : > { %5257 = vmatmul.f32.gmra.mxu2 %v11329_v21  ;;  %5318 = vmatpush.msrb.mxu1 %v5061_v63  ;;  %v5069_v38 = vld [vmem:[#allocation2 + $0x20c0] sm:$0xff]  ;;  %v5043_v63 = vld [vmem:[#allocation2 + $0x1ff0] sm:$0xff] }
 0x5f2   : > { %5403 = vmatpush.msra.mxu0 %v5020_v16  ;;  %8384 = vmatmul.msk.f32.gmra.mxu3 %vm2466_vm9, %v11374_v5  ;;  %v11419_v7 = vpop.f32.mrf.mxu2  ;;  %v11424_v16 = vpop.f32.mrf.mxu0 }
 0x5f3   : > { %5357 = vmatpush.msra.mxu2 %v5079_v60  ;;  %14357 = vst [vmem:[#allocation156_spill] sm:$0xff] %v11419_v7  ;;  %5383 = vmatpush.msrb.mxu3 %v4888_v27  ;;  %v11421_v20 = vpop.f32.mrf.mxu3  ;;  %v5002_v60 = vld [vmem:[#allocation2 + $0x1ea8] sm:$0xff]  ;;  %v4967_v7 = vld [vmem:[#allocation2 + $0x1d90] sm:$0xff]  ;;  %v4996_v27 = vld [vmem:[#allocation2 + $0x1e78] sm:$0xff] }
 0x5f4   : > { %5319 = vmatpush.msrb.mxu1 %v5055_v10  ;;  %5404 = vmatpush.msra.mxu0 %v5014_v62  ;;  %14358 = vst [vmem:[#allocation157_spill] sm:$0xff] %v11421_v20  ;;  %v5063_v10 = vld [vmem:[#allocation2 + $0x2090] sm:$0xff]  ;;  %v4961_v62 = vld [vmem:[#allocation2 + $0x1d60] sm:$0xff] }
 0x5f5   : > { %5446 = vmatpush.msrb.mxu2 %v4979_v43  ;;  %5472 = vmatpush.msra.mxu3 %v5075_v56  ;;  %14359 = vst [vmem:[#allocation158_spill] sm:$0xff] %v11424_v16  ;;  %v5037_v43 = vld [vmem:[#allocation2 + $0x1fc0] sm:$0xff]  ;;  %v5031_v16 = vld [vmem:[#allocation2 + $0x1f90] sm:$0xff] }
 0x5f6   : > { %5228 = vmatmul.f32.vlgmr.msra.gmra.mxu1 %v11320_v3  ;;  %5405 = vmatpush.msra.mxu0 %v5008_v52  ;;  %v5057_v56 = vld [vmem:[#allocation2 + $0x2060] sm:$0xff]  ;;  %v4990_v52 = vld [vmem:[#allocation2 + $0x1e48] sm:$0xff] }
 0x5f7   : > { %5320 = vmatpush.msrb.mxu1 %v5049_v53  ;;  %5447 = vmatpush.msrb.mxu2 %v4973_v48  ;;  %v4955_v48 = vld [vmem:[#allocation2 + $0x1d30] sm:$0xff]  ;;  %v5045_v20 = vld [vmem:[#allocation2 + $0x2000] sm:$0xff] }
 0x5f8   : > { %5473 = vmatpush.msra.mxu3 %v5069_v38  ;;  %5312 = vmatmul.f32.gmra.mxu0 %v11384_v19  ;;  %v5051_v38 = vld [vmem:[#allocation2 + $0x2030] sm:$0xff] }
 0x5f9   : > { %5321 = vmatpush.msrb.mxu1 %v5043_v63  ;;  %5406 = vmatpush.msra.mxu0 %v5002_v60  ;;  %v11428_v53 = vpop.f32.mrf.mxu1  ;;  %v4984_v60 = vld [vmem:[#allocation2 + $0x1e18] sm:$0xff] }
 0x5fa   : > { %5448 = vmatpush.msrb.mxu2 %v4967_v7  ;;  %5474 = vmatpush.msra.mxu3 %v5063_v10  ;;  %v5025_v7 = vld [vmem:[#allocation2 + $0x1f60] sm:$0xff] }
 0x5fb   : > { %5260 = vmatmul.f32.gmra.mxu2 %v11351_v28  ;;  %5322 = vmatpush.msrb.mxu1 %v5037_v43  ;;  %v4949_v10 = vld [vmem:[#allocation2 + $0x1d00] sm:$0xff]  ;;  %v5019_v43 = vld [vmem:[#allocation2 + $0x1f30] sm:$0xff] }
 0x5fc   : > { %5407 = vmatpush.msra.mxu0 %v4996_v27  ;;  %5449 = vmatpush.msrb.mxu2 %v4961_v62  ;;  %v11430_v63 = vpop.f32.mrf.mxu2  ;;  %v11436_v27 = vpop.f32.mrf.mxu0  ;;  %v4943_v62 = vld [vmem:[#allocation2 + $0x1cd0] sm:$0xff] }
 0x5fd   : > { %5475 = vmatpush.msra.mxu3 %v5057_v56  ;;  %14360 = vst [vmem:[#allocation159_spill] sm:$0xff] %v11430_v63  ;;  %5323 = vmatpush.msrb.mxu1 %v5031_v16  ;;  %v11433_v18 = vpop.f32.mrf.mxu3  ;;  %v5039_v56 = vld [vmem:[#allocation2 + $0x1fd0] sm:$0xff]  ;;  %v5013_v16 = vld [vmem:[#allocation2 + $0x1f00] sm:$0xff] }
 0x5fe   : > { %5384 = vmatmul.f32.vlgmr.msrb.gmra.mxu3 %v11320_v3  ;;  %5408 = vmatpush.msra.mxu0 %v4990_v52  ;;  %14361 = vst [vmem:[#allocation160_spill] sm:$0xff] %v11433_v18  ;;  %v4937_v52 = vld [vmem:[#allocation2 + $0x1ca0] sm:$0xff] }
 0x5ff   : > { %5450 = vmatpush.msrb.mxu2 %v4955_v48  ;;  %5476 = vmatpush.msra.mxu3 %v5051_v38  ;;  %14362 = vst [vmem:[#allocation161_spill] sm:$0xff] %v11436_v27  ;;  %v5033_v48 = vld [vmem:[#allocation2 + $0x1fa0] sm:$0xff]  ;;  %v5007_v38 = vld [vmem:[#allocation2 + $0x1ed0] sm:$0xff] }
 0x600   : > { %5231 = vmatmul.f32.gmra.mxu1 %v11358_v30  ;;  %5409 = vmatpush.msra.mxu0 %v4984_v60  ;;  %v4931_v27 = vld [vmem:[#allocation2 + $0x1c70] sm:$0xff] }
 0x601   : > { %5324 = vmatpush.msrb.mxu1 %v5025_v7  ;;  %5451 = vmatpush.msrb.mxu2 %v4949_v10  ;;  %v5027_v7 = vld [vmem:[#allocation2 + $0x1f70] sm:$0xff]  ;;  %v5001_v10 = vld [vmem:[#allocation2 + $0x1ea0] sm:$0xff] }
 0x602   : > { %5477 = vmatpush.msra.mxu3 %v5045_v20  ;;  %5410 = vmatmul.f32.vlgmr.msra.gmra.mxu0 %v11295_v46  ;;  %v5099_v20 = vld [vmem:[#allocation2 + $0x21b0] sm:$0xff] }
 0x603   : > { %5325 = vmatpush.msrb.mxu1 %v5019_v43  ;;  %5452 = vmatpush.msrb.mxu2 %v4943_v62  ;;  %v4925_v43 = vld [vmem:[#allocation2 + $0x1c40] sm:$0xff] }
 0x604   : > { %5478 = vmatpush.msra.mxu3 %v5039_v56  ;;  %8385 = vmatmul.msk.f32.vlgmr.msra.gmra.mxu2 %vm2466_vm9, %v11308_v17  ;;  %v11441_v60 = vpop.f32.mrf.mxu1  ;;  %v5021_v62 = vld [vmem:[#allocation2 + $0x1f40] sm:$0xff]  ;;  %v4995_v56 = vld [vmem:[#allocation2 + $0x1e70] sm:$0xff] }
 0x605   : > { %5326 = vmatpush.msrb.mxu1 %v5013_v16  ;;  %5453 = vmatpush.msrb.mxu2 %v4937_v52  ;;  %v4919_v16 = vld [vmem:[#allocation2 + $0x1c10] sm:$0xff] }
 0x606   : > { %5479 = vmatpush.msra.mxu3 %v5033_v48  ;;  %v11444_v18 = vpop.f32.mrf.mxu2  ;;  %5510 = vmatpush.msrb.mxu0 %v5099_v20  ;;  %v5015_v52 = vld [vmem:[#allocation2 + $0x1f10] sm:$0xff] }
 0x607   : > { %5387 = vmatmul.f32.gmra.mxu3 %v11358_v30  ;;  %5327 = vmatpush.msrb.mxu1 %v5007_v38  ;;  %14363 = vst [vmem:[#allocation162_spill] sm:$0xff] %v11444_v18  ;;  %v11449_v48 = vpop.f32.mrf.mxu0  ;;  %v4989_v38 = vld [vmem:[#allocation2 + $0x1e40] sm:$0xff]  ;;  %v4983_v20 = vld [vmem:[#allocation2 + $0x1e10] sm:$0xff] }
 0x608   : > { %5454 = vmatpush.msrb.mxu2 %v4931_v27  ;;  %5480 = vmatpush.msra.mxu3 %v5027_v7  ;;  %v11447_v63 = vpop.f32.mrf.mxu3  ;;  %14365 = vst [vmem:[#allocation164_spill] sm:$0xff] %v11449_v48  ;;  %v4913_v18 = vld [vmem:[#allocation2 + $0x1be0] sm:$0xff] }
 0x609   : > { %5234 = vmatmul.f32.gmra.mxu1 %v11384_v19  ;;  %14364 = vst [vmem:[#allocation163_spill] sm:$0xff] %v11447_v63  ;;  %v5009_v27 = vld [vmem:[#allocation2 + $0x1ee0] sm:$0xff] }
 0x60a   : > { %5328 = vmatpush.msrb.mxu1 %v5001_v10  ;;  %5455 = vmatpush.msrb.mxu2 %v4925_v43  ;;  %v5093_v7 = vld [vmem:[#allocation2 + $0x2180] sm:$0xff]  ;;  %v4907_v10 = vld [vmem:[#allocation2 + $0x1bb0] sm:$0xff] }
 0x60b   : > { %5481 = vmatpush.msra.mxu3 %v5021_v62  ;;  %5413 = vmatmul.f32.gmra.mxu0 %v11329_v21  ;;  %v5003_v43 = vld [vmem:[#allocation2 + $0x1eb0] sm:$0xff] }
 0x60c   : > { %5329 = vmatpush.msrb.mxu1 %v4995_v56  ;;  %5456 = vmatpush.msrb.mxu2 %v4919_v16  ;;  %v5087_v62 = vld [vmem:[#allocation2 + $0x2150] sm:$0xff]  ;;  %v11454_v63 = vpop.f32.mrf.mxu1  ;;  %v4901_v56 = vld [vmem:[#allocation2 + $0x1b80] sm:$0xff] }
 0x60d   : > { %5482 = vmatpush.msra.mxu3 %v5015_v52  ;;  %8386 = vmatmul.msk.f32.gmra.mxu2 %vm2466_vm9, %v11342_v49  ;;  %14366 = vst [vmem:[#allocation165_spill] sm:$0xff] %v11454_v63  ;;  %v4997_v16 = vld [vmem:[#allocation2 + $0x1e80] sm:$0xff]  ;;  %v5098_v52 = vld [vmem:[#allocation2 + $0x21a8] sm:$0xff] }
 0x60e   : > { %5330 = vmatpush.msrb.mxu1 %v4989_v38  ;;  %5457 = vmatpush.msrb.mxu2 %v4913_v18  ;;  %v4895_v18 = vld [vmem:[#allocation2 + $0x1b50] sm:$0xff]  ;;  %v4985_v63 = vld [vmem:[#allocation2 + $0x1e20] sm:$0xff] }
 0x60f   : > { %5483 = vmatpush.msra.mxu3 %v5009_v27  ;;  %5511 = vmatpush.msrb.mxu0 %v5093_v7  ;;  %v4991_v38 = vld [vmem:[#allocation2 + $0x1e50] sm:$0xff]  ;;  %v5081_v27 = vld [vmem:[#allocation2 + $0x2120] sm:$0xff] }
 0x610   : > { %5390 = vmatmul.f32.gmra.mxu3 %v11384_v19  ;;  %5331 = vmatpush.msrb.mxu1 %v4983_v20  ;;  %v11457_v48 = vpop.f32.mrf.mxu2  ;;  %v4889_v20 = vld [vmem:[#allocation2 + $0x1b20] sm:$0xff] }
 0x611   : > { %5458 = vmatpush.msrb.mxu2 %v4907_v10  ;;  %5484 = vmatpush.msra.mxu3 %v5003_v43  ;;  %14367 = vst [vmem:[#allocation166_spill] sm:$0xff] %v11457_v48  ;;  %v11463_v10 = vpop.f32.mrf.mxu0  ;;  %v5076_v43 = vld [vmem:[#allocation2 + $0x20f8] sm:$0xff]  ;;  %v5094_v48 = vld [vmem:[#allocation2 + $0x2188] sm:$0xff] }
 0x612   : > { %5332 = vmatmul.f32.vlgmr.msrb.gmra.mxu1 %v11295_v46  ;;  %5512 = vmatpush.msrb.mxu0 %v5087_v62  ;;  %v11460_v7 = vpop.f32.mrf.mxu3  ;;  %14369 = vst [vmem:[#allocation168_spill] sm:$0xff] %v11463_v10  ;;  %v5092_v62 = vld [vmem:[#allocation2 + $0x2178] sm:$0xff]  ;;  %v5058_v10 = vld [vmem:[#allocation2 + $0x2068] sm:$0xff] }
 0x613   : > { %5459 = vmatpush.msrb.mxu2 %v4901_v56  ;;  %5485 = vmatpush.msra.mxu3 %v4997_v16  ;;  %14368 = vst [vmem:[#allocation167_spill] sm:$0xff] %v11460_v7  ;;  %v5100_v56 = vld [vmem:[#allocation2 + $0x21b8] sm:$0xff]  ;;  %v5070_v16 = vld [vmem:[#allocation2 + $0x20c8] sm:$0xff] }
 0x614   : > { %5416 = vmatmul.f32.gmra.mxu0 %v11351_v28  ;;  %5432 = vmatpush.msra.mxu1 %v5098_v52  ;;  %v5086_v7 = vld [vmem:[#allocation2 + $0x2148] sm:$0xff]  ;;  %v5064_v52 = vld [vmem:[#allocation2 + $0x2098] sm:$0xff] }
 0x615   : > { %5460 = vmatpush.msrb.mxu2 %v4895_v18  ;;  %5486 = vmatpush.msra.mxu3 %v4991_v38  ;;  %v5080_v38 = vld [vmem:[#allocation2 + $0x2118] sm:$0xff] }
 0x616   : > { %8387 = vmatmul.msk.f32.gmra.mxu2 %vm2466_vm9, %v11374_v5  ;;  %5513 = vmatpush.msrb.mxu0 %v5081_v27  ;;  %v5088_v27 = vld [vmem:[#allocation2 + $0x2158] sm:$0xff] }
 0x617   : > { %5461 = vmatpush.msrb.mxu2 %v4889_v20  ;;  %5487 = vmatpush.msra.mxu3 %v4985_v63  ;;  %v4980_v20 = vld [vmem:[#allocation2 + $0x1df8] sm:$0xff] }
 0x618   : > { %5488 = vmatmul.f32.vlgmr.msra.gmra.mxu3 %v11295_v46  ;;  %5433 = vmatpush.msra.mxu1 %v5092_v62  ;;  %v5052_v62 = vld [vmem:[#allocation2 + $0x2038] sm:$0xff] }
 0x619   : > { %5550 = vmatpush.msra.mxu2 %v5076_v43  ;;  %5588 = vmatpush.msrb.mxu3 %v5100_v56  ;;  %v11468_v18 = vpop.f32.mrf.mxu1  ;;  %v5082_v43 = vld [vmem:[#allocation2 + $0x2128] sm:$0xff] }
 0x61a   : > { %14370 = vst [vmem:[#allocation169_spill] sm:$0xff] %v11468_v18  ;;  %5335 = vmatmul.f32.gmra.mxu1 %v11329_v21  ;;  %v11471_v63 = vpop.f32.mrf.mxu2 }
 0x61b   : > { %5551 = vmatpush.msra.mxu2 %v5070_v16  ;;  %5434 = vmatpush.msra.mxu1 %v5086_v7  ;;  %14371 = vst [vmem:[#allocation170_spill] sm:$0xff] %v11471_v63  ;;  %v11475_v56 = vpop.f32.mrf.mxu3  ;;  %v4974_v16 = vld [vmem:[#allocation2 + $0x1dc8] sm:$0xff]  ;;  %v11477_v18 = vpop.f32.mrf.mxu0  ;;  %v4968_v7 = vld [vmem:[#allocation2 + $0x1d98] sm:$0xff] }
 0x61c   : > { %5589 = vmatpush.msrb.mxu3 %v5094_v48  ;;  %8391 = vmatmul.msk.f32.vlgmr.msrb.gmra.mxu0 %vm2466_vm9, %v11308_v17  ;;  %14372 = vst [vmem:[#allocation171_spill] sm:$0xff] %v11475_v56  ;;  %v5046_v48 = vld [vmem:[#allocation2 + $0x2008] sm:$0xff] }
 0x61d   : > { %5552 = vmatpush.msra.mxu2 %v5064_v52  ;;  %5435 = vmatpush.msra.mxu1 %v5080_v38  ;;  %v5040_v52 = vld [vmem:[#allocation2 + $0x1fd8] sm:$0xff]  ;;  %v4962_v38 = vld [vmem:[#allocation2 + $0x1d68] sm:$0xff] }
 0x61e   : > { %5590 = vmatpush.msrb.mxu3 %v5088_v27  ;;  %5462 = vmatmul.f32.vlgmr.msrb.gmra.mxu2 %v11320_v3  ;;  %v5034_v27 = vld [vmem:[#allocation2 + $0x1fa8] sm:$0xff] }
 0x61f   : > { %5553 = vmatpush.msra.mxu2 %v5058_v10  ;;  %5524 = vmatpush.msrb.mxu1 %v4980_v20  ;;  %v4956_v20 = vld [vmem:[#allocation2 + $0x1d38] sm:$0xff] }
 0x620   : > { %5591 = vmatpush.msrb.mxu3 %v5082_v43  ;;  %v5028_v43 = vld [vmem:[#allocation2 + $0x1f78] sm:$0xff] }
 0x621   : > { %5491 = vmatmul.f32.gmra.mxu3 %v11329_v21  ;;  %5554 = vmatpush.msra.mxu2 %v5052_v62  ;;  %v4950_v62 = vld [vmem:[#allocation2 + $0x1d08] sm:$0xff] }
 0x622   : > { %5525 = vmatpush.msrb.mxu1 %v4974_v16  ;;  %v5022_v16 = vld [vmem:[#allocation2 + $0x1f48] sm:$0xff] }
 0x623   : > { %5338 = vmatmul.f32.gmra.mxu1 %v11351_v28  ;;  %5555 = vmatpush.msra.mxu2 %v5046_v48  ;;  %v11482_v10 = vpop.f32.mrf.mxu1 }
 0x624   : > { %5526 = vmatpush.msrb.mxu1 %v4968_v7  ;;  %8392 = vmatmul.msk.f32.gmra.mxu0 %vm2466_vm9, %v11342_v49  ;;  %v11486_v56 = vpop.f32.mrf.mxu2  ;;  %v4944_v7 = vld [vmem:[#allocation2 + $0x1cd8] sm:$0xff] }
 0x625   : > { %5556 = vmatpush.msra.mxu2 %v5040_v52  ;;  %14373 = vst [vmem:[#allocation172_spill] sm:$0xff] %v11486_v56  ;;  %v11492_v63 = vpop.f32.mrf.mxu0  ;;  %v5016_v52 = vld [vmem:[#allocation2 + $0x1f18] sm:$0xff] }
 0x626   : > { %5527 = vmatpush.msrb.mxu1 %v4962_v38  ;;  %5465 = vmatmul.f32.gmra.mxu2 %v11358_v30  ;;  %14375 = vst [vmem:[#allocation174_spill] sm:$0xff] %v11492_v63  ;;  %v4938_v38 = vld [vmem:[#allocation2 + $0x1ca8] sm:$0xff] }
 0x627   : > { %5557 = vmatpush.msra.mxu2 %v5034_v27  ;;  %v11489_v48 = vpop.f32.mrf.mxu3  ;;  %v5010_v27 = vld [vmem:[#allocation2 + $0x1ee8] sm:$0xff] }
 0x628   : > { %5528 = vmatpush.msrb.mxu1 %v4956_v20  ;;  %14374 = vst [vmem:[#allocation173_spill] sm:$0xff] %v11489_v48  ;;  %v4932_v20 = vld [vmem:[#allocation2 + $0x1c78] sm:$0xff]  ;;  %v4926_v63 = vld [vmem:[#allocation2 + $0x1c48] sm:$0xff] }
 0x629   : > { %5494 = vmatmul.f32.gmra.mxu3 %v11351_v28  ;;  %5558 = vmatpush.msra.mxu2 %v5028_v43  ;;  %v5004_v48 = vld [vmem:[#allocation2 + $0x1eb8] sm:$0xff] }
 0x62a   : > { %5529 = vmatpush.msrb.mxu1 %v4950_v62  ;;  %v4998_v62 = vld [vmem:[#allocation2 + $0x1e88] sm:$0xff] }
 0x62b   : > { %8388 = vmatmul.msk.f32.vlgmr.msra.gmra.mxu1 %vm2466_vm9, %v11308_v17  ;;  %5559 = vmatpush.msra.mxu2 %v5022_v16  ;;  %v4920_v16 = vld [vmem:[#allocation2 + $0x1c18] sm:$0xff] }
 0x62c   : > { %5530 = vmatpush.msrb.mxu1 %v4944_v7  ;;  %8393 = vmatmul.msk.f32.gmra.mxu0 %vm2466_vm9, %v11374_v5  ;;  %v11498_v43 = vpop.f32.mrf.mxu1  ;;  %v4992_v7 = vld [vmem:[#allocation2 + $0x1e58] sm:$0xff] }
 0x62d   : > { %5560 = vmatpush.msra.mxu2 %v5016_v52  ;;  %14376 = vst [vmem:[#allocation175_spill] sm:$0xff] %v11498_v43  ;;  %v11501_v56 = vpop.f32.mrf.mxu2  ;;  %v4986_v43 = vld [vmem:[#allocation2 + $0x1e28] sm:$0xff] }
 0x62e   : > { %5531 = vmatpush.msrb.mxu1 %v4938_v38  ;;  %5468 = vmatmul.f32.gmra.mxu2 %v11384_v19  ;;  %v4914_v38 = vld [vmem:[#allocation2 + $0x1be8] sm:$0xff] }
 0x62f   : > { %5561 = vmatpush.msra.mxu2 %v5010_v27  ;;  %v11509_v27 = vpop.f32.mrf.mxu0 }
 0x630   : > { %5532 = vmatpush.msrb.mxu1 %v4932_v20  ;;  %v11505_v52 = vpop.f32.mrf.mxu3  ;;  %14378 = vst [vmem:[#allocation177_spill] sm:$0xff] %v11509_v27  ;;  %v4908_v20 = vld [vmem:[#allocation2 + $0x1bb8] sm:$0xff]  ;;  %v3706_v27 = vadd.f32 %v11083_v51, %v11099_v22 }
 0x631   : > { %5562 = vmatpush.msra.mxu2 %v5004_v48  ;;  %8394 = vmatmul.msk.f32.vlgmr.msrb.gmra.mxu3 %vm2466_vm9, %v11308_v17  ;;  %14377 = vst [vmem:[#allocation176_spill] sm:$0xff] %v11505_v52  ;;  %v4902_v48 = vld [vmem:[#allocation2 + $0x1b88] sm:$0xff] }
 0x632   : > { %5533 = vmatpush.msrb.mxu1 %v4926_v63  ;;  %v4896_v63 = vld [vmem:[#allocation2 + $0x1b58] sm:$0xff] }
 0x633   : > { %8389 = vmatmul.msk.f32.gmra.mxu1 %vm2466_vm9, %v11342_v49  ;;  %5563 = vmatpush.msra.mxu2 %v4998_v62 }
 0x634   : > { %5534 = vmatpush.msrb.mxu1 %v4920_v16  ;;  %v4890_v16 = vld [vmem:[#allocation2 + $0x1b28] sm:$0xff] }
 0x635   : > { %5564 = vmatpush.msra.mxu2 %v4992_v7 }
 0x636   : > { %5535 = vmatpush.msrb.mxu1 %v4914_v38  ;;  %v11512_v17 = vpop.f32.mrf.mxu1 }
 0x637   : > { %5565 = vmatpush.msra.mxu2 %v4986_v43  ;;  %v11516_v62 = vpop.f32.mrf.mxu2 }
 0x638   : > { %5566 = vmatmul.f32.vlgmr.msra.gmra.mxu2 %v11295_v46  ;;  %5536 = vmatpush.msrb.mxu1 %v4908_v20  ;;  %v11522_v43 = vpop.f32.mrf.mxu0 }
 0x639   : > { %8395 = vmatmul.msk.f32.gmra.mxu3 %vm2466_vm9, %v11342_v49  ;;  %14380 = vst [vmem:[#allocation179_spill] sm:$0xff] %v11522_v43 }
 0x63a   : > { %5537 = vmatpush.msrb.mxu1 %v4902_v48  ;;  %v11520_v7 = vpop.f32.mrf.mxu3 }
 0x63b   : > { %8390 = vmatmul.msk.f32.gmra.mxu1 %vm2466_vm9, %v11374_v5  ;;  %14379 = vst [vmem:[#allocation178_spill] sm:$0xff] %v11520_v7 }
 0x63c   : > { %5538 = vmatpush.msrb.mxu1 %v4896_v63 }
 0x63e   : > { %5539 = vmatpush.msrb.mxu1 %v4890_v16 }
 0x640   : > { %5569 = vmatmul.f32.gmra.mxu2 %v11329_v21  ;;  %v11527_v46 = vpop.f32.mrf.mxu1 }
 0x641   : > { %8396 = vmatmul.msk.f32.gmra.mxu3 %vm2466_vm9, %v11374_v5  ;;  %v11530_v49 = vpop.f32.mrf.mxu2  ;;  %v2520_v5 = vadd.f32 %v10694_v2, %v10668_v14  ;;  %v3703_v2 = vadd.f32 %v11065_v58, %v11081_v8  ;;  %v4448_v58 = vadd.f32 %v11415_v59, %v11312_v13  ;;  %vm8122_vm9 = vcmask 392192  }
 0x642   : > { %v5203_v20 = vpop.f32.mrf.mxu0 }
 0x643   : > { %5540 = vmatmul.f32.vlgmr.msrb.gmra.mxu1 %v11320_v3  ;;  %v2517_v3 = vadd.f32 %v10681_v42, %v10662_v57  ;;  %v3709_v57 = vadd.f32 %v11101_v33, %v11126_v11  ;;  %v3729_v33 = vadd.f32 %v11067_v0, %v3703_v2 }
 0x644   : > { %v5177_v38 = vpop.f32.mrf.mxu3 }
 0x645   : > { %v2543_v52 = vadd.f32 %v10696_v6, %v2517_v3 }
 0x648   : > { %5572 = vmatmul.f32.gmra.mxu2 %v11351_v28  ;;  %v2523_v28 = vadd.f32 %v10707_v29, %v10678_v4  ;;  %v4445_v4 = vadd.f32 %v11400_v37, %v11283_v9  ;;  %v2965_v29 = vadd.f32 %v10810_v54, %v2543_v52 }
 0x649   : > { %v11534_v48 = vpop.f32.mrf.mxu1 }
 0x64a   : > { %v2991_v51 = vadd.f32 %v10914_v23, %v2965_v29  ;;  %v14382_v29 = vld [vmem:[#allocation17_spill] sm:$0xff] }
 0x64b   : > { %5543 = vmatmul.f32.gmra.mxu1 %v11358_v30  ;;  %v2546_v30 = vadd.f32 %v10711_v45, %v2520_v5 }
 0x64c   : > { %v5151_v63 = vpop.f32.mrf.mxu2  ;;  %v5206_v21 = vpop.f32.mrf.mxu0  ;;  %v3017_v11 = vadd.f32 %v10917_v44, %v2991_v51  ;;  %v11580_v44 = vld [vmem:[%s14123_s10] sm:$0x3f]  ;;  %v14386_v51 = vld [vmem:[#allocation13_spill] sm:$0xff] }
 0x64d   : > { %v5180_v16 = vpop.f32.mrf.mxu3  ;;  %v2968_v14 = vadd.f32 %v10824_v1, %v2546_v30  ;;  %v4442_v1 = vadd.f32 %v11386_v61, %v11270_v36 }
 0x64e   : > { %v4127_v0 = vadd.f32 %v3729_v33, %v3017_v11  ;;  %v14388_v33 = vld [vmem:[#allocation23_spill] sm:$0xff] }
 0x64f   : > { %v2994_v6 = vadd.f32 %v10927_v24, %v2968_v14  ;;  %v4471_v24 = vadd.f32 %v11391_v35, %v4445_v4  ;;  %v4468_v23 = vadd.f32 %v11365_v12, %v4442_v1  ;;  %v14384_v1 = vld [vmem:[#allocation16_spill] sm:$0xff] }
 0x651   : > { %v3020_v54 = vadd.f32 %v10930_v26, %v2994_v6  ;;  %v4866_v35 = vadd.f32 %v4468_v23, %v4127_v0  ;;  %v14392_v23 = vld [vmem:[#allocation64_spill] sm:$0xff] }
 0x652   : > { %v14394_v0 = vld [vmem:[#allocation112_spill] sm:$0xff] }
 0x653   : > { %5546 = vmatmul.f32.gmra.mxu1 %v11384_v19  ;;  %v11539_v43 = vpop.f32.mrf.mxu1  ;;  %v2549_v19 = vadd.f32 %v10727_v25, %v2523_v28  ;;  %v3732_v25 = vadd.f32 %v11086_v32, %v3706_v27  ;;  %v5178_v32 = vadd.f32 %v5177_v38, %v5151_v63 }
 0x654   : > { %14381 = vst [vmem:[#allocation180_spill] sm:$0xff] %v11539_v43 }
 0x655   : > { %v2971_v45 = vadd.f32 %v10856_v34, %v2549_v19  ;;  %v3735_v34 = vadd.f32 %v11106_v39, %v3709_v57  ;;  %v4133_v36 = vadd.f32 %v3732_v25, %v3020_v54  ;;  %v5204_v39 = vadd.f32 %v5203_v20, %v5178_v32  ;;  %v14390_v32 = vld [vmem:[#allocation24_spill] sm:$0xff] }
 0x656   : > { %v5154_v7 = vpop.f32.mrf.mxu2  ;;  %v5209_v42 = vpop.f32.mrf.mxu0 }
 0x657   : > { %v5183_v43 = vpop.f32.mrf.mxu3  ;;  %v5181_v8 = vadd.f32 %v5180_v16, %v5154_v7  ;;  %v2997_v22 = vadd.f32 %v10942_v31, %v2971_v45  ;;  %v4474_v31 = vadd.f32 %v11405_v40, %v4448_v58  ;;  %v4872_v59 = vadd.f32 %v4471_v24, %v4133_v36  ;;  %v14383_v45 = vld [vmem:[#allocation21_spill] sm:$0xff]  ;;  %v14385_v58 = vld [vmem:[#allocation19_spill] sm:$0xff] }
 0x658   : > { %v5602_v38 = vadd.f32 %v5204_v39, %v4866_v35  ;;  %v5621_v16 = vperm.slane %v11580_v44, 0  ;;  %v2598_v6 = vadd.f32 %v14383_v45, %v14382_v29  ;;  %v4523_v45 = vadd.f32 %v11376_v15, %v11369_v41  ;;  %v14410_v41 = vld [vmem:[#allocation152_spill] sm:$0xff]  ;;  %v14411_v15 = vld [vmem:[#allocation153_spill] sm:$0xff] }
 0x659   : > { %v3023_v37 = vadd.f32 %v10945_v47, %v2997_v22  ;;  %v5207_v9 = vadd.f32 %v5206_v21, %v5181_v8  ;;  %v2595_v8 = vadd.f32 %v14385_v58, %v14384_v1  ;;  %v14387_v22 = vld [vmem:[#allocation18_spill] sm:$0xff] }
 0x65a   : > { %v5633_v3 = vadd.f32 %v5621_v16, %v5602_v38  ;;  %v2601_v54 = vadd.f32 %v14388_v33, %v14387_v22  ;;  %v14399_v38 = vld [vmem:[#allocation119_spill] sm:$0xff]  ;;  %v14404_v58 = vld [vmem:[#allocation14_spill] sm:$0xff]  ;;  %v14406_v33 = vld [vmem:[#allocation65_spill] sm:$0xff] }
 0x65b   : > { %v4139_v26 = vadd.f32 %v3735_v34, %v3023_v37  ;;  %v5608_v7 = vadd.f32 %v5207_v9, %v4872_v59  ;;  %v14389_v34 = vld [vmem:[#allocation27_spill] sm:$0xff]  ;;  %v2621_v11 = vadd.f32 %v14390_v32, %v2595_v8  ;;  %v14405_v8 = vld [vmem:[#allocation76_spill] sm:$0xff]  ;;  %v14408_v32 = vld [vmem:[#allocation113_spill] sm:$0xff] }
 0x65c   : > { %v5651_v2 = vmax.f32 %v5633_v3, 0.0  ;;  %v2624_v24 = vadd.f32 %v14389_v34, %v2598_v6  ;;  %v14391_v37 = vld [vmem:[#allocation31_spill] sm:$0xff]  ;;  %v14402_v3 = vld [vmem:[#allocation109_spill] sm:$0xff] }
 0x65d   : > { %v4878_v27 = vadd.f32 %v4474_v31, %v4139_v26  ;;  %v5639_v20 = vadd.f32 %v5621_v16, %v5608_v7  ;;  %v2627_v36 = vadd.f32 %v14391_v37, %v2601_v54  ;;  %v14393_v9 = vld [vmem:[#allocation115_spill] sm:$0xff]  ;;  %v14395_v26 = vld [vmem:[#allocation61_spill] sm:$0xff]  ;;  %v14398_v7 = vld [vmem:[#allocation108_spill] sm:$0xff] }
 0x65e   : > { %v11573_v61 = vpop.f32.mrf.mxu1  ;;  %v3046_v31 = vadd.f32 %v14392_v23, %v2624_v24  ;;  %v3043_v59 = vadd.f32 %v14395_v26, %v2621_v11  ;;  %v14407_v34 = vld [vmem:[#allocation105_spill] sm:$0xff]  ;;  %v14413_v26 = vld [vmem:[#allocation80_spill] sm:$0xff] }
 0x65f   : > { %v5657_v30 = vmax.f32 %v5639_v20, 0.0  ;;  %v14401_v20 = vld [vmem:[#allocation63_spill] sm:$0xff] }
 0x660   : > { %v5157_v13 = vpop.f32.mrf.mxu2 }
 0x661   : > { %v5184_v52 = vadd.f32 %v5183_v43, %v5157_v13  ;;  %v11584_v12 = vpop.f32.mrf.mxu0  ;;  %v3784_v13 = vadd.f32 %v14394_v0, %v14393_v9  ;;  %v14412_v0 = vld [vmem:[#allocation72_spill] sm:$0xff] }
 0x662   : > { %v11582_v47 = vpop.f32.mrf.mxu3 }
 0x663   : > { %v5210_v40 = vadd.f32 %v5209_v42, %v5184_v52  ;;  %v14396_v52 = vld [vmem:[#allocation66_spill] sm:$0xff] }
 0x664   : > { %v3049_v35 = vadd.f32 %v14396_v52, %v2627_v36  ;;  %v14409_v36 = vld [vmem:[#allocation150_spill] sm:$0xff] }
 0x665   : > { %v5614_v63 = vadd.f32 %v5210_v40, %v4878_v27  ;;  %v14397_v27 = vld [vmem:[#allocation111_spill] sm:$0xff]  ;;  %v4520_v23 = vadd.f32 %v14409_v36, %v11335_v50 }
 0x666   : > { %v11587_v43 = vpop.f32.mrf.mxu1  ;;  %v3781_v40 = vadd.f32 %v14398_v7, %v14397_v27  ;;  %v3075_v54 = vadd.f32 %v14406_v33, %v3049_v35  ;;  %v14414_v35 = vld [vmem:[#allocation165_spill] sm:$0xff] }
 0x667   : > { %v5645_v21 = vadd.f32 %v5621_v16, %v5614_v63  ;;  %v14400_v63 = vld [vmem:[#allocation116_spill] sm:$0xff]  ;;  %v4546_v52 = vadd.f32 %v11428_v53, %v4520_v23 }
 0x668   : > { %v3787_v16 = vadd.f32 %v14400_v63, %v14399_v38  ;;  %v3807_v24 = vadd.f32 %v14407_v34, %v3781_v40  ;;  %v14415_v40 = vld [vmem:[#allocation11_spill] sm:$0xff]  ;;  %v14419_v34 = vmov 0.0  }
 0x669   : > { %v5663_v5 = vmax.f32 %v5645_v21, 0.0  ;;  %v5669_v38 = vadd.s32 32, %v14415_v40 }
 0x66a   : > { %v5255_v28 = vpop.f32.mrf.mxu2  ;;  %v11590_v14 = vpop.f32.mrf.mxu0  ;;  %v3813_v11 = vadd.f32 %v14408_v32, %v3787_v16  ;;  %v14421_v32 = vld [vmem:[#allocation22_spill] sm:$0xff] }
 0x66b   : > { %8400 = vmatpush.msk.msra.mxu0 %vm1420_vm5, %v5663_v5  ;;  %v3072_v5 = vadd.f32 %v14401_v20, %v3046_v31  ;;  %v4549_v31 = vadd.f32 %v11441_v60, %v4523_v45 }
 0x66c   : > { %v5284_v19 = vpop.f32.mrf.mxu3 }
 0x66d   : > { %5737 = vmatpush.msra.mxu0 %v5657_v30  ;;  %v3810_v30 = vadd.f32 %v14402_v3, %v3784_v13  ;;  %v3098_v22 = vadd.f32 %v14405_v8, %v3072_v5  ;;  %v14417_v3 = vld [vmem:[#allocation12_spill] sm:$0xff] }
 0x66e   : > { %vm5675_vm12 = vcmp.eq.s32.totalorder %v5669_v38, %v14417_v3 }
 0x66f   : > { %5738 = vmatpush.msra.mxu0 %v5651_v2  ;;  %v14403_v2 = vld [vmem:[#allocation59_spill] sm:$0xff] }
 0x670   : > { %8401 = vmatmul.msk.f32.vlgmr.msra.gmra.mxu0 %vm5687_vm10, %v10486_v55  ;;  %v3069_v29 = vadd.f32 %v14403_v2, %v3043_v59  ;;  %v3101_v59 = vadd.f32 %v14413_v26, %v3075_v54  ;;  %v5670_v54 = vadd.s32 40, %v14415_v40 }
 0x672   : > { %v3095_v13 = vadd.f32 %v14412_v0, %v3069_v29  ;;  %v4140_v20 = vadd.f32 %v3813_v11, %v3101_v59  ;;  %vm5676_vm15 = vcmp.eq.s32.totalorder %v5670_v54, %v14417_v3  ;;  %v14424_v0 = vld [vmem:[#allocation38_spill] sm:$0xff]  ;;  %v14426_v59 = vld [vmem:[#allocation37_spill] sm:$0xff] }
 0x673   : > { %v5229_v57 = vpop.f32.mrf.mxu1 }
 0x674   : > { %v5258_v4 = vpop.f32.mrf.mxu2  ;;  %v5256_v9 = vadd.f32 %v5255_v28, %v5229_v57  ;;  %v4128_v63 = vadd.f32 %v3807_v24, %v3095_v13  ;;  %v14416_v57 = vld [vmem:[#allocation10_spill] sm:$0xff]  ;;  %v14425_v13 = vld [vmem:[#allocation25_spill] sm:$0xff] }
 0x675   : > { %v5287_v42 = vpop.f32.mrf.mxu3  ;;  %v11596_v25 = vpop.f32.mrf.mxu0  ;;  %vm5672_vm11 = vcmp.eq.s32.totalorder %v5669_v38, %v14416_v57  ;;  %vm5673_vm14 = vcmp.eq.s32.totalorder %v5670_v54, %v14416_v57  ;;  %v2679_v26 = vadd.f32 %v14425_v13, %v14424_v0  ;;  %v14440_v0 = vld [vmem:[#allocation157_spill] sm:$0xff]  ;;  %v14441_v13 = vld [vmem:[#allocation67_spill] sm:$0xff] }
 0x676   : > { %v5282_v5 = vadd.f32 %v11582_v47, %v5256_v9  ;;  %v5622_v47 = vperm.slane %v11580_v44, 1  ;;  %vm5678_vm13 = vmor %vm5672_vm11, %vm5675_vm12 }
 0x677   : > { %v11655_v24 = vsel %vm5678_vm13, 1.0, %v14419_v34  ;;  %vm5679_vm0 = vmor %vm5673_vm14, %vm5676_vm15 }
 0x678   : > { %8402 = vmatmul.msk.f32.gmra.mxu0 %vm5687_vm10, %v14386_v51 }
 0x67d   : > { %v5232_v39 = vpop.f32.mrf.mxu1 }
 0x67e   : > { %v5261_v21 = vpop.f32.mrf.mxu2  ;;  %v5259_v6 = vadd.f32 %v5258_v4, %v5232_v39  ;;  %v4526_v4 = vadd.f32 %v14411_v15, %v14410_v41  ;;  %v4134_v39 = vadd.f32 %v3810_v30, %v3098_v22  ;;  %v4867_v30 = vadd.f32 %v4546_v52, %v4128_v63  ;;  %v14429_v63 = vld [vmem:[#allocation74_spill] sm:$0xff] }
 0x67f   : > { %v11629_v37 = vpop.f32.mrf.mxu0 }
 0x680   : > { %8403 = vmatmul.msk.f32.gmra.mxu0 %vm5687_vm10, %v14404_v58  ;;  %v4552_v27 = vadd.f32 %v14414_v35, %v4526_v4  ;;  %v5285_v7 = vadd.f32 %v5284_v19, %v5259_v6  ;;  %v4873_v16 = vadd.f32 %v4549_v31, %v4134_v39  ;;  %v14418_v19 = vld [vmem:[#allocation15_spill] sm:$0xff]  ;;  %v5603_v6 = vadd.f32 %v5282_v5, %v4867_v30  ;;  %v14422_v4 = vld [vmem:[#allocation29_spill] sm:$0xff]  ;;  %v14423_v31 = vld [vmem:[#allocation20_spill] sm:$0xff] }
 0x681   : > { %v11621_v1 = vpop.f32.mrf.mxu3  ;;  %v2673_v9 = vadd.f32 %v14423_v31, %v14422_v4  ;;  %v14427_v35 = vld [vmem:[#allocation34_spill] sm:$0xff]  ;;  %v14438_v4 = vld [vmem:[#allocation131_spill] sm:$0xff] }
 0x682   : > { %v4879_v53 = vadd.f32 %v4552_v27, %v4140_v20  ;;  %v5609_v2 = vadd.f32 %v5285_v7, %v4873_v16  ;;  %v5634_v41 = vadd.f32 %v5622_v47, %v5603_v6  ;;  %v14428_v7 = vld [vmem:[#allocation41_spill] sm:$0xff]  ;;  %v14430_v5 = vld [vmem:[#allocation70_spill] sm:$0xff] }
 0x683   : > { %v2699_v27 = vadd.f32 %v14427_v35, %v2673_v9  ;;  %v2705_v38 = vadd.f32 %v14428_v7, %v2679_v26  ;;  %v14431_v30 = vld [vmem:[#allocation78_spill] sm:$0xff]  ;;  %v14439_v9 = vld [vmem:[#allocation159_spill] sm:$0xff]  ;;  %v14444_v7 = vld [vmem:[#allocation156_spill] sm:$0xff] }
 0x684   : > { %v5640_v33 = vadd.f32 %v5622_v47, %v5609_v2  ;;  %v5652_v16 = vmax.f32 %v5634_v41, 0.0  ;;  %v14432_v2 = vld [vmem:[#allocation110_spill] sm:$0xff] }
 0x685   : > { %v14437_v41 = vld [vmem:[#allocation114_spill] sm:$0xff] }
 0x686   : > { %v5235_v50 = vpop.f32.mrf.mxu1  ;;  %v5658_v52 = vmax.f32 %v5640_v33, 0.0  ;;  %v14434_v33 = vld [vmem:[#allocation69_spill] sm:$0xff]  ;;  %v3865_v31 = vadd.f32 %v14438_v4, %v14437_v41  ;;  %v14455_v41 = vld [vmem:[#allocation39_spill] sm:$0xff] }
 0x687   : > { %v5262_v60 = vadd.f32 %v5261_v21, %v5235_v50  ;;  %v11642_v28 = vpop.f32.mrf.mxu2 }
 0x688   : > { %8404 = vmatmul.msk.f32.gmra.mxu0 %vm5687_vm10, %v14418_v19  ;;  %v11651_v21 = vpop.f32.mrf.mxu0 }
 0x689   : > { %v5288_v29 = vadd.f32 %v5287_v42, %v5262_v60  ;;  %v14420_v42 = vld [vmem:[#allocation33_spill] sm:$0xff]  ;;  %v3121_v60 = vadd.f32 %v14430_v5, %v2699_v27 }
 0x68a   : > { %v11648_v45 = vpop.f32.mrf.mxu3  ;;  %v2676_v11 = vadd.f32 %v14421_v32, %v14420_v42  ;;  %v14435_v42 = vld [vmem:[#allocation106_spill] sm:$0xff]  ;;  %v14436_v32 = vld [vmem:[#allocation123_spill] sm:$0xff] }
 0x68b   : > { %v5615_v8 = vadd.f32 %v5288_v29, %v4879_v53  ;;  %v3127_v53 = vadd.f32 %v14431_v30, %v2705_v38  ;;  %v14433_v29 = vld [vmem:[#allocation127_spill] sm:$0xff]  ;;  %v3147_v26 = vadd.f32 %v14441_v13, %v3121_v60  ;;  %v14445_v38 = vld [vmem:[#allocation154_spill] sm:$0xff] }
 0x68c   : > { %v2702_v39 = vadd.f32 %v14426_v59, %v2676_v11  ;;  %v3862_v6 = vadd.f32 %v14433_v29, %v14432_v2  ;;  %v3859_v11 = vadd.f32 %v14436_v32, %v14435_v42  ;;  %v14442_v59 = vld [vmem:[#allocation73_spill] sm:$0xff]  ;;  %v14448_v30 = vld [vmem:[#allocation26_spill] sm:$0xff] }
 0x68d   : > { %v5646_v22 = vadd.f32 %v5622_v47, %v5615_v8  ;;  %v5671_v8 = vadd.s32 48, %v14415_v40  ;;  %v4601_v40 = vadd.f32 %v14440_v0, %v14439_v9  ;;  %v14450_v60 = vld [vmem:[#allocation30_spill] sm:$0xff]  ;;  %v14454_v32 = vld [vmem:[#allocation45_spill] sm:$0xff]  ;;  %v14456_v9 = vld [vmem:[#allocation128_spill] sm:$0xff] }
 0x68e   : > { %v3124_v50 = vadd.f32 %v14429_v63, %v2702_v39  ;;  %v3153_v39 = vadd.f32 %v14442_v59, %v3127_v53  ;;  %v4598_v63 = vadd.f32 %v14445_v38, %v14444_v7  ;;  %v14451_v29 = vld [vmem:[#allocation46_spill] sm:$0xff]  ;;  %v2829_v4 = vadd.f32 %v14455_v41, %v14454_v32  ;;  %v14460_v38 = vld [vmem:[#allocation68_spill] sm:$0xff]  ;;  %v14467_v32 = vld [vmem:[#allocation47_spill] sm:$0xff] }
 0x68f   : > { %v5664_v36 = vmax.f32 %v5646_v22, 0.0  ;;  %v5333_v23 = vpop.f32.mrf.mxu1  ;;  %v11684_v22 = vsel %vm5679_vm0, 1.0, %v14419_v34  ;;  %vm5674_vm1 = vcmp.eq.s32.totalorder %v5671_v8, %v14416_v57  ;;  %vm5677_vm3 = vcmp.eq.s32.totalorder %v5671_v8, %v14417_v3  ;;  %v14449_v3 = vld [vmem:[#allocation42_spill] sm:$0xff]  ;;  %v14452_v8 = vld [vmem:[#allocation71_spill] sm:$0xff] }
 0x690   : > { %v5362_v15 = vpop.f32.mrf.mxu2  ;;  %8405 = vmatmul.msk.f32.gmra.mxu0 %vm5687_vm10, %v11655_v24  ;;  %v3150_v54 = vadd.f32 %v14434_v33, %v3124_v50  ;;  %v14446_v50 = vld [vmem:[#allocation162_spill] sm:$0xff]  ;;  %v2751_v2 = vadd.f32 %v14449_v3, %v14448_v30  ;;  %v2754_v53 = vadd.f32 %v14451_v29, %v14450_v60  ;;  %v14453_v33 = vld [vmem:[#allocation120_spill] sm:$0xff]  ;;  %vm5680_vm7 = vmor %vm5674_vm1, %vm5677_vm3  ;;  %v3891_v0 = vadd.f32 %v14456_v9, %v3865_v31 }
 0x691   : > { %8408 = vmatpush.msk.msra.mxu1 %vm1420_vm5, %v5664_v36  ;;  %v11679_v47 = vpop.f32.mrf.mxu0  ;;  %v3885_v42 = vadd.f32 %v14453_v33, %v3859_v11  ;;  %v14457_v13 = vld [vmem:[#allocation158_spill] sm:$0xff]  ;;  %v14462_v3 = vld [vmem:[#allocation155_spill] sm:$0xff]  ;;  %v14463_v60 = vld [vmem:[#allocation161_spill] sm:$0xff] }
 0x692   : > { %v4627_v59 = vadd.f32 %v14457_v13, %v4601_v40  ;;  %v4624_v11 = vadd.f32 %v14462_v3, %v4598_v63  ;;  %v14465_v31 = vld [vmem:[#allocation50_spill] sm:$0xff] }
 0x693   : > { %5775 = vmatpush.msra.mxu1 %v5658_v52  ;;  %v11672_v20 = vpop.f32.mrf.mxu3  ;;  %v14443_v52 = vld [vmem:[#allocation124_spill] sm:$0xff] }
 0x694   : > { %v3888_v35 = vadd.f32 %v14443_v52, %v3862_v6  ;;  %v3176_v6 = vadd.f32 %v14452_v8, %v3150_v54  ;;  %v14459_v52 = vld [vmem:[#allocation43_spill] sm:$0xff] }
 0x695   : > { %5776 = vmatpush.msra.mxu1 %v5652_v16  ;;  %v14447_v16 = vld [vmem:[#allocation160_spill] sm:$0xff] }
 0x696   : > { %8409 = vmatmul.msk.f32.vlgmr.msra.gmra.mxu1 %vm5687_vm10, %v10486_v55  ;;  %v4604_v5 = vadd.f32 %v14447_v16, %v14446_v50  ;;  %v3173_v50 = vadd.f32 %v14460_v38, %v3147_v26  ;;  %v14461_v16 = vld [vmem:[#allocation75_spill] sm:$0xff]  ;;  %v4135_v54 = vadd.f32 %v3888_v35, %v3176_v6  ;;  %v14466_v26 = vld [vmem:[#allocation52_spill] sm:$0xff] }
 0x697   : > { %v5336_v36 = vpop.f32.mrf.mxu1  ;;  %v3179_v30 = vadd.f32 %v14461_v16, %v3153_v39  ;;  %v2835_v39 = vadd.f32 %v14467_v32, %v14466_v26  ;;  %v14468_v35 = vld [vmem:[#allocation28_spill] sm:$0xff]  ;;  %v14477_v26 = vld [vmem:[#allocation83_spill] sm:$0xff] }
 0x698   : > { %8406 = vmatmul.msk.f32.gmra.mxu0 %vm5687_vm10, %v11684_v22  ;;  %v5337_v57 = vadd.f32 %v5336_v36, %v11590_v14  ;;  %v5334_v14 = vadd.f32 %v5333_v23, %v11584_v12  ;;  %v14458_v36 = vld [vmem:[#allocation49_spill] sm:$0xff]  ;;  %v4630_v29 = vadd.f32 %v14463_v60, %v4604_v5  ;;  %v11727_v12 = vsel %vm5680_vm7, 1.0, %v14419_v34  ;;  %v14464_v23 = vld [vmem:[#allocation35_spill] sm:$0xff]  ;;  %v14469_v34 = vld [vmem:[#allocation40_spill] sm:$0xff] }
 0x699   : > { %v5365_v27 = vpop.f32.mrf.mxu2  ;;  %v2832_v7 = vadd.f32 %v14459_v52, %v14458_v36  ;;  %v2757_v40 = vadd.f32 %v14465_v31, %v14464_v23  ;;  %v2777_v6 = vadd.f32 %v14468_v35, %v2751_v2  ;;  %v4129_v63 = vadd.f32 %v3885_v42, %v3173_v50  ;;  %v11735_v9 = vpop.f32.mrf.mxu0  ;;  %v14470_v52 = vld [vmem:[#allocation44_spill] sm:$0xff] }
 0x69a   : > { %v5363_v8 = vadd.f32 %v5362_v15, %v5337_v57  ;;  %v4141_v5 = vadd.f32 %v3891_v0, %v3179_v30  ;;  %v4874_v15 = vadd.f32 %v4627_v59, %v4135_v54  ;;  %v5360_v57 = vadd.f32 %v11642_v28, %v5334_v14  ;;  %v14471_v16 = vld [vmem:[#allocation84_spill] sm:$0xff]  ;;  %v14473_v14 = vld [vmem:[#allocation79_spill] sm:$0xff] }
 0x69b   : > { %v11722_v33 = vpop.f32.mrf.mxu3  ;;  %v2855_v36 = vadd.f32 %v14469_v34, %v2829_v4  ;;  %v2858_v38 = vadd.f32 %v14470_v52, %v2832_v7  ;;  %v3199_v3 = vadd.f32 %v14471_v16, %v2777_v6  ;;  %v14472_v60 = vld [vmem:[#allocation32_spill] sm:$0xff]  ;;  %v4868_v2 = vadd.f32 %v4624_v11, %v4129_v63  ;;  %v14484_v52 = vld [vmem:[#allocation102_spill] sm:$0xff] }
 0x69c   : > { %v2780_v23 = vadd.f32 %v14472_v60, %v2754_v53  ;;  %v4880_v42 = vadd.f32 %v4630_v29, %v4141_v5  ;;  %v5610_v0 = vadd.f32 %v5363_v8, %v4874_v15  ;;  %v14474_v30 = vld [vmem:[#allocation48_spill] sm:$0xff]  ;;  %v5623_v6 = vperm.slane %v11580_v44, 2  ;;  %v14481_v5 = vld [vmem:[#allocation81_spill] sm:$0xff] }
 0x69d   : > { %v3277_v50 = vadd.f32 %v14473_v14, %v2855_v36  ;;  %v14475_v54 = vld [vmem:[#allocation88_spill] sm:$0xff]  ;;  %v3280_v32 = vadd.f32 %v14477_v26, %v2858_v38  ;;  %v5604_v35 = vadd.f32 %v5360_v57, %v4868_v2  ;;  %v3225_v15 = vadd.f32 %v14481_v5, %v3199_v3  ;;  %v14487_v3 = vld [vmem:[#allocation89_spill] sm:$0xff] }
 0x69e   : > { %8410 = vmatmul.msk.f32.gmra.mxu1 %vm5687_vm10, %v14386_v51  ;;  %v3202_v4 = vadd.f32 %v14475_v54, %v2780_v23  ;;  %v14476_v31 = vld [vmem:[#allocation36_spill] sm:$0xff]  ;;  %v5641_v36 = vadd.f32 %v5623_v6, %v5610_v0  ;;  %v14486_v23 = vld [vmem:[#allocation129_spill] sm:$0xff] }
 0x69f   : > { %v2783_v7 = vadd.f32 %v14476_v31, %v2757_v40  ;;  %v14479_v29 = vld [vmem:[#allocation92_spill] sm:$0xff]  ;;  %v14483_v40 = vld [vmem:[#allocation85_spill] sm:$0xff]  ;;  %v5635_v14 = vadd.f32 %v5623_v6, %v5604_v35 }
 0x6a0   : > { %v5339_v41 = vpop.f32.mrf.mxu1  ;;  %8407 = vmatmul.msk.f32.gmra.mxu0 %vm5687_vm10, %v11727_v12  ;;  %v3228_v57 = vadd.f32 %v14483_v40, %v3202_v4  ;;  %v14485_v60 = vld [vmem:[#allocation132_spill] sm:$0xff]  ;;  %v14490_v54 = vld [vmem:[#allocation133_spill] sm:$0xff]  ;;  %v5659_v5 = vmax.f32 %v5641_v36, 0.0  ;;  %v14504_v36 = vld [vmem:[#allocation134_spill] sm:$0xff] }
 0x6a1   : > { %v5340_v13 = vadd.f32 %v5339_v41, %v11596_v25  ;;  %v5463_v28 = vpop.f32.mrf.mxu2  ;;  %v2861_v25 = vadd.f32 %v14474_v30, %v2835_v39  ;;  %v14478_v41 = vld [vmem:[#allocation87_spill] sm:$0xff]  ;;  %v3205_v8 = vadd.f32 %v14479_v29, %v2783_v7  ;;  %v4015_v2 = vadd.f32 %v14486_v23, %v14485_v60  ;;  %v14488_v30 = vld [vmem:[#allocation93_spill] sm:$0xff]  ;;  %v14489_v0 = vld [vmem:[#allocation136_spill] sm:$0xff]  ;;  %v5518_v29 = vpop.f32.mrf.mxu0 }
 0x6a2   : > { %v4018_v31 = vadd.f32 %v14490_v54, %v14489_v0  ;;  %v14491_v7 = vld [vmem:[#allocation97_spill] sm:$0xff]  ;;  %v14501_v23 = vld [vmem:[#allocation122_spill] sm:$0xff]  ;;  %v14503_v0 = vld [vmem:[#allocation135_spill] sm:$0xff] }
 0x6a3   : > { %v5366_v59 = vadd.f32 %v5365_v27, %v5340_v13  ;;  %v3283_v11 = vadd.f32 %v14478_v41, %v2861_v25  ;;  %v14480_v27 = vld [vmem:[#allocation96_spill] sm:$0xff]  ;;  %v14492_v4 = vld [vmem:[#allocation117_spill] sm:$0xff] }
 0x6a4   : > { %v3303_v63 = vadd.f32 %v14480_v27, %v3277_v50  ;;  %v14482_v13 = vld [vmem:[#allocation100_spill] sm:$0xff]  ;;  %v3231_v50 = vadd.f32 %v14487_v3, %v3205_v8  ;;  %v14494_v41 = vld [vmem:[#allocation77_spill] sm:$0xff]  ;;  %v14496_v8 = vld [vmem:[#allocation82_spill] sm:$0xff] }
 0x6a5   : > { %v5616_v53 = vadd.f32 %v5366_v59, %v4880_v42  ;;  %v3306_v39 = vadd.f32 %v14482_v13, %v3280_v32  ;;  %v3309_v38 = vadd.f32 %v14484_v52, %v3283_v11  ;;  %v5492_v59 = vpop.f32.mrf.mxu3  ;;  %v14493_v32 = vld [vmem:[#allocation118_spill] sm:$0xff]  ;;  %v3251_v11 = vadd.f32 %v14494_v41, %v3225_v15  ;;  %v14495_v35 = vld [vmem:[#allocation101_spill] sm:$0xff]  ;;  %v14499_v52 = vld [vmem:[#allocation168_spill] sm:$0xff] }
 0x6a6   : > { %8411 = vmatmul.msk.f32.gmra.mxu1 %vm5687_vm10, %v14404_v58  ;;  %v3329_v25 = vadd.f32 %v14488_v30, %v3303_v63  ;;  %v3254_v13 = vadd.f32 %v14496_v8, %v3228_v57  ;;  %v14497_v63 = vld [vmem:[#allocation140_spill] sm:$0xff]  ;;  %v14500_v60 = vld [vmem:[#allocation121_spill] sm:$0xff]  ;;  %v14502_v30 = vld [vmem:[#allocation130_spill] sm:$0xff] }
 0x6a7   : > { %v5647_v34 = vadd.f32 %v5623_v6, %v5616_v53  ;;  %v3332_v26 = vadd.f32 %v14491_v7, %v3306_v39  ;;  %v3937_v53 = vadd.f32 %v14493_v32, %v14492_v4  ;;  %v3335_v6 = vadd.f32 %v14495_v35, %v3309_v38  ;;  %v14505_v38 = vld [vmem:[#allocation164_spill] sm:$0xff]  ;;  %v14506_v41 = vld [vmem:[#allocation139_spill] sm:$0xff]  ;;  %v14507_v35 = vld [vmem:[#allocation86_spill] sm:$0xff] }
 0x6a8   : > { %v11759_v16 = vpop.f32.mrf.mxu1  ;;  %v4757_v39 = vadd.f32 %v11527_v46, %v14499_v52  ;;  %v3940_v3 = vadd.f32 %v14501_v23, %v14500_v60  ;;  %v4041_v15 = vadd.f32 %v14502_v30, %v4015_v2  ;;  %v4044_v7 = vadd.f32 %v14504_v36, %v4018_v31  ;;  %v14510_v31 = vld [vmem:[#allocation126_spill] sm:$0xff]  ;;  %v14514_v60 = vld [vmem:[#allocation175_spill] sm:$0xff]  ;;  %v14515_v23 = vld [vmem:[#allocation172_spill] sm:$0xff] }
 0x6a9   : > { %v5665_v42 = vmax.f32 %v5647_v34, 0.0  ;;  %v5466_v27 = vpop.f32.mrf.mxu2  ;;  %v14498_v34 = vld [vmem:[#allocation137_spill] sm:$0xff]  ;;  %v3963_v54 = vadd.f32 %v14503_v0, %v3937_v53  ;;  %v4754_v57 = vadd.f32 %v11512_v17, %v14505_v38  ;;  %v4760_v4 = vadd.f32 %v11534_v48, %v11477_v18 }
 0x6aa   : > { %v4021_v40 = vadd.f32 %v14498_v34, %v14497_v63  ;;  %v5493_v32 = vadd.f32 %v5492_v59, %v5466_v27  ;;  %v3966_v46 = vadd.f32 %v14506_v41, %v3940_v3  ;;  %v3257_v8 = vadd.f32 %v14507_v35, %v3231_v50  ;;  %v14508_v63 = vld [vmem:[#allocation170_spill] sm:$0xff] }
 0x6ab   : > { %8416 = vmatpush.msk.msrb.mxu2 %vm1420_vm5, %v5665_v42  ;;  %v5653_v42 = vmax.f32 %v5635_v14, 0.0  ;;  %v4679_v2 = vadd.f32 %v14508_v63, %v11482_v10  ;;  %v14509_v14 = vld [vmem:[#allocation125_spill] sm:$0xff]  ;;  %v4783_v34 = vadd.f32 %v11516_v62, %v4757_v39  ;;  %v5490_v18 = vadd.f32 %v11722_v33, %v5463_v28  ;;  %v14513_v27 = vld [vmem:[#allocation166_spill] sm:$0xff] }
 0x6ac   : > { %v3943_v53 = vadd.f32 %v14510_v31, %v14509_v14  ;;  %v4131_v59 = vadd.f32 %v4041_v15, %v3329_v25  ;;  %v4130_v50 = vadd.f32 %v3963_v54, %v3251_v11  ;;  %v14512_v10 = vld [vmem:[#allocation169_spill] sm:$0xff]  ;;  %v4682_v3 = vadd.f32 %v14515_v23, %v14514_v60  ;;  %v14516_v33 = vld [vmem:[#allocation142_spill] sm:$0xff] }
 0x6ad   : > { %5813 = vmatpush.msrb.mxu2 %v5659_v5  ;;  %v14511_v5 = vld [vmem:[#allocation138_spill] sm:$0xff]  ;;  %v4676_v52 = vadd.f32 %v14513_v27, %v14512_v10  ;;  %v4137_v30 = vadd.f32 %v4044_v7, %v3332_v26  ;;  %v4780_v0 = vadd.f32 %v11501_v56, %v4754_v57  ;;  %v5519_v62 = vadd.f32 %v5518_v29, %v5493_v32  ;;  %v5495_v11 = vpop.f32.mrf.mxu3  ;;  %v14518_v7 = vld [vmem:[#allocation163_spill] sm:$0xff] }
 0x6ae   : > { %8412 = vmatmul.msk.f32.gmra.mxu1 %vm5687_vm10, %v14418_v19  ;;  %v4047_v17 = vadd.f32 %v14511_v5, %v4021_v40  ;;  %v4786_v40 = vadd.f32 %v11530_v49, %v4760_v4  ;;  %v4136_v39 = vadd.f32 %v3966_v46, %v3254_v13  ;;  %v3969_v28 = vadd.f32 %v14516_v33, %v3943_v53  ;;  %v14519_v57 = vld [vmem:[#allocation171_spill] sm:$0xff]  ;;  %v5521_v13 = vpop.f32.mrf.mxu0 }
 0x6af   : > { %5814 = vmatpush.msrb.mxu2 %v5653_v42  ;;  %v14517_v42 = vld [vmem:[#allocation167_spill] sm:$0xff]  ;;  %v5415_v25 = vadd.f32 %v11651_v21, %v11648_v45  ;;  %v4876_v38 = vadd.f32 %v4783_v34, %v4137_v30  ;;  %v5516_v41 = vadd.f32 %v11735_v9, %v5490_v18  ;;  %v4702_v56 = vadd.f32 %v14518_v7, %v4676_v52  ;;  %v14521_v30 = vld [vmem:[#allocation58_spill] sm:$0xff] }
 0x6b0   : > { %v5440_v48 = vpop.f32.mrf.mxu1  ;;  %8417 = vmatmul.msk.f32.vlgmr.msrb.gmra.mxu2 %vm5687_vm10, %v10486_v55  ;;  %v4705_v36 = vadd.f32 %v14517_v42, %v4679_v2  ;;  %v4143_v54 = vadd.f32 %v4047_v17, %v3335_v6  ;;  %v4708_v49 = vadd.f32 %v14519_v57, %v4682_v3  ;;  %v5412_v29 = vadd.f32 %v11629_v37, %v11621_v1  ;;  %v14520_v3 = vld [vmem:[#allocation56_spill] sm:$0xff]  ;;  %v14523_v33 = vld [vmem:[#allocation55_spill] sm:$0xff]  ;;  %v14528_v7 = vld [vmem:[#allocation94_spill] sm:$0xff] }
 0x6b1   : > { %v5469_v15 = vpop.f32.mrf.mxu2  ;;  %v5441_v4 = vadd.f32 %v5440_v48, %v5415_v25  ;;  %v4870_v32 = vadd.f32 %v4780_v0, %v4131_v59  ;;  %v5612_v35 = vadd.f32 %v5519_v62, %v4876_v38  ;;  %v4142_v21 = vadd.f32 %v3969_v28, %v3257_v8  ;;  %v14525_v25 = vld [vmem:[#allocation62_spill] sm:$0xff]  ;;  %v14529_v57 = vld [vmem:[#allocation57_spill] sm:$0xff] }
 0x6b2   : > { %v5496_v26 = vadd.f32 %v5495_v11, %v5469_v15  ;;  %v4882_v46 = vadd.f32 %v4786_v40, %v4143_v54  ;;  %v5418_v6 = vadd.f32 %v11679_v47, %v11672_v20  ;;  %v5438_v9 = vadd.f32 %v11759_v16, %v5412_v29  ;;  %v14526_v54 = vld [vmem:[#allocation54_spill] sm:$0xff] }
 0x6b3   : > { %v4875_v63 = vadd.f32 %v4705_v36, %v4136_v39  ;;  %v5606_v2 = vadd.f32 %v5516_v41, %v4870_v32  ;;  %v5625_v1 = vperm.slane %v11580_v44, 4  ;;  %v4869_v31 = vadd.f32 %v4702_v56, %v4130_v50  ;;  %v14522_v39 = vld [vmem:[#allocation53_spill] sm:$0xff]  ;;  %v14524_v36 = vld [vmem:[#allocation60_spill] sm:$0xff]  ;;  %v14527_v41 = vld [vmem:[#allocation51_spill] sm:$0xff] }
 0x6b4   : > { %v5522_v45 = vadd.f32 %v5521_v13, %v5496_v26  ;;  %v4881_v8 = vadd.f32 %v4708_v49, %v4142_v21  ;;  %v5624_v34 = vperm.slane %v11580_v44, 3  ;;  %v2910_v0 = vadd.f32 %v14521_v30, %v14520_v3  ;;  %v14530_v13 = vld [vmem:[#allocation90_spill] sm:$0xff]  ;;  %v14531_v32 = vld [vmem:[#allocation148_spill] sm:$0xff]  ;;  %v14546_v30 = vld [vmem:[#allocation147_spill] sm:$0xff] }
 0x6b5   : > { %v5611_v53 = vadd.f32 %v5441_v4, %v4875_v63  ;;  %v5643_v20 = vadd.f32 %v5625_v1, %v5612_v35  ;;  %v5605_v47 = vadd.f32 %v5438_v9, %v4869_v31  ;;  %v5637_v59 = vadd.f32 %v5625_v1, %v5606_v2  ;;  %v5593_v52 = vpop.f32.mrf.mxu3  ;;  %v14535_v9 = vld [vmem:[#allocation143_spill] sm:$0xff] }
 0x6b6   : > { %8413 = vmatmul.msk.f32.gmra.mxu1 %vm5687_vm10, %v11655_v24  ;;  %v5618_v14 = vadd.f32 %v5522_v45, %v4882_v46  ;;  %v2907_v28 = vadd.f32 %v14523_v33, %v14522_v39  ;;  %v2913_v11 = vadd.f32 %v14525_v25, %v14524_v36  ;;  %v2936_v38 = vadd.f32 %v14526_v54, %v2910_v0  ;;  %v14532_v46 = vld [vmem:[#allocation146_spill] sm:$0xff]  ;;  %v14536_v2 = vld [vmem:[#allocation151_spill] sm:$0xff] }
 0x6b7   : > { %v5642_v27 = vadd.f32 %v5624_v34, %v5611_v53  ;;  %v5661_v60 = vmax.f32 %v5643_v20, 0.0  ;;  %v5636_v50 = vadd.f32 %v5624_v34, %v5605_v47  ;;  %v5655_v62 = vmax.f32 %v5637_v59, 0.0  ;;  %v14533_v45 = vld [vmem:[#allocation98_spill] sm:$0xff]  ;;  %v14538_v53 = vld [vmem:[#allocation95_spill] sm:$0xff]  ;;  %v14540_v20 = vld [vmem:[#allocation144_spill] sm:$0xff] }
 0x6b8   : > { %v5443_v37 = vpop.f32.mrf.mxu1  ;;  %8418 = vmatmul.msk.f32.gmra.mxu2 %vm5687_vm10, %v14386_v51  ;;  %v5649_v17 = vadd.f32 %v5625_v1, %v5618_v14  ;;  %v2933_v26 = vadd.f32 %v14527_v41, %v2907_v28  ;;  %v3358_v56 = vadd.f32 %v14528_v7, %v2936_v38  ;;  %v2939_v49 = vadd.f32 %v14529_v57, %v2913_v11  ;;  %v14537_v14 = vld [vmem:[#allocation149_spill] sm:$0xff]  ;;  %v14548_v39 = vld [vmem:[#allocation174_spill] sm:$0xff]  ;;  %v14552_v38 = vld [vmem:[#allocation107_spill] sm:$0xff] }
 0x6b9   : > { %v5444_v5 = vadd.f32 %v5443_v37, %v5418_v6  ;;  %v5660_v42 = vmax.f32 %v5642_v27, 0.0  ;;  %v5654_v15 = vmax.f32 %v5636_v50, 0.0  ;;  %v4096_v35 = vadd.f32 %v14532_v46, %v14531_v32  ;;  %v14534_v6 = vld [vmem:[#allocation145_spill] sm:$0xff]  ;;  %v14549_v28 = vld [vmem:[#allocation178_spill] sm:$0xff] }
 0x6ba   : > { %v5667_v18 = vmax.f32 %v5649_v17, 0.0  ;;  %v3355_v4 = vadd.f32 %v14530_v13, %v2933_v26  ;;  %v3361_v21 = vadd.f32 %v14533_v45, %v2939_v49  ;;  %v4093_v63 = vadd.f32 %v14535_v9, %v14534_v6  ;;  %v14545_v50 = vld [vmem:[#allocation141_spill] sm:$0xff]  ;;  %v14553_v26 = vld [vmem:[#allocation180_spill] sm:$0xff] }
 0x6bb   : > { %v5617_v16 = vadd.f32 %v5444_v5, %v4881_v8  ;;  %v5567_v48 = vpop.f32.mrf.mxu2  ;;  %v4099_v1 = vadd.f32 %v14537_v14, %v14536_v2  ;;  %v3384_v8 = vadd.f32 %v14538_v53, %v3358_v56  ;;  %v14539_v5 = vld [vmem:[#allocation91_spill] sm:$0xff]  ;;  %v4122_v47 = vadd.f32 %v14540_v20, %v4096_v35  ;;  %v8479_v20 = vld [vmem:[%s14124_s11 + $0x3b8] sm:$0xff] }
 0x6bc   : > { %8432 = vmatpush.msk.msrb.mxu0 %vm1420_vm5, %v5667_v18  ;;  %v3381_v17 = vadd.f32 %v14539_v5, %v3355_v4  ;;  %v4119_v3 = vadd.f32 %v14545_v50, %v4093_v63  ;;  %v5626_v63 = vperm.slane %v11580_v44, 5  ;;  %v8460_v5 = vld [vmem:[%s14124_s11 + $0x320] sm:$0xff] }
 0x6bd   : > { %v5648_v10 = vadd.f32 %v5624_v34, %v5617_v16  ;;  %v5596_v37 = vpop.f32.mrf.mxu3  ;;  %v14541_v16 = vld [vmem:[#allocation176_spill] sm:$0xff]  ;;  %v14542_v34 = vld [vmem:[#allocation177_spill] sm:$0xff]  ;;  %v4125_v0 = vadd.f32 %v14546_v30, %v4099_v1  ;;  %v8452_v50 = vld [vmem:[%s14124_s11 + $0x2e0] sm:$0xff] }
 0x6be   : > { %8414 = vmatmul.msk.f32.gmra.mxu1 %vm5687_vm10, %v11684_v22  ;;  %5889 = vmatpush.msrb.mxu0 %v5661_v60  ;;  %v4835_v18 = vadd.f32 %v14542_v34, %v14541_v16  ;;  %v14544_v60 = vld [vmem:[#allocation99_spill] sm:$0xff]  ;;  %v8456_v16 = vld [vmem:[%s14124_s11 + $0x300] sm:$0xff]  ;;  %v8478_v34 = vld [vmem:[%s14124_s11 + $0x3b0] sm:$0xff] }
 0x6bf   : > { %v5666_v23 = vmax.f32 %v5648_v10, 0.0  ;;  %v14543_v10 = vld [vmem:[#allocation104_spill] sm:$0xff]  ;;  %v8495_v30 = vld [vmem:[%s14124_s11 + $0x438] sm:$0xff] }
 0x6c0   : > { %v5541_v40 = vpop.f32.mrf.mxu1  ;;  %8419 = vmatmul.msk.f32.gmra.mxu2 %vm5687_vm10, %v14404_v58  ;;  %5890 = vmatpush.msrb.mxu0 %v5655_v62  ;;  %v3410_v27 = vadd.f32 %v14543_v10, %v3384_v8  ;;  %v14547_v62 = vld [vmem:[#allocation173_spill] sm:$0xff]  ;;  %v4861_v25 = vadd.f32 %v11573_v61, %v4835_v18  ;;  %v8461_v8 = vld [vmem:[%s14124_s11 + $0x328] sm:$0xff]  ;;  %v8476_v10 = vld [vmem:[%s14124_s11 + $0x3a0] sm:$0xff] }
 0x6c1   : > { %8424 = vmatpush.msk.msra.mxu3 %vm1420_vm5, %v5666_v23  ;;  %8433 = vmatmul.msk.f32.vlgmr.msrb.gmra.mxu0 %vm5687_vm10, %v10486_v55  ;;  %v3387_v23 = vadd.f32 %v14544_v60, %v3361_v21  ;;  %v4832_v33 = vadd.f32 %v14548_v39, %v14547_v62  ;;  %v5568_v11 = vadd.f32 %v5567_v48, %v5541_v40  ;;  %v8455_v18 = vld [vmem:[%s14124_s11 + $0x2f8] sm:$0xff]  ;;  %v8450_v62 = vld [vmem:[%s14124_s11 + $0x2d0] sm:$0xff]  ;;  %v8473_v39 = vld [vmem:[%s14124_s11 + $0x388] sm:$0xff] }
 0x6c2   : > { %v4138_v56 = vadd.f32 %v4122_v47, %v3410_v27  ;;  %v8457_v47 = vld [vmem:[%s14124_s11 + $0x308] sm:$0xff]  ;;  %v8475_v60 = vld [vmem:[%s14124_s11 + $0x398] sm:$0xff]  ;;  %6362 = vmatpush.msra.mxu0 %v8495_v30 }
 0x6c3   : > { %5851 = vmatpush.msra.mxu3 %v5660_v42  ;;  %v5570_v29 = vpop.f32.mrf.mxu2  ;;  %v14550_v42 = vld [vmem:[#allocation179_spill] sm:$0xff]  ;;  %v3413_v41 = vadd.f32 %v14552_v38, %v3387_v23  ;;  %v4858_v7 = vadd.f32 %v14553_v26, %v4832_v33  ;;  %v5594_v40 = vadd.f32 %v5593_v52, %v5568_v11  ;;  %v8463_v52 = vld [vmem:[%s14124_s11 + $0x338] sm:$0xff]  ;;  %v8492_v11 = vld [vmem:[%s14124_s11 + $0x420] sm:$0xff] }
 0x6c4   : > { %v4838_v36 = vadd.f32 %v14550_v42, %v14549_v28  ;;  %v4877_v61 = vadd.f32 %v4861_v25, %v4138_v56  ;;  %6292 = vmatpush.msra.mxu2 %v8463_v52  ;;  %v8453_v23 = vld [vmem:[%s14124_s11 + $0x2e8] sm:$0xff]  ;;  %v8471_v38 = vld [vmem:[%s14124_s11 + $0x378] sm:$0xff]  ;;  %v8524_v52 = vld [vmem:[%s14124_s11 + $0x520] sm:$0xff] }
 0x6c5   : > { %5852 = vmatpush.msra.mxu3 %v5654_v15  ;;  %v14551_v15 = vld [vmem:[#allocation103_spill] sm:$0xff]  ;;  %v4144_v48 = vadd.f32 %v4125_v0, %v3413_v41  ;;  %v5599_v46 = vpop.f32.mrf.mxu3  ;;  %v8494_v0 = vld [vmem:[%s14124_s11 + $0x430] sm:$0xff]  ;;  %v8491_v41 = vld [vmem:[%s14124_s11 + $0x418] sm:$0xff] }
 0x6c6   : > { %8425 = vmatmul.msk.f32.vlgmr.msra.gmra.mxu3 %vm5687_vm10, %v10486_v55  ;;  %8415 = vmatmul.msk.f32.gmra.mxu1 %vm5687_vm10, %v11727_v12  ;;  %v3407_v54 = vadd.f32 %v14551_v15, %v3381_v17  ;;  %v4864_v57 = vadd.f32 %v11587_v43, %v4838_v36  ;;  %v8459_v17 = vld [vmem:[%s14124_s11 + $0x318] sm:$0xff]  ;;  %v8493_v33 = vld [vmem:[%s14124_s11 + $0x428] sm:$0xff]  ;;  %v8472_v36 = vld [vmem:[%s14124_s11 + $0x380] sm:$0xff] }
 0x6c7   : > { %6327 = vmatpush.msrb.mxu3 %v8479_v20  ;;  %v8449_v28 = vld [vmem:[%s14124_s11 + $0x2c8] sm:$0xff]  ;;  %6363 = vmatpush.msra.mxu0 %v8494_v0  ;;  %v8448_v15 = vld [vmem:[%s14124_s11 + $0x2c0] sm:$0xff]  ;;  %v8527_v56 = vld [vmem:[%s14124_s11 + $0x538] sm:$0xff] }
 0x6c8   : > { %v5544_v31 = vpop.f32.mrf.mxu1  ;;  %8420 = vmatmul.msk.f32.gmra.mxu2 %vm5687_vm10, %v14418_v19  ;;  %v4883_v45 = vadd.f32 %v4864_v57, %v4144_v48  ;;  %v8469_v57 = vld [vmem:[%s14124_s11 + $0x368] sm:$0xff]  ;;  %v8488_v48 = vld [vmem:[%s14124_s11 + $0x400] sm:$0xff] }
 0x6c9   : > { %v5571_v59 = vadd.f32 %v5570_v29, %v5544_v31  ;;  %8434 = vmatmul.msk.f32.gmra.mxu0 %vm5687_vm10, %v14386_v51  ;;  %v4132_v29 = vadd.f32 %v4119_v3, %v3407_v54  ;;  %v8462_v31 = vld [vmem:[%s14124_s11 + $0x330] sm:$0xff]  ;;  %6328 = vmatpush.msrb.mxu3 %v8478_v34  ;;  %v8451_v3 = vld [vmem:[%s14124_s11 + $0x2d8] sm:$0xff]  ;;  %v8520_v34 = vld [vmem:[%s14124_s11 + $0x500] sm:$0xff] }
 0x6ca   : > { %6293 = vmatpush.msra.mxu2 %v8462_v31  ;;  %6364 = vmatpush.msra.mxu0 %v8493_v33  ;;  %v8517_v33 = vld [vmem:[%s14124_s11 + $0x4e8] sm:$0xff] }
 0x6cb   : > { %v5597_v49 = vadd.f32 %v5596_v37, %v5571_v59  ;;  %v5573_v13 = vpop.f32.mrf.mxu2  ;;  %v4871_v35 = vadd.f32 %v4858_v7, %v4132_v29  ;;  %v8454_v59 = vld [vmem:[%s14124_s11 + $0x2f0] sm:$0xff]  ;;  %v8489_v29 = vld [vmem:[%s14124_s11 + $0x408] sm:$0xff] }
 0x6cc   : > { %6294 = vmatpush.msra.mxu2 %v8461_v8  ;;  %6365 = vmatpush.msra.mxu0 %v8492_v11  ;;  %v8490_v7 = vld [vmem:[%s14124_s11 + $0x410] sm:$0xff]  ;;  %v8483_v8 = vld [vmem:[%s14124_s11 + $0x3d8] sm:$0xff] }
 0x6cd   : > { %v5613_v21 = vadd.f32 %v5597_v49, %v4877_v61  ;;  %v5607_v43 = vadd.f32 %v5594_v40, %v4871_v35  ;;  %v8526_v49 = vld [vmem:[%s14124_s11 + $0x530] sm:$0xff] }
 0x6ce   : > { %8426 = vmatmul.msk.f32.gmra.mxu3 %vm5687_vm10, %v14386_v51  ;;  %6295 = vmatpush.msra.mxu2 %v8460_v5  ;;  %v8510_v5 = vld [vmem:[%s14124_s11 + $0x4b0] sm:$0xff] }
 0x6cf   : > { %v5644_v14 = vadd.f32 %v5626_v63, %v5613_v21  ;;  %v5638_v37 = vadd.f32 %v5626_v63, %v5607_v43  ;;  %6366 = vmatpush.msra.mxu0 %v8491_v41  ;;  %v8465_v21 = vld [vmem:[%s14124_s11 + $0x348] sm:$0xff]  ;;  %v8503_v41 = vld [vmem:[%s14124_s11 + $0x478] sm:$0xff] }
 0x6d0   : > { %v5547_v4 = vpop.f32.mrf.mxu1  ;;  %8421 = vmatmul.msk.f32.gmra.mxu2 %vm5687_vm10, %v11655_v24 }
 0x6d1   : > { %v5574_v32 = vadd.f32 %v5573_v13, %v5547_v4  ;;  %8435 = vmatmul.msk.f32.gmra.mxu0 %vm5687_vm10, %v14404_v58  ;;  %v5662_v44 = vmax.f32 %v5644_v14, 0.0  ;;  %v5656_v53 = vmax.f32 %v5638_v37, 0.0  ;;  %6296 = vmatpush.msra.mxu2 %v8459_v17  ;;  %v8468_v13 = vld [vmem:[%s14124_s11 + $0x360] sm:$0xff]  ;;  %v8525_v4 = vld [vmem:[%s14124_s11 + $0x528] sm:$0xff]  ;;  %v8523_v37 = vld [vmem:[%s14124_s11 + $0x518] sm:$0xff] }
 0x6d2   : > { %6367 = vmatpush.msra.mxu0 %v8490_v7  ;;  %v8521_v17 = vld [vmem:[%s14124_s11 + $0x508] sm:$0xff] }
 0x6d3   : > { %v5600_v6 = vadd.f32 %v5599_v46, %v5574_v32  ;;  %v8467_v32 = vld [vmem:[%s14124_s11 + $0x358] sm:$0xff] }
 0x6d4   : > { %6368 = vmatpush.msra.mxu0 %v8489_v29  ;;  %v8487_v46 = vld [vmem:[%s14124_s11 + $0x3f8] sm:$0xff]  ;;  %v8512_v29 = vld [vmem:[%s14124_s11 + $0x4c0] sm:$0xff] }
 0x6d5   : > { %v5619_v9 = vadd.f32 %v5600_v6, %v4883_v45  ;;  %v8486_v45 = vld [vmem:[%s14124_s11 + $0x3f0] sm:$0xff]  ;;  %v8464_v6 = vld [vmem:[%s14124_s11 + $0x340] sm:$0xff] }
 0x6d6   : > { %8427 = vmatmul.msk.f32.gmra.mxu3 %vm5687_vm10, %v14404_v58  ;;  %6369 = vmatpush.msra.mxu0 %v8488_v48  ;;  %v8499_v48 = vld [vmem:[%s14124_s11 + $0x458] sm:$0xff] }
 0x6d7   : > { %v5650_v2 = vadd.f32 %v5626_v63, %v5619_v9 }
 0x6d8   : > { %8422 = vmatmul.msk.f32.gmra.mxu2 %vm5687_vm10, %v11684_v22  ;;  %6370 = vmatpush.msra.mxu0 %v8487_v46  ;;  %v8498_v46 = vld [vmem:[%s14124_s11 + $0x450] sm:$0xff] }
 0x6d9   : > { %v5668_v1 = vmax.f32 %v5650_v2, 0.0  ;;  %8436 = vmatmul.msk.f32.gmra.mxu0 %vm5687_vm10, %v14418_v19 }
 0x6da   : > { %6371 = vmatpush.msra.mxu0 %v8486_v45  ;;  %v5966_v45 = vld [vmem:[%s14124_s11 + $0x70] sm:$0xff] }
 0x6db   : > { %8440 = vmatpush.msk.msrb.mxu1 %vm1420_vm5, %v5668_v1  ;;  %v8485_v1 = vld [vmem:[%s14124_s11 + $0x3e8] sm:$0xff] }
 0x6dc   : > { %6372 = vmatpush.msra.mxu0 %v8485_v1  ;;  %v5963_v1 = vld [vmem:[%s14124_s11 + $0x58] sm:$0xff] }
 0x6dd   : > { %5927 = vmatpush.msrb.mxu1 %v5662_v44  ;;  %v8511_v44 = vld [vmem:[%s14124_s11 + $0x4b8] sm:$0xff] }
 0x6de   : > { %8428 = vmatmul.msk.f32.gmra.mxu3 %vm5687_vm10, %v14418_v19 }
 0x6df   : > { %5928 = vmatpush.msrb.mxu1 %v5656_v53  ;;  %v8522_v53 = vld [vmem:[%s14124_s11 + $0x510] sm:$0xff] }
 0x6e0   : > { %8423 = vmatmul.msk.f32.gmra.mxu2 %vm5687_vm10, %v11727_v12  ;;  %8441 = vmatmul.msk.f32.vlgmr.msrb.gmra.mxu1 %vm5687_vm10, %v10486_v55  ;;  %v8458_v55 = vld [vmem:[%s14124_s11 + $0x310] sm:$0xff] }
 0x6e1   : > { %8437 = vmatmul.msk.f32.gmra.mxu0 %vm5687_vm10, %v11655_v24  ;;  %6297 = vmatpush.msra.mxu2 %v8458_v55  ;;  %v8509_v55 = vld [vmem:[%s14124_s11 + $0x4a8] sm:$0xff] }
 0x6e2   : > { %6397 = vmatpush.msra.mxu1 %v8511_v44 }
 0x6e3   : > { %6298 = vmatpush.msra.mxu2 %v8457_v47  ;;  %v8482_v47 = vld [vmem:[%s14124_s11 + $0x3d0] sm:$0xff] }
 0x6e4   : > { %6398 = vmatpush.msra.mxu1 %v8510_v5  ;;  %v5961_v5 = vld [vmem:[%s14124_s11 + $0x48] sm:$0xff] }
 0x6e5   : > { %6299 = vmatpush.msra.mxu2 %v8456_v16 }
 0x6e6   : > { %8429 = vmatmul.msk.f32.gmra.mxu3 %vm5687_vm10, %v11655_v24  ;;  %6399 = vmatpush.msra.mxu1 %v8509_v55 }
 0x6e7   : > { %6300 = vmatpush.msra.mxu2 %v8455_v18 }
 0x6e8   : > { %8442 = vmatmul.msk.f32.gmra.mxu1 %vm5687_vm10, %v14386_v51  ;;  %v8477_v51 = vld [vmem:[%s14124_s11 + $0x3a8] sm:$0xff] }
 0x6e9   : > { %8438 = vmatmul.msk.f32.gmra.mxu0 %vm5687_vm10, %v11684_v22  ;;  %6329 = vmatpush.msrb.mxu3 %v8477_v51 }
 0x6ea   : > { %6301 = vmatpush.msra.mxu2 %v8454_v59  ;;  %v8481_v59 = vld [vmem:[%s14124_s11 + $0x3c8] sm:$0xff] }
 0x6eb   : > { %6330 = vmatpush.msrb.mxu3 %v8476_v10  ;;  %v8508_v10 = vld [vmem:[%s14124_s11 + $0x4a0] sm:$0xff] }
 0x6ec   : > { %6302 = vmatpush.msra.mxu2 %v8453_v23  ;;  %6400 = vmatpush.msra.mxu1 %v8508_v10  ;;  %v5998_v10 = vld [vmem:[%s14124_s11 + $0x170] sm:$0xff] }
 0x6ed   : > { %v11948_v27 = vpop.f32.mrf.mxu0  ;;  %6331 = vmatpush.msrb.mxu3 %v8475_v60  ;;  %v8519_v60 = vld [vmem:[%s14124_s11 + $0x4f8] sm:$0xff] }
 0x6ee   : > { %8430 = vmatmul.msk.f32.gmra.mxu3 %vm5687_vm10, %v11684_v22  ;;  %6303 = vmatpush.msra.mxu2 %v8452_v50  ;;  %v6171_v42 = vrot.slane %v11948_v27, 1  ;;  %v8480_v50 = vld [vmem:[%s14124_s11 + $0x3c0] sm:$0xff] }
 0x6f0   : > { %8443 = vmatmul.msk.f32.gmra.mxu1 %vm5687_vm10, %v14404_v58  ;;  %v8474_v58 = vld [vmem:[%s14124_s11 + $0x390] sm:$0xff]  ;;  %6304 = vmatpush.msra.mxu2 %v8451_v3  ;;  %v8507_v3 = vld [vmem:[%s14124_s11 + $0x498] sm:$0xff] }
 0x6f1   : > { %8439 = vmatmul.msk.f32.gmra.mxu0 %vm5687_vm10, %v11727_v12  ;;  %6332 = vmatpush.msrb.mxu3 %v8474_v58  ;;  %v8518_v58 = vld [vmem:[%s14124_s11 + $0x4f0] sm:$0xff] }
 0x6f2   : > { %6305 = vmatpush.msra.mxu2 %v8450_v62  ;;  %6401 = vmatpush.msra.mxu1 %v8507_v3  ;;  %v8506_v62 = vld [vmem:[%s14124_s11 + $0x490] sm:$0xff]  ;;  %v5959_v3 = vld [vmem:[%s14124_s11 + $0x38] sm:$0xff] }
 0x6f3   : > { %6333 = vmatpush.msrb.mxu3 %v8473_v39 }
 0x6f4   : > { %6306 = vmatpush.msra.mxu2 %v8449_v28  ;;  %v8505_v28 = vld [vmem:[%s14124_s11 + $0x488] sm:$0xff]  ;;  %6402 = vmatpush.msra.mxu1 %v8506_v62 }
 0x6f5   : > { %v11993_v25 = vpop.f32.mrf.mxu0  ;;  %6334 = vmatpush.msrb.mxu3 %v8472_v36  ;;  %v8516_v36 = vld [vmem:[%s14124_s11 + $0x4e0] sm:$0xff] }
 0x6f6   : > { %8431 = vmatmul.msk.f32.gmra.mxu3 %vm5687_vm10, %v11727_v12  ;;  %v6172_v54 = vrot.slane %v11993_v25, 1  ;;  %6307 = vmatpush.msra.mxu2 %v8448_v15  ;;  %v8504_v15 = vld [vmem:[%s14124_s11 + $0x480] sm:$0xff] }
 0x6f7   : > { %6335 = vmatpush.msrb.mxu3 %v8471_v38  ;;  %6403 = vmatpush.msra.mxu1 %v8505_v28 }
 0x6f8   : > { %8444 = vmatmul.msk.f32.gmra.mxu1 %vm5687_vm10, %v14418_v19  ;;  %v6173_v26 = vsel %vm1422_vm6, %v6171_v42, %v6172_v54  ;;  %v8470_v19 = vld [vmem:[%s14124_s11 + $0x370] sm:$0xff]  ;;  %6432 = vmatpush.msrb.mxu2 %v8527_v56 }
 0x6f9   : > { %6308 = vmatmul.f32.vlgmr.msra.gmra.mxu2 %v6173_v26  ;;  %6336 = vmatpush.msrb.mxu3 %v8470_v19  ;;  %v8514_v19 = vld [vmem:[%s14124_s11 + $0x4d0] sm:$0xff] }
 0x6fa   : > { %6433 = vmatpush.msrb.mxu2 %v8526_v49  ;;  %6404 = vmatpush.msra.mxu1 %v8504_v15  ;;  %v8502_v56 = vld [vmem:[%s14124_s11 + $0x470] sm:$0xff]  ;;  %v8501_v49 = vld [vmem:[%s14124_s11 + $0x468] sm:$0xff] }
 0x6fb   : > { %6337 = vmatpush.msrb.mxu3 %v8469_v57  ;;  %v8513_v57 = vld [vmem:[%s14124_s11 + $0x4c8] sm:$0xff] }
 0x6fc   : > { %6434 = vmatpush.msrb.mxu2 %v8525_v4  ;;  %6405 = vmatpush.msra.mxu1 %v8503_v41 }
 0x6fd   : > { %v12035_v61 = vpop.f32.mrf.mxu0  ;;  %6338 = vmatpush.msrb.mxu3 %v8468_v13  ;;  %v8500_v13 = vld [vmem:[%s14124_s11 + $0x460] sm:$0xff] }
 0x6fe   : > { %v6189_v40 = vrot.slane %v12035_v61, 1  ;;  %6435 = vmatpush.msrb.mxu2 %v8524_v52  ;;  %6406 = vmatpush.msra.mxu1 %v8502_v56  ;;  %v5964_v52 = vld [vmem:[%s14124_s11 + $0x60] sm:$0xff] }
 0x6ff   : > { %6339 = vmatpush.msrb.mxu3 %v8467_v32 }
 0x700   : > { %8445 = vmatmul.msk.f32.gmra.mxu1 %vm5687_vm10, %v11655_v24  ;;  %v6190_v35 = vsel %vm1422_vm6, %v6172_v54, %v6189_v40  ;;  %v8466_v24 = vld [vmem:[%s14124_s11 + $0x350] sm:$0xff]  ;;  %6436 = vmatpush.msrb.mxu2 %v8523_v37  ;;  %v8515_v54 = vld [vmem:[%s14124_s11 + $0x4d8] sm:$0xff] }
 0x701   : > { %6311 = vmatmul.f32.gmra.mxu2 %v6190_v35  ;;  %6340 = vmatpush.msrb.mxu3 %v8466_v24  ;;  %v5967_v35 = vld [vmem:[%s14124_s11 + $0x78] sm:$0xff]  ;;  %v8497_v24 = vld [vmem:[%s14124_s11 + $0x448] sm:$0xff] }
 0x702   : > { %6437 = vmatpush.msrb.mxu2 %v8522_v53  ;;  %6407 = vmatpush.msra.mxu1 %v8501_v49  ;;  %v8535_v37 = vld [vmem:[%s14124_s11 + $0x578] sm:$0xff]  ;;  %v5994_v49 = vld [vmem:[%s14124_s11 + $0x150] sm:$0xff] }
 0x703   : > { %6341 = vmatpush.msrb.mxu3 %v8465_v21 }
 0x704   : > { %6438 = vmatpush.msrb.mxu2 %v8521_v17  ;;  %6408 = vmatpush.msra.mxu1 %v8500_v13  ;;  %v8528_v13 = vld [vmem:[%s14124_s11 + $0x540] sm:$0xff] }
 0x705   : > { %v12062_v43 = vpop.f32.mrf.mxu0  ;;  %6342 = vmatpush.msrb.mxu3 %v8464_v6  ;;  %v8496_v6 = vld [vmem:[%s14124_s11 + $0x440] sm:$0xff] }
 0x706   : > { %v6201_v9 = vrot.slane %v12062_v43, 1  ;;  %6439 = vmatpush.msrb.mxu2 %v8520_v34  ;;  %6409 = vmatpush.msra.mxu1 %v8499_v48  ;;  %v8533_v34 = vld [vmem:[%s14124_s11 + $0x568] sm:$0xff]  ;;  %v5955_v48 = vld [vmem:[%s14124_s11 + $0x18] sm:$0xff] }
 0x707   : > { %6475 = vmatpush.msra.mxu3 %v8535_v37  ;;  %v5991_v37 = vld [vmem:[%s14124_s11 + $0x138] sm:$0xff] }
 0x708   : > { %8446 = vmatmul.msk.f32.gmra.mxu1 %vm5687_vm10, %v11684_v22  ;;  %v6202_v63 = vsel %vm1422_vm6, %v6189_v40, %v6201_v9  ;;  %6440 = vmatpush.msrb.mxu2 %v8519_v60 }
 0x709   : > { %6314 = vmatmul.f32.gmra.mxu2 %v6202_v63  ;;  %6410 = vmatpush.msra.mxu1 %v8498_v46 }
 0x70a   : > { %6441 = vmatpush.msrb.mxu2 %v8518_v58  ;;  %v8531_v58 = vld [vmem:[%s14124_s11 + $0x558] sm:$0xff] }
 0x70b   : > { %6411 = vmatpush.msra.mxu1 %v8497_v24  ;;  %v5954_v24 = vld [vmem:[%s14124_s11 + $0x10] sm:$0xff] }
 0x70c   : > { %6442 = vmatpush.msrb.mxu2 %v8517_v33  ;;  %v5996_v33 = vld [vmem:[%s14124_s11 + $0x160] sm:$0xff] }
 0x70d   : > { %v12068_v2 = vpop.f32.mrf.mxu0  ;;  %6412 = vmatpush.msra.mxu1 %v8496_v6  ;;  %v5992_v6 = vld [vmem:[%s14124_s11 + $0x140] sm:$0xff] }
 0x70e   : > { %14554 = vst [vmem:[#allocation17_spill] sm:$0xff] %v12068_v2  ;;  %v6213_v14 = vrot.slane %v12068_v2, 1  ;;  %6443 = vmatpush.msrb.mxu2 %v8516_v36  ;;  %v8530_v36 = vld [vmem:[%s14124_s11 + $0x550] sm:$0xff] }
 0x710   : > { %8447 = vmatmul.msk.f32.gmra.mxu1 %vm5687_vm10, %v11727_v12  ;;  %v6214_v22 = vsel %vm1422_vm6, %v6201_v9, %v6213_v14  ;;  %v8484_v12 = vld [vmem:[%s14124_s11 + $0x3e0] sm:$0xff]  ;;  %6444 = vmatpush.msrb.mxu2 %v8515_v54  ;;  %v5965_v9 = vld [vmem:[%s14124_s11 + $0x68] sm:$0xff]  ;;  %v5995_v54 = vld [vmem:[%s14124_s11 + $0x158] sm:$0xff] }
 0x711   : > { %6317 = vmatmul.f32.gmra.mxu2 %v6214_v22  ;;  %6373 = vmatpush.msra.mxu0 %v8484_v12  ;;  %v5962_v12 = vld [vmem:[%s14124_s11 + $0x50] sm:$0xff] }
 0x712   : > { %6445 = vmatpush.msrb.mxu2 %v8514_v19  ;;  %v5956_v19 = vld [vmem:[%s14124_s11 + $0x20] sm:$0xff] }
 0x713   : > { %v12086_v31 = vpop.f32.mrf.mxu1  ;;  %6374 = vmatpush.msra.mxu0 %v8483_v8  ;;  %v8534_v8 = vld [vmem:[%s14124_s11 + $0x570] sm:$0xff] }
 0x714   : > { %14555 = vst [vmem:[#allocation21_spill] sm:$0xff] %v12086_v31  ;;  %v6174_v18 = vrot.slane %v12086_v31, 1  ;;  %6446 = vmatpush.msrb.mxu2 %v8513_v57  ;;  %6476 = vmatpush.msra.mxu3 %v8534_v8  ;;  %v5979_v8 = vld [vmem:[%s14124_s11 + $0xd8] sm:$0xff] }
 0x715   : > { %v12106_v20 = vpop.f32.mrf.mxu0  ;;  %6375 = vmatpush.msra.mxu0 %v8482_v47  ;;  %v5999_v47 = vld [vmem:[%s14124_s11 + $0x178] sm:$0xff] }
 0x716   : > { %14556 = vst [vmem:[#allocation16_spill] sm:$0xff] %v12106_v20  ;;  %v6225_v16 = vrot.slane %v12106_v20, 1  ;;  %6447 = vmatpush.msrb.mxu2 %v8512_v29  ;;  %6477 = vmatpush.msra.mxu3 %v8533_v34 }
 0x717   : > { %6376 = vmatpush.msra.mxu0 %v8481_v59 }
 0x718   : > { %v6226_v51 = vsel %vm1422_vm6, %v6213_v14, %v6225_v16  ;;  %6584 = vmatpush.msra.mxu2 %v5999_v47 }
 0x719   : > { %6320 = vmatmul.f32.gmra.mxu2 %v6226_v51  ;;  %6377 = vmatpush.msra.mxu0 %v8480_v50  ;;  %v8532_v50 = vld [vmem:[%s14124_s11 + $0x560] sm:$0xff] }
 0x71a   : > { %6585 = vmatpush.msra.mxu2 %v5998_v10  ;;  %6478 = vmatpush.msra.mxu3 %v8532_v50 }
 0x71b   : > { %v12126_v23 = vpop.f32.mrf.mxu1  ;;  %6514 = vmatpush.msrb.mxu0 %v5967_v35  ;;  %v5993_v35 = vld [vmem:[%s14124_s11 + $0x148] sm:$0xff] }
 0x71c   : > { %14557 = vst [vmem:[#allocation19_spill] sm:$0xff] %v12126_v23  ;;  %v6175_v30 = vrot.slane %v12126_v23, 1  ;;  %6479 = vmatpush.msra.mxu3 %v8531_v58 }
 0x71d   : > { %v12142_v39 = vpop.f32.mrf.mxu0  ;;  %6515 = vmatpush.msrb.mxu0 %v5966_v45  ;;  %v5981_v45 = vld [vmem:[%s14124_s11 + $0xe8] sm:$0xff] }
 0x71e   : > { %v6176_v0 = vsel %vm1422_vm6, %v6174_v18, %v6175_v30  ;;  %14558 = vst [vmem:[#allocation13_spill] sm:$0xff] %v12142_v39  ;;  %v6237_v42 = vrot.slane %v12142_v39, 1  ;;  %v5960_v18 = vld [vmem:[%s14124_s11 + $0x40] sm:$0xff]  ;;  %6480 = vmatpush.msra.mxu3 %v8530_v36  ;;  %v5987_v36 = vld [vmem:[%s14124_s11 + $0x118] sm:$0xff] }
 0x71f   : > { %6343 = vmatmul.f32.vlgmr.msrb.gmra.mxu3 %v6176_v0  ;;  %6516 = vmatpush.msrb.mxu0 %v5965_v9  ;;  %v5958_v0 = vld [vmem:[%s14124_s11 + $0x30] sm:$0xff] }
 0x720   : > { %v6238_v11 = vsel %vm1422_vm6, %v6225_v16, %v6237_v42 }
 0x721   : > { %6323 = vmatmul.f32.gmra.mxu2 %v6238_v11  ;;  %6517 = vmatpush.msrb.mxu0 %v5964_v52  ;;  %v5957_v11 = vld [vmem:[%s14124_s11 + $0x28] sm:$0xff] }
 0x723   : > { %v12161_v38 = vpop.f32.mrf.mxu1  ;;  %6518 = vmatpush.msrb.mxu0 %v5963_v1  ;;  %v5980_v1 = vld [vmem:[%s14124_s11 + $0xe0] sm:$0xff] }
 0x724   : > { %14559 = vst [vmem:[#allocation18_spill] sm:$0xff] %v12161_v38  ;;  %v6191_v26 = vrot.slane %v12161_v38, 1 }
 0x725   : > { %6519 = vmatpush.msrb.mxu0 %v5962_v12  ;;  %v5952_v12 = vld [vmem:[%s14124_s11] sm:$0xff] }
 0x726   : > { %v6192_v7 = vsel %vm1422_vm6, %v6175_v30, %v6191_v26  ;;  %v5997_v30 = vld [vmem:[%s14124_s11 + $0x168] sm:$0xff] }
 0x727   : > { %6346 = vmatmul.f32.gmra.mxu3 %v6192_v7  ;;  %6520 = vmatpush.msrb.mxu0 %v5961_v5  ;;  %v5983_v7 = vld [vmem:[%s14124_s11 + $0xf8] sm:$0xff]  ;;  %v5990_v5 = vld [vmem:[%s14124_s11 + $0x130] sm:$0xff] }
 0x728   : > { %6586 = vmatpush.msra.mxu2 %v5997_v30  ;;  %6549 = vmatpush.msrb.mxu1 %v5983_v7  ;;  %v6015_v7 = vld [vmem:[%s14124_s11 + $0x1f8] sm:$0xff] }
 0x729   : > { %6521 = vmatpush.msrb.mxu0 %v5960_v18 }
 0x72a   : > { %6587 = vmatpush.msra.mxu2 %v5996_v33  ;;  %v5976_v33 = vld [vmem:[%s14124_s11 + $0xc0] sm:$0xff] }
 0x72b   : > { %v12186_v4 = vpop.f32.mrf.mxu1  ;;  %6522 = vmatpush.msrb.mxu0 %v5959_v3  ;;  %v5977_v3 = vld [vmem:[%s14124_s11 + $0xc8] sm:$0xff] }
 0x72c   : > { %14560 = vst [vmem:[#allocation23_spill] sm:$0xff] %v12186_v4  ;;  %v6203_v40 = vrot.slane %v12186_v4, 1  ;;  %6588 = vmatpush.msra.mxu2 %v5995_v54  ;;  %v5986_v54 = vld [vmem:[%s14124_s11 + $0x110] sm:$0xff] }
 0x72d   : > { %6523 = vmatpush.msrb.mxu0 %v5958_v0  ;;  %v5988_v0 = vld [vmem:[%s14124_s11 + $0x120] sm:$0xff] }
 0x72e   : > { %v6204_v32 = vsel %vm1422_vm6, %v6191_v26, %v6203_v40  ;;  %v8529_v26 = vld [vmem:[%s14124_s11 + $0x548] sm:$0xff]  ;;  %6589 = vmatpush.msra.mxu2 %v5994_v49 }
 0x72f   : > { %6349 = vmatmul.f32.gmra.mxu3 %v6204_v32  ;;  %6524 = vmatpush.msrb.mxu0 %v5957_v11  ;;  %v5975_v11 = vld [vmem:[%s14124_s11 + $0xb8] sm:$0xff] }
 0x730   : > { %6481 = vmatpush.msra.mxu3 %v8529_v26  ;;  %6590 = vmatpush.msra.mxu2 %v5993_v35  ;;  %v5984_v35 = vld [vmem:[%s14124_s11 + $0x100] sm:$0xff] }
 0x731   : > { %6525 = vmatpush.msrb.mxu0 %v5956_v19  ;;  %v5974_v19 = vld [vmem:[%s14124_s11 + $0xb0] sm:$0xff] }
 0x732   : > { %6482 = vmatpush.msra.mxu3 %v8528_v13  ;;  %6591 = vmatpush.msra.mxu2 %v5992_v6  ;;  %v5972_v6 = vld [vmem:[%s14124_s11 + $0xa0] sm:$0xff] }
 0x733   : > { %v12205_v21 = vpop.f32.mrf.mxu2  ;;  %v12213_v63 = vpop.f32.mrf.mxu1  ;;  %6526 = vmatpush.msrb.mxu0 %v5955_v48  ;;  %v5973_v48 = vld [vmem:[%s14124_s11 + $0xa8] sm:$0xff] }
 0x734   : > { %14561 = vst [vmem:[#allocation27_spill] sm:$0xff] %v12213_v63  ;;  %v6215_v14 = vrot.slane %v12213_v63, 1  ;;  %v6177_v44 = vrot.slane %v12205_v21, 1  ;;  %6592 = vmatpush.msra.mxu2 %v5991_v37  ;;  %6619 = vmatpush.msrb.mxu3 %v6015_v7  ;;  %v6012_v37 = vld [vmem:[%s14124_s11 + $0x1e0] sm:$0xff] }
 0x735   : > { %6527 = vmatpush.msrb.mxu0 %v5954_v24  ;;  %v6014_v24 = vld [vmem:[%s14124_s11 + $0x1f0] sm:$0xff] }
 0x736   : > { %v6216_v22 = vsel %vm1422_vm6, %v6203_v40, %v6215_v14  ;;  %v5982_v40 = vld [vmem:[%s14124_s11 + $0xf0] sm:$0xff]  ;;  %6593 = vmatpush.msra.mxu2 %v5990_v5  ;;  %6620 = vmatpush.msrb.mxu3 %v6014_v24 }
 0x737   : > { %6352 = vmatmul.f32.gmra.mxu3 %v6216_v22  ;;  %6550 = vmatpush.msrb.mxu1 %v5982_v40  ;;  %v5953_v22 = vld [vmem:[%s14124_s11 + $0x8] sm:$0xff]  ;;  %v5970_v5 = vld [vmem:[%s14124_s11 + $0x90] sm:$0xff] }
 0x738   : > { %6528 = vmatpush.msrb.mxu0 %v5953_v22  ;;  %v5971_v22 = vld [vmem:[%s14124_s11 + $0x98] sm:$0xff] }
 0x739   : > { %6551 = vmatpush.msrb.mxu1 %v5981_v45 }
 0x73a   : > { %6529 = vmatpush.msrb.mxu0 %v5952_v12  ;;  %v6031_v12 = vld [vmem:[%s14124_s11 + $0x278] sm:$0xff] }
 0x73b   : > { %v12230_v53 = vpop.f32.mrf.mxu2  ;;  %v12239_v55 = vpop.f32.mrf.mxu1  ;;  %6552 = vmatpush.msrb.mxu1 %v5980_v1 }
 0x73c   : > { %v6178_v17 = vrot.slane %v12230_v53, 1  ;;  %14562 = vst [vmem:[#allocation24_spill] sm:$0xff] %v12239_v55  ;;  %v6227_v16 = vrot.slane %v12239_v55, 1 }
 0x73d   : > { %6553 = vmatpush.msrb.mxu1 %v5979_v8 }
 0x73e   : > { %v6179_v51 = vsel %vm1422_vm6, %v6177_v44, %v6178_v17  ;;  %v6228_v59 = vsel %vm1422_vm6, %v6215_v14, %v6227_v16  ;;  %v12256_v60 = vpop.f32.mrf.mxu0 }
 0x73f   : > { %6378 = vmatmul.f32.vlgmr.msra.gmra.mxu0 %v6179_v51  ;;  %14563 = vst [vmem:[#allocation31_spill] sm:$0xff] %v12256_v60  ;;  %6355 = vmatmul.f32.gmra.mxu3 %v6228_v59  ;;  %v6183_v56 = vrot.slane %v12256_v60, 1  ;;  %v5989_v59 = vld [vmem:[%s14124_s11 + $0x128] sm:$0xff] }
 0x740   : > { %6594 = vmatpush.msra.mxu2 %v5989_v59  ;;  %6654 = vmatpush.msra.mxu0 %v6031_v12  ;;  %v8563_v12 = vld [vmem:[%s14124_s11 + $0x5f8] sm:$0xff] }
 0x742   : > { %6595 = vmatpush.msra.mxu2 %v5988_v0  ;;  %v6029_v0 = vld [vmem:[%s14124_s11 + $0x268] sm:$0xff] }
 0x743   : > { %v12273_v62 = vpop.f32.mrf.mxu2  ;;  %v12279_v42 = vpop.f32.mrf.mxu1 }
 0x744   : > { %14564 = vst [vmem:[#allocation64_spill] sm:$0xff] %v12273_v62  ;;  %v6193_v28 = vrot.slane %v12273_v62, 1  ;;  %v6239_v15 = vrot.slane %v12279_v42, 1  ;;  %6596 = vmatpush.msra.mxu2 %v5987_v36 }
 0x746   : > { %v6194_v41 = vsel %vm1422_vm6, %v6178_v17, %v6193_v28  ;;  %v6240_v57 = vsel %vm1422_vm6, %v6227_v16, %v6239_v15  ;;  %v12306_v29 = vpop.f32.mrf.mxu0  ;;  %v5978_v16 = vld [vmem:[%s14124_s11 + $0xd0] sm:$0xff]  ;;  %6597 = vmatpush.msra.mxu2 %v5986_v54  ;;  %v6028_v54 = vld [vmem:[%s14124_s11 + $0x260] sm:$0xff] }
 0x747   : > { %6381 = vmatmul.f32.gmra.mxu0 %v6194_v41  ;;  %14565 = vst [vmem:[#allocation115_spill] sm:$0xff] %v12306_v29  ;;  %6358 = vmatmul.f32.gmra.mxu3 %v6240_v57  ;;  %v6184_v46 = vrot.slane %v12306_v29, 1  ;;  %v5985_v57 = vld [vmem:[%s14124_s11 + $0x108] sm:$0xff] }
 0x748   : > { %6554 = vmatpush.msrb.mxu1 %v5978_v16  ;;  %6598 = vmatpush.msra.mxu2 %v5985_v57  ;;  %v6027_v57 = vld [vmem:[%s14124_s11 + $0x258] sm:$0xff] }
 0x749   : > { %v12317_v32 = vpop.f32.mrf.mxu3  ;;  %v6185_v14 = vsel %vm1422_vm6, %v6183_v56, %v6184_v46 }
 0x74a   : > { %14566 = vst [vmem:[#allocation112_spill] sm:$0xff] %v12317_v32  ;;  %6448 = vmatmul.f32.vlgmr.msrb.gmra.mxu2 %v6185_v14  ;;  %v6180_v47 = vrot.slane %v12317_v32, 1  ;;  %6555 = vmatpush.msrb.mxu1 %v5977_v3  ;;  %v6013_v14 = vld [vmem:[%s14124_s11 + $0x1e8] sm:$0xff] }
 0x74b   : > { %v12332_v9 = vpop.f32.mrf.mxu2  ;;  %6599 = vmatpush.msra.mxu2 %v5984_v35  ;;  %6621 = vmatpush.msrb.mxu3 %v6013_v14  ;;  %v6026_v35 = vld [vmem:[%s14124_s11 + $0x250] sm:$0xff] }
 0x74c   : > { %14567 = vst [vmem:[#allocation61_spill] sm:$0xff] %v12332_v9  ;;  %v6205_v52 = vrot.slane %v12332_v9, 1  ;;  %6556 = vmatpush.msrb.mxu1 %v5976_v33 }
 0x74d   : > { %6622 = vmatpush.msrb.mxu3 %v6012_v37  ;;  %v6006_v37 = vld [vmem:[%s14124_s11 + $0x1b0] sm:$0xff]  ;;  %6933 = vmatpush.msrb.mxu2 %v8563_v12 }
 0x74e   : > { %v6206_v44 = vsel %vm1422_vm6, %v6193_v28, %v6205_v52  ;;  %v12355_v17 = vpop.f32.mrf.mxu0  ;;  %6557 = vmatpush.msrb.mxu1 %v5975_v11  ;;  %v8558_v12 = vld [vmem:[%s14124_s11 + $0x5d0] sm:$0xff] }
 0x74f   : > { %6384 = vmatmul.f32.gmra.mxu0 %v6206_v44  ;;  %14568 = vst [vmem:[#allocation66_spill] sm:$0xff] %v12355_v17  ;;  %v6197_v18 = vrot.slane %v12355_v17, 1 }
 0x750   : > { %6558 = vmatpush.msrb.mxu1 %v5974_v19  ;;  %v6009_v19 = vld [vmem:[%s14124_s11 + $0x1c8] sm:$0xff] }
 0x751   : > { %v12361_v34 = vpop.f32.mrf.mxu3  ;;  %v6198_v50 = vsel %vm1422_vm6, %v6184_v46, %v6197_v18 }
 0x752   : > { %14569 = vst [vmem:[#allocation111_spill] sm:$0xff] %v12361_v34  ;;  %v6181_v51 = vrot.slane %v12361_v34, 1  ;;  %6451 = vmatmul.f32.gmra.mxu2 %v6198_v50  ;;  %6559 = vmatpush.msrb.mxu1 %v5973_v48  ;;  %v5969_v50 = vld [vmem:[%s14124_s11 + $0x88] sm:$0xff] }
 0x753   : > { %v12368_v10 = vpop.f32.mrf.mxu2 }
 0x754   : > { %v6182_v30 = vsel %vm1422_vm6, %v6180_v47, %v6181_v51  ;;  %v6217_v58 = vrot.slane %v12368_v10, 1  ;;  %6560 = vmatpush.msrb.mxu1 %v5972_v6  ;;  %v6030_v47 = vld [vmem:[%s14124_s11 + $0x270] sm:$0xff]  ;;  %v6007_v6 = vld [vmem:[%s14124_s11 + $0x1b8] sm:$0xff] }
 0x755   : > { %6413 = vmatmul.f32.vlgmr.msra.gmra.mxu1 %v6182_v30  ;;  %6655 = vmatpush.msra.mxu0 %v6030_v47  ;;  %v6005_v47 = vld [vmem:[%s14124_s11 + $0x1a8] sm:$0xff] }
 0x756   : > { %v6218_v28 = vsel %vm1422_vm6, %v6205_v52, %v6217_v58  ;;  %v12389_v15 = vpop.f32.mrf.mxu0  ;;  %6561 = vmatpush.msrb.mxu1 %v5971_v22 }
 0x757   : > { %6387 = vmatmul.f32.gmra.mxu0 %v6218_v28  ;;  %v6209_v26 = vrot.slane %v12389_v15, 1  ;;  %v5968_v28 = vld [vmem:[%s14124_s11 + $0x80] sm:$0xff] }
 0x758   : > { %6562 = vmatpush.msrb.mxu1 %v5970_v5  ;;  %6656 = vmatpush.msra.mxu0 %v6029_v0  ;;  %v6024_v5 = vld [vmem:[%s14124_s11 + $0x240] sm:$0xff] }
 0x759   : > { %v12394_v41 = vpop.f32.mrf.mxu3  ;;  %v6210_v13 = vsel %vm1422_vm6, %v6197_v18, %v6209_v26  ;;  %v6011_v18 = vld [vmem:[%s14124_s11 + $0x1d8] sm:$0xff] }
 0x75a   : > { %v6195_v56 = vrot.slane %v12394_v41, 1  ;;  %6454 = vmatmul.f32.gmra.mxu2 %v6210_v13  ;;  %6623 = vmatpush.msrb.mxu3 %v6011_v18 }
 0x75b   : > { %v12407_v49 = vpop.f32.mrf.mxu2  ;;  %6563 = vmatpush.msrb.mxu1 %v5969_v50  ;;  %6657 = vmatpush.msra.mxu0 %v6028_v54  ;;  %v6023_v50 = vld [vmem:[%s14124_s11 + $0x238] sm:$0xff]  ;;  %v6022_v54 = vld [vmem:[%s14124_s11 + $0x230] sm:$0xff] }
 0x75c   : > { %14570 = vst [vmem:[#allocation108_spill] sm:$0xff] %v12407_v49  ;;  %v6196_v40 = vsel %vm1422_vm6, %v6181_v51, %v6195_v56  ;;  %v6229_v46 = vrot.slane %v12407_v49, 1 }
 0x75d   : > { %v12421_v45 = vpop.f32.mrf.mxu1  ;;  %6416 = vmatmul.f32.gmra.mxu1 %v6196_v40  ;;  %v6008_v40 = vld [vmem:[%s14124_s11 + $0x1c0] sm:$0xff]  ;;  %6658 = vmatpush.msra.mxu0 %v6027_v57  ;;  %v6002_v57 = vld [vmem:[%s14124_s11 + $0x190] sm:$0xff] }
 0x75e   : > { %v6230_v52 = vsel %vm1422_vm6, %v6217_v58, %v6229_v46  ;;  %v12433_v1 = vpop.f32.mrf.mxu0  ;;  %v6010_v58 = vld [vmem:[%s14124_s11 + $0x1d0] sm:$0xff]  ;;  %v6186_v36 = vrot.slane %v12421_v45, 1  ;;  %6564 = vmatpush.msrb.mxu1 %v5968_v28  ;;  %v8561_v28 = vld [vmem:[%s14124_s11 + $0x5e8] sm:$0xff] }
 0x75f   : > { %6390 = vmatmul.f32.gmra.mxu0 %v6230_v52  ;;  %v6221_v8 = vrot.slane %v12433_v1, 1  ;;  %6624 = vmatpush.msrb.mxu3 %v6010_v58  ;;  %v6025_v52 = vld [vmem:[%s14124_s11 + $0x248] sm:$0xff]  ;;  %v6004_v58 = vld [vmem:[%s14124_s11 + $0x1a0] sm:$0xff] }
 0x760   : > { %6659 = vmatpush.msra.mxu0 %v6026_v35  ;;  %v6001_v35 = vld [vmem:[%s14124_s11 + $0x188] sm:$0xff] }
 0x761   : > { %v12441_v44 = vpop.f32.mrf.mxu3  ;;  %v6222_v59 = vsel %vm1422_vm6, %v6209_v26, %v6221_v8  ;;  %6625 = vmatpush.msrb.mxu3 %v6009_v19  ;;  %v8560_v19 = vld [vmem:[%s14124_s11 + $0x5e0] sm:$0xff] }
 0x762   : > { %v6207_v16 = vrot.slane %v12441_v44, 1  ;;  %6457 = vmatmul.f32.gmra.mxu2 %v6222_v59  ;;  %6660 = vmatpush.msra.mxu0 %v6025_v52  ;;  %v6000_v52 = vld [vmem:[%s14124_s11 + $0x180] sm:$0xff] }
 0x763   : > { %v12454_v51 = vpop.f32.mrf.mxu2  ;;  %6626 = vmatpush.msrb.mxu3 %v6008_v40  ;;  %v6021_v40 = vld [vmem:[%s14124_s11 + $0x228] sm:$0xff] }
 0x764   : > { %14571 = vst [vmem:[#allocation119_spill] sm:$0xff] %v12454_v51  ;;  %v6208_v3 = vsel %vm1422_vm6, %v6195_v56, %v6207_v16  ;;  %v6241_v30 = vrot.slane %v12454_v51, 1  ;;  %6661 = vmatpush.msra.mxu0 %v6024_v5 }
 0x765   : > { %v12468_v33 = vpop.f32.mrf.mxu1  ;;  %6419 = vmatmul.f32.gmra.mxu1 %v6208_v3  ;;  %6627 = vmatpush.msrb.mxu3 %v6007_v6  ;;  %v6020_v6 = vld [vmem:[%s14124_s11 + $0x220] sm:$0xff] }
 0x766   : > { %v6187_v11 = vrot.slane %v12468_v33, 1  ;;  %v6242_v26 = vsel %vm1422_vm6, %v6229_v46, %v6241_v30  ;;  %v12482_v7 = vpop.f32.mrf.mxu0  ;;  %6662 = vmatpush.msra.mxu0 %v6023_v50  ;;  %v6018_v50 = vld [vmem:[%s14124_s11 + $0x210] sm:$0xff] }
 0x767   : > { %6393 = vmatmul.f32.gmra.mxu0 %v6242_v26  ;;  %v6233_v48 = vrot.slane %v12482_v7, 1  ;;  %6628 = vmatpush.msrb.mxu3 %v6006_v37 }
 0x768   : > { %v6188_v56 = vsel %vm1422_vm6, %v6186_v36, %v6187_v11  ;;  %6663 = vmatpush.msra.mxu0 %v6022_v54 }
 0x769   : > { %v12488_v13 = vpop.f32.mrf.mxu3  ;;  %8536 = vmatmul.msk.f32.vlgmr.msra.gmra.mxu3 %vm6279_vm8, %v6188_v56  ;;  %v6234_v24 = vsel %vm1422_vm6, %v6221_v8, %v6233_v48 }
 0x76a   : > { %v6219_v46 = vrot.slane %v12488_v13, 1  ;;  %6460 = vmatmul.f32.gmra.mxu2 %v6234_v24  ;;  %6629 = vmatpush.msrb.mxu3 %v6005_v47  ;;  %v8557_v47 = vld [vmem:[%s14124_s11 + $0x5c8] sm:$0xff] }
 0x76b   : > { %6664 = vmatpush.msra.mxu0 %v6021_v40  ;;  %v8552_v40 = vld [vmem:[%s14124_s11 + $0x5a0] sm:$0xff] }
 0x76c   : > { %v6220_v14 = vsel %vm1422_vm6, %v6207_v16, %v6219_v46  ;;  %v8562_v16 = vld [vmem:[%s14124_s11 + $0x5f0] sm:$0xff]  ;;  %6630 = vmatpush.msrb.mxu3 %v6004_v58 }
 0x76d   : > { %v12507_v22 = vpop.f32.mrf.mxu1  ;;  %6422 = vmatmul.f32.gmra.mxu1 %v6220_v14  ;;  %6934 = vmatpush.msrb.mxu2 %v8562_v16 }
 0x76e   : > { %v6199_v8 = vrot.slane %v12507_v22, 1  ;;  %v12526_v18 = vpop.f32.mrf.mxu0  ;;  %6665 = vmatpush.msra.mxu0 %v6020_v6  ;;  %v8551_v6 = vld [vmem:[%s14124_s11 + $0x598] sm:$0xff] }
 0x76f   : > { %6530 = vmatmul.f32.vlgmr.msrb.gmra.mxu0 %v11948_v27  ;;  %v6245_v30 = vrot.slane %v12526_v18, 1  ;;  %6935 = vmatpush.msrb.mxu2 %v8561_v28  ;;  %v8555_v28 = vld [vmem:[%s14124_s11 + $0x5b8] sm:$0xff] }
 0x770   : > { %v6200_v59 = vsel %vm1422_vm6, %v6187_v11, %v6199_v8  ;;  %v6003_v11 = vld [vmem:[%s14124_s11 + $0x198] sm:$0xff] }
 0x771   : > { %v12532_v3 = vpop.f32.mrf.mxu3  ;;  %8537 = vmatmul.msk.f32.gmra.mxu3 %vm6279_vm8, %v6200_v59  ;;  %v6246_v36 = vsel %vm1422_vm6, %v6233_v48, %v6245_v30  ;;  %6936 = vmatpush.msrb.mxu2 %v8560_v19  ;;  %v8556_v30 = vld [vmem:[%s14124_s11 + $0x5c0] sm:$0xff] }
 0x772   : > { %v6231_v0 = vrot.slane %v12532_v3, 1  ;;  %6463 = vmatmul.f32.gmra.mxu2 %v6246_v36  ;;  %6631 = vmatpush.msrb.mxu3 %v6003_v11  ;;  %v6016_v36 = vld [vmem:[%s14124_s11 + $0x200] sm:$0xff]  ;;  %v8554_v11 = vld [vmem:[%s14124_s11 + $0x5b0] sm:$0xff] }
 0x774   : > { %v6232_v26 = vsel %vm1422_vm6, %v6219_v46, %v6231_v0  ;;  %v8559_v46 = vld [vmem:[%s14124_s11 + $0x5d8] sm:$0xff]  ;;  %6632 = vmatpush.msrb.mxu3 %v6002_v57  ;;  %v8553_v57 = vld [vmem:[%s14124_s11 + $0x5a8] sm:$0xff] }
 0x775   : > { %v12554_v56 = vpop.f32.mrf.mxu1  ;;  %6425 = vmatmul.f32.gmra.mxu1 %v6232_v26  ;;  %6937 = vmatpush.msrb.mxu2 %v8559_v46  ;;  %v6039_v26 = vld [vmem:[%s14124_s11 + $0x2b8] sm:$0xff]  ;;  %v6038_v46 = vld [vmem:[%s14124_s11 + $0x2b0] sm:$0xff] }
 0x776   : > { %v6211_v48 = vrot.slane %v12554_v56, 1  ;;  %6633 = vmatpush.msrb.mxu3 %v6001_v35  ;;  %6697 = vmatpush.msra.mxu1 %v6039_v26  ;;  %v6037_v35 = vld [vmem:[%s14124_s11 + $0x2a8] sm:$0xff] }
 0x777   : > { %6533 = vmatmul.f32.gmra.mxu0 %v11993_v25  ;;  %6938 = vmatpush.msrb.mxu2 %v8558_v12  ;;  %v8578_v12 = vld [vmem:[%s14124_s11 + $0x670] sm:$0xff] }
 0x778   : > { %v6212_v24 = vsel %vm1422_vm6, %v6199_v8, %v6211_v48  ;;  %v6019_v8 = vld [vmem:[%s14124_s11 + $0x218] sm:$0xff]  ;;  %6634 = vmatpush.msrb.mxu3 %v6000_v52  ;;  %6698 = vmatpush.msra.mxu1 %v6038_v46  ;;  %v6036_v52 = vld [vmem:[%s14124_s11 + $0x2a0] sm:$0xff] }
 0x779   : > { %v12574_v14 = vpop.f32.mrf.mxu3  ;;  %8538 = vmatmul.msk.f32.gmra.mxu3 %vm6279_vm8, %v6212_v24  ;;  %6666 = vmatpush.msra.mxu0 %v6019_v8  ;;  %v8579_v24 = vld [vmem:[%s14124_s11 + $0x678] sm:$0xff]  ;;  %v8592_v46 = vld [vmem:[%s14124_s11 + $0x6e0] sm:$0xff] }
 0x77a   : > { %v6243_v37 = vrot.slane %v12574_v14, 1  ;;  %6600 = vmatmul.f32.vlgmr.msra.gmra.mxu2 %v12205_v21  ;;  %6968 = vmatpush.msra.mxu3 %v8579_v24  ;;  %v8591_v24 = vld [vmem:[%s14124_s11 + $0x6d8] sm:$0xff] }
 0x77b   : > { %6939 = vmatpush.msrb.mxu2 %v8557_v47  ;;  %6667 = vmatpush.msra.mxu0 %v6018_v50  ;;  %v8577_v50 = vld [vmem:[%s14124_s11 + $0x668] sm:$0xff] }
 0x77c   : > { %v6244_v5 = vsel %vm1422_vm6, %v6231_v0, %v6243_v37  ;;  %v6017_v0 = vld [vmem:[%s14124_s11 + $0x208] sm:$0xff]  ;;  %v8550_v37 = vld [vmem:[%s14124_s11 + $0x590] sm:$0xff]  ;;  %6699 = vmatpush.msra.mxu1 %v6037_v35  ;;  %6969 = vmatpush.msra.mxu3 %v8578_v12  ;;  %v12686_v26 = vpop.f32.mrf.mxu2 }
 0x77d   : > { %v12592_v16 = vpop.f32.mrf.mxu1  ;;  %6428 = vmatmul.f32.gmra.mxu1 %v6244_v5  ;;  %6940 = vmatpush.msrb.mxu2 %v8556_v30  ;;  %v6035_v5 = vld [vmem:[%s14124_s11 + $0x298] sm:$0xff]  ;;  %v8574_v35 = vld [vmem:[%s14124_s11 + $0x650] sm:$0xff]  ;;  %v8589_v12 = vld [vmem:[%s14124_s11 + $0x6c8] sm:$0xff] }
 0x77e   : > { %v6223_v59 = vrot.slane %v12592_v16, 1  ;;  %6668 = vmatpush.msra.mxu0 %v6017_v0  ;;  %6700 = vmatpush.msra.mxu1 %v6036_v52  ;;  %v6034_v0 = vld [vmem:[%s14124_s11 + $0x290] sm:$0xff] }
 0x77f   : > { %6536 = vmatmul.f32.gmra.mxu0 %v12035_v61  ;;  %6941 = vmatpush.msrb.mxu2 %v8555_v28  ;;  %v8595_v28 = vld [vmem:[%s14124_s11 + $0x6f8] sm:$0xff]  ;;  %v8590_v52 = vld [vmem:[%s14124_s11 + $0x6d0] sm:$0xff] }
 0x780   : > { %v6224_v58 = vsel %vm1422_vm6, %v6211_v48, %v6223_v59  ;;  %6669 = vmatpush.msra.mxu0 %v6016_v36  ;;  %6701 = vmatpush.msra.mxu1 %v6035_v5  ;;  %v8576_v36 = vld [vmem:[%s14124_s11 + $0x660] sm:$0xff] }
 0x781   : > { %8539 = vmatmul.msk.f32.gmra.mxu3 %vm6279_vm8, %v6224_v58  ;;  %6942 = vmatpush.msrb.mxu2 %v8554_v11  ;;  %v8548_v58 = vld [vmem:[%s14124_s11 + $0x580] sm:$0xff]  ;;  %v8594_v11 = vld [vmem:[%s14124_s11 + $0x6f0] sm:$0xff] }
 0x782   : > { %6603 = vmatmul.f32.gmra.mxu2 %v12230_v53  ;;  %6970 = vmatpush.msra.mxu3 %v8577_v50  ;;  %v8588_v50 = vld [vmem:[%s14124_s11 + $0x6c0] sm:$0xff] }
 0x783   : > { %6943 = vmatpush.msrb.mxu2 %v8553_v57  ;;  %6702 = vmatpush.msra.mxu1 %v6034_v0  ;;  %v8575_v57 = vld [vmem:[%s14124_s11 + $0x658] sm:$0xff] }
 0x784   : > { %7003 = vmatpush.msrb.mxu0 %v8595_v28  ;;  %6971 = vmatpush.msra.mxu3 %v8576_v36  ;;  %v12727_v5 = vpop.f32.mrf.mxu2  ;;  %v8587_v0 = vld [vmem:[%s14124_s11 + $0x6b8] sm:$0xff]  ;;  %v8569_v28 = vld [vmem:[%s14124_s11 + $0x628] sm:$0xff] }
 0x785   : > { %v12617_v54 = vpop.f32.mrf.mxu1  ;;  %6565 = vmatmul.f32.vlgmr.msrb.gmra.mxu1 %v12086_v31  ;;  %6944 = vmatpush.msrb.mxu2 %v8552_v40  ;;  %v6032_v40 = vld [vmem:[%s14124_s11 + $0x280] sm:$0xff]  ;;  %v8625_v36 = vld [vmem:[%s14124_s11 + $0x7e8] sm:$0xff] }
 0x786   : > { %14572 = vst [vmem:[#allocation116_spill] sm:$0xff] %v12617_v54  ;;  %v6235_v19 = vrot.slane %v12617_v54, 1  ;;  %7004 = vmatpush.msrb.mxu0 %v8594_v11  ;;  %6972 = vmatpush.msra.mxu3 %v8575_v57  ;;  %v8568_v11 = vld [vmem:[%s14124_s11 + $0x620] sm:$0xff] }
 0x787   : > { %6539 = vmatmul.f32.gmra.mxu0 %v12062_v43  ;;  %6945 = vmatpush.msrb.mxu2 %v8551_v6  ;;  %v8573_v6 = vld [vmem:[%s14124_s11 + $0x648] sm:$0xff]  ;;  %v8624_v57 = vld [vmem:[%s14124_s11 + $0x7e0] sm:$0xff] }
 0x788   : > { %v6236_v48 = vsel %vm1422_vm6, %v6223_v59, %v6235_v19  ;;  %v8549_v59 = vld [vmem:[%s14124_s11 + $0x588] sm:$0xff]  ;;  %6973 = vmatpush.msra.mxu3 %v8574_v35  ;;  %v6813_v35 = vrot.slane %v11948_v27, 2 }
 0x789   : > { %8540 = vmatmul.msk.f32.gmra.mxu3 %vm6279_vm8, %v6236_v48  ;;  %6946 = vmatpush.msrb.mxu2 %v8550_v37  ;;  %v8593_v48 = vld [vmem:[%s14124_s11 + $0x6e8] sm:$0xff]  ;;  %v8572_v37 = vld [vmem:[%s14124_s11 + $0x640] sm:$0xff] }
 0x78a   : > { %6606 = vmatmul.f32.gmra.mxu2 %v12273_v62  ;;  %7005 = vmatpush.msrb.mxu0 %v8593_v48  ;;  %v8567_v48 = vld [vmem:[%s14124_s11 + $0x618] sm:$0xff] }
 0x78b   : > { %6947 = vmatpush.msrb.mxu2 %v8549_v59  ;;  %6974 = vmatpush.msra.mxu3 %v8573_v6  ;;  %v8627_v59 = vld [vmem:[%s14124_s11 + $0x7f8] sm:$0xff] }
 0x78c   : > { %7006 = vmatpush.msrb.mxu0 %v8592_v46  ;;  %v8611_v46 = vld [vmem:[%s14124_s11 + $0x778] sm:$0xff]  ;;  %v12777_v6 = vpop.f32.mrf.mxu2 }
 0x78d   : > { %v12655_v8 = vpop.f32.mrf.mxu1  ;;  %6568 = vmatmul.f32.gmra.mxu1 %v12126_v23  ;;  %6948 = vmatpush.msrb.mxu2 %v8548_v58  ;;  %v8626_v58 = vld [vmem:[%s14124_s11 + $0x7f0] sm:$0xff] }
 0x78e   : > { %14573 = vst [vmem:[#allocation63_spill] sm:$0xff] %v12655_v8  ;;  %v6247_v47 = vrot.slane %v12655_v8, 1  ;;  %7007 = vmatpush.msrb.mxu0 %v8591_v24  ;;  %6975 = vmatpush.msra.mxu3 %v8572_v37  ;;  %v6814_v24 = vrot.slane %v11993_v25, 2  ;;  %v8623_v37 = vld [vmem:[%s14124_s11 + $0x7d8] sm:$0xff] }
 0x78f   : > { %6542 = vmatmul.f32.gmra.mxu0 %v12068_v2  ;;  %7073 = vmatpush.msra.mxu2 %v8627_v59  ;;  %v8565_v59 = vld [vmem:[%s14124_s11 + $0x608] sm:$0xff] }
 0x790   : > { %v6248_v30 = vsel %vm1422_vm6, %v6235_v19, %v6247_v47  ;;  %v6033_v19 = vld [vmem:[%s14124_s11 + $0x288] sm:$0xff]  ;;  %v8571_v47 = vld [vmem:[%s14124_s11 + $0x638] sm:$0xff]  ;;  %7008 = vmatpush.msrb.mxu0 %v8590_v52  ;;  %v8566_v52 = vld [vmem:[%s14124_s11 + $0x610] sm:$0xff] }
 0x791   : > { %8541 = vmatmul.msk.f32.gmra.mxu3 %vm6279_vm8, %v6248_v30  ;;  %6703 = vmatpush.msra.mxu1 %v6033_v19  ;;  %v8570_v30 = vld [vmem:[%s14124_s11 + $0x630] sm:$0xff] }
 0x792   : > { %6609 = vmatmul.f32.gmra.mxu2 %v12332_v9  ;;  %7009 = vmatpush.msrb.mxu0 %v8589_v12  ;;  %v8586_v19 = vld [vmem:[%s14124_s11 + $0x6b0] sm:$0xff]  ;;  %v8584_v12 = vld [vmem:[%s14124_s11 + $0x6a0] sm:$0xff] }
 0x793   : > { %6704 = vmatpush.msra.mxu1 %v6032_v40  ;;  %6976 = vmatpush.msra.mxu3 %v8571_v47  ;;  %v8585_v40 = vld [vmem:[%s14124_s11 + $0x6a8] sm:$0xff]  ;;  %v8610_v47 = vld [vmem:[%s14124_s11 + $0x770] sm:$0xff] }
 0x794   : > { %7010 = vmatpush.msrb.mxu0 %v8588_v50  ;;  %7074 = vmatpush.msra.mxu2 %v8626_v58  ;;  %v8622_v50 = vld [vmem:[%s14124_s11 + $0x7d0] sm:$0xff]  ;;  %v8564_v58 = vld [vmem:[%s14124_s11 + $0x600] sm:$0xff] }
 0x795   : > { %6571 = vmatmul.f32.gmra.mxu1 %v12161_v38  ;;  %6977 = vmatpush.msra.mxu3 %v8570_v30  ;;  %v6815_v30 = vsel %vm1420_vm5, %v6813_v35, %v6814_v24  ;;  %v8607_v35 = vld [vmem:[%s14124_s11 + $0x758] sm:$0xff] }
 0x796   : > { %7011 = vmatpush.msrb.mxu0 %v8587_v0  ;;  %7075 = vmatpush.msra.mxu2 %v8625_v36  ;;  %v8583_v0 = vld [vmem:[%s14124_s11 + $0x698] sm:$0xff]  ;;  %v8609_v36 = vld [vmem:[%s14124_s11 + $0x768] sm:$0xff] }
 0x797   : > { %6545 = vmatmul.f32.gmra.mxu0 %v12106_v20  ;;  %6978 = vmatpush.msra.mxu3 %v8569_v28  ;;  %v8621_v28 = vld [vmem:[%s14124_s11 + $0x7c8] sm:$0xff] }
 0x798   : > { %7012 = vmatpush.msrb.mxu0 %v8586_v19  ;;  %7076 = vmatpush.msra.mxu2 %v8624_v57  ;;  %v6831_v19 = vrot.slane %v12035_v61, 2  ;;  %v8620_v57 = vld [vmem:[%s14124_s11 + $0x7c0] sm:$0xff] }
 0x799   : > { %6635 = vmatmul.f32.vlgmr.msrb.gmra.mxu3 %v12317_v32  ;;  %7038 = vmatpush.msrb.mxu1 %v8611_v46  ;;  %v12828_v46 = vpop.f32.mrf.mxu2 }
 0x79a   : > { %6612 = vmatmul.f32.gmra.mxu2 %v12368_v10  ;;  %6979 = vmatpush.msra.mxu3 %v8568_v11  ;;  %v8582_v11 = vld [vmem:[%s14124_s11 + $0x690] sm:$0xff] }
 0x79b   : > { %7013 = vmatpush.msrb.mxu0 %v8585_v40  ;;  %7077 = vmatpush.msra.mxu2 %v8623_v37  ;;  %v8581_v40 = vld [vmem:[%s14124_s11 + $0x688] sm:$0xff]  ;;  %v8619_v37 = vld [vmem:[%s14124_s11 + $0x7b8] sm:$0xff] }
 0x79c   : > { %6980 = vmatpush.msra.mxu3 %v8567_v48  ;;  %7039 = vmatpush.msrb.mxu1 %v8610_v47  ;;  %v8608_v48 = vld [vmem:[%s14124_s11 + $0x760] sm:$0xff] }
 0x79d   : > { %6574 = vmatmul.f32.gmra.mxu1 %v12186_v4  ;;  %7014 = vmatpush.msrb.mxu0 %v8584_v12  ;;  %v6832_v12 = vsel %vm1420_vm5, %v6814_v24, %v6831_v19  ;;  %v8580_v47 = vld [vmem:[%s14124_s11 + $0x680] sm:$0xff]  ;;  %v8605_v24 = vld [vmem:[%s14124_s11 + $0x748] sm:$0xff] }
 0x79e   : > { %6981 = vmatpush.msra.mxu3 %v8566_v52  ;;  %7078 = vmatpush.msra.mxu2 %v8622_v50  ;;  %v8618_v50 = vld [vmem:[%s14124_s11 + $0x7b0] sm:$0xff] }
 0x79f   : > { %6670 = vmatmul.f32.vlgmr.msra.gmra.mxu0 %v12256_v60  ;;  %7040 = vmatpush.msrb.mxu1 %v8609_v36  ;;  %v8603_v36 = vld [vmem:[%s14124_s11 + $0x738] sm:$0xff] }
 0x7a0   : > { %6982 = vmatpush.msra.mxu3 %v8565_v59  ;;  %7015 = vmatpush.msrb.mxu0 %v8583_v0  ;;  %v8606_v59 = vld [vmem:[%s14124_s11 + $0x750] sm:$0xff]  ;;  %v8604_v0 = vld [vmem:[%s14124_s11 + $0x740] sm:$0xff] }
 0x7a1   : > { %6638 = vmatmul.f32.gmra.mxu3 %v12361_v34  ;;  %7079 = vmatpush.msra.mxu2 %v8621_v28  ;;  %v8616_v28 = vld [vmem:[%s14124_s11 + $0x7a0] sm:$0xff] }
 0x7a2   : > { %6615 = vmatmul.f32.gmra.mxu2 %v12407_v49  ;;  %6983 = vmatpush.msra.mxu3 %v8564_v58  ;;  %v12833_v52 = vpop.f32.mrf.mxu3  ;;  %v6843_v58 = vrot.slane %v12062_v43, 2 }
 0x7a3   : > { %7016 = vmatpush.msrb.mxu0 %v8582_v11  ;;  %7080 = vmatpush.msra.mxu2 %v8620_v57  ;;  %v8615_v11 = vld [vmem:[%s14124_s11 + $0x798] sm:$0xff] }
 0x7a4   : > { %7041 = vmatpush.msrb.mxu1 %v8608_v48  ;;  %v6844_v57 = vsel %vm1420_vm5, %v6831_v19, %v6843_v58  ;;  %v12872_v48 = vpop.f32.mrf.mxu2  ;;  %v8601_v19 = vld [vmem:[%s14124_s11 + $0x728] sm:$0xff] }
 0x7a5   : > { %6577 = vmatmul.f32.gmra.mxu1 %v12213_v63  ;;  %7017 = vmatpush.msrb.mxu0 %v8581_v40  ;;  %v8602_v40 = vld [vmem:[%s14124_s11 + $0x730] sm:$0xff] }
 0x7a6   : > { %7042 = vmatpush.msrb.mxu1 %v8607_v35  ;;  %7081 = vmatpush.msra.mxu2 %v8619_v37 }
 0x7a7   : > { %6673 = vmatmul.f32.gmra.mxu0 %v12306_v29 }
 0x7a8   : > { %7018 = vmatpush.msrb.mxu0 %v8580_v47  ;;  %7043 = vmatpush.msrb.mxu1 %v8606_v59  ;;  %v8613_v47 = vld [vmem:[%s14124_s11 + $0x788] sm:$0xff]  ;;  %v6855_v59 = vrot.slane %v12068_v2, 2 }
 0x7a9   : > { %6641 = vmatmul.f32.gmra.mxu3 %v12394_v41  ;;  %7082 = vmatpush.msra.mxu2 %v8618_v50  ;;  %v8600_v50 = vld [vmem:[%s14124_s11 + $0x720] sm:$0xff] }
 0x7aa   : > { %6949 = vmatmul.f32.vlgmr.msrb.gmra.mxu2 %v6815_v30  ;;  %v8617_v30 = vld [vmem:[%s14124_s11 + $0x7a8] sm:$0xff]  ;;  %7044 = vmatpush.msrb.mxu1 %v8605_v24  ;;  %v12879_v37 = vpop.f32.mrf.mxu3  ;;  %v8612_v24 = vld [vmem:[%s14124_s11 + $0x780] sm:$0xff] }
 0x7ab   : > { %7083 = vmatpush.msra.mxu2 %v8617_v30  ;;  %v8657_v30 = vld [vmem:[%s14124_s11 + $0x8b8] sm:$0xff] }
 0x7ac   : > { %7045 = vmatpush.msrb.mxu1 %v8604_v0  ;;  %v8599_v0 = vld [vmem:[%s14124_s11 + $0x718] sm:$0xff]  ;;  %7358 = vmatpush.msra.mxu0 %v8657_v30  ;;  %v6867_v30 = vrot.slane %v12106_v20, 2 }
 0x7ad   : > { %6580 = vmatmul.f32.gmra.mxu1 %v12239_v55  ;;  %7084 = vmatpush.msra.mxu2 %v8616_v28  ;;  %v8656_v28 = vld [vmem:[%s14124_s11 + $0x8b0] sm:$0xff] }
 0x7ae   : > { %7046 = vmatpush.msrb.mxu1 %v8603_v36  ;;  %v6856_v36 = vsel %vm1420_vm5, %v6843_v58, %v6855_v59  ;;  %v12923_v58 = vpop.f32.mrf.mxu2  ;;  %7359 = vmatpush.msra.mxu0 %v8656_v28  ;;  %v8653_v28 = vld [vmem:[%s14124_s11 + $0x898] sm:$0xff]  ;;  %v6868_v8 = vsel %vm1420_vm5, %v6855_v59, %v6867_v30 }
 0x7af   : > { %6676 = vmatmul.f32.gmra.mxu0 %v12355_v17  ;;  %7085 = vmatpush.msra.mxu2 %v8615_v11  ;;  %v8598_v11 = vld [vmem:[%s14124_s11 + $0x710] sm:$0xff]  ;;  %v8689_v59 = vld [vmem:[%s14124_s11 + $0x9b8] sm:$0xff] }
 0x7b0   : > { %7047 = vmatpush.msrb.mxu1 %v8602_v40  ;;  %v6816_v40 = vrot.slane %v12086_v31, 2 }
 0x7b1   : > { %6644 = vmatmul.f32.gmra.mxu3 %v12441_v44 }
 0x7b2   : > { %6952 = vmatmul.f32.gmra.mxu2 %v6832_v12  ;;  %v8614_v12 = vld [vmem:[%s14124_s11 + $0x790] sm:$0xff]  ;;  %7048 = vmatpush.msrb.mxu1 %v8601_v19  ;;  %v8655_v19 = vld [vmem:[%s14124_s11 + $0x8a8] sm:$0xff] }
 0x7b3   : > { %7086 = vmatpush.msra.mxu2 %v8614_v12  ;;  %v6817_v12 = vrot.slane %v12126_v23, 2  ;;  %7360 = vmatpush.msra.mxu0 %v8655_v19  ;;  %v8652_v19 = vld [vmem:[%s14124_s11 + $0x890] sm:$0xff]  ;;  %v8632_v23 = vld [vmem:[%s14124_s11 + $0x820] sm:$0xff] }
 0x7b4   : > { %7049 = vmatpush.msrb.mxu1 %v8600_v50  ;;  %v12928_v50 = vpop.f32.mrf.mxu3 }
 0x7b5   : > { %8542 = vmatmul.msk.f32.vlgmr.msra.gmra.mxu1 %vm6279_vm8, %v12421_v45  ;;  %7087 = vmatpush.msra.mxu2 %v8613_v47  ;;  %v8597_v47 = vld [vmem:[%s14124_s11 + $0x708] sm:$0xff] }
 0x7b6   : > { %7050 = vmatpush.msrb.mxu1 %v8599_v0  ;;  %v8596_v0 = vld [vmem:[%s14124_s11 + $0x700] sm:$0xff] }
 0x7b7   : > { %6679 = vmatmul.f32.gmra.mxu0 %v12389_v15  ;;  %7088 = vmatpush.msra.mxu2 %v8612_v24  ;;  %v8654_v24 = vld [vmem:[%s14124_s11 + $0x8a0] sm:$0xff] }
 0x7b8   : > { %7051 = vmatpush.msrb.mxu1 %v8598_v11  ;;  %7361 = vmatpush.msra.mxu0 %v8654_v24  ;;  %v8635_v11 = vld [vmem:[%s14124_s11 + $0x838] sm:$0xff]  ;;  %v6833_v24 = vrot.slane %v12161_v38, 2 }
 0x7b9   : > { %6647 = vmatmul.f32.gmra.mxu3 %v12488_v13  ;;  %7428 = vmatpush.msrb.mxu2 %v8689_v59 }
 0x7ba   : > { %6955 = vmatmul.f32.gmra.mxu2 %v6844_v57  ;;  %7052 = vmatpush.msrb.mxu1 %v8597_v47  ;;  %v6820_v47 = vrot.slane %v12230_v53, 2  ;;  %v6834_v59 = vsel %vm1420_vm5, %v6817_v12, %v6833_v24 }
 0x7bb   : > { %7362 = vmatpush.msra.mxu0 %v8653_v28  ;;  %7116 = vmatpush.msrb.mxu3 %v8635_v11  ;;  %v8650_v28 = vld [vmem:[%s14124_s11 + $0x880] sm:$0xff] }
 0x7bc   : > { %v12877_v35 = vpop.f32.mrf.mxu0  ;;  %7053 = vmatpush.msrb.mxu1 %v8596_v0  ;;  %v8634_v0 = vld [vmem:[%s14124_s11 + $0x830] sm:$0xff]  ;;  %v12979_v2 = vpop.f32.mrf.mxu3 }
 0x7bd   : > { %8543 = vmatmul.msk.f32.gmra.mxu1 %vm6279_vm8, %v12468_v33  ;;  %7363 = vmatpush.msra.mxu0 %v8652_v19  ;;  %v6879_v19 = vrot.slane %v12142_v39, 2  ;;  %v6835_v39 = vrot.slane %v12273_v62, 2  ;;  %v8646_v62 = vld [vmem:[%s14124_s11 + $0x860] sm:$0xff] }
 0x7be   : > { %7117 = vmatpush.msrb.mxu3 %v8634_v0  ;;  %v8688_v0 = vld [vmem:[%s14124_s11 + $0x9b0] sm:$0xff] }
 0x7bf   : > { %6682 = vmatmul.f32.gmra.mxu0 %v12433_v1  ;;  %7429 = vmatpush.msrb.mxu2 %v8688_v0  ;;  %v8686_v0 = vld [vmem:[%s14124_s11 + $0x9a0] sm:$0xff] }
 0x7c1   : > { %6650 = vmatmul.f32.gmra.mxu3 %v12532_v3 }
 0x7c2   : > { %6958 = vmatmul.f32.gmra.mxu2 %v6856_v36  ;;  %v6818_v36 = vsel %vm1420_vm5, %v6816_v40, %v6817_v12  ;;  %v6819_v40 = vrot.slane %v12205_v21, 2  ;;  %v8631_v12 = vld [vmem:[%s14124_s11 + $0x818] sm:$0xff] }
 0x7c4   : > { %v12914_v57 = vpop.f32.mrf.mxu0  ;;  %v6821_v38 = vsel %vm1420_vm5, %v6819_v40, %v6820_v47  ;;  %v8649_v40 = vld [vmem:[%s14124_s11 + $0x878] sm:$0xff] }
 0x7c5   : > { %8544 = vmatmul.msk.f32.gmra.mxu1 %vm6279_vm8, %v12507_v22 }
 0x7c7   : > { %6685 = vmatmul.f32.gmra.mxu0 %v12482_v7 }
 0x7c9   : > { %6984 = vmatmul.f32.vlgmr.msra.gmra.mxu3 %v6818_v36  ;;  %v8651_v36 = vld [vmem:[%s14124_s11 + $0x888] sm:$0xff] }
 0x7ca   : > { %6961 = vmatmul.f32.gmra.mxu2 %v6868_v8  ;;  %v8633_v8 = vld [vmem:[%s14124_s11 + $0x828] sm:$0xff]  ;;  %7364 = vmatpush.msra.mxu0 %v8651_v36 }
 0x7cb   : > { %7118 = vmatpush.msrb.mxu3 %v8633_v8  ;;  %v6880_v8 = vsel %vm1420_vm5, %v6867_v30, %v6879_v19  ;;  %v8630_v30 = vld [vmem:[%s14124_s11 + $0x810] sm:$0xff]  ;;  %v8647_v19 = vld [vmem:[%s14124_s11 + $0x868] sm:$0xff] }
 0x7cc   : > { %v12951_v20 = vpop.f32.mrf.mxu0  ;;  %7365 = vmatpush.msra.mxu0 %v8650_v28  ;;  %v8648_v28 = vld [vmem:[%s14124_s11 + $0x870] sm:$0xff] }
 0x7cd   : > { %8545 = vmatmul.msk.f32.gmra.mxu1 %vm6279_vm8, %v12554_v56  ;;  %v12971_v11 = vpop.f32.mrf.mxu2  ;;  %7119 = vmatpush.msrb.mxu3 %v8632_v23  ;;  %v6845_v23 = vrot.slane %v12186_v4, 2  ;;  %v6836_v4 = vsel %vm1420_vm5, %v6820_v47, %v6835_v39  ;;  %v8628_v47 = vld [vmem:[%s14124_s11 + $0x800] sm:$0xff] }
 0x7ce   : > { %7366 = vmatpush.msra.mxu0 %v8649_v40  ;;  %v8629_v40 = vld [vmem:[%s14124_s11 + $0x808] sm:$0xff] }
 0x7cf   : > { %7019 = vmatmul.f32.vlgmr.msrb.gmra.mxu0 %v6821_v38  ;;  %v8687_v38 = vld [vmem:[%s14124_s11 + $0x9a8] sm:$0xff]  ;;  %7120 = vmatpush.msrb.mxu3 %v8631_v12  ;;  %v8673_v12 = vld [vmem:[%s14124_s11 + $0x938] sm:$0xff]  ;;  %v6846_v31 = vsel %vm1420_vm5, %v6833_v24, %v6845_v23  ;;  %v8684_v24 = vld [vmem:[%s14124_s11 + $0x990] sm:$0xff] }
 0x7d0   : > { %7430 = vmatpush.msrb.mxu2 %v8687_v38  ;;  %7367 = vmatpush.msra.mxu0 %v8648_v28  ;;  %v6825_v38 = vrot.slane %v12256_v60, 2  ;;  %v6826_v28 = vrot.slane %v12306_v29, 2 }
 0x7d1   : > { %6987 = vmatmul.f32.gmra.mxu3 %v6834_v59  ;;  %7393 = vmatpush.msra.mxu1 %v8673_v12  ;;  %v6847_v12 = vrot.slane %v12332_v9, 2 }
 0x7d2   : > { %v12987_v36 = vpop.f32.mrf.mxu1  ;;  %6964 = vmatmul.f32.gmra.mxu2 %v6880_v8  ;;  %7121 = vmatpush.msrb.mxu3 %v8630_v30  ;;  %v8685_v30 = vld [vmem:[%s14124_s11 + $0x998] sm:$0xff] }
 0x7d3   : > { %7431 = vmatpush.msrb.mxu2 %v8686_v0  ;;  %v8672_v0 = vld [vmem:[%s14124_s11 + $0x930] sm:$0xff]  ;;  %7368 = vmatpush.msra.mxu0 %v8647_v19  ;;  %v8671_v19 = vld [vmem:[%s14124_s11 + $0x928] sm:$0xff]  ;;  %v6848_v60 = vsel %vm1420_vm5, %v6835_v39, %v6847_v12 }
 0x7d4   : > { %v13000_v59 = vpop.f32.mrf.mxu0  ;;  %7122 = vmatpush.msrb.mxu3 %v8629_v40  ;;  %v6827_v40 = vsel %vm1420_vm5, %v6825_v38, %v6826_v28  ;;  %7394 = vmatpush.msra.mxu1 %v8672_v0  ;;  %v8644_v0 = vld [vmem:[%s14124_s11 + $0x850] sm:$0xff]  ;;  %v8643_v39 = vld [vmem:[%s14124_s11 + $0x848] sm:$0xff] }
 0x7d5   : > { %8546 = vmatmul.msk.f32.gmra.mxu1 %vm6279_vm8, %v12592_v16  ;;  %v13020_v8 = vpop.f32.mrf.mxu2  ;;  %7432 = vmatpush.msrb.mxu2 %v8685_v30  ;;  %v6857_v30 = vrot.slane %v12213_v63, 2  ;;  %v6839_v63 = vrot.slane %v12355_v17, 2 }
 0x7d6   : > { %7123 = vmatpush.msrb.mxu3 %v8628_v47  ;;  %7369 = vmatpush.msra.mxu0 %v8646_v62  ;;  %v8683_v47 = vld [vmem:[%s14124_s11 + $0x988] sm:$0xff]  ;;  %v8670_v62 = vld [vmem:[%s14124_s11 + $0x920] sm:$0xff] }
 0x7d7   : > { %7022 = vmatmul.f32.gmra.mxu0 %v6836_v4  ;;  %v13040_v4 = vpop.f32.mrf.mxu3  ;;  %7433 = vmatpush.msrb.mxu2 %v8684_v24  ;;  %v8682_v24 = vld [vmem:[%s14124_s11 + $0x980] sm:$0xff]  ;;  %v6858_v9 = vsel %vm1420_vm5, %v6845_v23, %v6857_v30  ;;  %v6345_v23 = vadd.f32 %v12833_v52, %v12686_v26  ;;  %v6869_v26 = vrot.slane %v12239_v55, 2  ;;  %v8680_v52 = vld [vmem:[%s14124_s11 + $0x970] sm:$0xff] }
 0x7d8   : > { %7395 = vmatpush.msra.mxu1 %v8671_v19  ;;  %v6822_v19 = vrot.slane %v12317_v32, 2  ;;  %v8666_v32 = vld [vmem:[%s14124_s11 + $0x900] sm:$0xff] }
 0x7d9   : > { %6990 = vmatmul.f32.gmra.mxu3 %v6846_v31  ;;  %v8645_v31 = vld [vmem:[%s14124_s11 + $0x858] sm:$0xff]  ;;  %7434 = vmatpush.msrb.mxu2 %v8683_v47  ;;  %v8668_v47 = vld [vmem:[%s14124_s11 + $0x910] sm:$0xff] }
 0x7da   : > { %v13038_v29 = vpop.f32.mrf.mxu1  ;;  %7089 = vmatmul.f32.vlgmr.msra.gmra.mxu2 %v6827_v40  ;;  %7370 = vmatpush.msra.mxu0 %v8645_v31  ;;  %v8669_v31 = vld [vmem:[%s14124_s11 + $0x918] sm:$0xff] }
 0x7db   : > { %7396 = vmatpush.msra.mxu1 %v8670_v62  ;;  %7435 = vmatpush.msrb.mxu2 %v8682_v24  ;;  %v8642_v62 = vld [vmem:[%s14124_s11 + $0x840] sm:$0xff] }
 0x7dc   : > { %v13057_v38 = vpop.f32.mrf.mxu0  ;;  %7371 = vmatpush.msra.mxu0 %v8644_v0  ;;  %v8667_v0 = vld [vmem:[%s14124_s11 + $0x908] sm:$0xff] }
 0x7dd   : > { %8547 = vmatmul.msk.f32.gmra.mxu1 %vm6279_vm8, %v12617_v54  ;;  %v13067_v40 = vpop.f32.mrf.mxu2  ;;  %v6823_v54 = vrot.slane %v12361_v34, 2  ;;  %v6840_v34 = vsel %vm1420_vm5, %v6826_v28, %v6839_v63  ;;  %v6380_v28 = vadd.f32 %v12877_v35, %v6345_v23  ;;  %v6870_v23 = vsel %vm1420_vm5, %v6857_v30, %v6869_v26  ;;  %v8705_v30 = vld [vmem:[%s14124_s11 + $0xa38] sm:$0xff] }
 0x7de   : > { %7397 = vmatpush.msra.mxu1 %v8669_v31  ;;  %7372 = vmatpush.msra.mxu0 %v8643_v39 }
 0x7df   : > { %7025 = vmatmul.f32.gmra.mxu0 %v6848_v60  ;;  %v8681_v60 = vld [vmem:[%s14124_s11 + $0x978] sm:$0xff]  ;;  %v13101_v24 = vpop.f32.mrf.mxu3  ;;  %v6824_v31 = vsel %vm1420_vm5, %v6822_v19, %v6823_v54  ;;  %v6415_v19 = vadd.f32 %v12987_v36, %v6380_v28  ;;  %v8678_v36 = vld [vmem:[%s14124_s11 + $0x960] sm:$0xff]  ;;  %7463 = vmatpush.msra.mxu3 %v8705_v30 }
 0x7e0   : > { %7398 = vmatpush.msra.mxu1 %v8668_v47  ;;  %7436 = vmatpush.msrb.mxu2 %v8681_v60  ;;  %v6851_v47 = vrot.slane %v12389_v15, 2  ;;  %v8665_v60 = vld [vmem:[%s14124_s11 + $0x8f8] sm:$0xff] }
 0x7e1   : > { %6993 = vmatmul.f32.gmra.mxu3 %v6858_v9  ;;  %v6859_v9 = vrot.slane %v12368_v10, 2  ;;  %7373 = vmatpush.msra.mxu0 %v8642_v62  ;;  %v6837_v62 = vrot.slane %v12394_v41, 2 }
 0x7e2   : > { %v13086_v17 = vpop.f32.mrf.mxu1  ;;  %7092 = vmatmul.f32.gmra.mxu2 %v6840_v34  ;;  %v8679_v34 = vld [vmem:[%s14124_s11 + $0x968] sm:$0xff]  ;;  %7399 = vmatpush.msra.mxu1 %v8667_v0  ;;  %v6852_v28 = vsel %vm1420_vm5, %v6839_v63, %v6851_v47  ;;  %v8676_v63 = vld [vmem:[%s14124_s11 + $0x950] sm:$0xff] }
 0x7e3   : > { %v6860_v35 = vsel %vm1420_vm5, %v6847_v12, %v6859_v9  ;;  %7437 = vmatpush.msrb.mxu2 %v8680_v52  ;;  %v8664_v12 = vld [vmem:[%s14124_s11 + $0x8f0] sm:$0xff]  ;;  %v6450_v52 = vadd.f32 %v12971_v11, %v6415_v19 }
 0x7e4   : > { %v13109_v39 = vpop.f32.mrf.mxu0  ;;  %7400 = vmatpush.msra.mxu1 %v8666_v32  ;;  %v6348_v32 = vadd.f32 %v12879_v37, %v12727_v5  ;;  %v6881_v5 = vrot.slane %v12279_v42, 2  ;;  %v8704_v37 = vld [vmem:[%s14124_s11 + $0xa30] sm:$0xff] }
 0x7e5   : > { %7054 = vmatmul.f32.vlgmr.msrb.gmra.mxu1 %v6824_v31  ;;  %v13118_v55 = vpop.f32.mrf.mxu2  ;;  %7438 = vmatpush.msrb.mxu2 %v8679_v34  ;;  %v8677_v31 = vld [vmem:[%s14124_s11 + $0x958] sm:$0xff]  ;;  %v6871_v34 = vrot.slane %v12407_v49, 2 }
 0x7e6   : > { %7401 = vmatpush.msra.mxu1 %v8665_v60  ;;  %v6383_v11 = vadd.f32 %v12914_v57, %v6348_v32  ;;  %7464 = vmatpush.msra.mxu3 %v8704_v37  ;;  %v8661_v32 = vld [vmem:[%s14124_s11 + $0x8d8] sm:$0xff] }
 0x7e7   : > { %7028 = vmatmul.f32.gmra.mxu0 %v6860_v35  ;;  %7439 = vmatpush.msrb.mxu2 %v8678_v36  ;;  %v8663_v35 = vld [vmem:[%s14124_s11 + $0x8e8] sm:$0xff]  ;;  %v6872_v57 = vsel %vm1420_vm5, %v6859_v9, %v6871_v34  ;;  %v8674_v9 = vld [vmem:[%s14124_s11 + $0x940] sm:$0xff] }
 0x7e8   : > { %7402 = vmatpush.msra.mxu1 %v8664_v12  ;;  %v8675_v12 = vld [vmem:[%s14124_s11 + $0x948] sm:$0xff]  ;;  %v6418_v30 = vadd.f32 %v13038_v29, %v6383_v11  ;;  %v6882_v29 = vsel %vm1420_vm5, %v6869_v26, %v6881_v5  ;;  %v8702_v26 = vld [vmem:[%s14124_s11 + $0xa20] sm:$0xff]  ;;  %v6351_v5 = vadd.f32 %v12928_v50, %v12777_v6  ;;  %v6829_v6 = vrot.slane %v12468_v33, 2 }
 0x7e9   : > { %6996 = vmatmul.f32.gmra.mxu3 %v6870_v23  ;;  %v6838_v23 = vsel %vm1420_vm5, %v6823_v54, %v6837_v62  ;;  %7440 = vmatpush.msrb.mxu2 %v8677_v31  ;;  %v8662_v54 = vld [vmem:[%s14124_s11 + $0x8e0] sm:$0xff]  ;;  %v6863_v31 = vrot.slane %v12433_v1, 2 }
 0x7ea   : > { %v13133_v0 = vpop.f32.mrf.mxu1  ;;  %7095 = vmatmul.f32.gmra.mxu2 %v6852_v28  ;;  %7403 = vmatpush.msra.mxu1 %v8663_v35  ;;  %v6849_v35 = vrot.slane %v12441_v44, 2  ;;  %v6453_v37 = vadd.f32 %v13020_v8, %v6418_v30  ;;  %v6386_v30 = vadd.f32 %v12951_v20, %v6351_v5  ;;  %v6875_v5 = vrot.slane %v12482_v7, 2 }
 0x7eb   : > { %7441 = vmatpush.msrb.mxu2 %v8676_v63  ;;  %v6864_v11 = vsel %vm1420_vm5, %v6851_v47, %v6863_v31  ;;  %v8701_v47 = vld [vmem:[%s14124_s11 + $0xa18] sm:$0xff] }
 0x7ec   : > { %v6484_v60 = vpop.f32.mrf.mxu3  ;;  %v13162_v36 = vpop.f32.mrf.mxu0  ;;  %7404 = vmatpush.msra.mxu1 %v8662_v54  ;;  %v6883_v54 = vrot.slane %v12454_v51, 2  ;;  %v6850_v8 = vsel %vm1420_vm5, %v6837_v62, %v6849_v35  ;;  %v8719_v62 = vld [vmem:[%s14124_s11 + $0xaa8] sm:$0xff]  ;;  %v6421_v20 = vadd.f32 %v13086_v17, %v6386_v30  ;;  %v6876_v30 = vsel %vm1420_vm5, %v6863_v31, %v6875_v5 }
 0x7ed   : > { %v13160_v19 = vadd.f32 %v6484_v60, %v6450_v52  ;;  %7057 = vmatmul.f32.gmra.mxu1 %v6838_v23  ;;  %v13171_v28 = vpop.f32.mrf.mxu2  ;;  %v8703_v52 = vld [vmem:[%s14124_s11 + $0xa28] sm:$0xff]  ;;  %v8721_v60 = vld [vmem:[%s14124_s11 + $0xab8] sm:$0xff]  ;;  %7442 = vmatpush.msrb.mxu2 %v8675_v12  ;;  %v8660_v23 = vld [vmem:[%s14124_s11 + $0x8d0] sm:$0xff] }
 0x7ee   : > { %7405 = vmatpush.msra.mxu1 %v8661_v32  ;;  %7465 = vmatpush.msra.mxu3 %v8703_v52  ;;  %v8659_v12 = vld [vmem:[%s14124_s11 + $0x8c8] sm:$0xff] }
 0x7ef   : > { %7031 = vmatmul.f32.gmra.mxu0 %v6872_v57  ;;  %7443 = vmatpush.msrb.mxu2 %v8674_v9  ;;  %v8720_v57 = vld [vmem:[%s14124_s11 + $0xab0] sm:$0xff]  ;;  %v6828_v9 = vrot.slane %v12421_v45, 2 }
 0x7f0   : > { %7498 = vmatpush.msrb.mxu0 %v8721_v60  ;;  %7406 = vmatpush.msra.mxu1 %v8660_v23  ;;  %v6360_v60 = vadd.f32 %v13101_v24, %v12923_v58  ;;  %v8718_v58 = vld [vmem:[%s14124_s11 + $0xaa0] sm:$0xff] }
 0x7f1   : > { %6999 = vmatmul.f32.gmra.mxu3 %v6882_v29  ;;  %v8658_v29 = vld [vmem:[%s14124_s11 + $0x8c0] sm:$0xff]  ;;  %v6830_v17 = vsel %vm1420_vm5, %v6828_v9, %v6829_v6 }
 0x7f2   : > { %v13194_v63 = vpop.f32.mrf.mxu1  ;;  %7098 = vmatmul.f32.gmra.mxu2 %v6864_v11  ;;  %7466 = vmatpush.msra.mxu3 %v8702_v26  ;;  %v6884_v26 = vsel %vm1420_vm5, %v6871_v34, %v6883_v54  ;;  %v6861_v11 = vrot.slane %v12488_v13, 2  ;;  %v6395_v24 = vadd.f32 %v13109_v39, %v6360_v60  ;;  %v8699_v34 = vld [vmem:[%s14124_s11 + $0xa08] sm:$0xff]  ;;  %v6354_v39 = vadd.f32 %v12979_v2, %v12828_v46 }
 0x7f3   : > { %7407 = vmatpush.msra.mxu1 %v8659_v12  ;;  %7499 = vmatpush.msrb.mxu0 %v8720_v57  ;;  %v7238_v12 = vrot.slane %v11948_v27, 3  ;;  %v7239_v57 = vrot.slane %v11993_v25, 3  ;;  %v6841_v46 = vrot.slane %v12507_v22, 2 }
 0x7f4   : > { %v6487_v50 = vpop.f32.mrf.mxu3  ;;  %v13224_v52 = vpop.f32.mrf.mxu0  ;;  %7467 = vmatpush.msra.mxu3 %v8701_v47  ;;  %v6456_v47 = vadd.f32 %v13067_v40, %v6421_v20  ;;  %v6862_v2 = vsel %vm1420_vm5, %v6849_v35, %v6861_v11  ;;  %v8716_v40 = vld [vmem:[%s14124_s11 + $0xa90] sm:$0xff]  ;;  %v6389_v31 = vadd.f32 %v13000_v59, %v6354_v39  ;;  %v8697_v35 = vld [vmem:[%s14124_s11 + $0x9f8] sm:$0xff]  ;;  %v8715_v59 = vld [vmem:[%s14124_s11 + $0xa88] sm:$0xff] }
 0x7f5   : > { %v13222_v32 = vadd.f32 %v6487_v50, %v6453_v37  ;;  %7060 = vmatmul.f32.gmra.mxu1 %v6850_v8  ;;  %v6464_v23 = vpop.f32.mrf.mxu2  ;;  %v8700_v37 = vld [vmem:[%s14124_s11 + $0xa10] sm:$0xff]  ;;  %7500 = vmatpush.msrb.mxu0 %v8719_v62  ;;  %v8717_v50 = vld [vmem:[%s14124_s11 + $0xa98] sm:$0xff]  ;;  %v8695_v39 = vld [vmem:[%s14124_s11 + $0x9e8] sm:$0xff] }
 0x7f6   : > { %7408 = vmatpush.msra.mxu1 %v8658_v29  ;;  %7468 = vmatpush.msra.mxu3 %v8700_v37  ;;  %v8698_v29 = vld [vmem:[%s14124_s11 + $0xa00] sm:$0xff]  ;;  %v6424_v37 = vadd.f32 %v13133_v0, %v6389_v31  ;;  %v6842_v0 = vsel %vm1420_vm5, %v6829_v6, %v6841_v46  ;;  %v7256_v6 = vrot.slane %v12035_v61, 3 }
 0x7f7   : > { %7034 = vmatmul.f32.gmra.mxu0 %v6884_v26  ;;  %v8751_v26 = vld [vmem:[%s14124_s11 + $0xb78] sm:$0xff] }
 0x7f8   : > { %7501 = vmatpush.msrb.mxu0 %v8718_v58  ;;  %7469 = vmatpush.msra.mxu3 %v8699_v34  ;;  %v6887_v58 = vrot.slane %v12526_v18, 2  ;;  %v8750_v34 = vld [vmem:[%s14124_s11 + $0xb70] sm:$0xff] }
 0x7f9   : > { %8636 = vmatmul.msk.f32.vlgmr.msrb.gmra.mxu3 %vm6279_vm8, %v6830_v17  ;;  %7783 = vmatpush.msra.mxu2 %v8751_v26 }
 0x7fa   : > { %v6429_v54 = vpop.f32.mrf.mxu1  ;;  %7101 = vmatmul.f32.gmra.mxu2 %v6876_v30  ;;  %7502 = vmatpush.msrb.mxu0 %v8717_v50  ;;  %v6532_v50 = vadd.f32 %v13162_v36, %v13160_v19  ;;  %v6357_v30 = vadd.f32 %v13040_v4, %v12872_v48  ;;  %v6459_v36 = vadd.f32 %v13118_v55, %v6424_v37  ;;  %v6853_v48 = vrot.slane %v12554_v56, 2  ;;  %v8712_v4 = vld [vmem:[%s14124_s11 + $0xa70] sm:$0xff] }
 0x7fb   : > { %v6430_v8 = vadd.f32 %v6429_v54, %v6395_v24  ;;  %7470 = vmatpush.msra.mxu3 %v8698_v29  ;;  %v8696_v24 = vld [vmem:[%s14124_s11 + $0x9f0] sm:$0xff]  ;;  %v6873_v54 = vrot.slane %v12532_v3, 2  ;;  %7784 = vmatpush.msra.mxu2 %v8750_v34  ;;  %v6888_v29 = vsel %vm1420_vm5, %v6875_v5, %v6887_v58  ;;  %v7245_v58 = vrot.slane %v12230_v53, 3 }
 0x7fc   : > { %v6490_v9 = vpop.f32.mrf.mxu3  ;;  %v13283_v20 = vpop.f32.mrf.mxu0  ;;  %7503 = vmatpush.msrb.mxu0 %v8716_v40  ;;  %v6392_v5 = vadd.f32 %v13057_v38, %v6357_v30  ;;  %v6885_v34 = vrot.slane %v12574_v14, 2 }
 0x7fd   : > { %v13281_v62 = vadd.f32 %v6490_v9, %v6456_v47  ;;  %7063 = vmatmul.f32.gmra.mxu1 %v6862_v2  ;;  %v13285_v60 = vadd.f32 %v6464_v23, %v6430_v8  ;;  %v6601_v17 = vpop.f32.mrf.mxu2  ;;  %v7240_v23 = vsel %vm1418_vm4, %v7238_v12, %v7239_v57  ;;  %7471 = vmatpush.msra.mxu3 %v8697_v35  ;;  %v8714_v12 = vld [vmem:[%s14124_s11 + $0xa80] sm:$0xff]  ;;  %v8713_v47 = vld [vmem:[%s14124_s11 + $0xa78] sm:$0xff]  ;;  %v8749_v2 = vld [vmem:[%s14124_s11 + $0xb68] sm:$0xff] }
 0x7fe   : > { %7504 = vmatpush.msrb.mxu0 %v8715_v59  ;;  %v8694_v9 = vld [vmem:[%s14124_s11 + $0x9e0] sm:$0xff]  ;;  %v6874_v55 = vsel %vm1420_vm5, %v6861_v11, %v6873_v54  ;;  %v8693_v11 = vld [vmem:[%s14124_s11 + $0x9d8] sm:$0xff]  ;;  %7785 = vmatpush.msra.mxu2 %v8749_v2  ;;  %v6427_v38 = vadd.f32 %v13194_v63, %v6392_v5  ;;  %v8711_v63 = vld [vmem:[%s14124_s11 + $0xa68] sm:$0xff] }
 0x7ff   : > { %7374 = vmatmul.f32.vlgmr.msra.gmra.mxu0 %v7240_v23  ;;  %7472 = vmatpush.msra.mxu3 %v8696_v24  ;;  %v8748_v59 = vld [vmem:[%s14124_s11 + $0xb60] sm:$0xff]  ;;  %v7244_v23 = vrot.slane %v12205_v21, 3  ;;  %v8692_v24 = vld [vmem:[%s14124_s11 + $0x9d0] sm:$0xff] }
 0x800   : > { %7505 = vmatpush.msrb.mxu0 %v8714_v12  ;;  %v6535_v12 = vadd.f32 %v13224_v52, %v13222_v32  ;;  %7786 = vmatpush.msra.mxu2 %v8748_v59  ;;  %v7268_v32 = vrot.slane %v12062_v43, 3  ;;  %v8746_v52 = vld [vmem:[%s14124_s11 + $0xb50] sm:$0xff] }
 0x801   : > { %8637 = vmatmul.msk.f32.gmra.mxu3 %vm6279_vm8, %v6842_v0  ;;  %v8747_v0 = vld [vmem:[%s14124_s11 + $0xb58] sm:$0xff]  ;;  %v7246_v30 = vsel %vm1418_vm4, %v7244_v23, %v7245_v58  ;;  %v14574_v59 = vld [vmem:[#allocation64_spill] sm:$0xff] }
 0x802   : > { %v6566_v8 = vpop.f32.mrf.mxu1  ;;  %7104 = vmatmul.f32.gmra.mxu2 %v6888_v29  ;;  %7473 = vmatpush.msra.mxu3 %v8695_v39  ;;  %v6886_v29 = vsel %vm1420_vm5, %v6873_v54, %v6885_v34  ;;  %v8708_v54 = vld [vmem:[%s14124_s11 + $0xa50] sm:$0xff]  ;;  %v14575_v23 = vld [vmem:[#allocation21_spill] sm:$0xff]  ;;  %v6538_v34 = vadd.f32 %v13283_v20, %v13281_v62 }
 0x803   : > { %v6567_v19 = vadd.f32 %v6566_v8, %v6532_v50  ;;  %7506 = vmatpush.msrb.mxu0 %v8713_v47  ;;  %v8691_v50 = vld [vmem:[%s14124_s11 + $0x9c8] sm:$0xff]  ;;  %v6462_v47 = vadd.f32 %v13171_v28, %v6427_v38  ;;  %7787 = vmatpush.msra.mxu2 %v8747_v0  ;;  %v6865_v28 = vrot.slane %v12592_v16, 2  ;;  %v7260_v38 = vrot.slane %v14574_v59, 3 }
 0x804   : > { %v6493_v40 = vpop.f32.mrf.mxu3  ;;  %v13350_v35 = vpop.f32.mrf.mxu0  ;;  %7474 = vmatpush.msra.mxu3 %v8694_v9  ;;  %v8709_v9 = vld [vmem:[%s14124_s11 + $0xa58] sm:$0xff] }
 0x805   : > { %v13348_v31 = vadd.f32 %v6493_v40, %v6459_v36  ;;  %7066 = vmatmul.f32.gmra.mxu1 %v6874_v55  ;;  %v13352_v26 = vadd.f32 %v6601_v17, %v6567_v19  ;;  %v6604_v37 = vpop.f32.mrf.mxu2  ;;  %v7257_v17 = vsel %vm1418_vm4, %v7239_v57, %v7256_v6  ;;  %7507 = vmatpush.msrb.mxu0 %v8712_v4  ;;  %v8690_v19 = vld [vmem:[%s14124_s11 + $0x9c0] sm:$0xff]  ;;  %v8745_v4 = vld [vmem:[%s14124_s11 + $0xb48] sm:$0xff] }
 0x806   : > { %v6854_v57 = vsel %vm1420_vm5, %v6841_v46, %v6853_v48  ;;  %7475 = vmatpush.msra.mxu3 %v8693_v11  ;;  %v8710_v46 = vld [vmem:[%s14124_s11 + $0xa60] sm:$0xff]  ;;  %7788 = vmatpush.msra.mxu2 %v8746_v52  ;;  %v7269_v11 = vsel %vm1418_vm4, %v7256_v6, %v7268_v32  ;;  %v8707_v6 = vld [vmem:[%s14124_s11 + $0xa48] sm:$0xff]  ;;  %v8742_v52 = vld [vmem:[%s14124_s11 + $0xb30] sm:$0xff] }
 0x807   : > { %7377 = vmatmul.f32.gmra.mxu0 %v7257_v17  ;;  %v6866_v17 = vsel %vm1420_vm5, %v6853_v48, %v6865_v28  ;;  %v8743_v48 = vld [vmem:[%s14124_s11 + $0xb38] sm:$0xff] }
 0x808   : > { %7476 = vmatpush.msra.mxu3 %v8692_v24  ;;  %7508 = vmatpush.msrb.mxu0 %v8711_v63  ;;  %v7241_v24 = vrot.slane %v14575_v23, 3  ;;  %v14576_v63 = vld [vmem:[#allocation19_spill] sm:$0xff] }
 0x809   : > { %8638 = vmatmul.msk.f32.gmra.mxu3 %vm6279_vm8, %v6854_v57  ;;  %v7242_v57 = vrot.slane %v14576_v63, 3  ;;  %7789 = vmatpush.msra.mxu2 %v8745_v4 }
 0x80a   : > { %v6569_v39 = vpop.f32.mrf.mxu1  ;;  %7444 = vmatmul.f32.vlgmr.msrb.gmra.mxu2 %v7246_v30  ;;  %7477 = vmatpush.msra.mxu3 %v8691_v50  ;;  %v7261_v50 = vsel %vm1418_vm4, %v7245_v58, %v7260_v38 }
 0x80b   : > { %v6570_v8 = vadd.f32 %v6569_v39, %v6535_v12  ;;  %7509 = vmatpush.msrb.mxu0 %v8710_v46  ;;  %v14577_v39 = vld [vmem:[#allocation17_spill] sm:$0xff]  ;;  %v7243_v20 = vsel %vm1418_vm4, %v7241_v24, %v7242_v57  ;;  %v8740_v24 = vld [vmem:[%s14124_s11 + $0xb20] sm:$0xff] }
 0x80c   : > { %v6496_v36 = vpop.f32.mrf.mxu3  ;;  %v13410_v40 = vpop.f32.mrf.mxu0  ;;  %7478 = vmatpush.msra.mxu3 %v8690_v19  ;;  %v7280_v46 = vrot.slane %v14577_v39, 3 }
 0x80d   : > { %v13408_v2 = vadd.f32 %v6496_v36, %v6462_v47  ;;  %7069 = vmatmul.f32.gmra.mxu1 %v6886_v29  ;;  %v13412_v55 = vadd.f32 %v6604_v37, %v6570_v8  ;;  %v6607_v5 = vpop.f32.mrf.mxu2  ;;  %7510 = vmatpush.msrb.mxu0 %v8709_v9  ;;  %v8744_v37 = vld [vmem:[%s14124_s11 + $0xb40] sm:$0xff]  ;;  %v14578_v47 = vld [vmem:[#allocation116_spill] sm:$0xff]  ;;  %v8741_v29 = vld [vmem:[%s14124_s11 + $0xb28] sm:$0xff] }
 0x80e   : > { %7790 = vmatpush.msra.mxu2 %v8744_v37  ;;  %v8706_v8 = vld [vmem:[%s14124_s11 + $0xa40] sm:$0xff]  ;;  %v6877_v30 = vrot.slane %v14578_v47, 2  ;;  %v8729_v9 = vld [vmem:[%s14124_s11 + $0xaf8] sm:$0xff] }
 0x80f   : > { %7380 = vmatmul.f32.gmra.mxu0 %v7269_v11  ;;  %7541 = vmatpush.msrb.mxu1 %v8729_v9  ;;  %v14580_v37 = vld [vmem:[#allocation18_spill] sm:$0xff]  ;;  %v8766_v9 = vld [vmem:[%s14124_s11 + $0xbf0] sm:$0xff] }
 0x810   : > { %7511 = vmatpush.msrb.mxu0 %v8708_v54  ;;  %7791 = vmatpush.msra.mxu2 %v8743_v48  ;;  %v7281_v54 = vsel %vm1418_vm4, %v7268_v32, %v7280_v46  ;;  %v6541_v32 = vadd.f32 %v13350_v35, %v13348_v31  ;;  %v8767_v48 = vld [vmem:[%s14124_s11 + $0xbf8] sm:$0xff]  ;;  %v14581_v35 = vld [vmem:[#allocation16_spill] sm:$0xff] }
 0x811   : > { %8639 = vmatmul.msk.f32.gmra.mxu3 %vm6279_vm8, %v6866_v17  ;;  %v7258_v17 = vrot.slane %v14580_v37, 3 }
 0x812   : > { %v6572_v0 = vpop.f32.mrf.mxu1  ;;  %7512 = vmatpush.msrb.mxu0 %v8707_v6  ;;  %7447 = vmatmul.f32.gmra.mxu2 %v7261_v50  ;;  %v8728_v6 = vld [vmem:[%s14124_s11 + $0xaf0] sm:$0xff]  ;;  %v7292_v50 = vrot.slane %v14581_v35, 3 }
 0x813   : > { %v6573_v12 = vadd.f32 %v6572_v0, %v6538_v34  ;;  %7792 = vmatpush.msra.mxu2 %v8742_v52  ;;  %7542 = vmatpush.msrb.mxu1 %v8728_v6  ;;  %v8727_v0 = vld [vmem:[%s14124_s11 + $0xae8] sm:$0xff]  ;;  %v8725_v6 = vld [vmem:[%s14124_s11 + $0xad8] sm:$0xff] }
 0x814   : > { %v6499_v62 = vpop.f32.mrf.mxu3  ;;  %v13454_v58 = vpop.f32.mrf.mxu0  ;;  %7513 = vmatpush.msrb.mxu0 %v8706_v8  ;;  %7818 = vmatpush.msrb.mxu3 %v8767_v48 }
 0x815   : > { %v13452_v19 = vadd.f32 %v6499_v62, %v13285_v60  ;;  %7409 = vmatmul.f32.vlgmr.msra.gmra.mxu1 %v7243_v20  ;;  %v13456_v36 = vadd.f32 %v6607_v5, %v6573_v12  ;;  %v6610_v4 = vpop.f32.mrf.mxu2  ;;  %v14579_v60 = vld [vmem:[#allocation61_spill] sm:$0xff]  ;;  %v6878_v5 = vsel %vm1420_vm5, %v6865_v28, %v6877_v30  ;;  %7793 = vmatpush.msra.mxu2 %v8741_v29  ;;  %v14582_v20 = vld [vmem:[#allocation63_spill] sm:$0xff]  ;;  %v8738_v29 = vld [vmem:[%s14124_s11 + $0xb10] sm:$0xff] }
 0x816   : > { %v7272_v11 = vrot.slane %v14579_v60, 3  ;;  %v8739_v28 = vld [vmem:[%s14124_s11 + $0xb18] sm:$0xff]  ;;  %v7259_v62 = vsel %vm1418_vm4, %v7242_v57, %v7258_v17  ;;  %v6889_v52 = vrot.slane %v14582_v20, 2  ;;  %7543 = vmatpush.msrb.mxu1 %v8727_v0  ;;  %7819 = vmatpush.msrb.mxu3 %v8766_v9  ;;  %v14583_v0 = vld [vmem:[#allocation23_spill] sm:$0xff] }
 0x817   : > { %7383 = vmatmul.f32.gmra.mxu0 %v7281_v54  ;;  %7794 = vmatpush.msra.mxu2 %v8740_v24  ;;  %v8737_v24 = vld [vmem:[%s14124_s11 + $0xb08] sm:$0xff]  ;;  %v7270_v48 = vrot.slane %v14583_v0, 3  ;;  %v14584_v9 = vld [vmem:[#allocation13_spill] sm:$0xff] }
 0x818   : > { %v7273_v31 = vsel %vm1418_vm4, %v7260_v38, %v7272_v11  ;;  %v8726_v38 = vld [vmem:[%s14124_s11 + $0xae0] sm:$0xff] }
 0x819   : > { %8640 = vmatmul.msk.f32.gmra.mxu3 %vm6279_vm8, %v6878_v5  ;;  %7795 = vmatpush.msra.mxu2 %v8739_v28  ;;  %v6890_v28 = vsel %vm1420_vm5, %v6877_v30, %v6889_v52  ;;  %v8764_v30 = vld [vmem:[%s14124_s11 + $0xbe0] sm:$0xff]  ;;  %v8782_v52 = vld [vmem:[%s14124_s11 + $0xc70] sm:$0xff] }
 0x81a   : > { %v6575_v34 = vpop.f32.mrf.mxu1  ;;  %7450 = vmatmul.f32.gmra.mxu2 %v7273_v31  ;;  %7544 = vmatpush.msrb.mxu1 %v8726_v38  ;;  %v8783_v31 = vld [vmem:[%s14124_s11 + $0xc78] sm:$0xff] }
 0x81b   : > { %v6576_v12 = vadd.f32 %v6575_v34, %v6541_v32  ;;  %v7284_v34 = vrot.slane %v12368_v10, 3  ;;  %7796 = vmatpush.msra.mxu2 %v8738_v29  ;;  %7853 = vmatpush.msra.mxu0 %v8783_v31 }
 0x81c   : > { %v6636_v8 = vpop.f32.mrf.mxu3  ;;  %v13504_v5 = vpop.f32.mrf.mxu0  ;;  %7545 = vmatpush.msrb.mxu1 %v8725_v6  ;;  %v7304_v6 = vrot.slane %v14584_v9, 3 }
 0x81d   : > { %v13502_v54 = vadd.f32 %v6636_v8, %v13352_v26  ;;  %7412 = vmatmul.f32.gmra.mxu1 %v7259_v62  ;;  %v13506_v57 = vadd.f32 %v6610_v4, %v6576_v12  ;;  %v6613_v32 = vpop.f32.mrf.mxu2  ;;  %v7293_v26 = vsel %vm1418_vm4, %v7280_v46, %v7292_v50  ;;  %v8765_v4 = vld [vmem:[%s14124_s11 + $0xbe8] sm:$0xff]  ;;  %v8736_v12 = vld [vmem:[%s14124_s11 + $0xb00] sm:$0xff]  ;;  %v8724_v46 = vld [vmem:[%s14124_s11 + $0xad0] sm:$0xff]  ;;  %v6544_v8 = vadd.f32 %v13410_v40, %v13408_v2 }
 0x81e   : > { %7797 = vmatpush.msra.mxu2 %v8737_v24  ;;  %7820 = vmatpush.msrb.mxu3 %v8765_v4  ;;  %v7285_v38 = vsel %vm1418_vm4, %v7272_v11, %v7284_v34  ;;  %v8723_v2 = vld [vmem:[%s14124_s11 + $0xac8] sm:$0xff]  ;;  %v8763_v40 = vld [vmem:[%s14124_s11 + $0xbd8] sm:$0xff]  ;;  %v14585_v4 = vld [vmem:[#allocation112_spill] sm:$0xff] }
 0x81f   : > { %7386 = vmatmul.f32.gmra.mxu0 %v7293_v26  ;;  %7546 = vmatpush.msrb.mxu1 %v8724_v46  ;;  %v7271_v26 = vsel %vm1418_vm4, %v7258_v17, %v7270_v48  ;;  %v7247_v11 = vrot.slane %v14585_v4, 3  ;;  %v8722_v17 = vld [vmem:[%s14124_s11 + $0xac0] sm:$0xff] }
 0x820   : > { %7798 = vmatpush.msra.mxu2 %v8736_v12  ;;  %7821 = vmatpush.msrb.mxu3 %v8764_v30  ;;  %v8781_v12 = vld [vmem:[%s14124_s11 + $0xc68] sm:$0xff]  ;;  %v8780_v30 = vld [vmem:[%s14124_s11 + $0xc60] sm:$0xff] }
 0x821   : > { %8641 = vmatmul.msk.f32.gmra.mxu3 %vm6279_vm8, %v6890_v28  ;;  %v14586_v28 = vld [vmem:[#allocation111_spill] sm:$0xff]  ;;  %7854 = vmatpush.msra.mxu0 %v8782_v52 }
 0x822   : > { %v6578_v62 = vpop.f32.mrf.mxu1  ;;  %7453 = vmatmul.f32.gmra.mxu2 %v7285_v38  ;;  %v7248_v46 = vrot.slane %v14586_v28, 3  ;;  %7547 = vmatpush.msrb.mxu1 %v8723_v2 }
 0x823   : > { %v6579_v29 = vadd.f32 %v6578_v62, %v6544_v8  ;;  %7822 = vmatpush.msrb.mxu3 %v8763_v40  ;;  %7855 = vmatpush.msra.mxu0 %v8781_v12  ;;  %v8779_v40 = vld [vmem:[%s14124_s11 + $0xc58] sm:$0xff] }
 0x824   : > { %v6639_v24 = vpop.f32.mrf.mxu3  ;;  %v13560_v8 = vpop.f32.mrf.mxu0  ;;  %v7249_v52 = vsel %vm1418_vm4, %v7247_v11, %v7248_v46  ;;  %7548 = vmatpush.msrb.mxu1 %v8722_v17  ;;  %v8778_v11 = vld [vmem:[%s14124_s11 + $0xc50] sm:$0xff] }
 0x825   : > { %v13558_v31 = vadd.f32 %v6639_v24, %v13412_v55  ;;  %14588 = vst [vmem:[#allocation59_spill] sm:$0xff] %v13560_v8  ;;  %7415 = vmatmul.f32.gmra.mxu1 %v7271_v26  ;;  %v13562_v62 = vadd.f32 %v6613_v32, %v6579_v29  ;;  %v6616_v38 = vpop.f32.mrf.mxu2  ;;  %v7305_v55 = vsel %vm1418_vm4, %v7292_v50, %v7304_v6  ;;  %v7296_v24 = vrot.slane %v12407_v49, 3  ;;  %v8762_v32 = vld [vmem:[%s14124_s11 + $0xbd0] sm:$0xff]  ;;  %v14589_v29 = vld [vmem:[#allocation27_spill] sm:$0xff] }
 0x826   : > { %v7282_v2 = vrot.slane %v14589_v29, 3  ;;  %v6547_v50 = vadd.f32 %v13454_v58, %v13452_v19  ;;  %v8761_v6 = vld [vmem:[%s14124_s11 + $0xbc8] sm:$0xff]  ;;  %7856 = vmatpush.msra.mxu0 %v8780_v30  ;;  %7823 = vmatpush.msrb.mxu3 %v8762_v32  ;;  %v8760_v19 = vld [vmem:[%s14124_s11 + $0xbc0] sm:$0xff]  ;;  %v7262_v32 = vrot.slane %v12394_v41, 3 }
 0x827   : > { %14587 = vst [vmem:[#allocation109_spill] sm:$0xff] %v13558_v31  ;;  %7389 = vmatmul.f32.gmra.mxu0 %v7305_v55  ;;  %v7297_v17 = vsel %vm1418_vm4, %v7284_v34, %v7296_v24  ;;  %v14590_v55 = vld [vmem:[#allocation31_spill] sm:$0xff] }
 0x828   : > { %v7250_v8 = vrot.slane %v14590_v55, 3  ;;  %v14591_v31 = vld [vmem:[#allocation115_spill] sm:$0xff]  ;;  %7857 = vmatpush.msra.mxu0 %v8779_v40  ;;  %v7283_v30 = vsel %vm1418_vm4, %v7270_v48, %v7282_v2  ;;  %7824 = vmatpush.msrb.mxu3 %v8761_v6  ;;  %v8759_v40 = vld [vmem:[%s14124_s11 + $0xbb8] sm:$0xff] }
 0x829   : > { %7479 = vmatmul.f32.vlgmr.msra.gmra.mxu3 %v7249_v52  ;;  %v7251_v49 = vrot.slane %v14591_v31, 3  ;;  %v8777_v34 = vld [vmem:[%s14124_s11 + $0xc48] sm:$0xff]  ;;  %v8815_v48 = vld [vmem:[%s14124_s11 + $0xd78] sm:$0xff] }
 0x82a   : > { %v6581_v26 = vpop.f32.mrf.mxu1  ;;  %7456 = vmatmul.f32.gmra.mxu2 %v7297_v17  ;;  %7858 = vmatpush.msra.mxu0 %v8778_v11  ;;  %v8758_v11 = vld [vmem:[%s14124_s11 + $0xbb0] sm:$0xff] }
 0x82b   : > { %v6582_v12 = vadd.f32 %v6581_v26, %v6547_v50  ;;  %7825 = vmatpush.msrb.mxu3 %v8760_v19  ;;  %7923 = vmatpush.msrb.mxu2 %v8815_v48  ;;  %v8814_v17 = vld [vmem:[%s14124_s11 + $0xd70] sm:$0xff]  ;;  %v7263_v19 = vsel %vm1418_vm4, %v7248_v46, %v7262_v32  ;;  %v8757_v48 = vld [vmem:[%s14124_s11 + $0xba8] sm:$0xff] }
 0x82c   : > { %v6642_v58 = vpop.f32.mrf.mxu3  ;;  %v13604_v50 = vpop.f32.mrf.mxu0  ;;  %7859 = vmatpush.msra.mxu0 %v8777_v34  ;;  %v8813_v46 = vld [vmem:[%s14124_s11 + $0xd68] sm:$0xff] }
 0x82d   : > { %v13602_v52 = vadd.f32 %v6642_v58, %v13456_v36  ;;  %14593 = vst [vmem:[#allocation76_spill] sm:$0xff] %v13604_v50  ;;  %7418 = vmatmul.f32.gmra.mxu1 %v7283_v30  ;;  %v13606_v26 = vadd.f32 %v6616_v38, %v6582_v12  ;;  %v8776_v36 = vld [vmem:[%s14124_s11 + $0xc40] sm:$0xff]  ;;  %v13617_v6 = vpop.f32.mrf.mxu2  ;;  %v7252_v38 = vsel %vm1418_vm4, %v7250_v8, %v7251_v49  ;;  %v7308_v12 = vrot.slane %v12454_v51, 3  ;;  %v14594_v58 = vld [vmem:[#allocation24_spill] sm:$0xff]  ;;  %v8775_v8 = vld [vmem:[%s14124_s11 + $0xc38] sm:$0xff] }
 0x82e   : > { %v7294_v30 = vrot.slane %v14594_v58, 3  ;;  %7826 = vmatpush.msrb.mxu3 %v8759_v40  ;;  %7860 = vmatpush.msra.mxu0 %v8776_v36  ;;  %v8774_v36 = vld [vmem:[%s14124_s11 + $0xc30] sm:$0xff] }
 0x82f   : > { %14592 = vst [vmem:[#allocation14_spill] sm:$0xff] %v13602_v52  ;;  %7514 = vmatmul.f32.vlgmr.msrb.gmra.mxu0 %v7252_v38  ;;  %7924 = vmatpush.msrb.mxu2 %v8814_v17  ;;  %v7309_v40 = vsel %vm1418_vm4, %v7296_v24, %v7308_v12  ;;  %v14595_v38 = vld [vmem:[#allocation66_spill] sm:$0xff]  ;;  %v14185_v17 = vrot.slane %v12441_v44, 3 }
 0x830   : > { %7827 = vmatpush.msrb.mxu3 %v8758_v11  ;;  %v7264_v50 = vrot.slane %v14595_v38, 3  ;;  %7861 = vmatpush.msra.mxu0 %v8775_v8  ;;  %v7295_v11 = vsel %vm1418_vm4, %v7282_v2, %v7294_v30  ;;  %v8812_v24 = vld [vmem:[%s14124_s11 + $0xd60] sm:$0xff]  ;;  %v8755_v8 = vld [vmem:[%s14124_s11 + $0xb98] sm:$0xff]  ;;  %v8773_v2 = vld [vmem:[%s14124_s11 + $0xc28] sm:$0xff] }
 0x831   : > { %7482 = vmatmul.f32.gmra.mxu3 %v7263_v19  ;;  %v8756_v19 = vld [vmem:[%s14124_s11 + $0xba0] sm:$0xff]  ;;  %7925 = vmatpush.msrb.mxu2 %v8813_v46  ;;  %v7663_v46 = vrot.slane %v11948_v27, 4 }
 0x832   : > { %v13635_v34 = vpop.f32.mrf.mxu1  ;;  %7459 = vmatmul.f32.gmra.mxu2 %v7309_v40  ;;  %7828 = vmatpush.msrb.mxu3 %v8757_v48  ;;  %v8799_v48 = vld [vmem:[%s14124_s11 + $0xcf8] sm:$0xff]  ;;  %v7664_v40 = vrot.slane %v11993_v25, 4  ;;  %v8772_v27 = vld [vmem:[%s14124_s11 + $0xc20] sm:$0xff]  ;;  %v8798_v25 = vld [vmem:[%s14124_s11 + $0xcf0] sm:$0xff] }
 0x833   : > { %7862 = vmatpush.msra.mxu0 %v8774_v36  ;;  %7926 = vmatpush.msrb.mxu2 %v8812_v24  ;;  %v8811_v36 = vld [vmem:[%s14124_s11 + $0xd58] sm:$0xff]  ;;  %v8753_v24 = vld [vmem:[%s14124_s11 + $0xb88] sm:$0xff] }
 0x834   : > { %v6645_v52 = vpop.f32.mrf.mxu3  ;;  %v13656_v51 = vpop.f32.mrf.mxu0  ;;  %7829 = vmatpush.msrb.mxu3 %v8756_v19  ;;  %v8754_v19 = vld [vmem:[%s14124_s11 + $0xb90] sm:$0xff]  ;;  %7888 = vmatpush.msra.mxu1 %v8799_v48 }
 0x835   : > { %v13654_v12 = vadd.f32 %v6645_v52, %v13506_v57  ;;  %14597 = vst [vmem:[#allocation105_spill] sm:$0xff] %v13656_v51  ;;  %7421 = vmatmul.f32.gmra.mxu1 %v7295_v11  ;;  %v13667_v57 = vpop.f32.mrf.mxu2  ;;  %v7265_v52 = vsel %vm1418_vm4, %v7251_v49, %v7264_v50  ;;  %v7275_v11 = vsel %vm1418_vm4, %v7262_v32, %v14185_v17  ;;  %v7306_v49 = vrot.slane %v12279_v42, 3  ;;  %v8810_v32 = vld [vmem:[%s14124_s11 + $0xd50] sm:$0xff] }
 0x836   : > { %7830 = vmatpush.msrb.mxu3 %v8755_v8  ;;  %7863 = vmatpush.msra.mxu0 %v8773_v2  ;;  %v7665_v8 = vsel %vm1416_vm2, %v7663_v46, %v7664_v40  ;;  %v8752_v2 = vld [vmem:[%s14124_s11 + $0xb80] sm:$0xff]  ;;  %v7286_v17 = vrot.slane %v12488_v13, 3  ;;  %v8809_v46 = vld [vmem:[%s14124_s11 + $0xd48] sm:$0xff] }
 0x837   : > { %14596 = vst [vmem:[#allocation65_spill] sm:$0xff] %v13654_v12  ;;  %7517 = vmatmul.f32.gmra.mxu0 %v7265_v52  ;;  %7927 = vmatpush.msrb.mxu2 %v8811_v36  ;;  %v7276_v52 = vrot.slane %v12389_v15, 3  ;;  %v7307_v36 = vsel %vm1418_vm4, %v7294_v30, %v7306_v49  ;;  %v8770_v30 = vld [vmem:[%s14124_s11 + $0xc10] sm:$0xff] }
 0x838   : > { %7831 = vmatpush.msrb.mxu3 %v8754_v19  ;;  %7864 = vmatpush.msra.mxu0 %v8772_v27  ;;  %v8797_v27 = vld [vmem:[%s14124_s11 + $0xce8] sm:$0xff] }
 0x839   : > { %7485 = vmatmul.f32.gmra.mxu3 %v7275_v11  ;;  %v8771_v11 = vld [vmem:[%s14124_s11 + $0xc18] sm:$0xff]  ;;  %7889 = vmatpush.msra.mxu1 %v8798_v25  ;;  %v7277_v25 = vsel %vm1418_vm4, %v7264_v50, %v7276_v52 }
 0x83a   : > { %v13691_v48 = vpop.f32.mrf.mxu1  ;;  %7799 = vmatmul.f32.vlgmr.msra.gmra.mxu2 %v7665_v8  ;;  %7832 = vmatpush.msrb.mxu3 %v8753_v24  ;;  %v7681_v24 = vrot.slane %v12035_v61, 4  ;;  %v7254_v8 = vrot.slane %v12468_v33, 3  ;;  %v8769_v61 = vld [vmem:[%s14124_s11 + $0xc08] sm:$0xff]  ;;  %v8795_v50 = vld [vmem:[%s14124_s11 + $0xcd8] sm:$0xff] }
 0x83b   : > { %7928 = vmatpush.msrb.mxu2 %v8810_v32  ;;  %7865 = vmatpush.msra.mxu0 %v8771_v11  ;;  %v8796_v32 = vld [vmem:[%s14124_s11 + $0xce0] sm:$0xff] }
 0x83c   : > { %v6648_v19 = vpop.f32.mrf.mxu3  ;;  %v13715_v12 = vpop.f32.mrf.mxu0  ;;  %7833 = vmatpush.msrb.mxu3 %v8752_v2  ;;  %7890 = vmatpush.msra.mxu1 %v8797_v27  ;;  %v14600_v2 = vrot.slane %v12441_v44, 3  ;;  %v7682_v27 = vsel %vm1416_vm2, %v7664_v40, %v7681_v24  ;;  %v8806_v40 = vld [vmem:[%s14124_s11 + $0xd30] sm:$0xff] }
 0x83d   : > { %v13713_v51 = vadd.f32 %v6648_v19, %v13562_v62  ;;  %14599 = vst [vmem:[#allocation150_spill] sm:$0xff] %v13715_v12  ;;  %7424 = vmatmul.f32.gmra.mxu1 %v7307_v36  ;;  %v13720_v49 = vpop.f32.mrf.mxu2  ;;  %7929 = vmatpush.msrb.mxu2 %v8809_v46  ;;  %v8808_v62 = vld [vmem:[%s14124_s11 + $0xd40] sm:$0xff]  ;;  %v7253_v19 = vrot.slane %v12421_v45, 3  ;;  %v8807_v46 = vld [vmem:[%s14124_s11 + $0xd38] sm:$0xff] }
 0x83e   : > { %v7287_v11 = vsel %vm1418_vm4, %v14600_v2, %v7286_v17  ;;  %7866 = vmatpush.msra.mxu0 %v8770_v30  ;;  %7891 = vmatpush.msra.mxu1 %v8796_v32  ;;  %v8768_v30 = vld [vmem:[%s14124_s11 + $0xc00] sm:$0xff]  ;;  %v8794_v2 = vld [vmem:[%s14124_s11 + $0xcd0] sm:$0xff]  ;;  %v7298_v32 = vrot.slane %v12532_v3, 3 }
 0x83f   : > { %14598 = vst [vmem:[#allocation113_spill] sm:$0xff] %v13713_v51  ;;  %7520 = vmatmul.f32.gmra.mxu0 %v7277_v25  ;;  %7930 = vmatpush.msrb.mxu2 %v8808_v62  ;;  %v7288_v25 = vrot.slane %v12433_v1, 3  ;;  %v7255_v62 = vsel %vm1418_vm4, %v7253_v19, %v7254_v8 }
 0x840   : > { %7867 = vmatpush.msra.mxu0 %v8769_v61  ;;  %7892 = vmatpush.msra.mxu1 %v8795_v50  ;;  %v8805_v50 = vld [vmem:[%s14124_s11 + $0xd28] sm:$0xff] }
 0x841   : > { %7488 = vmatmul.f32.gmra.mxu3 %v7287_v11  ;;  %7931 = vmatpush.msrb.mxu2 %v8807_v46  ;;  %v8792_v46 = vld [vmem:[%s14124_s11 + $0xcc0] sm:$0xff] }
 0x842   : > { %v13741_v36 = vpop.f32.mrf.mxu1  ;;  %7802 = vmatmul.f32.gmra.mxu2 %v7682_v27  ;;  %v8793_v27 = vld [vmem:[%s14124_s11 + $0xcc8] sm:$0xff]  ;;  %7868 = vmatpush.msra.mxu0 %v8768_v30  ;;  %v7266_v30 = vrot.slane %v12507_v22, 3 }
 0x843   : > { %7893 = vmatpush.msra.mxu1 %v8794_v2  ;;  %7932 = vmatpush.msrb.mxu2 %v8806_v40  ;;  %v8804_v2 = vld [vmem:[%s14124_s11 + $0xd20] sm:$0xff] }
 0x844   : > { %v6651_v11 = vpop.f32.mrf.mxu3  ;;  %v13762_v12 = vpop.f32.mrf.mxu0 }
 0x845   : > { %v13760_v61 = vadd.f32 %v6651_v11, %v13606_v26  ;;  %14602 = vst [vmem:[#allocation153_spill] sm:$0xff] %v13762_v12  ;;  %8730 = vmatmul.msk.f32.vlgmr.msrb.gmra.mxu1 %vm6279_vm8, %v7255_v62  ;;  %v13771_v19 = vpop.f32.mrf.mxu2  ;;  %v7289_v26 = vsel %vm1418_vm4, %v7276_v52, %v7288_v25  ;;  %v7693_v11 = vrot.slane %v12062_v43, 4  ;;  %v7299_v62 = vsel %vm1418_vm4, %v7286_v17, %v7298_v32  ;;  %v8791_v43 = vld [vmem:[%s14124_s11 + $0xcb8] sm:$0xff] }
 0x846   : > { %7894 = vmatpush.msra.mxu1 %v8793_v27  ;;  %7933 = vmatpush.msrb.mxu2 %v8805_v50  ;;  %v8803_v17 = vld [vmem:[%s14124_s11 + $0xd18] sm:$0xff]  ;;  %v7300_v27 = vrot.slane %v12482_v7, 3  ;;  %v8790_v50 = vld [vmem:[%s14124_s11 + $0xcb0] sm:$0xff]  ;;  %v7310_v12 = vrot.slane %v12574_v14, 3 }
 0x847   : > { %14601 = vst [vmem:[#allocation152_spill] sm:$0xff] %v13760_v61  ;;  %7523 = vmatmul.f32.gmra.mxu0 %v7289_v26  ;;  %v7694_v40 = vsel %vm1416_vm2, %v7681_v24, %v7693_v11 }
 0x848   : > { %7895 = vmatpush.msra.mxu1 %v8792_v46  ;;  %7934 = vmatpush.msrb.mxu2 %v8804_v2  ;;  %v8802_v46 = vld [vmem:[%s14124_s11 + $0xd10] sm:$0xff]  ;;  %v8789_v2 = vld [vmem:[%s14124_s11 + $0xca8] sm:$0xff]  ;;  %v7301_v51 = vsel %vm1418_vm4, %v7288_v25, %v7300_v27 }
 0x849   : > { %7491 = vmatmul.f32.gmra.mxu3 %v7299_v62  ;;  %v7267_v62 = vsel %vm1418_vm4, %v7254_v8, %v7266_v30  ;;  %v8801_v8 = vld [vmem:[%s14124_s11 + $0xd08] sm:$0xff] }
 0x84a   : > { %v13786_v52 = vpop.f32.mrf.mxu1  ;;  %7805 = vmatmul.f32.gmra.mxu2 %v7694_v40  ;;  %7896 = vmatpush.msra.mxu1 %v8791_v43 }
 0x84b   : > { %7935 = vmatpush.msrb.mxu2 %v8803_v17  ;;  %v8788_v17 = vld [vmem:[%s14124_s11 + $0xca0] sm:$0xff] }
 0x84c   : > { %v6985_v26 = vpop.f32.mrf.mxu3  ;;  %v7020_v61 = vpop.f32.mrf.mxu0  ;;  %7897 = vmatpush.msra.mxu1 %v8790_v50  ;;  %v7311_v50 = vsel %vm1418_vm4, %v7298_v32, %v7310_v12  ;;  %v7312_v12 = vrot.slane %v12526_v18, 3  ;;  %v8786_v32 = vld [vmem:[%s14124_s11 + $0xc90] sm:$0xff] }
 0x84d   : > { %v6986_v24 = vadd.f32 %v6985_v26, %v13617_v6  ;;  %8731 = vmatmul.msk.f32.gmra.mxu1 %vm6279_vm8, %v7267_v62  ;;  %v13811_v40 = vpop.f32.mrf.mxu2  ;;  %v7705_v6 = vrot.slane %v14577_v39, 4  ;;  %7936 = vmatpush.msrb.mxu2 %v8802_v46  ;;  %v7278_v26 = vrot.slane %v12554_v56, 3  ;;  %v8787_v39 = vld [vmem:[%s14124_s11 + $0xc98] sm:$0xff] }
 0x84e   : > { %7898 = vmatpush.msra.mxu1 %v8789_v2  ;;  %v7667_v2 = vrot.slane %v14576_v63, 4  ;;  %v8784_v63 = vld [vmem:[%s14124_s11 + $0xc80] sm:$0xff] }
 0x84f   : > { %v13809_v43 = vadd.f32 %v7020_v61, %v6986_v24  ;;  %7526 = vmatmul.f32.gmra.mxu0 %v7301_v51  ;;  %v8800_v61 = vld [vmem:[%s14124_s11 + $0xd00] sm:$0xff]  ;;  %7937 = vmatpush.msrb.mxu2 %v8801_v8  ;;  %v7706_v51 = vsel %vm1416_vm2, %v7693_v11, %v7705_v6  ;;  %v7279_v46 = vsel %vm1418_vm4, %v7266_v30, %v7278_v26  ;;  %v7666_v24 = vrot.slane %v14575_v23, 4  ;;  %v8785_v11 = vld [vmem:[%s14124_s11 + $0xc88] sm:$0xff] }
 0x850   : > { %7899 = vmatpush.msra.mxu1 %v8788_v17  ;;  %v7313_v30 = vsel %vm1418_vm4, %v7300_v27, %v7312_v12  ;;  %v7717_v23 = vrot.slane %v14581_v35, 4  ;;  %v8823_v27 = vld [vmem:[%s14124_s11 + $0xdb8] sm:$0xff]  ;;  %v7669_v12 = vrot.slane %v12205_v21, 4  ;;  %v8821_v21 = vld [vmem:[%s14124_s11 + $0xda8] sm:$0xff] }
 0x851   : > { %7494 = vmatmul.f32.gmra.mxu3 %v7311_v50  ;;  %7938 = vmatpush.msrb.mxu2 %v8800_v61 }
 0x852   : > { %v13826_v25 = vpop.f32.mrf.mxu1  ;;  %7808 = vmatmul.f32.gmra.mxu2 %v7706_v51  ;;  %7900 = vmatpush.msra.mxu1 %v8787_v39  ;;  %v7290_v39 = vrot.slane %v12592_v16, 3  ;;  %v7718_v35 = vsel %vm1416_vm2, %v7705_v6, %v7717_v23 }
 0x853   : > { %7966 = vmatpush.msra.mxu3 %v8823_v27  ;;  %v8819_v27 = vld [vmem:[%s14124_s11 + $0xd98] sm:$0xff] }
 0x854   : > { %v6988_v62 = vpop.f32.mrf.mxu3  ;;  %v7023_v17 = vpop.f32.mrf.mxu0  ;;  %7901 = vmatpush.msra.mxu1 %v8786_v32  ;;  %v7670_v32 = vrot.slane %v12230_v53, 4 }
 0x855   : > { %v6989_v8 = vadd.f32 %v6988_v62, %v13667_v57  ;;  %8732 = vmatmul.msk.f32.gmra.mxu1 %vm6279_vm8, %v7279_v46  ;;  %v13843_v61 = vpop.f32.mrf.mxu2  ;;  %v7668_v57 = vsel %vm1416_vm2, %v7666_v24, %v7667_v2  ;;  %v7291_v46 = vsel %vm1418_vm4, %v7278_v26, %v7290_v39  ;;  %v7683_v24 = vrot.slane %v14580_v37, 4 }
 0x856   : > { %7902 = vmatpush.msra.mxu1 %v8785_v11  ;;  %v7671_v26 = vsel %vm1416_vm2, %v7669_v12, %v7670_v32  ;;  %v7729_v37 = vrot.slane %v14584_v9, 4  ;;  %v7685_v12 = vrot.slane %v14574_v59, 4  ;;  %v8817_v59 = vld [vmem:[%s14124_s11 + $0xd88] sm:$0xff] }
 0x857   : > { %v13841_v50 = vadd.f32 %v7023_v17, %v6989_v8  ;;  %7529 = vmatmul.f32.gmra.mxu0 %v7313_v30  ;;  %v8822_v8 = vld [vmem:[%s14124_s11 + $0xdb0] sm:$0xff]  ;;  %v7684_v30 = vsel %vm1416_vm2, %v7667_v2, %v7683_v24 }
 0x858   : > { %7903 = vmatpush.msra.mxu1 %v8784_v63  ;;  %7967 = vmatpush.msra.mxu3 %v8822_v8  ;;  %v8820_v63 = vld [vmem:[%s14124_s11 + $0xda0] sm:$0xff]  ;;  %v7730_v9 = vsel %vm1416_vm2, %v7717_v23, %v7729_v37  ;;  %v8818_v8 = vld [vmem:[%s14124_s11 + $0xd90] sm:$0xff]  ;;  %v7314_v37 = vrot.slane %v14582_v20, 3 }
 0x859   : > { %7834 = vmatmul.f32.vlgmr.msrb.gmra.mxu3 %v7668_v57 }
 0x85a   : > { %v13852_v51 = vpop.f32.mrf.mxu1  ;;  %7811 = vmatmul.f32.gmra.mxu2 %v7718_v35  ;;  %7968 = vmatpush.msra.mxu3 %v8821_v21  ;;  %v7675_v21 = vrot.slane %v14590_v55, 4  ;;  %v7697_v55 = vrot.slane %v14579_v60, 4 }
 0x85c   : > { %v6991_v62 = vpop.f32.mrf.mxu3  ;;  %v7026_v11 = vpop.f32.mrf.mxu0  ;;  %7969 = vmatpush.msra.mxu3 %v8820_v63 }
 0x85d   : > { %v6992_v17 = vadd.f32 %v6991_v62, %v13720_v49  ;;  %8733 = vmatmul.msk.f32.gmra.mxu1 %vm6279_vm8, %v7291_v46  ;;  %v7090_v6 = vpop.f32.mrf.mxu2  ;;  %v7302_v49 = vrot.slane %v14578_v47, 3  ;;  %v7695_v46 = vrot.slane %v14583_v0, 4  ;;  %v7686_v0 = vsel %vm1416_vm2, %v7670_v32, %v7685_v12 }
 0x85e   : > { %7970 = vmatpush.msra.mxu3 %v8819_v27 }
 0x85f   : > { %v7027_v53 = vadd.f32 %v7026_v11, %v6992_v17  ;;  %7869 = vmatmul.f32.vlgmr.msra.gmra.mxu0 %v7671_v26  ;;  %v7303_v62 = vsel %vm1418_vm4, %v7290_v39, %v7302_v49  ;;  %v7676_v26 = vrot.slane %v14591_v31, 4 }
 0x860   : > { %7971 = vmatpush.msra.mxu3 %v8818_v8  ;;  %v7689_v8 = vrot.slane %v14595_v38, 4  ;;  %v7719_v38 = vrot.slane %v14594_v58, 4  ;;  %v6672_v58 = vadd.f32 %v13504_v5, %v13502_v54 }
 0x861   : > { %7837 = vmatmul.f32.gmra.mxu3 %v7684_v30  ;;  %v7677_v32 = vsel %vm1416_vm2, %v7675_v21, %v7676_v26 }
 0x862   : > { %v7055_v57 = vpop.f32.mrf.mxu1  ;;  %7814 = vmatmul.f32.gmra.mxu2 %v7730_v9  ;;  %7972 = vmatpush.msra.mxu3 %v8817_v59  ;;  %v7709_v59 = vrot.slane %v12368_v10, 4 }
 0x863   : > { %v7056_v35 = vadd.f32 %v7055_v57, %v13809_v43  ;;  %v7707_v57 = vrot.slane %v14589_v29, 4 }
 0x864   : > { %v6994_v2 = vpop.f32.mrf.mxu3  ;;  %v7029_v11 = vpop.f32.mrf.mxu0 }
 0x865   : > { %v6995_v17 = vadd.f32 %v6994_v2, %v13771_v19  ;;  %8734 = vmatmul.msk.f32.gmra.mxu1 %vm6279_vm8, %v7303_v62  ;;  %v13890_v43 = vadd.f32 %v7090_v6, %v7056_v35  ;;  %v7093_v39 = vpop.f32.mrf.mxu2  ;;  %v7696_v19 = vsel %vm1416_vm2, %v7683_v24, %v7695_v46  ;;  %v8816_v6 = vld [vmem:[%s14124_s11 + $0xd80] sm:$0xff]  ;;  %v7315_v24 = vsel %vm1418_vm4, %v7302_v49, %v7314_v37 }
 0x866   : > { %7973 = vmatpush.msra.mxu3 %v8816_v6  ;;  %v7708_v60 = vsel %vm1416_vm2, %v7695_v46, %v7707_v57  ;;  %v7673_v49 = vrot.slane %v14586_v28, 4  ;;  %v7720_v10 = vsel %vm1416_vm2, %v7707_v57, %v7719_v38 }
 0x867   : > { %v7030_v23 = vadd.f32 %v7029_v11, %v6995_v17  ;;  %7872 = vmatmul.f32.gmra.mxu0 %v7686_v0  ;;  %v7672_v17 = vrot.slane %v14585_v4, 4  ;;  %v7690_v11 = vsel %vm1416_vm2, %v7676_v26, %v7689_v8  ;;  %v7701_v26 = vrot.slane %v12389_v15, 4 }
 0x868   : > { %v7731_v15 = vrot.slane %v12279_v42, 4 }
 0x869   : > { %7840 = vmatmul.f32.gmra.mxu3 %v7696_v19  ;;  %v7687_v19 = vrot.slane %v12394_v41, 4  ;;  %v7702_v6 = vsel %vm1416_vm2, %v7689_v8, %v7701_v26 }
 0x86a   : > { %v7058_v30 = vpop.f32.mrf.mxu1  ;;  %7939 = vmatmul.f32.vlgmr.msrb.gmra.mxu2 %v7677_v32 }
 0x86b   : > { %v7059_v63 = vadd.f32 %v7058_v30, %v13841_v50  ;;  %v7698_v50 = vsel %vm1416_vm2, %v7685_v12, %v7697_v55  ;;  %v7674_v12 = vsel %vm1416_vm2, %v7672_v17, %v7673_v49  ;;  %v14603_v30 = vld [vmem:[#allocation108_spill] sm:$0xff]  ;;  %v14606_v17 = vld [vmem:[#allocation119_spill] sm:$0xff] }
 0x86c   : > { %v6997_v31 = vpop.f32.mrf.mxu3  ;;  %v7032_v35 = vpop.f32.mrf.mxu0 }
 0x86d   : > { %v6998_v27 = vadd.f32 %v6997_v31, %v13811_v40  ;;  %8735 = vmatmul.msk.f32.gmra.mxu1 %vm6279_vm8, %v7315_v24  ;;  %v7094_v9 = vadd.f32 %v7093_v39, %v7059_v63  ;;  %v7096_v62 = vpop.f32.mrf.mxu2  ;;  %v7721_v63 = vrot.slane %v14603_v30, 4  ;;  %v6707_v31 = vadd.f32 %v13635_v34, %v6672_v58  ;;  %v14604_v34 = vld [vmem:[#allocation109_spill] sm:$0xff] }
 0x86f   : > { %v7033_v2 = vadd.f32 %v7032_v35, %v6998_v27  ;;  %7875 = vmatmul.f32.gmra.mxu0 %v7698_v50  ;;  %v7722_v5 = vsel %vm1416_vm2, %v7709_v59, %v7721_v63  ;;  %v7732_v35 = vsel %vm1416_vm2, %v7719_v38, %v7731_v15  ;;  %v14605_v50 = vld [vmem:[#allocation59_spill] sm:$0xff] }
 0x871   : > { %7843 = vmatmul.f32.gmra.mxu3 %v7708_v60 }
 0x872   : > { %v7061_v29 = vpop.f32.mrf.mxu1  ;;  %7942 = vmatmul.f32.gmra.mxu2 %v7690_v11 }
 0x873   : > { %v7062_v40 = vadd.f32 %v7061_v29, %v7027_v53  ;;  %v7710_v53 = vsel %vm1416_vm2, %v7697_v55, %v7709_v59  ;;  %v7688_v55 = vsel %vm1416_vm2, %v7673_v49, %v7687_v19  ;;  %v7733_v49 = vrot.slane %v14606_v17, 4 }
 0x874   : > { %v7000_v39 = vpop.f32.mrf.mxu3  ;;  %v7035_v46 = vpop.f32.mrf.mxu0  ;;  %v7679_v29 = vrot.slane %v12468_v33, 4 }
 0x875   : > { %v7001_v0 = vadd.f32 %v7000_v39, %v13843_v61  ;;  %7904 = vmatmul.f32.vlgmr.msra.gmra.mxu1 %v7674_v12  ;;  %v13920_v4 = vadd.f32 %v7096_v62, %v7062_v40  ;;  %v7099_v21 = vpop.f32.mrf.mxu2  ;;  %v7699_v62 = vrot.slane %v12441_v44, 4  ;;  %v7678_v12 = vrot.slane %v12421_v45, 4 }
 0x877   : > { %v7036_v28 = vadd.f32 %v7035_v46, %v7001_v0  ;;  %7878 = vmatmul.f32.gmra.mxu0 %v7710_v53  ;;  %v7734_v0 = vsel %vm1416_vm2, %v7721_v63, %v7733_v49  ;;  %v7725_v46 = vrot.slane %v12482_v7, 4  ;;  %v7680_v33 = vsel %vm1416_vm2, %v7678_v12, %v7679_v29  ;;  %v14608_v53 = vld [vmem:[#allocation76_spill] sm:$0xff] }
 0x878   : > { %v7691_v7 = vrot.slane %v12507_v22, 4  ;;  %v14609_v22 = vld [vmem:[#allocation65_spill] sm:$0xff] }
 0x879   : > { %7846 = vmatmul.f32.gmra.mxu3 %v7720_v10 }
 0x87a   : > { %v7064_v37 = vpop.f32.mrf.mxu1  ;;  %7945 = vmatmul.f32.gmra.mxu2 %v7702_v6 }
 0x87b   : > { %v7065_v61 = vadd.f32 %v7064_v37, %v7030_v23  ;;  %v7713_v23 = vrot.slane %v12433_v1, 4  ;;  %v7700_v1 = vsel %vm1416_vm2, %v7687_v19, %v7699_v62 }
 0x87c   : > { %v7125_v32 = vpop.f32.mrf.mxu3  ;;  %v7375_v24 = vpop.f32.mrf.mxu0 }
 0x87d   : > { %v7126_v41 = vadd.f32 %v7125_v32, %v13890_v43  ;;  %7907 = vmatmul.f32.gmra.mxu1 %v7688_v55  ;;  %v7100_v57 = vadd.f32 %v7099_v21, %v7065_v61  ;;  %v7102_v54 = vpop.f32.mrf.mxu2  ;;  %v6675_v43 = vadd.f32 %v14605_v50, %v14604_v34  ;;  %v7714_v60 = vsel %vm1416_vm2, %v7701_v26, %v7713_v23 }
 0x87e   : > { %v7711_v21 = vrot.slane %v12488_v13, 4  ;;  %v7726_v45 = vsel %vm1416_vm2, %v7713_v23, %v7725_v46  ;;  %v7692_v32 = vsel %vm1416_vm2, %v7679_v29, %v7691_v7  ;;  %v7723_v55 = vrot.slane %v12532_v3, 4 }
 0x87f   : > { %v13934_v27 = vadd.f32 %v7126_v41, %v6707_v31  ;;  %7881 = vmatmul.f32.gmra.mxu0 %v7722_v5  ;;  %v6710_v11 = vadd.f32 %v13691_v48, %v6675_v43  ;;  %v14610_v31 = vld [vmem:[#allocation105_spill] sm:$0xff]  ;;  %v7703_v23 = vrot.slane %v12554_v56, 4 }
 0x880   : > { %v7712_v37 = vsel %vm1416_vm2, %v7699_v62, %v7711_v21  ;;  %v7724_v5 = vsel %vm1416_vm2, %v7711_v21, %v7723_v55 }
 0x881   : > { %7849 = vmatmul.f32.gmra.mxu3 %v7732_v35  ;;  %v7704_v50 = vsel %vm1416_vm2, %v7691_v7, %v7703_v23  ;;  %v7739_v7 = vrot.slane %v14582_v20, 4 }
 0x882   : > { %v7067_v42 = vpop.f32.mrf.mxu1  ;;  %7948 = vmatmul.f32.gmra.mxu2 %v7714_v60  ;;  %v14612_v60 = vld [vmem:[#allocation150_spill] sm:$0xff] }
 0x883   : > { %v7068_v8 = vadd.f32 %v7067_v42, %v7033_v2 }
 0x884   : > { %v7128_v40 = vpop.f32.mrf.mxu3  ;;  %v7378_v44 = vpop.f32.mrf.mxu0 }
 0x885   : > { %v7129_v59 = vadd.f32 %v7128_v40, %v7094_v9  ;;  %7910 = vmatmul.f32.gmra.mxu1 %v7700_v1  ;;  %v7103_v39 = vadd.f32 %v7102_v54, %v7068_v8  ;;  %v7105_v2 = vpop.f32.mrf.mxu2  ;;  %v14607_v9 = vld [vmem:[#allocation14_spill] sm:$0xff]  ;;  %v14611_v8 = vld [vmem:[#allocation113_spill] sm:$0xff] }
 0x886   : > { %v6678_v26 = vadd.f32 %v14608_v53, %v14607_v9  ;;  %v6684_v17 = vadd.f32 %v14612_v60, %v14611_v8 }
 0x887   : > { %v13948_v38 = vadd.f32 %v7129_v59, %v6710_v11  ;;  %7884 = vmatmul.f32.gmra.mxu0 %v7734_v0  ;;  %v14614_v0 = vld [vmem:[#allocation153_spill] sm:$0xff] }
 0x888   : > { %v6713_v58 = vadd.f32 %v13741_v36, %v6678_v26  ;;  %v6681_v36 = vadd.f32 %v14610_v31, %v14609_v22  ;;  %v6719_v29 = vadd.f32 %v13826_v25, %v6684_v17 }
 0x889   : > { %8824 = vmatmul.msk.f32.vlgmr.msra.gmra.mxu3 %vm6279_vm8, %v7680_v33 }
 0x88a   : > { %v7070_v48 = vpop.f32.mrf.mxu1  ;;  %7951 = vmatmul.f32.gmra.mxu2 %v7726_v45 }
 0x88b   : > { %v7071_v10 = vadd.f32 %v7070_v48, %v7036_v28  ;;  %v7737_v28 = vrot.slane %v12526_v18, 4  ;;  %v6716_v18 = vadd.f32 %v13786_v52, %v6681_v36 }
 0x88c   : > { %v7131_v19 = vpop.f32.mrf.mxu3  ;;  %v7381_v6 = vpop.f32.mrf.mxu0 }
 0x88d   : > { %v7132_v61 = vadd.f32 %v7131_v19, %v13920_v4  ;;  %7913 = vmatmul.f32.gmra.mxu1 %v7712_v37  ;;  %v7106_v13 = vadd.f32 %v7105_v2, %v7071_v10  ;;  %v7445_v63 = vpop.f32.mrf.mxu2  ;;  %v7738_v4 = vsel %vm1416_vm2, %v7725_v46, %v7737_v28 }
 0x88f   : > { %v13962_v30 = vadd.f32 %v7132_v61, %v6713_v58 }
 0x891   : > { %8825 = vmatmul.msk.f32.gmra.mxu3 %vm6279_vm8, %v7692_v32 }
 0x892   : > { %v7410_v15 = vpop.f32.mrf.mxu1  ;;  %7954 = vmatmul.f32.gmra.mxu2 %v7738_v4 }
 0x893   : > { %v7411_v41 = vadd.f32 %v7410_v15, %v7375_v24  ;;  %v7735_v24 = vrot.slane %v12574_v14, 4 }
 0x894   : > { %v7134_v54 = vpop.f32.mrf.mxu3  ;;  %v7384_v34 = vpop.f32.mrf.mxu0 }
 0x895   : > { %v7135_v35 = vadd.f32 %v7134_v54, %v7100_v57  ;;  %7916 = vmatmul.f32.gmra.mxu1 %v7724_v5  ;;  %v7446_v3 = vadd.f32 %v7445_v63, %v7411_v41  ;;  %v7448_v42 = vpop.f32.mrf.mxu2  ;;  %v7736_v52 = vsel %vm1416_vm2, %v7723_v55, %v7735_v24  ;;  %v7715_v57 = vrot.slane %v12592_v16, 4 }
 0x896   : > { %v7727_v16 = vrot.slane %v14578_v47, 4 }
 0x897   : > { %v13974_v62 = vadd.f32 %v7135_v35, %v6716_v18  ;;  %v7716_v59 = vsel %vm1416_vm2, %v7703_v23, %v7715_v57 }
 0x898   : > { %v7728_v26 = vsel %vm1416_vm2, %v7715_v57, %v7727_v16 }
 0x899   : > { %8826 = vmatmul.msk.f32.gmra.mxu3 %vm6279_vm8, %v7704_v50 }
 0x89a   : > { %v7413_v43 = vpop.f32.mrf.mxu1 }
 0x89b   : > { %v7414_v56 = vadd.f32 %v7413_v43, %v7378_v44  ;;  %v14613_v44 = vld [vmem:[#allocation152_spill] sm:$0xff] }
 0x89c   : > { %v7137_v49 = vpop.f32.mrf.mxu3  ;;  %v7387_v12 = vpop.f32.mrf.mxu0  ;;  %v6687_v46 = vadd.f32 %v14614_v0, %v14613_v44 }
 0x89d   : > { %v7138_v40 = vadd.f32 %v7137_v49, %v7103_v39  ;;  %7919 = vmatmul.f32.gmra.mxu1 %v7736_v52  ;;  %v7449_v1 = vadd.f32 %v7448_v42, %v7414_v56  ;;  %v7451_v14 = vpop.f32.mrf.mxu2 }
 0x89e   : > { %v6722_v25 = vadd.f32 %v13852_v51, %v6687_v46  ;;  %v7740_v51 = vsel %vm1416_vm2, %v7727_v16, %v7739_v7 }
 0x89f   : > { %v13984_v11 = vadd.f32 %v7138_v40, %v6719_v29 }
 0x8a1   : > { %8827 = vmatmul.msk.f32.gmra.mxu3 %vm6279_vm8, %v7716_v59 }
 0x8a2   : > { %v7416_v2 = vpop.f32.mrf.mxu1 }
 0x8a3   : > { %v7417_v33 = vadd.f32 %v7416_v2, %v7381_v6 }
 0x8a4   : > { %v7140_v21 = vpop.f32.mrf.mxu3  ;;  %v7390_v19 = vpop.f32.mrf.mxu0 }
 0x8a5   : > { %v7141_v39 = vadd.f32 %v7140_v21, %v7106_v13  ;;  %v7452_v48 = vadd.f32 %v7451_v14, %v7417_v33  ;;  %v7454_v53 = vpop.f32.mrf.mxu2 }
 0x8a7   : > { %v13992_v9 = vadd.f32 %v7141_v39, %v6722_v25 }
 0x8a9   : > { %8828 = vmatmul.msk.f32.gmra.mxu3 %vm6279_vm8, %v7728_v26 }
 0x8aa   : > { %v7419_v10 = vpop.f32.mrf.mxu1 }
 0x8ab   : > { %v7420_v45 = vadd.f32 %v7419_v10, %v7384_v34 }
 0x8ac   : > { %v7480_v37 = vpop.f32.mrf.mxu3  ;;  %v7515_v55 = vpop.f32.mrf.mxu0 }
 0x8ad   : > { %v7481_v58 = vadd.f32 %v7480_v37, %v7446_v3  ;;  %v7455_v61 = vadd.f32 %v7454_v53, %v7420_v45  ;;  %v7457_v47 = vpop.f32.mrf.mxu2 }
 0x8af   : > { %v7516_v54 = vadd.f32 %v7515_v55, %v7481_v58 }
 0x8b1   : > { %8829 = vmatmul.msk.f32.gmra.mxu3 %vm6279_vm8, %v7740_v51 }
 0x8b2   : > { %v7422_v13 = vpop.f32.mrf.mxu1 }
 0x8b3   : > { %v7423_v6 = vadd.f32 %v7422_v13, %v7387_v12 }
 0x8b4   : > { %v7483_v63 = vpop.f32.mrf.mxu3  ;;  %v7518_v20 = vpop.f32.mrf.mxu0 }
 0x8b5   : > { %v7484_v28 = vadd.f32 %v7483_v63, %v7449_v1  ;;  %v7458_v32 = vadd.f32 %v7457_v47, %v7423_v6  ;;  %v7460_v15 = vpop.f32.mrf.mxu2 }
 0x8b7   : > { %v7519_v34 = vadd.f32 %v7518_v20, %v7484_v28 }
 0x8ba   : > { %v7425_v22 = vpop.f32.mrf.mxu1 }
 0x8bb   : > { %v7426_v31 = vadd.f32 %v7425_v22, %v7390_v19 }
 0x8bc   : > { %v7486_v36 = vpop.f32.mrf.mxu3  ;;  %v7521_v50 = vpop.f32.mrf.mxu0 }
 0x8bd   : > { %v7487_v41 = vadd.f32 %v7486_v36, %v7452_v48  ;;  %v7461_v4 = vadd.f32 %v7460_v15, %v7426_v31  ;;  %v7800_v18 = vpop.f32.mrf.mxu2 }
 0x8bf   : > { %v7522_v49 = vadd.f32 %v7521_v50, %v7487_v41  ;;  %v14020_v41 = vld [vmem:[%s14125_s12] ss:$0 sm:$0xff] }
 0x8c2   : > { %v7550_v5 = vpop.f32.mrf.mxu1 }
 0x8c3   : > { %v7551_v23 = vadd.f32 %v7550_v5, %v7516_v54 }
 0x8c4   : > { %v7489_v35 = vpop.f32.mrf.mxu3  ;;  %v7524_v29 = vpop.f32.mrf.mxu0 }
 0x8c5   : > { %v7568_v3 = vadd.f32 %v7551_v23, %v13934_v27  ;;  %v7490_v42 = vadd.f32 %v7489_v35, %v7455_v61  ;;  %v7803_v56 = vpop.f32.mrf.mxu2 }
 0x8c7   : > { %v7525_v59 = vadd.f32 %v7524_v29, %v7490_v42 }
 0x8ca   : > { %v7553_v24 = vpop.f32.mrf.mxu1 }
 0x8cb   : > { %v7554_v43 = vadd.f32 %v7553_v24, %v7519_v34 }
 0x8cc   : > { %v7492_v8 = vpop.f32.mrf.mxu3 }
 0x8cd   : > { %v14001_v60 = vadd.f32 %v7554_v43, %v13948_v38  ;;  %v7493_v17 = vadd.f32 %v7492_v8, %v7458_v32  ;;  %v7806_v14 = vpop.f32.mrf.mxu2  ;;  %v7527_v38 = vpop.f32.mrf.mxu0 }
 0x8cf   : > { %v7528_v46 = vadd.f32 %v7527_v38, %v7493_v17 }
 0x8d2   : > { %v7556_v52 = vpop.f32.mrf.mxu1 }
 0x8d3   : > { %v7557_v57 = vadd.f32 %v7556_v52, %v7522_v49 }
 0x8d4   : > { %v7495_v40 = vpop.f32.mrf.mxu3 }
 0x8d5   : > { %v14004_v1 = vadd.f32 %v7557_v57, %v13962_v30  ;;  %v7496_v27 = vadd.f32 %v7495_v40, %v7461_v4  ;;  %v7809_v33 = vpop.f32.mrf.mxu2  ;;  %v7530_v30 = vpop.f32.mrf.mxu0 }
 0x8d7   : > { %v7531_v48 = vadd.f32 %v7530_v30, %v7496_v27 }
 0x8da   : > { %v7559_v12 = vpop.f32.mrf.mxu1 }
 0x8db   : > { %v7560_v2 = vadd.f32 %v7559_v12, %v7525_v59 }
 0x8dc   : > { %v7835_v44 = vpop.f32.mrf.mxu3 }
 0x8dd   : > { %v14007_v0 = vadd.f32 %v7560_v2, %v13974_v62  ;;  %v7812_v10 = vpop.f32.mrf.mxu2  ;;  %v7870_v7 = vpop.f32.mrf.mxu0  ;;  %v7836_v51 = vadd.f32 %v7835_v44, %v7800_v18 }
 0x8df   : > { %v7871_v63 = vadd.f32 %v7870_v7, %v7836_v51 }
 0x8e2   : > { %v7562_v21 = vpop.f32.mrf.mxu1 }
 0x8e3   : > { %v7563_v16 = vadd.f32 %v7562_v21, %v7528_v46 }
 0x8e4   : > { %v7838_v25 = vpop.f32.mrf.mxu3 }
 0x8e5   : > { %v14010_v39 = vadd.f32 %v7563_v16, %v13984_v11  ;;  %v14015_v37 = vpop.f32.mrf.mxu2  ;;  %v7873_v13 = vpop.f32.mrf.mxu0  ;;  %v7839_v32 = vadd.f32 %v7838_v25, %v7803_v56 }
 0x8ea   : > { %v7565_v53 = vpop.f32.mrf.mxu1 }
 0x8eb   : > { %v7566_v26 = vadd.f32 %v7565_v53, %v7531_v48 }
 0x8ec   : > { %v7841_v45 = vpop.f32.mrf.mxu3 }
 0x8ed   : > { %v14013_v19 = vadd.f32 %v7566_v26, %v13992_v9  ;;  %v7940_v47 = vpop.f32.mrf.mxu2  ;;  %v7876_v15 = vpop.f32.mrf.mxu0  ;;  %v7874_v9 = vadd.f32 %v7873_v13, %v7839_v32  ;;  %v7842_v5 = vadd.f32 %v7841_v45, %v7806_v14 }
 0x8ef   : > { %v7877_v50 = vadd.f32 %v7876_v15, %v7842_v5 }
 0x8f2   : > { %v7905_v58 = vpop.f32.mrf.mxu1 }
 0x8f3   : > { %v7906_v28 = vadd.f32 %v7905_v58, %v7871_v63 }
 0x8f4   : > { %v7844_v62 = vpop.f32.mrf.mxu3 }
 0x8f5   : > { %v7943_v55 = vpop.f32.mrf.mxu2  ;;  %v7941_v22 = vadd.f32 %v7940_v47, %v7906_v28  ;;  %v7879_v24 = vpop.f32.mrf.mxu0  ;;  %v7845_v49 = vadd.f32 %v7844_v62, %v7809_v33 }
 0x8f7   : > { %v7880_v14 = vadd.f32 %v7879_v24, %v7845_v49 }
 0x8fa   : > { %v7908_v11 = vpop.f32.mrf.mxu1 }
 0x8fb   : > { %v7909_v20 = vadd.f32 %v7908_v11, %v7874_v9 }
 0x8fc   : > { %v7847_v61 = vpop.f32.mrf.mxu3 }
 0x8fd   : > { %v7944_v35 = vadd.f32 %v7943_v55, %v7909_v20  ;;  %v7946_v42 = vpop.f32.mrf.mxu2  ;;  %v7882_v2 = vpop.f32.mrf.mxu0 }
 0x902   : > { %v7911_v4 = vpop.f32.mrf.mxu1 }
 0x903   : > { %v7912_v8 = vadd.f32 %v7911_v4, %v7877_v50 }
 0x904   : > { %v7850_v6 = vpop.f32.mrf.mxu3 }
 0x905   : > { %v7947_v29 = vadd.f32 %v7946_v42, %v7912_v8  ;;  %v7949_v12 = vpop.f32.mrf.mxu2  ;;  %v7851_v7 = vadd.f32 %v7850_v6, %v14015_v37  ;;  %v7885_v13 = vpop.f32.mrf.mxu0 }
 0x907   : > { %v7886_v28 = vadd.f32 %v7885_v13, %v7851_v7 }
 0x90a   : > { %v7914_v56 = vpop.f32.mrf.mxu1 }
 0x90b   : > { %v7915_v44 = vadd.f32 %v7914_v56, %v7880_v14 }
 0x90c   : > { %v7975_v31 = vpop.f32.mrf.mxu3 }
 0x90d   : > { %v7976_v36 = vadd.f32 %v7975_v31, %v7941_v22  ;;  %v7950_v25 = vadd.f32 %v7949_v12, %v7915_v44 }
 0x90f   : > { %v7993_v54 = vadd.f32 %v7976_v36, %v7568_v3 }
 0x911   : > { %v8002_v23 = vadd.f32 %v14020_v41, %v7993_v54 }
 0x912   : > { %v7917_v33 = vpop.f32.mrf.mxu1 }
 0x913   : > { %v8830_v18 = vmul.f32 -1.442695, %v8002_v23 }
 0x914   : > { %v7978_v34 = vpop.f32.mrf.mxu3 }
 0x915   : > { %8909 = vpow2.f32 %v8830_v18  ;;  %v7979_v43 = vadd.f32 %v7978_v34, %v7944_v35 }
 0x917   : > { %v7994_v17 = vadd.f32 %v7979_v43, %v14001_v60  ;;  %v7848_v60 = vadd.f32 %v7847_v61, %v7812_v10  ;;  %v7952_v61 = vpop.f32.mrf.mxu2 }
 0x919   : > { %v8003_v52 = vadd.f32 %v14020_v41, %v7994_v17  ;;  %v7883_v26 = vadd.f32 %v7882_v2, %v7848_v60 }
 0x91b   : > { %v8910_v57 = vpop.eup %8909  ;;  %v8831_v3 = vmul.f32 -1.442695, %v8003_v52 }
 0x91c   : > { %v8026_v40 = vadd.f32 1.0, %v8910_v57  ;;  %v7981_v27 = vpop.f32.mrf.mxu3 }
 0x91d   : > { %8911 = vpow2.f32 %v8831_v3  ;;  %v7982_v59 = vadd.f32 %v7981_v27, %v7947_v29 }
 0x91e   : > { %8913 = vrcp.f32 %v8026_v40  ;;  %v8041_v47 = vand.u32 2147483647, %v8026_v40  ;;  %v8043_v51 = vand.u32 2147483648, %v8026_v40  ;;  %vm8037_vm4 = vweird.f32 %v8026_v40 }
 0x91f   : > { %v7995_v38 = vadd.f32 %v7982_v59, %v14004_v1  ;;  %v7918_v1 = vadd.f32 %v7917_v33, %v7883_v26  ;;  %v7955_v24 = vpop.f32.mrf.mxu2 }
 0x920   : > { %vm8042_vm6 = vcmp.eq.f32.partialorder %v8041_v47, 8.507059e+37  ;;  %v8044_v9 = vor.u32 1.1754944e-38, %v8043_v51 }
 0x921   : > { %v8004_v46 = vadd.f32 %v14020_v41, %v7995_v38  ;;  %v7953_v6 = vadd.f32 %v7952_v61, %v7918_v1 }
 0x923   : > { %v8912_v21 = vpop.eup %8911  ;;  %v8832_v16 = vmul.f32 -1.442695, %v8004_v46 }
 0x924   : > { %v8914_v30 = vpop.eup %8913  ;;  %v14027_v48 = vadd.f32 1.0, %v8912_v21  ;;  %v7984_v53 = vpop.f32.mrf.mxu3 }
 0x925   : > { %8915 = vpow2.f32 %v8832_v16  ;;  %v7985_v45 = vadd.f32 %v7984_v53, %v7950_v25  ;;  %v8033_v62 = vmul.f32 %v8914_v30, %v8026_v40  ;;  %vm8038_vm2 = vweird.f32 %v8914_v30 }
 0x926   : > { %8917 = vrcp.f32 %v14027_v48  ;;  %vm8039_vm5 = vmor %vm8037_vm4, %vm8038_vm2  ;;  %v8056_v35 = vand.u32 2147483647, %v14027_v48  ;;  %v8058_v42 = vand.u32 2147483648, %v14027_v48  ;;  %vm8052_vm11 = vweird.f32 %v14027_v48 }
 0x927   : > { %v7996_v10 = vadd.f32 %v7985_v45, %v14007_v0  ;;  %v8034_v58 = vsub.f32 1.0, %v8033_v62  ;;  %v7920_v0 = vpop.f32.mrf.mxu1 }
 0x928   : > { %v7921_v5 = vadd.f32 %v7920_v0, %v7886_v28  ;;  %vm8057_vm13 = vcmp.eq.f32.partialorder %v8056_v35, 8.507059e+37  ;;  %v8059_v57 = vor.u32 1.1754944e-38, %v8058_v42 }
 0x929   : > { %v8005_v11 = vadd.f32 %v14020_v41, %v7996_v10  ;;  %v8035_v63 = vmul.f32 %v8914_v30, %v8034_v58 }
 0x92a   : > { %v7956_v8 = vadd.f32 %v7955_v24, %v7921_v5 }
 0x92b   : > { %v8916_v32 = vpop.eup %8915  ;;  %v8833_v37 = vmul.f32 -1.442695, %v8005_v11  ;;  %v8036_v55 = vadd.f32 %v8914_v30, %v8035_v63 }
 0x92c   : > { %v8918_v15 = vpop.eup %8917  ;;  %v8028_v22 = vadd.f32 1.0, %v8916_v32  ;;  %v7987_v31 = vpop.f32.mrf.mxu3 }
 0x92d   : > { %8919 = vpow2.f32 %v8833_v37  ;;  %v7988_v36 = vadd.f32 %v7987_v31, %v7953_v6  ;;  %v8040_v4 = vsel %vm8039_vm5, %v8914_v30, %v8036_v55  ;;  %v8048_v20 = vmul.f32 %v8918_v15, %v14027_v48 }
 0x92e   : > { %8921 = vrcp.f32 %v8028_v22  ;;  %v8045_v54 = vsel %vm8042_vm6, %v8044_v9, %v8040_v4  ;;  %vm8053_vm10 = vweird.f32 %v8918_v15  ;;  %v8073_v12 = vand.u32 2147483648, %v8028_v22 }
 0x92f   : > { %v7997_v23 = vadd.f32 %v7988_v36, %v14010_v39  ;;  %8135 = vrot.lane.b32.xlu2 %v8045_v54, %s9039_s9  ;;  %8123 = vst.msk [vmem:[%s14042_s27] sm:$0xff] %vm8122_vm9, %v8045_v54  ;;  %v8049_v18 = vsub.f32 1.0, %v8048_v20  ;;  %vm8054_vm12 = vmor %vm8052_vm11, %vm8053_vm10  ;;  %v8071_v38 = vand.u32 2147483647, %v8028_v22  ;;  %vm8067_vm15 = vweird.f32 %v8028_v22 }
 0x931   : > { %v8006_v34 = vadd.f32 %v14020_v41, %v7997_v23  ;;  %v8050_v50 = vmul.f32 %v8918_v15, %v8049_v18  ;;  %vm8072_vm1 = vcmp.eq.f32.partialorder %v8071_v38, 8.507059e+37 }
 0x933   : > { %v8920_v43 = vpop.eup %8919  ;;  %v8834_v39 = vmul.f32 -1.442695, %v8006_v34  ;;  %v8051_v17 = vadd.f32 %v8918_v15, %v8050_v50 }
 0x934   : > { %v8922_v56 = vpop.eup %8921  ;;  %v8029_v49 = vadd.f32 1.0, %v8920_v43  ;;  %v7990_v52 = vpop.f32.mrf.mxu3 }
 0x935   : > { %8923 = vpow2.f32 %v8834_v39  ;;  %v7991_v3 = vadd.f32 %v7990_v52, %v7956_v8  ;;  %v8055_v29 = vsel %vm8054_vm12, %v8918_v15, %v8051_v17  ;;  %v8063_v40 = vmul.f32 %v8922_v56, %v8028_v22 }
 0x936   : > { %8925 = vrcp.f32 %v8029_v49  ;;  %v8060_v27 = vsel %vm8057_vm13, %v8059_v57, %v8055_v29  ;;  %vm8068_vm14 = vweird.f32 %v8922_v56  ;;  %v8088_v53 = vand.u32 2147483648, %v8029_v49 }
 0x937   : > { %v7998_v14 = vadd.f32 %v7991_v3, %v14013_v19  ;;  %8124 = vst.msk [vmem:[%s14042_s27 + $0x8] sm:$0xff] %vm8122_vm9, %v8060_v27  ;;  %8137 = vrot.lane.b32.xlu2 %v8060_v27, %s9039_s9  ;;  %v8064_v59 = vsub.f32 1.0, %v8063_v40  ;;  %vm8069_vm0 = vmor %vm8067_vm15, %vm8068_vm14  ;;  %v8074_v19 = vor.u32 1.1754944e-38, %v8073_v12  ;;  %v8086_v45 = vand.u32 2147483647, %v8029_v49 }
 0x938   : > { %vm8082_vm7 = vweird.f32 %v8029_v49  ;;  %v8089_v58 = vor.u32 1.1754944e-38, %v8088_v53 }
 0x939   : > { %v8007_v2 = vadd.f32 %v14020_v41, %v7998_v14  ;;  %v8065_v44 = vmul.f32 %v8922_v56, %v8064_v59  ;;  %vm8087_vm2 = vcmp.eq.f32.partialorder %v8086_v45, 8.507059e+37 }
 0x93b   : > { %v8924_v60 = vpop.eup %8923  ;;  %v8835_v46 = vmul.f32 -1.442695, %v8007_v2  ;;  %v8066_v33 = vadd.f32 %v8922_v56, %v8065_v44 }
 0x93c   : > { %v8926_v21 = vpop.eup %8925  ;;  %v8030_v16 = vadd.f32 1.0, %v8924_v60 }
 0x93d   : > { %8927 = vpow2.f32 %v8835_v46  ;;  %v8070_v25 = vsel %vm8069_vm0, %v8922_v56, %v8066_v33  ;;  %v8078_v30 = vmul.f32 %v8926_v21, %v8029_v49  ;;  %vm8083_vm3 = vweird.f32 %v8926_v21 }
 0x93e   : > { %8929 = vrcp.f32 %v8030_v16  ;;  %v8075_v48 = vsel %vm8072_vm1, %v8074_v19, %v8070_v25  ;;  %vm8084_vm8 = vmor %vm8082_vm7, %vm8083_vm3  ;;  %v8103_v11 = vand.u32 2147483648, %v8030_v16  ;;  %v8101_v28 = vand.u32 2147483647, %v8030_v16 }
 0x93f   : > { %8139 = vrot.lane.b32.xlu0 %v8075_v48, %s9039_s9  ;;  %8125 = vst.msk [vmem:[%s14042_s27 + $0x10] sm:$0xff] %vm8122_vm9, %v8075_v48  ;;  %v8079_v41 = vsub.f32 1.0, %v8078_v30  ;;  %vm8097_vm5 = vweird.f32 %v8030_v16 }
 0x940   : > { %v8104_v6 = vor.u32 1.1754944e-38, %v8103_v11  ;;  %vm8102_vm10 = vcmp.eq.f32.partialorder %v8101_v28, 8.507059e+37 }
 0x941   : > { %v8080_v26 = vmul.f32 %v8926_v21, %v8079_v41 }
 0x943   : > { %v8928_v62 = vpop.eup %8927  ;;  %v8081_v7 = vadd.f32 %v8926_v21, %v8080_v26 }
 0x944   : > { %v8930_v1 = vpop.eup %8929  ;;  %v8031_v10 = vadd.f32 1.0, %v8928_v62 }
 0x945   : > { %v8085_v61 = vsel %vm8084_vm8, %v8926_v21, %v8081_v7  ;;  %v8093_v47 = vmul.f32 %v8930_v1, %v8030_v16  ;;  %vm8098_vm4 = vweird.f32 %v8930_v1 }
 0x946   : > { %8931 = vrcp.f32 %v8031_v10  ;;  %v8090_v51 = vsel %vm8087_vm2, %v8089_v58, %v8085_v61  ;;  %vm8099_vm6 = vmor %vm8097_vm5, %vm8098_vm4  ;;  %v8118_v31 = vand.u32 2147483648, %v8031_v10  ;;  %v8116_v36 = vand.u32 2147483647, %v8031_v10 }
 0x947   : > { %8141 = vrot.lane.b32.xlu1 %v8090_v51, %s9039_s9  ;;  %8126 = vst.msk [vmem:[%s14042_s27 + $0x18] sm:$0xff] %vm8122_vm9, %v8090_v51  ;;  %v8094_v13 = vsub.f32 1.0, %v8093_v47  ;;  %vm8112_vm12 = vweird.f32 %v8031_v10 }
 0x948   : > { %v8119_v20 = vor.u32 1.1754944e-38, %v8118_v31  ;;  %vm8117_vm14 = vcmp.eq.f32.partialorder %v8116_v36, 8.507059e+37 }
 0x949   : > { %v8095_v63 = vmul.f32 %v8930_v1, %v8094_v13 }
 0x94b   : > { %v8096_v32 = vadd.f32 %v8930_v1, %v8095_v63 }
 0x94c   : > { %v8932_v37 = vpop.eup %8931 }
 0x94d   : > { %v8100_v55 = vsel %vm8099_vm6, %v8930_v1, %v8096_v32  ;;  %v8108_v15 = vmul.f32 %v8932_v37, %v8031_v10  ;;  %vm8113_vm11 = vweird.f32 %v8932_v37 }
 0x94e   : > { %v8105_v0 = vsel %vm8102_vm10, %v8104_v6, %v8100_v55  ;;  %vm8114_vm13 = vmor %vm8112_vm12, %vm8113_vm11 }
 0x94f   : > { %8127 = vst.msk [vmem:[%s14042_s27 + $0x20] sm:$0xff] %vm8122_vm9, %v8105_v0  ;;  %8143 = vrot.lane.b32.xlu2 %v8105_v0, %s9039_s9  ;;  %v8109_v22 = vsub.f32 1.0, %v8108_v15 }
 0x951   : > { %v8110_v9 = vmul.f32 %v8932_v37, %v8109_v22 }
 0x953   : > { %v8111_v4 = vadd.f32 %v8932_v37, %v8110_v9 }
 0x955   : > { %v8115_v54 = vsel %vm8114_vm13, %v8932_v37, %v8111_v4 }
 0x956   : > { %v8120_v5 = vsel %vm8117_vm14, %v8119_v20, %v8115_v54 }
 0x957   : > { %8145 = vrot.lane.b32.xlu0 %v8120_v5, %s9039_s9  ;;  %8128 = vst.msk [vmem:[%s14042_s27 + $0x28] sm:$0xff] %vm8122_vm9, %v8120_v5  ;;  %s8979_s9 = scalar_lea.hbm %s8978_s20, 96 }
 0x958   : > { %p8980_p13 = scmp.ne.s32.totalorder %s8978_s20, %s8979_s9  ;;  %p8985_p3 = scmp.lt.s32.totalorder %s8983_s17, %s8979_s9 }
 0x95a   : > { %p8981_p0 = pnand %p8980_p13, %p9150_p5  ;;  %p8986_p4 = por %p8985_p3, %p8984_p2 }
 0x95c   : > { %p8982_p1 = pneg %p8981_p0 }
 0x95e   : > { %p8987_p7 = pnand %p8986_p4, %p8982_p1 }
 0x989   : > { %v8136_v23 = vpop.permute.xlu2 %8135 }
 0x98a   : > { %8836 = vst.msk [vmem:[%s14042_s27 + $0x30] sm:$0xff] %vm8122_vm9, %v8136_v23 }
 0x991   : > { %v8138_v18 = vpop.permute.xlu2 %8137 }
 0x992   : > { %8837 = vst.msk [vmem:[%s14042_s27 + $0x38] sm:$0xff] %vm8122_vm9, %v8138_v18 }
 0x9a9   : > { %v8144_v35 = vpop.permute.xlu2 %8143 }
 0x9aa   : > { %8840 = vst.msk [vmem:[%s14042_s27 + $0x50] sm:$0xff] %vm8122_vm9, %v8144_v35 }
 0x9b1   : > { %v8140_v42 = vpop.permute.xlu0 %8139 }
 0x9b2   : > { %8838 = vst.msk [vmem:[%s14042_s27 + $0x40] sm:$0xff] %vm8122_vm9, %v8140_v42 }
 0x9b9   : > { %v8142_v34 = vpop.permute.xlu1 %8141 }
 0x9ba   : > { %8839 = vst.msk [vmem:[%s14042_s27 + $0x48] sm:$0xff] %vm8122_vm9, %v8142_v34 }
 0x9c9   : > { %v8146_v50 = vpop.permute.xlu0 %8145 }
 0x9ca   : > { %8841 = vst.msk [vmem:[%s14042_s27 + $0x58] sm:$0xff] %vm8122_vm9, %v8146_v50 }
 0x9cb   : > { %8990 = shalt.err (!%p8987_p7)
}
 0x9cc   : > { %s9040_s16 = smov 128   ;;  %s9041_s27 = smov 8  }
 0x9cd   : > { %8852 = dma.vmem_to_hbm [thread:$0]  (%p9150_p5), %s8174_s21, 1536, %s8176_s30, %s8161_s15, %s9040_s16, %s9040_s16, %s9041_s27  }
 0x9ce PF: > { %p8864_p8 = scmp.ge.s32.totalorder %s9029_s28, 2  ;;  %s8190_s0 = sand.u32 1, %s9017_s25  }
 0x9cf   : > { %s8191_s24 = scalar_lea.sflag [#allocation4], %s8190_s0 }
 0x9d0   : > { %p8859_p9 = pnand %p8864_p8, %p9154_p6 }
 0x9d2   : > { %p8860_p10 = pneg %p8859_p9 }
 0x9d4   : > { %9012 = dma.done.wait (%p8860_p10), %s8191_s24, 1536  }
 0x9d5   : > { %9014 = vsyncadd (%p8860_p10), %s8191_s24, 4294965760  ;;  %s14615_s20 = sld [smem:[#allocation8_spill]]  ;;  %p24_p11 = scmp.ge.s32.totalorder %s9137_s14, 4  }
 0x9d6   : > { %s14616_s27 = sld [smem:[#allocation9_spill]]  ;;  %s14617_s25 = smov %s9021_s26 }
 0x9d7   : > { %s14619_s28 = smov %s9137_s14  ;;  %26 = sbr.rel (!%p24_p11) target bundleno = 7 (0x7), region = 123 }
 0x9db   : > { %s14618_s26 = smov %s14615_s20 }
 0x9dc   :  { %8197 = vsyncpa [#allocation3], 1 }
 0x9dd   :  { %8199 = vsyncpa [#allocation3 + $0x1], 1 }
 0x9de   :  { %8200 = vsyncpa [#allocation4], 1 }
 0x9df   :  { %8202 = vsyncpa [#allocation4 + $0x1], 1 }

</bundles_post_ra>
